<compile_context>
chip_gen: v5e
topology: v5e:2x2
jax: 0.10.0
libtpu: 0.0.40
codegen_flags: <defaults>
</compile_context>

<pallas_src>
import functools

import jax
import jax.numpy as jnp
from jax.experimental import pallas as pl
from jax.experimental.pallas import tpu as pltpu

# ---------------- synthetic, deterministic config (mirrors cfg.MODEL) ----------------
NUM_CLASSES = 3                              # cfg.Customer_DATA['NUM']
ANCHORS_PER_SCALE = 3                        # cfg.MODEL['ANCHORS_PER_SCLAE']
D = 5 + NUM_CLASSES                          # per-anchor prediction width
OUT_CHANNEL = ANCHORS_PER_SCALE * D          # 24
STRIDES = (8.0, 16.0, 32.0)                  # cfg.MODEL['STRIDES']
ANCHORS = (                                  # cfg.MODEL['ANCHORS'] (grid-cell units)
    ((1.25, 1.625), (2.0, 3.75), (4.125, 2.875)),
    ((1.875, 3.8125), (3.875, 2.8125), (3.6875, 7.4375)),
    ((3.625, 2.8125), (4.875, 6.1875), (11.65625, 10.1875)),
)

_TM_CAP = 2048                 # max rows per block
_VMEM_BUDGET = 6 << 20         # per-block activation budget (leaves double-buffer headroom)


def _pick_tm(m, row_bytes=0):
    """Largest legal row-tile: full array if small, else biggest divisor <= cap."""
    cap = _TM_CAP
    if row_bytes:
        # keep (inputs + outputs) per block well under VMEM even with double buffering
        cap = min(cap, max(256, (_VMEM_BUDGET // max(row_bytes, 1)) // 8 * 8))
    if m <= cap or (m % 8) != 0:
        return m                      # full-array block is always legal
    tm = cap
    while m % tm:
        tm -= 8
    return tm


# -------- Pallas kernel 1: split-K fused 1x1 conv:  y = act(sum_i x_i@w_i [+add] + b) --------
def _fused_linear_kernel(*refs, n_x, has_add, act):
    xs = refs[:n_x]
    ws = refs[n_x:2 * n_x]
    b_ref = refs[2 * n_x]
    add_ref = refs[2 * n_x + 1] if has_add else None
    o_ref = refs[-1]

    acc = jnp.dot(xs[0][...], ws[0][...], preferred_element_type=jnp.float32)
    for x_ref, w_ref in zip(xs[1:], ws[1:]):
        acc = acc + jnp.dot(x_ref[...], w_ref[...], preferred_element_type=jnp.float32)
    acc = acc + b_ref[...]
    if has_add:
        acc = acc + add_ref[...].astype(jnp.float32)
    if act:
        acc = jnp.where(acc > 0.0, acc, 0.1 * acc)      # darknet LeakyReLU(0.1)
    o_ref[...] = acc.astype(o_ref.dtype)


def fused_linear(xs, ws, b, *, add=None, act=True, out_dtype=jnp.bfloat16):
    """xs: list of (M, K_i) bf16; ws: list of (K_i, N) bf16; b: (1, N) f32; add: (M, N)."""
    M = xs[0].shape[0]
    N = ws[0].shape[1]
    row_bytes = 2 * (sum(x.shape[1] for x in xs) + N) + (2 * N if add is not None else 0)
    tm = _pick_tm(M, row_bytes)
    n_x = len(xs)

    in_specs = [pl.BlockSpec((tm, x.shape[1]), lambda i: (i, 0)) for x in xs]
    in_specs += [pl.BlockSpec(w.shape, lambda i: (0, 0)) for w in ws]
    in_specs += [pl.BlockSpec((1, N), lambda i: (0, 0))]
    args = list(xs) + list(ws) + [b]
    if add is not None:
        in_specs.append(pl.BlockSpec((tm, N), lambda i: (i, 0)))
        args.append(add)

    return pl.pallas_call(
        functools.partial(_fused_linear_kernel, n_x=n_x, has_add=add is not None, act=act),
        out_shape=jax.ShapeDtypeStruct((M, N), out_dtype),
        grid_spec=pltpu.PrefetchScalarGridSpec(
            num_scalar_prefetch=0,
            grid=(M // tm,),
            in_specs=in_specs,
            out_specs=pl.BlockSpec((tm, N), lambda i: (i, 0)),
        ),
        compiler_params=pltpu.CompilerParams(dimension_semantics=("parallel",)),
    )(*args)


def fused_conv1x1(xs_nhwc, ws, b, *, add_nhwc=None, act=True, out_dtype=jnp.bfloat16):
    B, H, W, _ = xs_nhwc[0].shape
    N = ws[0].shape[1]
    xs2d = [x.reshape(B * H * W, x.shape[-1]) for x in xs_nhwc]
    add2d = None if add_nhwc is None else add_nhwc.reshape(B * H * W, N)
    y = fused_linear(xs2d, ws, b, add=add2d, act=act, out_dtype=out_dtype)
    return y.reshape(B, H, W, N)


# -------- Pallas kernel 2: lateral conv + upsample-branch projection (low-res) --------
def _lat_proj_kernel(x_ref, w1_ref, b1_ref, w2_ref, o_ref):
    h = jnp.dot(x_ref[...], w1_ref[...], preferred_element_type=jnp.float32) + b1_ref[...]
    h = jnp.where(h > 0.0, h, 0.1 * h)
    o_ref[...] = jnp.dot(h.astype(w2_ref.dtype), w2_ref[...],
                         preferred_element_type=jnp.float32).astype(o_ref.dtype)


def lat_project(x_nhwc, w1, b1, w2, out_dtype=jnp.bfloat16):
    """leaky(x @ w1 + b1) @ w2, computed at the lateral (low) resolution."""
    B, H, W, K = x_nhwc.shape
    M = B * H * W
    N = w2.shape[1]
    tm = _pick_tm(M, 2 * (K + w1.shape[1] + N))
    y = pl.pallas_call(
        _lat_proj_kernel,
        out_shape=jax.ShapeDtypeStruct((M, N), out_dtype),
        grid_spec=pltpu.PrefetchScalarGridSpec(
            num_scalar_prefetch=0,
            grid=(M // tm,),
            in_specs=[pl.BlockSpec((tm, K), lambda i: (i, 0)),
                      pl.BlockSpec(w1.shape, lambda i: (0, 0)),
                      pl.BlockSpec((1, w1.shape[1]), lambda i: (0, 0)),
                      pl.BlockSpec(w2.shape, lambda i: (0, 0))],
            out_specs=pl.BlockSpec((tm, N), lambda i: (i, 0)),
        ),
        compiler_params=pltpu.CompilerParams(dimension_semantics=("parallel",)),
    )(x_nhwc.reshape(M, K), w1, b1, w2)
    return y.reshape(B, H, W, N)


# -------- Pallas kernel 3: fused PredictNet head (conv + conv + YOLO decode) --------
def _head_kernel(x_ref, w1_ref, b1_ref, w2_ref, b2_ref,
                 goff_ref, s1_ref, s2_ref, whm_ref, raw_ref, dec_ref):
    h = jnp.dot(x_ref[...], w1_ref[...], preferred_element_type=jnp.float32) + b1_ref[...]
    h = jnp.where(h > 0.0, h, 0.1 * h)                                  # LeakyReLU(0.1)
    raw = jnp.dot(h.astype(w2_ref.dtype), w2_ref[...],
                  preferred_element_type=jnp.float32) + b2_ref[...]     # no activation
    raw_ref[...] = raw
    sig = jax.nn.sigmoid(raw)
    # decode: xy -> (sig + grid)*stride ; wh -> exp(raw)*anchor*stride ; conf/cls -> sig
    # exp() is masked to the w/h lanes (whm) so other logits never overflow.
    dec_ref[...] = (sig + goff_ref[...]) * s1_ref[...] + jnp.exp(raw * whm_ref[...]) * s2_ref[...]


def yolo_head_fused(x_nhwc, head_params, anchors, stride):
    w1, b1, w2, b2 = head_params
    B, H, W, K = x_nhwc.shape
    M = B * H * W
    C = OUT_CHANNEL

    # precomputed decode constants (data-independent -> constant-folded under jit)
    comp = jnp.arange(C) % D                                       # (C,)
    s = jnp.arange(M) % (H * W)
    gx = (s % W).astype(jnp.float32)[:, None]
    gy = (s // W).astype(jnp.float32)[:, None]
    goff = jnp.where(comp[None, :] == 0, gx, 0.0) + jnp.where(comp[None, :] == 1, gy, 0.0)
    s1 = jnp.where(comp < 2, float(stride),
                   jnp.where(comp < 4, 0.0, 1.0)).astype(jnp.float32)[None, :]
    whm = ((comp == 2) | (comp == 3)).astype(jnp.float32)[None, :]
    asc = []
    for a in range(ANCHORS_PER_SCALE):
        aw, ah = anchors[a]
        asc += [0.0, 0.0, float(aw), float(ah)] + [0.0] * (D - 4)
    s2 = (jnp.asarray(asc, jnp.float32) * float(stride))[None, :]

    tm = _pick_tm(M, 2 * (K + w1.shape[1]) + 4 * 3 * C)
    raw, dec = pl.pallas_call(
        _head_kernel,
        out_shape=(jax.ShapeDtypeStruct((M, C), jnp.float32),
                   jax.ShapeDtypeStruct((M, C), jnp.float32)),
        grid_spec=pltpu.PrefetchScalarGridSpec(
            num_scalar_prefetch=0,
            grid=(M // tm,),
            in_specs=[pl.BlockSpec((tm, K), lambda i: (i, 0)),
                      pl.BlockSpec(w1.shape, lambda i: (0, 0)),
                      pl.BlockSpec((1, w1.shape[1]), lambda i: (0, 0)),
                      pl.BlockSpec(w2.shape, lambda i: (0, 0)),
                      pl.BlockSpec((1, C), lambda i: (0, 0)),
                      pl.BlockSpec((tm, C), lambda i: (i, 0)),
                      pl.BlockSpec((1, C), lambda i: (0, 0)),
                      pl.BlockSpec((1, C), lambda i: (0, 0)),
                      pl.BlockSpec((1, C), lambda i: (0, 0))],
            out_specs=(pl.BlockSpec((tm, C), lambda i: (i, 0)),
                       pl.BlockSpec((tm, C), lambda i: (i, 0))),
        ),
        compiler_params=pltpu.CompilerParams(dimension_semantics=("parallel",)),
    )(x_nhwc.reshape(M, K), w1, b1, w2, b2, goff, s1, s2, whm)

    p = raw.reshape(B, H, W, ANCHORS_PER_SCALE, D)      # matches torch view+permute
    p_d = dec.reshape(-1, D)                            # eval-mode flatten
    return p, p_d


# ---------------- plain-JAX glue (spatial reshuffles / pooling only) ----------------
def space_to_depth(x, r=2):
    B, H, W, C = x.shape
    x = x.reshape(B, H // r, r, W // r, r, C).transpose(0, 1, 3, 2, 4, 5)
    return x.reshape(B, H // r, W // r, r * r * C)


def downsample_conv(x, w, b):
    # 2x2 stride-2 conv expressed as space-to-depth + Pallas 1x1-conv matmul
    return fused_conv1x1([space_to_depth(x, 2)], [w], b, act=True)


def upsample2(x):
    # TODO(synk): nearest-neighbour upsample kept in XLA; only the already-projected
    #             lateral tensor is upsampled (the concat + high-res lateral matmul are
    #             eliminated), but a fully in-kernel fold would need a sublane interleave.
    return jnp.repeat(jnp.repeat(x, 2, axis=1), 2, axis=2)


def maxpool_same(x, k):
    # TODO(synk): SPP max-pooling kept in XLA glue (reduce_window), not Pallas.
    pad = k // 2
    return jax.lax.reduce_window(
        x, jnp.finfo(x.dtype).min, jax.lax.max,
        (1, k, k, 1), (1, 1, 1, 1),
        padding=((0, 0), (pad, pad), (pad, pad), (0, 0)),
    )


# ---------------- parameters (deterministic in-script init, bf16 weights) ----------------
def _winit(key, cin, cout):
    return (jax.random.normal(key, (cin, cout), jnp.float32) / jnp.sqrt(cin)).astype(jnp.bfloat16)


def _bias(n):
    return jnp.zeros((1, n), jnp.float32)


def init_params(key):
    names = [
        # backbone patchify stages -> features at stride 8 / 16 / 32
        ('c1', 12, 16), ('c2', 64, 32), ('c3', 128, 64), ('c4', 256, 128), ('c5', 512, 256),
        # SPP reduce, split-K over [x, mp5, mp9, mp13]
        ('spp0', 256, 256), ('spp1', 256, 256), ('spp2', 256, 256), ('spp3', 256, 256),
        # PANet top-down (lateral + split fuse weights) and bottom-up
        ('lat_l', 256, 128), ('fuse_m_up', 128, 128), ('fuse_m_skip', 128, 128),
        ('lat_m', 128, 64), ('fuse_s_up', 64, 64), ('fuse_s_skip', 64, 64),
        ('down_s', 256, 128), ('fuse_m2_a', 128, 128), ('fuse_m2_c', 128, 128),
        ('down_m', 512, 256), ('fuse_l2_a', 256, 256), ('fuse_l2_c', 256, 256),
        # PredictNet heads
        ('pred_s1', 64, 128), ('pred_s2', 128, OUT_CHANNEL),
        ('pred_m1', 128, 256), ('pred_m2', 256, OUT_CHANNEL),
        ('pred_l1', 256, 512), ('pred_l2', 512, OUT_CHANNEL),
    ]
    keys = jax.random.split(key, len(names))
    w = {n: _winit(k, ci, co) for k, (n, ci, co) in zip(keys, names)}
    return {
        'c1': (w['c1'], _bias(16)), 'c2': (w['c2'], _bias(32)), 'c3': (w['c3'], _bias(64)),
        'c4': (w['c4'], _bias(128)), 'c5': (w['c5'], _bias(256)),
        'spp_w': [w['spp0'], w['spp1'], w['spp2'], w['spp3']], 'spp_b': _bias(256),
        'lat_l': (w['lat_l'], _bias(128)), 'fuse_m_up': w['fuse_m_up'],
        'fuse_m_skip': w['fuse_m_skip'], 'fuse_m_b': _bias(128),
        'lat_m': (w['lat_m'], _bias(64)), 'fuse_s_up': w['fuse_s_up'],
        'fuse_s_skip': w['fuse_s_skip'], 'fuse_s_b': _bias(64),
        'down_s': (w['down_s'], _bias(128)),
        'fuse_m2_w': [w['fuse_m2_a'], w['fuse_m2_c']], 'fuse_m2_b': _bias(128),
        'down_m': (w['down_m'], _bias(256)),
        'fuse_l2_w': [w['fuse_l2_a'], w['fuse_l2_c']], 'fuse_l2_b': _bias(256),
        'pred_s': (w['pred_s1'], _bias(128), w['pred_s2'], _bias(OUT_CHANNEL)),
        'pred_m': (w['pred_m1'], _bias(256), w['pred_m2'], _bias(OUT_CHANNEL)),
        'pred_l': (w['pred_l1'], _bias(512), w['pred_l2'], _bias(OUT_CHANNEL)),
    }


# ---------------- YOLO.forward (eval mode) ----------------
def build_model_forward(params, x_nchw):
    p = params
    x = jnp.transpose(x_nchw, (0, 2, 3, 1)).astype(jnp.bfloat16)   # NCHW -> NHWC, bf16

    # backbone (stride-2 patchify stages -> features at stride 8 / 16 / 32)
    c1 = downsample_conv(x,  *p['c1'])     # stride 2
    c2 = downsample_conv(c1, *p['c2'])     # stride 4
    c3 = downsample_conv(c2, *p['c3'])     # stride 8   (small-scale feature)
    c4 = downsample_conv(c3, *p['c4'])     # stride 16  (medium-scale feature)
    c5 = downsample_conv(c4, *p['c5'])     # stride 32  (large-scale feature)

    # SPP: split-K fusion of [c5, mp5, mp9, mp13] @ W  (no concatenated tensor in HBM)
    spp_branches = [c5, maxpool_same(c5, 5), maxpool_same(c5, 9), maxpool_same(c5, 13)]
    fl = fused_conv1x1(spp_branches, p['spp_w'], p['spp_b'])

    # PANet top-down: lateral conv + upsampled-branch weight applied at LOW resolution,
    # then split-K fuse with the skip feature (upsampled projection enters additively).
    zu_m = upsample2(lat_project(fl, *p['lat_l'], p['fuse_m_up']))
    fm = fused_conv1x1([c4], [p['fuse_m_skip']], p['fuse_m_b'], add_nhwc=zu_m)
    zu_s = upsample2(lat_project(fm, *p['lat_m'], p['fuse_s_up']))
    fs = fused_conv1x1([c3], [p['fuse_s_skip']], p['fuse_s_b'], add_nhwc=zu_s)

    # PANet bottom-up
    ds = downsample_conv(fs, *p['down_s'])
    fm2 = fused_conv1x1([ds, fm], p['fuse_m2_w'], p['fuse_m2_b'])
    dm = downsample_conv(fm2, *p['down_m'])
    fl2 = fused_conv1x1([dm, fl], p['fuse_l2_w'], p['fuse_l2_b'])

    # PredictNet + YOLOHead decode, fused into a single kernel per scale
    p_s, pd_s = yolo_head_fused(fs,  p['pred_s'], ANCHORS[0], STRIDES[0])
    p_m, pd_m = yolo_head_fused(fm2, p['pred_m'], ANCHORS[1], STRIDES[1])
    p_l, pd_l = yolo_head_fused(fl2, p['pred_l'], ANCHORS[2], STRIDES[2])

    # eval-mode: (raw per-scale predictions, torch.cat(decoded, 0))
    return (p_s, p_m, p_l), jnp.concatenate([pd_s, pd_m, pd_l], axis=0)


if __name__ == "__main__":
    params = init_params(jax.random.PRNGKey(0))
    x = jax.random.normal(jax.random.PRNGKey(0), (2, 3, 64, 64), jnp.float32)

    fwd = jax.jit(build_model_forward)
    (p_s, p_m, p_l), p_d = fwd(params, x)
    jax.block_until_ready(p_d)

    assert p_s.shape == (2, 8, 8, ANCHORS_PER_SCALE, D)
    assert p_m.shape == (2, 4, 4, ANCHORS_PER_SCALE, D)
    assert p_l.shape == (2, 2, 2, ANCHORS_PER_SCALE, D)
    n_boxes = 2 * ANCHORS_PER_SCALE * (8 * 8 + 4 * 4 + 2 * 2)
    assert p_d.shape == (n_boxes, D)
    assert bool(jnp.all(jnp.isfinite(p_d)))

    print("KERNEL_OK")
</pallas_src>

<mosaic_0001>
module attributes {stable_mosaic.version = 11 : i64} {
  func.func @_fused_linear_kernel(%arg0: i32, %arg1: memref<2048x12xbf16, #tpu.memory_space<vmem>>, %arg2: memref<12x16xbf16, #tpu.memory_space<vmem>>, %arg3: memref<1x16xf32, #tpu.memory_space<vmem>>, %arg4: memref<2048x16xbf16, #tpu.memory_space<vmem>>) attributes {dimension_semantics = [#tpu.dimension_semantics<parallel>], iteration_bounds = array<i64: 1>, scalar_prefetch = 0 : i64, scratch_operands = 0 : i64, tpu.core_type = #tpu.core_type<tc>, window_params = [{transform_indices = @transform_0, window_bounds = array<i64: 2048, 12>}, {pipeline_mode = #tpu.pipeline_mode<synchronous>, transform_indices = @transform_1, window_bounds = array<i64: 12, 16>}, {pipeline_mode = #tpu.pipeline_mode<synchronous>, transform_indices = @transform_2, window_bounds = array<i64: 1, 16>}, {transform_indices = @transform_3, window_bounds = array<i64: 2048, 16>}]} {
    %c0 = arith.constant 0 : index
    %c0_0 = arith.constant 0 : index
    %0 = vector.load %arg1[%c0, %c0_0] : memref<2048x12xbf16, #tpu.memory_space<vmem>>, vector<2048x12xbf16>
    %c0_1 = arith.constant 0 : index
    %c0_2 = arith.constant 0 : index
    %1 = vector.load %arg2[%c0_1, %c0_2] : memref<12x16xbf16, #tpu.memory_space<vmem>>, vector<12x16xbf16>
    %cst = arith.constant dense<0.000000e+00> : vector<2048x16xf32>
    %2 = tpu.matmul %0, %1, %cst {dimension_numbers = #tpu.dot_dimension_numbers<[1], [0], [0], [1], [0, 0, 1, 1], [], []>} : vector<2048x12xbf16>, vector<12x16xbf16>, vector<2048x16xf32> -> vector<2048x16xf32>
    %c0_3 = arith.constant 0 : index
    %c0_4 = arith.constant 0 : index
    %3 = vector.load %arg3[%c0_3, %c0_4] : memref<1x16xf32, #tpu.memory_space<vmem>>, vector<1x16xf32>
    %4 = vector.broadcast %3 : vector<1x16xf32> to vector<2048x16xf32>
    %5 = arith.addf %2, %4 : vector<2048x16xf32>
    %cst_5 = arith.constant 0.000000e+00 : f32
    %6 = vector.broadcast %cst_5 : f32 to vector<2048x16xf32>
    %7 = arith.cmpf ogt, %5, %6 : vector<2048x16xf32>
    %cst_6 = arith.constant 1.000000e-01 : f32
    %8 = vector.broadcast %cst_6 : f32 to vector<2048x16xf32>
    %9 = arith.mulf %8, %5 : vector<2048x16xf32>
    %10 = arith.select %7, %5, %9 : vector<2048x16xi1>, vector<2048x16xf32>
    %11 = arith.truncf %10 : vector<2048x16xf32> to vector<2048x16xbf16>
    %c0_7 = arith.constant 0 : index
    %c0_8 = arith.constant 0 : index
    %12 = vector.load %arg4[%c0_7, %c0_8] : memref<2048x16xbf16, #tpu.memory_space<vmem>>, vector<2048x16xbf16>
    tpu.vector_store %arg4[%c0_7, %c0_8], %11 {strides = array<i32>} : memref<2048x16xbf16, #tpu.memory_space<vmem>>, vector<2048x16xbf16>,
    return
  }
  func.func @transform_0(%arg0: i32) -> (i32, i32) {
    %c0_i32 = arith.constant 0 : i32
    %c0_i32_0 = arith.constant 0 : i32
    return %arg0, %c0_i32 : i32, i32
  }
  func.func @transform_1(%arg0: i32) -> (i32, i32) {
    %c0_i32 = arith.constant 0 : i32
    %c0_i32_0 = arith.constant 0 : i32
    %c0_i32_1 = arith.constant 0 : i32
    return %c0_i32, %c0_i32_0 : i32, i32
  }
  func.func @transform_2(%arg0: i32) -> (i32, i32) {
    %c0_i32 = arith.constant 0 : i32
    %c0_i32_0 = arith.constant 0 : i32
    %c0_i32_1 = arith.constant 0 : i32
    return %c0_i32, %c0_i32_0 : i32, i32
  }
  func.func @transform_3(%arg0: i32) -> (i32, i32) {
    %c0_i32 = arith.constant 0 : i32
    %c0_i32_0 = arith.constant 0 : i32
    return %arg0, %c0_i32 : i32, i32
  }
}

module attributes {stable_mosaic.version = 11 : i64} {
  func.func @_fused_linear_kernel(%arg0: i32, %arg1: memref<512x64xbf16, #tpu.memory_space<vmem>>, %arg2: memref<64x32xbf16, #tpu.memory_space<vmem>>, %arg3: memref<1x32xf32, #tpu.memory_space<vmem>>, %arg4: memref<512x32xbf16, #tpu.memory_space<vmem>>) attributes {dimension_semantics = [#tpu.dimension_semantics<parallel>], iteration_bounds = array<i64: 1>, scalar_prefetch = 0 : i64, scratch_operands = 0 : i64, tpu.core_type = #tpu.core_type<tc>, window_params = [{transform_indices = @transform_0, window_bounds = array<i64: 512, 64>}, {pipeline_mode = #tpu.pipeline_mode<synchronous>, transform_indices = @transform_1, window_bounds = array<i64: 64, 32>}, {pipeline_mode = #tpu.pipeline_mode<synchronous>, transform_indices = @transform_2, window_bounds = array<i64: 1, 32>}, {transform_indices = @transform_3, window_bounds = array<i64: 512, 32>}]} {
    %c0 = arith.constant 0 : index
    %c0_0 = arith.constant 0 : index
    %0 = vector.load %arg1[%c0, %c0_0] : memref<512x64xbf16, #tpu.memory_space<vmem>>, vector<512x64xbf16>
    %c0_1 = arith.constant 0 : index
    %c0_2 = arith.constant 0 : index
    %1 = vector.load %arg2[%c0_1, %c0_2] : memref<64x32xbf16, #tpu.memory_space<vmem>>, vector<64x32xbf16>
    %cst = arith.constant dense<0.000000e+00> : vector<512x32xf32>
    %2 = tpu.matmul %0, %1, %cst {dimension_numbers = #tpu.dot_dimension_numbers<[1], [0], [0], [1], [0, 0, 1, 1], [], []>} : vector<512x64xbf16>, vector<64x32xbf16>, vector<512x32xf32> -> vector<512x32xf32>
    %c0_3 = arith.constant 0 : index
    %c0_4 = arith.constant 0 : index
    %3 = vector.load %arg3[%c0_3, %c0_4] : memref<1x32xf32, #tpu.memory_space<vmem>>, vector<1x32xf32>
    %4 = vector.broadcast %3 : vector<1x32xf32> to vector<512x32xf32>
    %5 = arith.addf %2, %4 : vector<512x32xf32>
    %cst_5 = arith.constant 0.000000e+00 : f32
    %6 = vector.broadcast %cst_5 : f32 to vector<512x32xf32>
    %7 = arith.cmpf ogt, %5, %6 : vector<512x32xf32>
    %cst_6 = arith.constant 1.000000e-01 : f32
    %8 = vector.broadcast %cst_6 : f32 to vector<512x32xf32>
    %9 = arith.mulf %8, %5 : vector<512x32xf32>
    %10 = arith.select %7, %5, %9 : vector<512x32xi1>, vector<512x32xf32>
    %11 = arith.truncf %10 : vector<512x32xf32> to vector<512x32xbf16>
    %c0_7 = arith.constant 0 : index
    %c0_8 = arith.constant 0 : index
    %12 = vector.load %arg4[%c0_7, %c0_8] : memref<512x32xbf16, #tpu.memory_space<vmem>>, vector<512x32xbf16>
    tpu.vector_store %arg4[%c0_7, %c0_8], %11 {strides = array<i32>} : memref<512x32xbf16, #tpu.memory_space<vmem>>, vector<512x32xbf16>,
    return
  }
  func.func @transform_0(%arg0: i32) -> (i32, i32) {
    %c0_i32 = arith.constant 0 : i32
    %c0_i32_0 = arith.constant 0 : i32
    return %arg0, %c0_i32 : i32, i32
  }
  func.func @transform_1(%arg0: i32) -> (i32, i32) {
    %c0_i32 = arith.constant 0 : i32
    %c0_i32_0 = arith.constant 0 : i32
    %c0_i32_1 = arith.constant 0 : i32
    return %c0_i32, %c0_i32_0 : i32, i32
  }
  func.func @transform_2(%arg0: i32) -> (i32, i32) {
    %c0_i32 = arith.constant 0 : i32
    %c0_i32_0 = arith.constant 0 : i32
    %c0_i32_1 = arith.constant 0 : i32
    return %c0_i32, %c0_i32_0 : i32, i32
  }
  func.func @transform_3(%arg0: i32) -> (i32, i32) {
    %c0_i32 = arith.constant 0 : i32
    %c0_i32_0 = arith.constant 0 : i32
    return %arg0, %c0_i32 : i32, i32
  }
}

module attributes {stable_mosaic.version = 11 : i64} {
  func.func @_fused_linear_kernel(%arg0: i32, %arg1: memref<128x128xbf16, #tpu.memory_space<vmem>>, %arg2: memref<128x64xbf16, #tpu.memory_space<vmem>>, %arg3: memref<1x64xf32, #tpu.memory_space<vmem>>, %arg4: memref<128x64xbf16, #tpu.memory_space<vmem>>) attributes {dimension_semantics = [#tpu.dimension_semantics<parallel>], iteration_bounds = array<i64: 1>, scalar_prefetch = 0 : i64, scratch_operands = 0 : i64, tpu.core_type = #tpu.core_type<tc>, window_params = [{transform_indices = @transform_0, window_bounds = array<i64: 128, 128>}, {pipeline_mode = #tpu.pipeline_mode<synchronous>, transform_indices = @transform_1, window_bounds = array<i64: 128, 64>}, {pipeline_mode = #tpu.pipeline_mode<synchronous>, transform_indices = @transform_2, window_bounds = array<i64: 1, 64>}, {transform_indices = @transform_3, window_bounds = array<i64: 128, 64>}]} {
    %c0 = arith.constant 0 : index
    %c0_0 = arith.constant 0 : index
    %0 = vector.load %arg1[%c0, %c0_0] : memref<128x128xbf16, #tpu.memory_space<vmem>>, vector<128x128xbf16>
    %c0_1 = arith.constant 0 : index
    %c0_2 = arith.constant 0 : index
    %1 = vector.load %arg2[%c0_1, %c0_2] : memref<128x64xbf16, #tpu.memory_space<vmem>>, vector<128x64xbf16>
    %cst = arith.constant dense<0.000000e+00> : vector<128x64xf32>
    %2 = tpu.matmul %0, %1, %cst {dimension_numbers = #tpu.dot_dimension_numbers<[1], [0], [0], [1], [0, 0, 1, 1], [], []>} : vector<128x128xbf16>, vector<128x64xbf16>, vector<128x64xf32> -> vector<128x64xf32>
    %c0_3 = arith.constant 0 : index
    %c0_4 = arith.constant 0 : index
    %3 = vector.load %arg3[%c0_3, %c0_4] : memref<1x64xf32, #tpu.memory_space<vmem>>, vector<1x64xf32>
    %4 = vector.broadcast %3 : vector<1x64xf32> to vector<128x64xf32>
    %5 = arith.addf %2, %4 : vector<128x64xf32>
    %cst_5 = arith.constant 0.000000e+00 : f32
    %6 = vector.broadcast %cst_5 : f32 to vector<128x64xf32>
    %7 = arith.cmpf ogt, %5, %6 : vector<128x64xf32>
    %cst_6 = arith.constant 1.000000e-01 : f32
    %8 = vector.broadcast %cst_6 : f32 to vector<128x64xf32>
    %9 = arith.mulf %8, %5 : vector<128x64xf32>
    %10 = arith.select %7, %5, %9 : vector<128x64xi1>, vector<128x64xf32>
    %11 = arith.truncf %10 : vector<128x64xf32> to vector<128x64xbf16>
    %c0_7 = arith.constant 0 : index
    %c0_8 = arith.constant 0 : index
    %12 = vector.load %arg4[%c0_7, %c0_8] : memref<128x64xbf16, #tpu.memory_space<vmem>>, vector<128x64xbf16>
    tpu.vector_store %arg4[%c0_7, %c0_8], %11 {strides = array<i32>} : memref<128x64xbf16, #tpu.memory_space<vmem>>, vector<128x64xbf16>,
    return
  }
  func.func @transform_0(%arg0: i32) -> (i32, i32) {
    %c0_i32 = arith.constant 0 : i32
    %c0_i32_0 = arith.constant 0 : i32
    return %arg0, %c0_i32 : i32, i32
  }
  func.func @transform_1(%arg0: i32) -> (i32, i32) {
    %c0_i32 = arith.constant 0 : i32
    %c0_i32_0 = arith.constant 0 : i32
    %c0_i32_1 = arith.constant 0 : i32
    return %c0_i32, %c0_i32_0 : i32, i32
  }
  func.func @transform_2(%arg0: i32) -> (i32, i32) {
    %c0_i32 = arith.constant 0 : i32
    %c0_i32_0 = arith.constant 0 : i32
    %c0_i32_1 = arith.constant 0 : i32
    return %c0_i32, %c0_i32_0 : i32, i32
  }
  func.func @transform_3(%arg0: i32) -> (i32, i32) {
    %c0_i32 = arith.constant 0 : i32
    %c0_i32_0 = arith.constant 0 : i32
    return %arg0, %c0_i32 : i32, i32
  }
}

module attributes {stable_mosaic.version = 11 : i64} {
  func.func @_fused_linear_kernel(%arg0: i32, %arg1: memref<32x256xbf16, #tpu.memory_space<vmem>>, %arg2: memref<256x128xbf16, #tpu.memory_space<vmem>>, %arg3: memref<1x128xf32, #tpu.memory_space<vmem>>, %arg4: memref<32x128xbf16, #tpu.memory_space<vmem>>) attributes {dimension_semantics = [#tpu.dimension_semantics<parallel>], iteration_bounds = array<i64: 1>, scalar_prefetch = 0 : i64, scratch_operands = 0 : i64, tpu.core_type = #tpu.core_type<tc>, window_params = [{transform_indices = @transform_0, window_bounds = array<i64: 32, 256>}, {pipeline_mode = #tpu.pipeline_mode<synchronous>, transform_indices = @transform_1, window_bounds = array<i64: 256, 128>}, {pipeline_mode = #tpu.pipeline_mode<synchronous>, transform_indices = @transform_2, window_bounds = array<i64: 1, 128>}, {transform_indices = @transform_3, window_bounds = array<i64: 32, 128>}]} {
    %c0 = arith.constant 0 : index
    %c0_0 = arith.constant 0 : index
    %0 = vector.load %arg1[%c0, %c0_0] : memref<32x256xbf16, #tpu.memory_space<vmem>>, vector<32x256xbf16>
    %c0_1 = arith.constant 0 : index
    %c0_2 = arith.constant 0 : index
    %1 = vector.load %arg2[%c0_1, %c0_2] : memref<256x128xbf16, #tpu.memory_space<vmem>>, vector<256x128xbf16>
    %cst = arith.constant dense<0.000000e+00> : vector<32x128xf32>
    %2 = tpu.matmul %0, %1, %cst {dimension_numbers = #tpu.dot_dimension_numbers<[1], [0], [0], [1], [0, 0, 1, 1], [], []>} : vector<32x256xbf16>, vector<256x128xbf16>, vector<32x128xf32> -> vector<32x128xf32>
    %c0_3 = arith.constant 0 : index
    %c0_4 = arith.constant 0 : index
    %3 = vector.load %arg3[%c0_3, %c0_4] : memref<1x128xf32, #tpu.memory_space<vmem>>, vector<1x128xf32>
    %4 = vector.broadcast %3 : vector<1x128xf32> to vector<32x128xf32>
    %5 = arith.addf %2, %4 : vector<32x128xf32>
    %cst_5 = arith.constant 0.000000e+00 : f32
    %6 = vector.broadcast %cst_5 : f32 to vector<32x128xf32>
    %7 = arith.cmpf ogt, %5, %6 : vector<32x128xf32>
    %cst_6 = arith.constant 1.000000e-01 : f32
    %8 = vector.broadcast %cst_6 : f32 to vector<32x128xf32>
    %9 = arith.mulf %8, %5 : vector<32x128xf32>
    %10 = arith.select %7, %5, %9 : vector<32x128xi1>, vector<32x128xf32>
    %11 = arith.truncf %10 : vector<32x128xf32> to vector<32x128xbf16>
    %c0_7 = arith.constant 0 : index
    %c0_8 = arith.constant 0 : index
    %12 = vector.load %arg4[%c0_7, %c0_8] : memref<32x128xbf16, #tpu.memory_space<vmem>>, vector<32x128xbf16>
    tpu.vector_store %arg4[%c0_7, %c0_8], %11 {strides = array<i32>} : memref<32x128xbf16, #tpu.memory_space<vmem>>, vector<32x128xbf16>,
    return
  }
  func.func @transform_0(%arg0: i32) -> (i32, i32) {
    %c0_i32 = arith.constant 0 : i32
    %c0_i32_0 = arith.constant 0 : i32
    return %arg0, %c0_i32 : i32, i32
  }
  func.func @transform_1(%arg0: i32) -> (i32, i32) {
    %c0_i32 = arith.constant 0 : i32
    %c0_i32_0 = arith.constant 0 : i32
    %c0_i32_1 = arith.constant 0 : i32
    return %c0_i32, %c0_i32_0 : i32, i32
  }
  func.func @transform_2(%arg0: i32) -> (i32, i32) {
    %c0_i32 = arith.constant 0 : i32
    %c0_i32_0 = arith.constant 0 : i32
    %c0_i32_1 = arith.constant 0 : i32
    return %c0_i32, %c0_i32_0 : i32, i32
  }
  func.func @transform_3(%arg0: i32) -> (i32, i32) {
    %c0_i32 = arith.constant 0 : i32
    %c0_i32_0 = arith.constant 0 : i32
    return %arg0, %c0_i32 : i32, i32
  }
}

module attributes {stable_mosaic.version = 11 : i64} {
  func.func @_fused_linear_kernel(%arg0: i32, %arg1: memref<8x512xbf16, #tpu.memory_space<vmem>>, %arg2: memref<512x256xbf16, #tpu.memory_space<vmem>>, %arg3: memref<1x256xf32, #tpu.memory_space<vmem>>, %arg4: memref<8x256xbf16, #tpu.memory_space<vmem>>) attributes {dimension_semantics = [#tpu.dimension_semantics<parallel>], iteration_bounds = array<i64: 1>, scalar_prefetch = 0 : i64, scratch_operands = 0 : i64, tpu.core_type = #tpu.core_type<tc>, window_params = [{transform_indices = @transform_0, window_bounds = array<i64: 8, 512>}, {pipeline_mode = #tpu.pipeline_mode<synchronous>, transform_indices = @transform_1, window_bounds = array<i64: 512, 256>}, {pipeline_mode = #tpu.pipeline_mode<synchronous>, transform_indices = @transform_2, window_bounds = array<i64: 1, 256>}, {transform_indices = @transform_3, window_bounds = array<i64: 8, 256>}]} {
    %c0 = arith.constant 0 : index
    %c0_0 = arith.constant 0 : index
    %0 = vector.load %arg1[%c0, %c0_0] : memref<8x512xbf16, #tpu.memory_space<vmem>>, vector<8x512xbf16>
    %c0_1 = arith.constant 0 : index
    %c0_2 = arith.constant 0 : index
    %1 = vector.load %arg2[%c0_1, %c0_2] : memref<512x256xbf16, #tpu.memory_space<vmem>>, vector<512x256xbf16>
    %cst = arith.constant dense<0.000000e+00> : vector<8x256xf32>
    %2 = tpu.matmul %0, %1, %cst {dimension_numbers = #tpu.dot_dimension_numbers<[1], [0], [0], [1], [0, 0, 1, 1], [], []>} : vector<8x512xbf16>, vector<512x256xbf16>, vector<8x256xf32> -> vector<8x256xf32>
    %c0_3 = arith.constant 0 : index
    %c0_4 = arith.constant 0 : index
    %3 = vector.load %arg3[%c0_3, %c0_4] : memref<1x256xf32, #tpu.memory_space<vmem>>, vector<1x256xf32>
    %4 = vector.broadcast %3 : vector<1x256xf32> to vector<8x256xf32>
    %5 = arith.addf %2, %4 : vector<8x256xf32>
    %cst_5 = arith.constant 0.000000e+00 : f32
    %6 = vector.broadcast %cst_5 : f32 to vector<8x256xf32>
    %7 = arith.cmpf ogt, %5, %6 : vector<8x256xf32>
    %cst_6 = arith.constant 1.000000e-01 : f32
    %8 = vector.broadcast %cst_6 : f32 to vector<8x256xf32>
    %9 = arith.mulf %8, %5 : vector<8x256xf32>
    %10 = arith.select %7, %5, %9 : vector<8x256xi1>, vector<8x256xf32>
    %11 = arith.truncf %10 : vector<8x256xf32> to vector<8x256xbf16>
    %c0_7 = arith.constant 0 : index
    %c0_8 = arith.constant 0 : index
    %12 = vector.load %arg4[%c0_7, %c0_8] : memref<8x256xbf16, #tpu.memory_space<vmem>>, vector<8x256xbf16>
    tpu.vector_store %arg4[%c0_7, %c0_8], %11 {strides = array<i32>} : memref<8x256xbf16, #tpu.memory_space<vmem>>, vector<8x256xbf16>,
    return
  }
  func.func @transform_0(%arg0: i32) -> (i32, i32) {
    %c0_i32 = arith.constant 0 : i32
    %c0_i32_0 = arith.constant 0 : i32
    return %arg0, %c0_i32 : i32, i32
  }
  func.func @transform_1(%arg0: i32) -> (i32, i32) {
    %c0_i32 = arith.constant 0 : i32
    %c0_i32_0 = arith.constant 0 : i32
    %c0_i32_1 = arith.constant 0 : i32
    return %c0_i32, %c0_i32_0 : i32, i32
  }
  func.func @transform_2(%arg0: i32) -> (i32, i32) {
    %c0_i32 = arith.constant 0 : i32
    %c0_i32_0 = arith.constant 0 : i32
    %c0_i32_1 = arith.constant 0 : i32
    return %c0_i32, %c0_i32_0 : i32, i32
  }
  func.func @transform_3(%arg0: i32) -> (i32, i32) {
    %c0_i32 = arith.constant 0 : i32
    %c0_i32_0 = arith.constant 0 : i32
    return %arg0, %c0_i32 : i32, i32
  }
}

module attributes {stable_mosaic.version = 11 : i64} {
  func.func @_fused_linear_kernel(%arg0: i32, %arg1: memref<8x256xbf16, #tpu.memory_space<vmem>>, %arg2: memref<8x256xbf16, #tpu.memory_space<vmem>>, %arg3: memref<8x256xbf16, #tpu.memory_space<vmem>>, %arg4: memref<8x256xbf16, #tpu.memory_space<vmem>>, %arg5: memref<256x256xbf16, #tpu.memory_space<vmem>>, %arg6: memref<256x256xbf16, #tpu.memory_space<vmem>>, %arg7: memref<256x256xbf16, #tpu.memory_space<vmem>>, %arg8: memref<256x256xbf16, #tpu.memory_space<vmem>>, %arg9: memref<1x256xf32, #tpu.memory_space<vmem>>, %arg10: memref<8x256xbf16, #tpu.memory_space<vmem>>) attributes {dimension_semantics = [#tpu.dimension_semantics<parallel>], iteration_bounds = array<i64: 1>, scalar_prefetch = 0 : i64, scratch_operands = 0 : i64, tpu.core_type = #tpu.core_type<tc>, window_params = [{transform_indices = @transform_0, window_bounds = array<i64: 8, 256>}, {transform_indices = @transform_1, window_bounds = array<i64: 8, 256>}, {transform_indices = @transform_2, window_bounds = array<i64: 8, 256>}, {transform_indices = @transform_3, window_bounds = array<i64: 8, 256>}, {pipeline_mode = #tpu.pipeline_mode<synchronous>, transform_indices = @transform_4, window_bounds = array<i64: 256, 256>}, {pipeline_mode = #tpu.pipeline_mode<synchronous>, transform_indices = @transform_5, window_bounds = array<i64: 256, 256>}, {pipeline_mode = #tpu.pipeline_mode<synchronous>, transform_indices = @transform_6, window_bounds = array<i64: 256, 256>}, {pipeline_mode = #tpu.pipeline_mode<synchronous>, transform_indices = @transform_7, window_bounds = array<i64: 256, 256>}, {pipeline_mode = #tpu.pipeline_mode<synchronous>, transform_indices = @transform_8, window_bounds = array<i64: 1, 256>}, {transform_indices = @transform_9, window_bounds = array<i64: 8, 256>}]} {
    %c0 = arith.constant 0 : index
    %c0_0 = arith.constant 0 : index
    %0 = vector.load %arg1[%c0, %c0_0] : memref<8x256xbf16, #tpu.memory_space<vmem>>, vector<8x256xbf16>
    %c0_1 = arith.constant 0 : index
    %c0_2 = arith.constant 0 : index
    %1 = vector.load %arg5[%c0_1, %c0_2] : memref<256x256xbf16, #tpu.memory_space<vmem>>, vector<256x256xbf16>
    %cst = arith.constant dense<0.000000e+00> : vector<8x256xf32>
    %2 = tpu.matmul %0, %1, %cst {dimension_numbers = #tpu.dot_dimension_numbers<[1], [0], [0], [1], [0, 0, 1, 1], [], []>} : vector<8x256xbf16>, vector<256x256xbf16>, vector<8x256xf32> -> vector<8x256xf32>
    %c0_3 = arith.constant 0 : index
    %c0_4 = arith.constant 0 : index
    %3 = vector.load %arg2[%c0_3, %c0_4] : memref<8x256xbf16, #tpu.memory_space<vmem>>, vector<8x256xbf16>
    %c0_5 = arith.constant 0 : index
    %c0_6 = arith.constant 0 : index
    %4 = vector.load %arg6[%c0_5, %c0_6] : memref<256x256xbf16, #tpu.memory_space<vmem>>, vector<256x256xbf16>
    %cst_7 = arith.constant dense<0.000000e+00> : vector<8x256xf32>
    %5 = tpu.matmul %3, %4, %cst_7 {dimension_numbers = #tpu.dot_dimension_numbers<[1], [0], [0], [1], [0, 0, 1, 1], [], []>} : vector<8x256xbf16>, vector<256x256xbf16>, vector<8x256xf32> -> vector<8x256xf32>
    %6 = arith.addf %2, %5 : vector<8x256xf32>
    %c0_8 = arith.constant 0 : index
    %c0_9 = arith.constant 0 : index
    %7 = vector.load %arg3[%c0_8, %c0_9] : memref<8x256xbf16, #tpu.memory_space<vmem>>, vector<8x256xbf16>
    %c0_10 = arith.constant 0 : index
    %c0_11 = arith.constant 0 : index
    %8 = vector.load %arg7[%c0_10, %c0_11] : memref<256x256xbf16, #tpu.memory_space<vmem>>, vector<256x256xbf16>
    %cst_12 = arith.constant dense<0.000000e+00> : vector<8x256xf32>
    %9 = tpu.matmul %7, %8, %cst_12 {dimension_numbers = #tpu.dot_dimension_numbers<[1], [0], [0], [1], [0, 0, 1, 1], [], []>} : vector<8x256xbf16>, vector<256x256xbf16>, vector<8x256xf32> -> vector<8x256xf32>
    %10 = arith.addf %6, %9 : vector<8x256xf32>
    %c0_13 = arith.constant 0 : index
    %c0_14 = arith.constant 0 : index
    %11 = vector.load %arg4[%c0_13, %c0_14] : memref<8x256xbf16, #tpu.memory_space<vmem>>, vector<8x256xbf16>
    %c0_15 = arith.constant 0 : index
    %c0_16 = arith.constant 0 : index
    %12 = vector.load %arg8[%c0_15, %c0_16] : memref<256x256xbf16, #tpu.memory_space<vmem>>, vector<256x256xbf16>
    %cst_17 = arith.constant dense<0.000000e+00> : vector<8x256xf32>
    %13 = tpu.matmul %11, %12, %cst_17 {dimension_numbers = #tpu.dot_dimension_numbers<[1], [0], [0], [1], [0, 0, 1, 1], [], []>} : vector<8x256xbf16>, vector<256x256xbf16>, vector<8x256xf32> -> vector<8x256xf32>
    %14 = arith.addf %10, %13 : vector<8x256xf32>
    %c0_18 = arith.constant 0 : index
    %c0_19 = arith.constant 0 : index
    %15 = vector.load %arg9[%c0_18, %c0_19] : memref<1x256xf32, #tpu.memory_space<vmem>>, vector<1x256xf32>
    %16 = vector.broadcast %15 : vector<1x256xf32> to vector<8x256xf32>
    %17 = arith.addf %14, %16 : vector<8x256xf32>
    %cst_20 = arith.constant 0.000000e+00 : f32
    %18 = vector.broadcast %cst_20 : f32 to vector<8x256xf32>
    %19 = arith.cmpf ogt, %17, %18 : vector<8x256xf32>
    %cst_21 = arith.constant 1.000000e-01 : f32
    %20 = vector.broadcast %cst_21 : f32 to vector<8x256xf32>
    %21 = arith.mulf %20, %17 : vector<8x256xf32>
    %22 = arith.select %19, %17, %21 : vector<8x256xi1>, vector<8x256xf32>
    %23 = arith.truncf %22 : vector<8x256xf32> to vector<8x256xbf16>
    %c0_22 = arith.constant 0 : index
    %c0_23 = arith.constant 0 : index
    %24 = vector.load %arg10[%c0_22, %c0_23] : memref<8x256xbf16, #tpu.memory_space<vmem>>, vector<8x256xbf16>
    tpu.vector_store %arg10[%c0_22, %c0_23], %23 {strides = array<i32>} : memref<8x256xbf16, #tpu.memory_space<vmem>>, vector<8x256xbf16>,
    return
  }
  func.func @transform_0(%arg0: i32) -> (i32, i32) {
    %c0_i32 = arith.constant 0 : i32
    %c0_i32_0 = arith.constant 0 : i32
    return %arg0, %c0_i32 : i32, i32
  }
  func.func @transform_1(%arg0: i32) -> (i32, i32) {
    %c0_i32 = arith.constant 0 : i32
    %c0_i32_0 = arith.constant 0 : i32
    return %arg0, %c0_i32 : i32, i32
  }
  func.func @transform_2(%arg0: i32) -> (i32, i32) {
    %c0_i32 = arith.constant 0 : i32
    %c0_i32_0 = arith.constant 0 : i32
    return %arg0, %c0_i32 : i32, i32
  }
  func.func @transform_3(%arg0: i32) -> (i32, i32) {
    %c0_i32 = arith.constant 0 : i32
    %c0_i32_0 = arith.constant 0 : i32
    return %arg0, %c0_i32 : i32, i32
  }
  func.func @transform_4(%arg0: i32) -> (i32, i32) {
    %c0_i32 = arith.constant 0 : i32
    %c0_i32_0 = arith.constant 0 : i32
    %c0_i32_1 = arith.constant 0 : i32
    return %c0_i32, %c0_i32_0 : i32, i32
  }
  func.func @transform_5(%arg0: i32) -> (i32, i32) {
    %c0_i32 = arith.constant 0 : i32
    %c0_i32_0 = arith.constant 0 : i32
    %c0_i32_1 = arith.constant 0 : i32
    return %c0_i32, %c0_i32_0 : i32, i32
  }
  func.func @transform_6(%arg0: i32) -> (i32, i32) {
    %c0_i32 = arith.constant 0 : i32
    %c0_i32_0 = arith.constant 0 : i32
    %c0_i32_1 = arith.constant 0 : i32
    return %c0_i32, %c0_i32_0 : i32, i32
  }
  func.func @transform_7(%arg0: i32) -> (i32, i32) {
    %c0_i32 = arith.constant 0 : i32
    %c0_i32_0 = arith.constant 0 : i32
    %c0_i32_1 = arith.constant 0 : i32
    return %c0_i32, %c0_i32_0 : i32, i32
  }
  func.func @transform_8(%arg0: i32) -> (i32, i32) {
    %c0_i32 = arith.constant 0 : i32
    %c0_i32_0 = arith.constant 0 : i32
    %c0_i32_1 = arith.constant 0 : i32
    return %c0_i32, %c0_i32_0 : i32, i32
  }
  func.func @transform_9(%arg0: i32) -> (i32, i32) {
    %c0_i32 = arith.constant 0 : i32
    %c0_i32_0 = arith.constant 0 : i32
    return %arg0, %c0_i32 : i32, i32
  }
}

module attributes {stable_mosaic.version = 11 : i64} {
  func.func @_lat_proj_kernel(%arg0: i32, %arg1: memref<8x256xbf16, #tpu.memory_space<vmem>>, %arg2: memref<256x128xbf16, #tpu.memory_space<vmem>>, %arg3: memref<1x128xf32, #tpu.memory_space<vmem>>, %arg4: memref<128x128xbf16, #tpu.memory_space<vmem>>, %arg5: memref<8x128xbf16, #tpu.memory_space<vmem>>) attributes {dimension_semantics = [#tpu.dimension_semantics<parallel>], iteration_bounds = array<i64: 1>, scalar_prefetch = 0 : i64, scratch_operands = 0 : i64, tpu.core_type = #tpu.core_type<tc>, window_params = [{transform_indices = @transform_0, window_bounds = array<i64: 8, 256>}, {pipeline_mode = #tpu.pipeline_mode<synchronous>, transform_indices = @transform_1, window_bounds = array<i64: 256, 128>}, {pipeline_mode = #tpu.pipeline_mode<synchronous>, transform_indices = @transform_2, window_bounds = array<i64: 1, 128>}, {pipeline_mode = #tpu.pipeline_mode<synchronous>, transform_indices = @transform_3, window_bounds = array<i64: 128, 128>}, {transform_indices = @transform_4, window_bounds = array<i64: 8, 128>}]} {
    %c0 = arith.constant 0 : index
    %c0_0 = arith.constant 0 : index
    %0 = vector.load %arg1[%c0, %c0_0] : memref<8x256xbf16, #tpu.memory_space<vmem>>, vector<8x256xbf16>
    %c0_1 = arith.constant 0 : index
    %c0_2 = arith.constant 0 : index
    %1 = vector.load %arg2[%c0_1, %c0_2] : memref<256x128xbf16, #tpu.memory_space<vmem>>, vector<256x128xbf16>
    %cst = arith.constant dense<0.000000e+00> : vector<8x128xf32>
    %2 = tpu.matmul %0, %1, %cst {dimension_numbers = #tpu.dot_dimension_numbers<[1], [0], [0], [1], [0, 0, 1, 1], [], []>} : vector<8x256xbf16>, vector<256x128xbf16>, vector<8x128xf32> -> vector<8x128xf32>
    %c0_3 = arith.constant 0 : index
    %c0_4 = arith.constant 0 : index
    %3 = vector.load %arg3[%c0_3, %c0_4] : memref<1x128xf32, #tpu.memory_space<vmem>>, vector<1x128xf32>
    %4 = vector.broadcast %3 : vector<1x128xf32> to vector<8x128xf32>
    %5 = arith.addf %2, %4 : vector<8x128xf32>
    %cst_5 = arith.constant 0.000000e+00 : f32
    %6 = vector.broadcast %cst_5 : f32 to vector<8x128xf32>
    %7 = arith.cmpf ogt, %5, %6 : vector<8x128xf32>
    %cst_6 = arith.constant 1.000000e-01 : f32
    %8 = vector.broadcast %cst_6 : f32 to vector<8x128xf32>
    %9 = arith.mulf %8, %5 : vector<8x128xf32>
    %10 = arith.select %7, %5, %9 : vector<8x128xi1>, vector<8x128xf32>
    %11 = arith.truncf %10 : vector<8x128xf32> to vector<8x128xbf16>
    %c0_7 = arith.constant 0 : index
    %c0_8 = arith.constant 0 : index
    %12 = vector.load %arg4[%c0_7, %c0_8] : memref<128x128xbf16, #tpu.memory_space<vmem>>, vector<128x128xbf16>
    %cst_9 = arith.constant dense<0.000000e+00> : vector<8x128xf32>
    %13 = tpu.matmul %11, %12, %cst_9 {dimension_numbers = #tpu.dot_dimension_numbers<[1], [0], [0], [1], [0, 0, 1, 1], [], []>} : vector<8x128xbf16>, vector<128x128xbf16>, vector<8x128xf32> -> vector<8x128xf32>
    %14 = arith.truncf %13 : vector<8x128xf32> to vector<8x128xbf16>
    %c0_10 = arith.constant 0 : index
    %c0_11 = arith.constant 0 : index
    %15 = vector.load %arg5[%c0_10, %c0_11] : memref<8x128xbf16, #tpu.memory_space<vmem>>, vector<8x128xbf16>
    tpu.vector_store %arg5[%c0_10, %c0_11], %14 {strides = array<i32>} : memref<8x128xbf16, #tpu.memory_space<vmem>>, vector<8x128xbf16>,
    return
  }
  func.func @transform_0(%arg0: i32) -> (i32, i32) {
    %c0_i32 = arith.constant 0 : i32
    %c0_i32_0 = arith.constant 0 : i32
    return %arg0, %c0_i32 : i32, i32
  }
  func.func @transform_1(%arg0: i32) -> (i32, i32) {
    %c0_i32 = arith.constant 0 : i32
    %c0_i32_0 = arith.constant 0 : i32
    %c0_i32_1 = arith.constant 0 : i32
    return %c0_i32, %c0_i32_0 : i32, i32
  }
  func.func @transform_2(%arg0: i32) -> (i32, i32) {
    %c0_i32 = arith.constant 0 : i32
    %c0_i32_0 = arith.constant 0 : i32
    %c0_i32_1 = arith.constant 0 : i32
    return %c0_i32, %c0_i32_0 : i32, i32
  }
  func.func @transform_3(%arg0: i32) -> (i32, i32) {
    %c0_i32 = arith.constant 0 : i32
    %c0_i32_0 = arith.constant 0 : i32
    %c0_i32_1 = arith.constant 0 : i32
    return %c0_i32, %c0_i32_0 : i32, i32
  }
  func.func @transform_4(%arg0: i32) -> (i32, i32) {
    %c0_i32 = arith.constant 0 : i32
    %c0_i32_0 = arith.constant 0 : i32
    return %arg0, %c0_i32 : i32, i32
  }
}

module attributes {stable_mosaic.version = 11 : i64} {
  func.func @_lat_proj_kernel(%arg0: i32, %arg1: memref<32x128xbf16, #tpu.memory_space<vmem>>, %arg2: memref<128x64xbf16, #tpu.memory_space<vmem>>, %arg3: memref<1x64xf32, #tpu.memory_space<vmem>>, %arg4: memref<64x64xbf16, #tpu.memory_space<vmem>>, %arg5: memref<32x64xbf16, #tpu.memory_space<vmem>>) attributes {dimension_semantics = [#tpu.dimension_semantics<parallel>], iteration_bounds = array<i64: 1>, scalar_prefetch = 0 : i64, scratch_operands = 0 : i64, tpu.core_type = #tpu.core_type<tc>, window_params = [{transform_indices = @transform_0, window_bounds = array<i64: 32, 128>}, {pipeline_mode = #tpu.pipeline_mode<synchronous>, transform_indices = @transform_1, window_bounds = array<i64: 128, 64>}, {pipeline_mode = #tpu.pipeline_mode<synchronous>, transform_indices = @transform_2, window_bounds = array<i64: 1, 64>}, {pipeline_mode = #tpu.pipeline_mode<synchronous>, transform_indices = @transform_3, window_bounds = array<i64: 64, 64>}, {transform_indices = @transform_4, window_bounds = array<i64: 32, 64>}]} {
    %c0 = arith.constant 0 : index
    %c0_0 = arith.constant 0 : index
    %0 = vector.load %arg1[%c0, %c0_0] : memref<32x128xbf16, #tpu.memory_space<vmem>>, vector<32x128xbf16>
    %c0_1 = arith.constant 0 : index
    %c0_2 = arith.constant 0 : index
    %1 = vector.load %arg2[%c0_1, %c0_2] : memref<128x64xbf16, #tpu.memory_space<vmem>>, vector<128x64xbf16>
    %cst = arith.constant dense<0.000000e+00> : vector<32x64xf32>
    %2 = tpu.matmul %0, %1, %cst {dimension_numbers = #tpu.dot_dimension_numbers<[1], [0], [0], [1], [0, 0, 1, 1], [], []>} : vector<32x128xbf16>, vector<128x64xbf16>, vector<32x64xf32> -> vector<32x64xf32>
    %c0_3 = arith.constant 0 : index
    %c0_4 = arith.constant 0 : index
    %3 = vector.load %arg3[%c0_3, %c0_4] : memref<1x64xf32, #tpu.memory_space<vmem>>, vector<1x64xf32>
    %4 = vector.broadcast %3 : vector<1x64xf32> to vector<32x64xf32>
    %5 = arith.addf %2, %4 : vector<32x64xf32>
    %cst_5 = arith.constant 0.000000e+00 : f32
    %6 = vector.broadcast %cst_5 : f32 to vector<32x64xf32>
    %7 = arith.cmpf ogt, %5, %6 : vector<32x64xf32>
    %cst_6 = arith.constant 1.000000e-01 : f32
    %8 = vector.broadcast %cst_6 : f32 to vector<32x64xf32>
    %9 = arith.mulf %8, %5 : vector<32x64xf32>
    %10 = arith.select %7, %5, %9 : vector<32x64xi1>, vector<32x64xf32>
    %11 = arith.truncf %10 : vector<32x64xf32> to vector<32x64xbf16>
    %c0_7 = arith.constant 0 : index
    %c0_8 = arith.constant 0 : index
    %12 = vector.load %arg4[%c0_7, %c0_8] : memref<64x64xbf16, #tpu.memory_space<vmem>>, vector<64x64xbf16>
    %cst_9 = arith.constant dense<0.000000e+00> : vector<32x64xf32>
    %13 = tpu.matmul %11, %12, %cst_9 {dimension_numbers = #tpu.dot_dimension_numbers<[1], [0], [0], [1], [0, 0, 1, 1], [], []>} : vector<32x64xbf16>, vector<64x64xbf16>, vector<32x64xf32> -> vector<32x64xf32>
    %14 = arith.truncf %13 : vector<32x64xf32> to vector<32x64xbf16>
    %c0_10 = arith.constant 0 : index
    %c0_11 = arith.constant 0 : index
    %15 = vector.load %arg5[%c0_10, %c0_11] : memref<32x64xbf16, #tpu.memory_space<vmem>>, vector<32x64xbf16>
    tpu.vector_store %arg5[%c0_10, %c0_11], %14 {strides = array<i32>} : memref<32x64xbf16, #tpu.memory_space<vmem>>, vector<32x64xbf16>,
    return
  }
  func.func @transform_0(%arg0: i32) -> (i32, i32) {
    %c0_i32 = arith.constant 0 : i32
    %c0_i32_0 = arith.constant 0 : i32
    return %arg0, %c0_i32 : i32, i32
  }
  func.func @transform_1(%arg0: i32) -> (i32, i32) {
    %c0_i32 = arith.constant 0 : i32
    %c0_i32_0 = arith.constant 0 : i32
    %c0_i32_1 = arith.constant 0 : i32
    return %c0_i32, %c0_i32_0 : i32, i32
  }
  func.func @transform_2(%arg0: i32) -> (i32, i32) {
    %c0_i32 = arith.constant 0 : i32
    %c0_i32_0 = arith.constant 0 : i32
    %c0_i32_1 = arith.constant 0 : i32
    return %c0_i32, %c0_i32_0 : i32, i32
  }
  func.func @transform_3(%arg0: i32) -> (i32, i32) {
    %c0_i32 = arith.constant 0 : i32
    %c0_i32_0 = arith.constant 0 : i32
    %c0_i32_1 = arith.constant 0 : i32
    return %c0_i32, %c0_i32_0 : i32, i32
  }
  func.func @transform_4(%arg0: i32) -> (i32, i32) {
    %c0_i32 = arith.constant 0 : i32
    %c0_i32_0 = arith.constant 0 : i32
    return %arg0, %c0_i32 : i32, i32
  }
}

module attributes {stable_mosaic.version = 11 : i64} {
  func.func @_fused_linear_kernel(%arg0: i32, %arg1: memref<32x128xbf16, #tpu.memory_space<vmem>>, %arg2: memref<128x128xbf16, #tpu.memory_space<vmem>>, %arg3: memref<1x128xf32, #tpu.memory_space<vmem>>, %arg4: memref<32x128xbf16, #tpu.memory_space<vmem>>, %arg5: memref<32x128xbf16, #tpu.memory_space<vmem>>) attributes {dimension_semantics = [#tpu.dimension_semantics<parallel>], iteration_bounds = array<i64: 1>, scalar_prefetch = 0 : i64, scratch_operands = 0 : i64, tpu.core_type = #tpu.core_type<tc>, window_params = [{transform_indices = @transform_0, window_bounds = array<i64: 32, 128>}, {pipeline_mode = #tpu.pipeline_mode<synchronous>, transform_indices = @transform_1, window_bounds = array<i64: 128, 128>}, {pipeline_mode = #tpu.pipeline_mode<synchronous>, transform_indices = @transform_2, window_bounds = array<i64: 1, 128>}, {transform_indices = @transform_3, window_bounds = array<i64: 32, 128>}, {transform_indices = @transform_4, window_bounds = array<i64: 32, 128>}]} {
    %c0 = arith.constant 0 : index
    %c0_0 = arith.constant 0 : index
    %0 = vector.load %arg1[%c0, %c0_0] : memref<32x128xbf16, #tpu.memory_space<vmem>>, vector<32x128xbf16>
    %c0_1 = arith.constant 0 : index
    %c0_2 = arith.constant 0 : index
    %1 = vector.load %arg2[%c0_1, %c0_2] : memref<128x128xbf16, #tpu.memory_space<vmem>>, vector<128x128xbf16>
    %cst = arith.constant dense<0.000000e+00> : vector<32x128xf32>
    %2 = tpu.matmul %0, %1, %cst {dimension_numbers = #tpu.dot_dimension_numbers<[1], [0], [0], [1], [0, 0, 1, 1], [], []>} : vector<32x128xbf16>, vector<128x128xbf16>, vector<32x128xf32> -> vector<32x128xf32>
    %c0_3 = arith.constant 0 : index
    %c0_4 = arith.constant 0 : index
    %3 = vector.load %arg3[%c0_3, %c0_4] : memref<1x128xf32, #tpu.memory_space<vmem>>, vector<1x128xf32>
    %4 = vector.broadcast %3 : vector<1x128xf32> to vector<32x128xf32>
    %5 = arith.addf %2, %4 : vector<32x128xf32>
    %c0_5 = arith.constant 0 : index
    %c0_6 = arith.constant 0 : index
    %6 = vector.load %arg4[%c0_5, %c0_6] : memref<32x128xbf16, #tpu.memory_space<vmem>>, vector<32x128xbf16>
    %7 = arith.extf %6 : vector<32x128xbf16> to vector<32x128xf32>
    %8 = arith.addf %5, %7 : vector<32x128xf32>
    %cst_7 = arith.constant 0.000000e+00 : f32
    %9 = vector.broadcast %cst_7 : f32 to vector<32x128xf32>
    %10 = arith.cmpf ogt, %8, %9 : vector<32x128xf32>
    %cst_8 = arith.constant 1.000000e-01 : f32
    %11 = vector.broadcast %cst_8 : f32 to vector<32x128xf32>
    %12 = arith.mulf %11, %8 : vector<32x128xf32>
    %13 = arith.select %10, %8, %12 : vector<32x128xi1>, vector<32x128xf32>
    %14 = arith.truncf %13 : vector<32x128xf32> to vector<32x128xbf16>
    %c0_9 = arith.constant 0 : index
    %c0_10 = arith.constant 0 : index
    %15 = vector.load %arg5[%c0_9, %c0_10] : memref<32x128xbf16, #tpu.memory_space<vmem>>, vector<32x128xbf16>
    tpu.vector_store %arg5[%c0_9, %c0_10], %14 {strides = array<i32>} : memref<32x128xbf16, #tpu.memory_space<vmem>>, vector<32x128xbf16>,
    return
  }
  func.func @transform_0(%arg0: i32) -> (i32, i32) {
    %c0_i32 = arith.constant 0 : i32
    %c0_i32_0 = arith.constant 0 : i32
    return %arg0, %c0_i32 : i32, i32
  }
  func.func @transform_1(%arg0: i32) -> (i32, i32) {
    %c0_i32 = arith.constant 0 : i32
    %c0_i32_0 = arith.constant 0 : i32
    %c0_i32_1 = arith.constant 0 : i32
    return %c0_i32, %c0_i32_0 : i32, i32
  }
  func.func @transform_2(%arg0: i32) -> (i32, i32) {
    %c0_i32 = arith.constant 0 : i32
    %c0_i32_0 = arith.constant 0 : i32
    %c0_i32_1 = arith.constant 0 : i32
    return %c0_i32, %c0_i32_0 : i32, i32
  }
  func.func @transform_3(%arg0: i32) -> (i32, i32) {
    %c0_i32 = arith.constant 0 : i32
    %c0_i32_0 = arith.constant 0 : i32
    return %arg0, %c0_i32 : i32, i32
  }
  func.func @transform_4(%arg0: i32) -> (i32, i32) {
    %c0_i32 = arith.constant 0 : i32
    %c0_i32_0 = arith.constant 0 : i32
    return %arg0, %c0_i32 : i32, i32
  }
}

module attributes {stable_mosaic.version = 11 : i64} {
  func.func @_fused_linear_kernel(%arg0: i32, %arg1: memref<128x64xbf16, #tpu.memory_space<vmem>>, %arg2: memref<64x64xbf16, #tpu.memory_space<vmem>>, %arg3: memref<1x64xf32, #tpu.memory_space<vmem>>, %arg4: memref<128x64xbf16, #tpu.memory_space<vmem>>, %arg5: memref<128x64xbf16, #tpu.memory_space<vmem>>) attributes {dimension_semantics = [#tpu.dimension_semantics<parallel>], iteration_bounds = array<i64: 1>, scalar_prefetch = 0 : i64, scratch_operands = 0 : i64, tpu.core_type = #tpu.core_type<tc>, window_params = [{transform_indices = @transform_0, window_bounds = array<i64: 128, 64>}, {pipeline_mode = #tpu.pipeline_mode<synchronous>, transform_indices = @transform_1, window_bounds = array<i64: 64, 64>}, {pipeline_mode = #tpu.pipeline_mode<synchronous>, transform_indices = @transform_2, window_bounds = array<i64: 1, 64>}, {transform_indices = @transform_3, window_bounds = array<i64: 128, 64>}, {transform_indices = @transform_4, window_bounds = array<i64: 128, 64>}]} {
    %c0 = arith.constant 0 : index
    %c0_0 = arith.constant 0 : index
    %0 = vector.load %arg1[%c0, %c0_0] : memref<128x64xbf16, #tpu.memory_space<vmem>>, vector<128x64xbf16>
    %c0_1 = arith.constant 0 : index
    %c0_2 = arith.constant 0 : index
    %1 = vector.load %arg2[%c0_1, %c0_2] : memref<64x64xbf16, #tpu.memory_space<vmem>>, vector<64x64xbf16>
    %cst = arith.constant dense<0.000000e+00> : vector<128x64xf32>
    %2 = tpu.matmul %0, %1, %cst {dimension_numbers = #tpu.dot_dimension_numbers<[1], [0], [0], [1], [0, 0, 1, 1], [], []>} : vector<128x64xbf16>, vector<64x64xbf16>, vector<128x64xf32> -> vector<128x64xf32>
    %c0_3 = arith.constant 0 : index
    %c0_4 = arith.constant 0 : index
    %3 = vector.load %arg3[%c0_3, %c0_4] : memref<1x64xf32, #tpu.memory_space<vmem>>, vector<1x64xf32>
    %4 = vector.broadcast %3 : vector<1x64xf32> to vector<128x64xf32>
    %5 = arith.addf %2, %4 : vector<128x64xf32>
    %c0_5 = arith.constant 0 : index
    %c0_6 = arith.constant 0 : index
    %6 = vector.load %arg4[%c0_5, %c0_6] : memref<128x64xbf16, #tpu.memory_space<vmem>>, vector<128x64xbf16>
    %7 = arith.extf %6 : vector<128x64xbf16> to vector<128x64xf32>
    %8 = arith.addf %5, %7 : vector<128x64xf32>
    %cst_7 = arith.constant 0.000000e+00 : f32
    %9 = vector.broadcast %cst_7 : f32 to vector<128x64xf32>
    %10 = arith.cmpf ogt, %8, %9 : vector<128x64xf32>
    %cst_8 = arith.constant 1.000000e-01 : f32
    %11 = vector.broadcast %cst_8 : f32 to vector<128x64xf32>
    %12 = arith.mulf %11, %8 : vector<128x64xf32>
    %13 = arith.select %10, %8, %12 : vector<128x64xi1>, vector<128x64xf32>
    %14 = arith.truncf %13 : vector<128x64xf32> to vector<128x64xbf16>
    %c0_9 = arith.constant 0 : index
    %c0_10 = arith.constant 0 : index
    %15 = vector.load %arg5[%c0_9, %c0_10] : memref<128x64xbf16, #tpu.memory_space<vmem>>, vector<128x64xbf16>
    tpu.vector_store %arg5[%c0_9, %c0_10], %14 {strides = array<i32>} : memref<128x64xbf16, #tpu.memory_space<vmem>>, vector<128x64xbf16>,
    return
  }
  func.func @transform_0(%arg0: i32) -> (i32, i32) {
    %c0_i32 = arith.constant 0 : i32
    %c0_i32_0 = arith.constant 0 : i32
    return %arg0, %c0_i32 : i32, i32
  }
  func.func @transform_1(%arg0: i32) -> (i32, i32) {
    %c0_i32 = arith.constant 0 : i32
    %c0_i32_0 = arith.constant 0 : i32
    %c0_i32_1 = arith.constant 0 : i32
    return %c0_i32, %c0_i32_0 : i32, i32
  }
  func.func @transform_2(%arg0: i32) -> (i32, i32) {
    %c0_i32 = arith.constant 0 : i32
    %c0_i32_0 = arith.constant 0 : i32
    %c0_i32_1 = arith.constant 0 : i32
    return %c0_i32, %c0_i32_0 : i32, i32
  }
  func.func @transform_3(%arg0: i32) -> (i32, i32) {
    %c0_i32 = arith.constant 0 : i32
    %c0_i32_0 = arith.constant 0 : i32
    return %arg0, %c0_i32 : i32, i32
  }
  func.func @transform_4(%arg0: i32) -> (i32, i32) {
    %c0_i32 = arith.constant 0 : i32
    %c0_i32_0 = arith.constant 0 : i32
    return %arg0, %c0_i32 : i32, i32
  }
}

module attributes {stable_mosaic.version = 11 : i64} {
  func.func @_fused_linear_kernel(%arg0: i32, %arg1: memref<32x128xbf16, #tpu.memory_space<vmem>>, %arg2: memref<32x128xbf16, #tpu.memory_space<vmem>>, %arg3: memref<128x128xbf16, #tpu.memory_space<vmem>>, %arg4: memref<128x128xbf16, #tpu.memory_space<vmem>>, %arg5: memref<1x128xf32, #tpu.memory_space<vmem>>, %arg6: memref<32x128xbf16, #tpu.memory_space<vmem>>) attributes {dimension_semantics = [#tpu.dimension_semantics<parallel>], iteration_bounds = array<i64: 1>, scalar_prefetch = 0 : i64, scratch_operands = 0 : i64, tpu.core_type = #tpu.core_type<tc>, window_params = [{transform_indices = @transform_0, window_bounds = array<i64: 32, 128>}, {transform_indices = @transform_1, window_bounds = array<i64: 32, 128>}, {pipeline_mode = #tpu.pipeline_mode<synchronous>, transform_indices = @transform_2, window_bounds = array<i64: 128, 128>}, {pipeline_mode = #tpu.pipeline_mode<synchronous>, transform_indices = @transform_3, window_bounds = array<i64: 128, 128>}, {pipeline_mode = #tpu.pipeline_mode<synchronous>, transform_indices = @transform_4, window_bounds = array<i64: 1, 128>}, {transform_indices = @transform_5, window_bounds = array<i64: 32, 128>}]} {
    %c0 = arith.constant 0 : index
    %c0_0 = arith.constant 0 : index
    %0 = vector.load %arg1[%c0, %c0_0] : memref<32x128xbf16, #tpu.memory_space<vmem>>, vector<32x128xbf16>
    %c0_1 = arith.constant 0 : index
    %c0_2 = arith.constant 0 : index
    %1 = vector.load %arg3[%c0_1, %c0_2] : memref<128x128xbf16, #tpu.memory_space<vmem>>, vector<128x128xbf16>
    %cst = arith.constant dense<0.000000e+00> : vector<32x128xf32>
    %2 = tpu.matmul %0, %1, %cst {dimension_numbers = #tpu.dot_dimension_numbers<[1], [0], [0], [1], [0, 0, 1, 1], [], []>} : vector<32x128xbf16>, vector<128x128xbf16>, vector<32x128xf32> -> vector<32x128xf32>
    %c0_3 = arith.constant 0 : index
    %c0_4 = arith.constant 0 : index
    %3 = vector.load %arg2[%c0_3, %c0_4] : memref<32x128xbf16, #tpu.memory_space<vmem>>, vector<32x128xbf16>
    %c0_5 = arith.constant 0 : index
    %c0_6 = arith.constant 0 : index
    %4 = vector.load %arg4[%c0_5, %c0_6] : memref<128x128xbf16, #tpu.memory_space<vmem>>, vector<128x128xbf16>
    %cst_7 = arith.constant dense<0.000000e+00> : vector<32x128xf32>
    %5 = tpu.matmul %3, %4, %cst_7 {dimension_numbers = #tpu.dot_dimension_numbers<[1], [0], [0], [1], [0, 0, 1, 1], [], []>} : vector<32x128xbf16>, vector<128x128xbf16>, vector<32x128xf32> -> vector<32x128xf32>
    %6 = arith.addf %2, %5 : vector<32x128xf32>
    %c0_8 = arith.constant 0 : index
    %c0_9 = arith.constant 0 : index
    %7 = vector.load %arg5[%c0_8, %c0_9] : memref<1x128xf32, #tpu.memory_space<vmem>>, vector<1x128xf32>
    %8 = vector.broadcast %7 : vector<1x128xf32> to vector<32x128xf32>
    %9 = arith.addf %6, %8 : vector<32x128xf32>
    %cst_10 = arith.constant 0.000000e+00 : f32
    %10 = vector.broadcast %cst_10 : f32 to vector<32x128xf32>
    %11 = arith.cmpf ogt, %9, %10 : vector<32x128xf32>
    %cst_11 = arith.constant 1.000000e-01 : f32
    %12 = vector.broadcast %cst_11 : f32 to vector<32x128xf32>
    %13 = arith.mulf %12, %9 : vector<32x128xf32>
    %14 = arith.select %11, %9, %13 : vector<32x128xi1>, vector<32x128xf32>
    %15 = arith.truncf %14 : vector<32x128xf32> to vector<32x128xbf16>
    %c0_12 = arith.constant 0 : index
    %c0_13 = arith.constant 0 : index
    %16 = vector.load %arg6[%c0_12, %c0_13] : memref<32x128xbf16, #tpu.memory_space<vmem>>, vector<32x128xbf16>
    tpu.vector_store %arg6[%c0_12, %c0_13], %15 {strides = array<i32>} : memref<32x128xbf16, #tpu.memory_space<vmem>>, vector<32x128xbf16>,
    return
  }
  func.func @transform_0(%arg0: i32) -> (i32, i32) {
    %c0_i32 = arith.constant 0 : i32
    %c0_i32_0 = arith.constant 0 : i32
    return %arg0, %c0_i32 : i32, i32
  }
  func.func @transform_1(%arg0: i32) -> (i32, i32) {
    %c0_i32 = arith.constant 0 : i32
    %c0_i32_0 = arith.constant 0 : i32
    return %arg0, %c0_i32 : i32, i32
  }
  func.func @transform_2(%arg0: i32) -> (i32, i32) {
    %c0_i32 = arith.constant 0 : i32
    %c0_i32_0 = arith.constant 0 : i32
    %c0_i32_1 = arith.constant 0 : i32
    return %c0_i32, %c0_i32_0 : i32, i32
  }
  func.func @transform_3(%arg0: i32) -> (i32, i32) {
    %c0_i32 = arith.constant 0 : i32
    %c0_i32_0 = arith.constant 0 : i32
    %c0_i32_1 = arith.constant 0 : i32
    return %c0_i32, %c0_i32_0 : i32, i32
  }
  func.func @transform_4(%arg0: i32) -> (i32, i32) {
    %c0_i32 = arith.constant 0 : i32
    %c0_i32_0 = arith.constant 0 : i32
    %c0_i32_1 = arith.constant 0 : i32
    return %c0_i32, %c0_i32_0 : i32, i32
  }
  func.func @transform_5(%arg0: i32) -> (i32, i32) {
    %c0_i32 = arith.constant 0 : i32
    %c0_i32_0 = arith.constant 0 : i32
    return %arg0, %c0_i32 : i32, i32
  }
}

module attributes {stable_mosaic.version = 11 : i64} {
  func.func @_fused_linear_kernel(%arg0: i32, %arg1: memref<8x256xbf16, #tpu.memory_space<vmem>>, %arg2: memref<8x256xbf16, #tpu.memory_space<vmem>>, %arg3: memref<256x256xbf16, #tpu.memory_space<vmem>>, %arg4: memref<256x256xbf16, #tpu.memory_space<vmem>>, %arg5: memref<1x256xf32, #tpu.memory_space<vmem>>, %arg6: memref<8x256xbf16, #tpu.memory_space<vmem>>) attributes {dimension_semantics = [#tpu.dimension_semantics<parallel>], iteration_bounds = array<i64: 1>, scalar_prefetch = 0 : i64, scratch_operands = 0 : i64, tpu.core_type = #tpu.core_type<tc>, window_params = [{transform_indices = @transform_0, window_bounds = array<i64: 8, 256>}, {transform_indices = @transform_1, window_bounds = array<i64: 8, 256>}, {pipeline_mode = #tpu.pipeline_mode<synchronous>, transform_indices = @transform_2, window_bounds = array<i64: 256, 256>}, {pipeline_mode = #tpu.pipeline_mode<synchronous>, transform_indices = @transform_3, window_bounds = array<i64: 256, 256>}, {pipeline_mode = #tpu.pipeline_mode<synchronous>, transform_indices = @transform_4, window_bounds = array<i64: 1, 256>}, {transform_indices = @transform_5, window_bounds = array<i64: 8, 256>}]} {
    %c0 = arith.constant 0 : index
    %c0_0 = arith.constant 0 : index
    %0 = vector.load %arg1[%c0, %c0_0] : memref<8x256xbf16, #tpu.memory_space<vmem>>, vector<8x256xbf16>
    %c0_1 = arith.constant 0 : index
    %c0_2 = arith.constant 0 : index
    %1 = vector.load %arg3[%c0_1, %c0_2] : memref<256x256xbf16, #tpu.memory_space<vmem>>, vector<256x256xbf16>
    %cst = arith.constant dense<0.000000e+00> : vector<8x256xf32>
    %2 = tpu.matmul %0, %1, %cst {dimension_numbers = #tpu.dot_dimension_numbers<[1], [0], [0], [1], [0, 0, 1, 1], [], []>} : vector<8x256xbf16>, vector<256x256xbf16>, vector<8x256xf32> -> vector<8x256xf32>
    %c0_3 = arith.constant 0 : index
    %c0_4 = arith.constant 0 : index
    %3 = vector.load %arg2[%c0_3, %c0_4] : memref<8x256xbf16, #tpu.memory_space<vmem>>, vector<8x256xbf16>
    %c0_5 = arith.constant 0 : index
    %c0_6 = arith.constant 0 : index
    %4 = vector.load %arg4[%c0_5, %c0_6] : memref<256x256xbf16, #tpu.memory_space<vmem>>, vector<256x256xbf16>
    %cst_7 = arith.constant dense<0.000000e+00> : vector<8x256xf32>
    %5 = tpu.matmul %3, %4, %cst_7 {dimension_numbers = #tpu.dot_dimension_numbers<[1], [0], [0], [1], [0, 0, 1, 1], [], []>} : vector<8x256xbf16>, vector<256x256xbf16>, vector<8x256xf32> -> vector<8x256xf32>
    %6 = arith.addf %2, %5 : vector<8x256xf32>
    %c0_8 = arith.constant 0 : index
    %c0_9 = arith.constant 0 : index
    %7 = vector.load %arg5[%c0_8, %c0_9] : memref<1x256xf32, #tpu.memory_space<vmem>>, vector<1x256xf32>
    %8 = vector.broadcast %7 : vector<1x256xf32> to vector<8x256xf32>
    %9 = arith.addf %6, %8 : vector<8x256xf32>
    %cst_10 = arith.constant 0.000000e+00 : f32
    %10 = vector.broadcast %cst_10 : f32 to vector<8x256xf32>
    %11 = arith.cmpf ogt, %9, %10 : vector<8x256xf32>
    %cst_11 = arith.constant 1.000000e-01 : f32
    %12 = vector.broadcast %cst_11 : f32 to vector<8x256xf32>
    %13 = arith.mulf %12, %9 : vector<8x256xf32>
    %14 = arith.select %11, %9, %13 : vector<8x256xi1>, vector<8x256xf32>
    %15 = arith.truncf %14 : vector<8x256xf32> to vector<8x256xbf16>
    %c0_12 = arith.constant 0 : index
    %c0_13 = arith.constant 0 : index
    %16 = vector.load %arg6[%c0_12, %c0_13] : memref<8x256xbf16, #tpu.memory_space<vmem>>, vector<8x256xbf16>
    tpu.vector_store %arg6[%c0_12, %c0_13], %15 {strides = array<i32>} : memref<8x256xbf16, #tpu.memory_space<vmem>>, vector<8x256xbf16>,
    return
  }
  func.func @transform_0(%arg0: i32) -> (i32, i32) {
    %c0_i32 = arith.constant 0 : i32
    %c0_i32_0 = arith.constant 0 : i32
    return %arg0, %c0_i32 : i32, i32
  }
  func.func @transform_1(%arg0: i32) -> (i32, i32) {
    %c0_i32 = arith.constant 0 : i32
    %c0_i32_0 = arith.constant 0 : i32
    return %arg0, %c0_i32 : i32, i32
  }
  func.func @transform_2(%arg0: i32) -> (i32, i32) {
    %c0_i32 = arith.constant 0 : i32
    %c0_i32_0 = arith.constant 0 : i32
    %c0_i32_1 = arith.constant 0 : i32
    return %c0_i32, %c0_i32_0 : i32, i32
  }
  func.func @transform_3(%arg0: i32) -> (i32, i32) {
    %c0_i32 = arith.constant 0 : i32
    %c0_i32_0 = arith.constant 0 : i32
    %c0_i32_1 = arith.constant 0 : i32
    return %c0_i32, %c0_i32_0 : i32, i32
  }
  func.func @transform_4(%arg0: i32) -> (i32, i32) {
    %c0_i32 = arith.constant 0 : i32
    %c0_i32_0 = arith.constant 0 : i32
    %c0_i32_1 = arith.constant 0 : i32
    return %c0_i32, %c0_i32_0 : i32, i32
  }
  func.func @transform_5(%arg0: i32) -> (i32, i32) {
    %c0_i32 = arith.constant 0 : i32
    %c0_i32_0 = arith.constant 0 : i32
    return %arg0, %c0_i32 : i32, i32
  }
}

module attributes {stable_mosaic.version = 11 : i64} {
  func.func @_fused_linear_kernel(%arg0: i32, %arg1: memref<32x256xbf16, #tpu.memory_space<vmem>>, %arg2: memref<256x128xbf16, #tpu.memory_space<vmem>>, %arg3: memref<1x128xf32, #tpu.memory_space<vmem>>, %arg4: memref<32x128xbf16, #tpu.memory_space<vmem>>) attributes {dimension_semantics = [#tpu.dimension_semantics<parallel>], iteration_bounds = array<i64: 1>, scalar_prefetch = 0 : i64, scratch_operands = 0 : i64, tpu.core_type = #tpu.core_type<tc>, window_params = [{transform_indices = @transform_0, window_bounds = array<i64: 32, 256>}, {pipeline_mode = #tpu.pipeline_mode<synchronous>, transform_indices = @transform_1, window_bounds = array<i64: 256, 128>}, {pipeline_mode = #tpu.pipeline_mode<synchronous>, transform_indices = @transform_2, window_bounds = array<i64: 1, 128>}, {transform_indices = @transform_3, window_bounds = array<i64: 32, 128>}]} {
    %c0 = arith.constant 0 : index
    %c0_0 = arith.constant 0 : index
    %0 = vector.load %arg1[%c0, %c0_0] : memref<32x256xbf16, #tpu.memory_space<vmem>>, vector<32x256xbf16>
    %c0_1 = arith.constant 0 : index
    %c0_2 = arith.constant 0 : index
    %1 = vector.load %arg2[%c0_1, %c0_2] : memref<256x128xbf16, #tpu.memory_space<vmem>>, vector<256x128xbf16>
    %cst = arith.constant dense<0.000000e+00> : vector<32x128xf32>
    %2 = tpu.matmul %0, %1, %cst {dimension_numbers = #tpu.dot_dimension_numbers<[1], [0], [0], [1], [0, 0, 1, 1], [], []>} : vector<32x256xbf16>, vector<256x128xbf16>, vector<32x128xf32> -> vector<32x128xf32>
    %c0_3 = arith.constant 0 : index
    %c0_4 = arith.constant 0 : index
    %3 = vector.load %arg3[%c0_3, %c0_4] : memref<1x128xf32, #tpu.memory_space<vmem>>, vector<1x128xf32>
    %4 = vector.broadcast %3 : vector<1x128xf32> to vector<32x128xf32>
    %5 = arith.addf %2, %4 : vector<32x128xf32>
    %cst_5 = arith.constant 0.000000e+00 : f32
    %6 = vector.broadcast %cst_5 : f32 to vector<32x128xf32>
    %7 = arith.cmpf ogt, %5, %6 : vector<32x128xf32>
    %cst_6 = arith.constant 1.000000e-01 : f32
    %8 = vector.broadcast %cst_6 : f32 to vector<32x128xf32>
    %9 = arith.mulf %8, %5 : vector<32x128xf32>
    %10 = arith.select %7, %5, %9 : vector<32x128xi1>, vector<32x128xf32>
    %11 = arith.truncf %10 : vector<32x128xf32> to vector<32x128xbf16>
    %c0_7 = arith.constant 0 : index
    %c0_8 = arith.constant 0 : index
    %12 = vector.load %arg4[%c0_7, %c0_8] : memref<32x128xbf16, #tpu.memory_space<vmem>>, vector<32x128xbf16>
    tpu.vector_store %arg4[%c0_7, %c0_8], %11 {strides = array<i32>} : memref<32x128xbf16, #tpu.memory_space<vmem>>, vector<32x128xbf16>,
    return
  }
  func.func @transform_0(%arg0: i32) -> (i32, i32) {
    %c0_i32 = arith.constant 0 : i32
    %c0_i32_0 = arith.constant 0 : i32
    return %arg0, %c0_i32 : i32, i32
  }
  func.func @transform_1(%arg0: i32) -> (i32, i32) {
    %c0_i32 = arith.constant 0 : i32
    %c0_i32_0 = arith.constant 0 : i32
    %c0_i32_1 = arith.constant 0 : i32
    return %c0_i32, %c0_i32_0 : i32, i32
  }
  func.func @transform_2(%arg0: i32) -> (i32, i32) {
    %c0_i32 = arith.constant 0 : i32
    %c0_i32_0 = arith.constant 0 : i32
    %c0_i32_1 = arith.constant 0 : i32
    return %c0_i32, %c0_i32_0 : i32, i32
  }
  func.func @transform_3(%arg0: i32) -> (i32, i32) {
    %c0_i32 = arith.constant 0 : i32
    %c0_i32_0 = arith.constant 0 : i32
    return %arg0, %c0_i32 : i32, i32
  }
}

module attributes {stable_mosaic.version = 11 : i64} {
  func.func @_head_kernel(%arg0: i32, %arg1: memref<8x256xbf16, #tpu.memory_space<vmem>>, %arg2: memref<256x512xbf16, #tpu.memory_space<vmem>>, %arg3: memref<1x512xf32, #tpu.memory_space<vmem>>, %arg4: memref<512x24xbf16, #tpu.memory_space<vmem>>, %arg5: memref<1x24xf32, #tpu.memory_space<vmem>>, %arg6: memref<8x24xf32, #tpu.memory_space<vmem>>, %arg7: memref<1x24xf32, #tpu.memory_space<vmem>>, %arg8: memref<1x24xf32, #tpu.memory_space<vmem>>, %arg9: memref<1x24xf32, #tpu.memory_space<vmem>>, %arg10: memref<8x24xf32, #tpu.memory_space<vmem>>, %arg11: memref<8x24xf32, #tpu.memory_space<vmem>>) attributes {dimension_semantics = [#tpu.dimension_semantics<parallel>], iteration_bounds = array<i64: 1>, scalar_prefetch = 0 : i64, scratch_operands = 0 : i64, tpu.core_type = #tpu.core_type<tc>, window_params = [{transform_indices = @transform_0, window_bounds = array<i64: 8, 256>}, {pipeline_mode = #tpu.pipeline_mode<synchronous>, transform_indices = @transform_1, window_bounds = array<i64: 256, 512>}, {pipeline_mode = #tpu.pipeline_mode<synchronous>, transform_indices = @transform_2, window_bounds = array<i64: 1, 512>}, {pipeline_mode = #tpu.pipeline_mode<synchronous>, transform_indices = @transform_3, window_bounds = array<i64: 512, 24>}, {pipeline_mode = #tpu.pipeline_mode<synchronous>, transform_indices = @transform_4, window_bounds = array<i64: 1, 24>}, {transform_indices = @transform_5, window_bounds = array<i64: 8, 24>}, {pipeline_mode = #tpu.pipeline_mode<synchronous>, transform_indices = @transform_6, window_bounds = array<i64: 1, 24>}, {pipeline_mode = #tpu.pipeline_mode<synchronous>, transform_indices = @transform_7, window_bounds = array<i64: 1, 24>}, {pipeline_mode = #tpu.pipeline_mode<synchronous>, transform_indices = @transform_8, window_bounds = array<i64: 1, 24>}, {transform_indices = @transform_9, window_bounds = array<i64: 8, 24>}, {transform_indices = @transform_10, window_bounds = array<i64: 8, 24>}]} {
    %c0 = arith.constant 0 : index
    %c0_0 = arith.constant 0 : index
    %0 = vector.load %arg1[%c0, %c0_0] : memref<8x256xbf16, #tpu.memory_space<vmem>>, vector<8x256xbf16>
    %c0_1 = arith.constant 0 : index
    %c0_2 = arith.constant 0 : index
    %1 = vector.load %arg2[%c0_1, %c0_2] : memref<256x512xbf16, #tpu.memory_space<vmem>>, vector<256x512xbf16>
    %cst = arith.constant dense<0.000000e+00> : vector<8x512xf32>
    %2 = tpu.matmul %0, %1, %cst {dimension_numbers = #tpu.dot_dimension_numbers<[1], [0], [0], [1], [0, 0, 1, 1], [], []>} : vector<8x256xbf16>, vector<256x512xbf16>, vector<8x512xf32> -> vector<8x512xf32>
    %c0_3 = arith.constant 0 : index
    %c0_4 = arith.constant 0 : index
    %3 = vector.load %arg3[%c0_3, %c0_4] : memref<1x512xf32, #tpu.memory_space<vmem>>, vector<1x512xf32>
    %4 = vector.broadcast %3 : vector<1x512xf32> to vector<8x512xf32>
    %5 = arith.addf %2, %4 : vector<8x512xf32>
    %cst_5 = arith.constant 0.000000e+00 : f32
    %6 = vector.broadcast %cst_5 : f32 to vector<8x512xf32>
    %7 = arith.cmpf ogt, %5, %6 : vector<8x512xf32>
    %cst_6 = arith.constant 1.000000e-01 : f32
    %8 = vector.broadcast %cst_6 : f32 to vector<8x512xf32>
    %9 = arith.mulf %8, %5 : vector<8x512xf32>
    %10 = arith.select %7, %5, %9 : vector<8x512xi1>, vector<8x512xf32>
    %11 = arith.truncf %10 : vector<8x512xf32> to vector<8x512xbf16>
    %c0_7 = arith.constant 0 : index
    %c0_8 = arith.constant 0 : index
    %12 = vector.load %arg4[%c0_7, %c0_8] : memref<512x24xbf16, #tpu.memory_space<vmem>>, vector<512x24xbf16>
    %cst_9 = arith.constant dense<0.000000e+00> : vector<8x24xf32>
    %13 = tpu.matmul %11, %12, %cst_9 {dimension_numbers = #tpu.dot_dimension_numbers<[1], [0], [0], [1], [0, 0, 1, 1], [], []>} : vector<8x512xbf16>, vector<512x24xbf16>, vector<8x24xf32> -> vector<8x24xf32>
    %c0_10 = arith.constant 0 : index
    %c0_11 = arith.constant 0 : index
    %14 = vector.load %arg5[%c0_10, %c0_11] : memref<1x24xf32, #tpu.memory_space<vmem>>, vector<1x24xf32>
    %15 = vector.broadcast %14 : vector<1x24xf32> to vector<8x24xf32>
    %16 = arith.addf %13, %15 : vector<8x24xf32>
    %c0_12 = arith.constant 0 : index
    %c0_13 = arith.constant 0 : index
    %17 = vector.load %arg10[%c0_12, %c0_13] : memref<8x24xf32, #tpu.memory_space<vmem>>, vector<8x24xf32>
    tpu.vector_store %arg10[%c0_12, %c0_13], %16 {strides = array<i32>} : memref<8x24xf32, #tpu.memory_space<vmem>>, vector<8x24xf32>,
    %18 = arith.negf %16 : vector<8x24xf32>
    %19 = math.exp %18 : vector<8x24xf32>
    %cst_14 = arith.constant 1.000000e+00 : f32
    %20 = vector.broadcast %cst_14 : f32 to vector<8x24xf32>
    %21 = arith.addf %20, %19 : vector<8x24xf32>
    %22 = arith.divf %20, %21 : vector<8x24xf32>
    %c0_15 = arith.constant 0 : index
    %c0_16 = arith.constant 0 : index
    %23 = vector.load %arg6[%c0_15, %c0_16] : memref<8x24xf32, #tpu.memory_space<vmem>>, vector<8x24xf32>
    %24 = arith.addf %22, %23 : vector<8x24xf32>
    %c0_17 = arith.constant 0 : index
    %c0_18 = arith.constant 0 : index
    %25 = vector.load %arg7[%c0_17, %c0_18] : memref<1x24xf32, #tpu.memory_space<vmem>>, vector<1x24xf32>
    %26 = vector.broadcast %25 : vector<1x24xf32> to vector<8x24xf32>
    %27 = arith.mulf %24, %26 : vector<8x24xf32>
    %c0_19 = arith.constant 0 : index
    %c0_20 = arith.constant 0 : index
    %28 = vector.load %arg9[%c0_19, %c0_20] : memref<1x24xf32, #tpu.memory_space<vmem>>, vector<1x24xf32>
    %29 = vector.broadcast %28 : vector<1x24xf32> to vector<8x24xf32>
    %30 = arith.mulf %16, %29 : vector<8x24xf32>
    %31 = math.exp %30 : vector<8x24xf32>
    %c0_21 = arith.constant 0 : index
    %c0_22 = arith.constant 0 : index
    %32 = vector.load %arg8[%c0_21, %c0_22] : memref<1x24xf32, #tpu.memory_space<vmem>>, vector<1x24xf32>
    %33 = vector.broadcast %32 : vector<1x24xf32> to vector<8x24xf32>
    %34 = arith.mulf %31, %33 : vector<8x24xf32>
    %35 = arith.addf %27, %34 : vector<8x24xf32>
    %c0_23 = arith.constant 0 : index
    %c0_24 = arith.constant 0 : index
    %36 = vector.load %arg11[%c0_23, %c0_24] : memref<8x24xf32, #tpu.memory_space<vmem>>, vector<8x24xf32>
    tpu.vector_store %arg11[%c0_23, %c0_24], %35 {strides = array<i32>} : memref<8x24xf32, #tpu.memory_space<vmem>>, vector<8x24xf32>,
    return
  }
  func.func @transform_0(%arg0: i32) -> (i32, i32) {
    %c0_i32 = arith.constant 0 : i32
    %c0_i32_0 = arith.constant 0 : i32
    return %arg0, %c0_i32 : i32, i32
  }
  func.func @transform_1(%arg0: i32) -> (i32, i32) {
    %c0_i32 = arith.constant 0 : i32
    %c0_i32_0 = arith.constant 0 : i32
    %c0_i32_1 = arith.constant 0 : i32
    return %c0_i32, %c0_i32_0 : i32, i32
  }
  func.func @transform_2(%arg0: i32) -> (i32, i32) {
    %c0_i32 = arith.constant 0 : i32
    %c0_i32_0 = arith.constant 0 : i32
    %c0_i32_1 = arith.constant 0 : i32
    return %c0_i32, %c0_i32_0 : i32, i32
  }
  func.func @transform_3(%arg0: i32) -> (i32, i32) {
    %c0_i32 = arith.constant 0 : i32
    %c0_i32_0 = arith.constant 0 : i32
    %c0_i32_1 = arith.constant 0 : i32
    return %c0_i32, %c0_i32_0 : i32, i32
  }
  func.func @transform_4(%arg0: i32) -> (i32, i32) {
    %c0_i32 = arith.constant 0 : i32
    %c0_i32_0 = arith.constant 0 : i32
    %c0_i32_1 = arith.constant 0 : i32
    return %c0_i32, %c0_i32_0 : i32, i32
  }
  func.func @transform_5(%arg0: i32) -> (i32, i32) {
    %c0_i32 = arith.constant 0 : i32
    %c0_i32_0 = arith.constant 0 : i32
    return %arg0, %c0_i32 : i32, i32
  }
  func.func @transform_6(%arg0: i32) -> (i32, i32) {
    %c0_i32 = arith.constant 0 : i32
    %c0_i32_0 = arith.constant 0 : i32
    %c0_i32_1 = arith.constant 0 : i32
    return %c0_i32, %c0_i32_0 : i32, i32
  }
  func.func @transform_7(%arg0: i32) -> (i32, i32) {
    %c0_i32 = arith.constant 0 : i32
    %c0_i32_0 = arith.constant 0 : i32
    %c0_i32_1 = arith.constant 0 : i32
    return %c0_i32, %c0_i32_0 : i32, i32
  }
  func.func @transform_8(%arg0: i32) -> (i32, i32) {
    %c0_i32 = arith.constant 0 : i32
    %c0_i32_0 = arith.constant 0 : i32
    %c0_i32_1 = arith.constant 0 : i32
    return %c0_i32, %c0_i32_0 : i32, i32
  }
  func.func @transform_9(%arg0: i32) -> (i32, i32) {
    %c0_i32 = arith.constant 0 : i32
    %c0_i32_0 = arith.constant 0 : i32
    return %arg0, %c0_i32 : i32, i32
  }
  func.func @transform_10(%arg0: i32) -> (i32, i32) {
    %c0_i32 = arith.constant 0 : i32
    %c0_i32_0 = arith.constant 0 : i32
    return %arg0, %c0_i32 : i32, i32
  }
}

module attributes {stable_mosaic.version = 11 : i64} {
  func.func @_head_kernel(%arg0: i32, %arg1: memref<32x128xbf16, #tpu.memory_space<vmem>>, %arg2: memref<128x256xbf16, #tpu.memory_space<vmem>>, %arg3: memref<1x256xf32, #tpu.memory_space<vmem>>, %arg4: memref<256x24xbf16, #tpu.memory_space<vmem>>, %arg5: memref<1x24xf32, #tpu.memory_space<vmem>>, %arg6: memref<32x24xf32, #tpu.memory_space<vmem>>, %arg7: memref<1x24xf32, #tpu.memory_space<vmem>>, %arg8: memref<1x24xf32, #tpu.memory_space<vmem>>, %arg9: memref<1x24xf32, #tpu.memory_space<vmem>>, %arg10: memref<32x24xf32, #tpu.memory_space<vmem>>, %arg11: memref<32x24xf32, #tpu.memory_space<vmem>>) attributes {dimension_semantics = [#tpu.dimension_semantics<parallel>], iteration_bounds = array<i64: 1>, scalar_prefetch = 0 : i64, scratch_operands = 0 : i64, tpu.core_type = #tpu.core_type<tc>, window_params = [{transform_indices = @transform_0, window_bounds = array<i64: 32, 128>}, {pipeline_mode = #tpu.pipeline_mode<synchronous>, transform_indices = @transform_1, window_bounds = array<i64: 128, 256>}, {pipeline_mode = #tpu.pipeline_mode<synchronous>, transform_indices = @transform_2, window_bounds = array<i64: 1, 256>}, {pipeline_mode = #tpu.pipeline_mode<synchronous>, transform_indices = @transform_3, window_bounds = array<i64: 256, 24>}, {pipeline_mode = #tpu.pipeline_mode<synchronous>, transform_indices = @transform_4, window_bounds = array<i64: 1, 24>}, {transform_indices = @transform_5, window_bounds = array<i64: 32, 24>}, {pipeline_mode = #tpu.pipeline_mode<synchronous>, transform_indices = @transform_6, window_bounds = array<i64: 1, 24>}, {pipeline_mode = #tpu.pipeline_mode<synchronous>, transform_indices = @transform_7, window_bounds = array<i64: 1, 24>}, {pipeline_mode = #tpu.pipeline_mode<synchronous>, transform_indices = @transform_8, window_bounds = array<i64: 1, 24>}, {transform_indices = @transform_9, window_bounds = array<i64: 32, 24>}, {transform_indices = @transform_10, window_bounds = array<i64: 32, 24>}]} {
    %c0 = arith.constant 0 : index
    %c0_0 = arith.constant 0 : index
    %0 = vector.load %arg1[%c0, %c0_0] : memref<32x128xbf16, #tpu.memory_space<vmem>>, vector<32x128xbf16>
    %c0_1 = arith.constant 0 : index
    %c0_2 = arith.constant 0 : index
    %1 = vector.load %arg2[%c0_1, %c0_2] : memref<128x256xbf16, #tpu.memory_space<vmem>>, vector<128x256xbf16>
    %cst = arith.constant dense<0.000000e+00> : vector<32x256xf32>
    %2 = tpu.matmul %0, %1, %cst {dimension_numbers = #tpu.dot_dimension_numbers<[1], [0], [0], [1], [0, 0, 1, 1], [], []>} : vector<32x128xbf16>, vector<128x256xbf16>, vector<32x256xf32> -> vector<32x256xf32>
    %c0_3 = arith.constant 0 : index
    %c0_4 = arith.constant 0 : index
    %3 = vector.load %arg3[%c0_3, %c0_4] : memref<1x256xf32, #tpu.memory_space<vmem>>, vector<1x256xf32>
    %4 = vector.broadcast %3 : vector<1x256xf32> to vector<32x256xf32>
    %5 = arith.addf %2, %4 : vector<32x256xf32>
    %cst_5 = arith.constant 0.000000e+00 : f32
    %6 = vector.broadcast %cst_5 : f32 to vector<32x256xf32>
    %7 = arith.cmpf ogt, %5, %6 : vector<32x256xf32>
    %cst_6 = arith.constant 1.000000e-01 : f32
    %8 = vector.broadcast %cst_6 : f32 to vector<32x256xf32>
    %9 = arith.mulf %8, %5 : vector<32x256xf32>
    %10 = arith.select %7, %5, %9 : vector<32x256xi1>, vector<32x256xf32>
    %11 = arith.truncf %10 : vector<32x256xf32> to vector<32x256xbf16>
    %c0_7 = arith.constant 0 : index
    %c0_8 = arith.constant 0 : index
    %12 = vector.load %arg4[%c0_7, %c0_8] : memref<256x24xbf16, #tpu.memory_space<vmem>>, vector<256x24xbf16>
    %cst_9 = arith.constant dense<0.000000e+00> : vector<32x24xf32>
    %13 = tpu.matmul %11, %12, %cst_9 {dimension_numbers = #tpu.dot_dimension_numbers<[1], [0], [0], [1], [0, 0, 1, 1], [], []>} : vector<32x256xbf16>, vector<256x24xbf16>, vector<32x24xf32> -> vector<32x24xf32>
    %c0_10 = arith.constant 0 : index
    %c0_11 = arith.constant 0 : index
    %14 = vector.load %arg5[%c0_10, %c0_11] : memref<1x24xf32, #tpu.memory_space<vmem>>, vector<1x24xf32>
    %15 = vector.broadcast %14 : vector<1x24xf32> to vector<32x24xf32>
    %16 = arith.addf %13, %15 : vector<32x24xf32>
    %c0_12 = arith.constant 0 : index
    %c0_13 = arith.constant 0 : index
    %17 = vector.load %arg10[%c0_12, %c0_13] : memref<32x24xf32, #tpu.memory_space<vmem>>, vector<32x24xf32>
    tpu.vector_store %arg10[%c0_12, %c0_13], %16 {strides = array<i32>} : memref<32x24xf32, #tpu.memory_space<vmem>>, vector<32x24xf32>,
    %18 = arith.negf %16 : vector<32x24xf32>
    %19 = math.exp %18 : vector<32x24xf32>
    %cst_14 = arith.constant 1.000000e+00 : f32
    %20 = vector.broadcast %cst_14 : f32 to vector<32x24xf32>
    %21 = arith.addf %20, %19 : vector<32x24xf32>
    %22 = arith.divf %20, %21 : vector<32x24xf32>
    %c0_15 = arith.constant 0 : index
    %c0_16 = arith.constant 0 : index
    %23 = vector.load %arg6[%c0_15, %c0_16] : memref<32x24xf32, #tpu.memory_space<vmem>>, vector<32x24xf32>
    %24 = arith.addf %22, %23 : vector<32x24xf32>
    %c0_17 = arith.constant 0 : index
    %c0_18 = arith.constant 0 : index
    %25 = vector.load %arg7[%c0_17, %c0_18] : memref<1x24xf32, #tpu.memory_space<vmem>>, vector<1x24xf32>
    %26 = vector.broadcast %25 : vector<1x24xf32> to vector<32x24xf32>
    %27 = arith.mulf %24, %26 : vector<32x24xf32>
    %c0_19 = arith.constant 0 : index
    %c0_20 = arith.constant 0 : index
    %28 = vector.load %arg9[%c0_19, %c0_20] : memref<1x24xf32, #tpu.memory_space<vmem>>, vector<1x24xf32>
    %29 = vector.broadcast %28 : vector<1x24xf32> to vector<32x24xf32>
    %30 = arith.mulf %16, %29 : vector<32x24xf32>
    %31 = math.exp %30 : vector<32x24xf32>
    %c0_21 = arith.constant 0 : index
    %c0_22 = arith.constant 0 : index
    %32 = vector.load %arg8[%c0_21, %c0_22] : memref<1x24xf32, #tpu.memory_space<vmem>>, vector<1x24xf32>
    %33 = vector.broadcast %32 : vector<1x24xf32> to vector<32x24xf32>
    %34 = arith.mulf %31, %33 : vector<32x24xf32>
    %35 = arith.addf %27, %34 : vector<32x24xf32>
    %c0_23 = arith.constant 0 : index
    %c0_24 = arith.constant 0 : index
    %36 = vector.load %arg11[%c0_23, %c0_24] : memref<32x24xf32, #tpu.memory_space<vmem>>, vector<32x24xf32>
    tpu.vector_store %arg11[%c0_23, %c0_24], %35 {strides = array<i32>} : memref<32x24xf32, #tpu.memory_space<vmem>>, vector<32x24xf32>,
    return
  }
  func.func @transform_0(%arg0: i32) -> (i32, i32) {
    %c0_i32 = arith.constant 0 : i32
    %c0_i32_0 = arith.constant 0 : i32
    return %arg0, %c0_i32 : i32, i32
  }
  func.func @transform_1(%arg0: i32) -> (i32, i32) {
    %c0_i32 = arith.constant 0 : i32
    %c0_i32_0 = arith.constant 0 : i32
    %c0_i32_1 = arith.constant 0 : i32
    return %c0_i32, %c0_i32_0 : i32, i32
  }
  func.func @transform_2(%arg0: i32) -> (i32, i32) {
    %c0_i32 = arith.constant 0 : i32
    %c0_i32_0 = arith.constant 0 : i32
    %c0_i32_1 = arith.constant 0 : i32
    return %c0_i32, %c0_i32_0 : i32, i32
  }
  func.func @transform_3(%arg0: i32) -> (i32, i32) {
    %c0_i32 = arith.constant 0 : i32
    %c0_i32_0 = arith.constant 0 : i32
    %c0_i32_1 = arith.constant 0 : i32
    return %c0_i32, %c0_i32_0 : i32, i32
  }
  func.func @transform_4(%arg0: i32) -> (i32, i32) {
    %c0_i32 = arith.constant 0 : i32
    %c0_i32_0 = arith.constant 0 : i32
    %c0_i32_1 = arith.constant 0 : i32
    return %c0_i32, %c0_i32_0 : i32, i32
  }
  func.func @transform_5(%arg0: i32) -> (i32, i32) {
    %c0_i32 = arith.constant 0 : i32
    %c0_i32_0 = arith.constant 0 : i32
    return %arg0, %c0_i32 : i32, i32
  }
  func.func @transform_6(%arg0: i32) -> (i32, i32) {
    %c0_i32 = arith.constant 0 : i32
    %c0_i32_0 = arith.constant 0 : i32
    %c0_i32_1 = arith.constant 0 : i32
    return %c0_i32, %c0_i32_0 : i32, i32
  }
  func.func @transform_7(%arg0: i32) -> (i32, i32) {
    %c0_i32 = arith.constant 0 : i32
    %c0_i32_0 = arith.constant 0 : i32
    %c0_i32_1 = arith.constant 0 : i32
    return %c0_i32, %c0_i32_0 : i32, i32
  }
  func.func @transform_8(%arg0: i32) -> (i32, i32) {
    %c0_i32 = arith.constant 0 : i32
    %c0_i32_0 = arith.constant 0 : i32
    %c0_i32_1 = arith.constant 0 : i32
    return %c0_i32, %c0_i32_0 : i32, i32
  }
  func.func @transform_9(%arg0: i32) -> (i32, i32) {
    %c0_i32 = arith.constant 0 : i32
    %c0_i32_0 = arith.constant 0 : i32
    return %arg0, %c0_i32 : i32, i32
  }
  func.func @transform_10(%arg0: i32) -> (i32, i32) {
    %c0_i32 = arith.constant 0 : i32
    %c0_i32_0 = arith.constant 0 : i32
    return %arg0, %c0_i32 : i32, i32
  }
}

module attributes {stable_mosaic.version = 11 : i64} {
  func.func @_head_kernel(%arg0: i32, %arg1: memref<128x64xbf16, #tpu.memory_space<vmem>>, %arg2: memref<64x128xbf16, #tpu.memory_space<vmem>>, %arg3: memref<1x128xf32, #tpu.memory_space<vmem>>, %arg4: memref<128x24xbf16, #tpu.memory_space<vmem>>, %arg5: memref<1x24xf32, #tpu.memory_space<vmem>>, %arg6: memref<128x24xf32, #tpu.memory_space<vmem>>, %arg7: memref<1x24xf32, #tpu.memory_space<vmem>>, %arg8: memref<1x24xf32, #tpu.memory_space<vmem>>, %arg9: memref<1x24xf32, #tpu.memory_space<vmem>>, %arg10: memref<128x24xf32, #tpu.memory_space<vmem>>, %arg11: memref<128x24xf32, #tpu.memory_space<vmem>>) attributes {dimension_semantics = [#tpu.dimension_semantics<parallel>], iteration_bounds = array<i64: 1>, scalar_prefetch = 0 : i64, scratch_operands = 0 : i64, tpu.core_type = #tpu.core_type<tc>, window_params = [{transform_indices = @transform_0, window_bounds = array<i64: 128, 64>}, {pipeline_mode = #tpu.pipeline_mode<synchronous>, transform_indices = @transform_1, window_bounds = array<i64: 64, 128>}, {pipeline_mode = #tpu.pipeline_mode<synchronous>, transform_indices = @transform_2, window_bounds = array<i64: 1, 128>}, {pipeline_mode = #tpu.pipeline_mode<synchronous>, transform_indices = @transform_3, window_bounds = array<i64: 128, 24>}, {pipeline_mode = #tpu.pipeline_mode<synchronous>, transform_indices = @transform_4, window_bounds = array<i64: 1, 24>}, {transform_indices = @transform_5, window_bounds = array<i64: 128, 24>}, {pipeline_mode = #tpu.pipeline_mode<synchronous>, transform_indices = @transform_6, window_bounds = array<i64: 1, 24>}, {pipeline_mode = #tpu.pipeline_mode<synchronous>, transform_indices = @transform_7, window_bounds = array<i64: 1, 24>}, {pipeline_mode = #tpu.pipeline_mode<synchronous>, transform_indices = @transform_8, window_bounds = array<i64: 1, 24>}, {transform_indices = @transform_9, window_bounds = array<i64: 128, 24>}, {transform_indices = @transform_10, window_bounds = array<i64: 128, 24>}]} {
    %c0 = arith.constant 0 : index
    %c0_0 = arith.constant 0 : index
    %0 = vector.load %arg1[%c0, %c0_0] : memref<128x64xbf16, #tpu.memory_space<vmem>>, vector<128x64xbf16>
    %c0_1 = arith.constant 0 : index
    %c0_2 = arith.constant 0 : index
    %1 = vector.load %arg2[%c0_1, %c0_2] : memref<64x128xbf16, #tpu.memory_space<vmem>>, vector<64x128xbf16>
    %cst = arith.constant dense<0.000000e+00> : vector<128x128xf32>
    %2 = tpu.matmul %0, %1, %cst {dimension_numbers = #tpu.dot_dimension_numbers<[1], [0], [0], [1], [0, 0, 1, 1], [], []>} : vector<128x64xbf16>, vector<64x128xbf16>, vector<128x128xf32> -> vector<128x128xf32>
    %c0_3 = arith.constant 0 : index
    %c0_4 = arith.constant 0 : index
    %3 = vector.load %arg3[%c0_3, %c0_4] : memref<1x128xf32, #tpu.memory_space<vmem>>, vector<1x128xf32>
    %4 = vector.broadcast %3 : vector<1x128xf32> to vector<128x128xf32>
    %5 = arith.addf %2, %4 : vector<128x128xf32>
    %cst_5 = arith.constant 0.000000e+00 : f32
    %6 = vector.broadcast %cst_5 : f32 to vector<128x128xf32>
    %7 = arith.cmpf ogt, %5, %6 : vector<128x128xf32>
    %cst_6 = arith.constant 1.000000e-01 : f32
    %8 = vector.broadcast %cst_6 : f32 to vector<128x128xf32>
    %9 = arith.mulf %8, %5 : vector<128x128xf32>
    %10 = arith.select %7, %5, %9 : vector<128x128xi1>, vector<128x128xf32>
    %11 = arith.truncf %10 : vector<128x128xf32> to vector<128x128xbf16>
    %c0_7 = arith.constant 0 : index
    %c0_8 = arith.constant 0 : index
    %12 = vector.load %arg4[%c0_7, %c0_8] : memref<128x24xbf16, #tpu.memory_space<vmem>>, vector<128x24xbf16>
    %cst_9 = arith.constant dense<0.000000e+00> : vector<128x24xf32>
    %13 = tpu.matmul %11, %12, %cst_9 {dimension_numbers = #tpu.dot_dimension_numbers<[1], [0], [0], [1], [0, 0, 1, 1], [], []>} : vector<128x128xbf16>, vector<128x24xbf16>, vector<128x24xf32> -> vector<128x24xf32>
    %c0_10 = arith.constant 0 : index
    %c0_11 = arith.constant 0 : index
    %14 = vector.load %arg5[%c0_10, %c0_11] : memref<1x24xf32, #tpu.memory_space<vmem>>, vector<1x24xf32>
    %15 = vector.broadcast %14 : vector<1x24xf32> to vector<128x24xf32>
    %16 = arith.addf %13, %15 : vector<128x24xf32>
    %c0_12 = arith.constant 0 : index
    %c0_13 = arith.constant 0 : index
    %17 = vector.load %arg10[%c0_12, %c0_13] : memref<128x24xf32, #tpu.memory_space<vmem>>, vector<128x24xf32>
    tpu.vector_store %arg10[%c0_12, %c0_13], %16 {strides = array<i32>} : memref<128x24xf32, #tpu.memory_space<vmem>>, vector<128x24xf32>,
    %18 = arith.negf %16 : vector<128x24xf32>
    %19 = math.exp %18 : vector<128x24xf32>
    %cst_14 = arith.constant 1.000000e+00 : f32
    %20 = vector.broadcast %cst_14 : f32 to vector<128x24xf32>
    %21 = arith.addf %20, %19 : vector<128x24xf32>
    %22 = arith.divf %20, %21 : vector<128x24xf32>
    %c0_15 = arith.constant 0 : index
    %c0_16 = arith.constant 0 : index
    %23 = vector.load %arg6[%c0_15, %c0_16] : memref<128x24xf32, #tpu.memory_space<vmem>>, vector<128x24xf32>
    %24 = arith.addf %22, %23 : vector<128x24xf32>
    %c0_17 = arith.constant 0 : index
    %c0_18 = arith.constant 0 : index
    %25 = vector.load %arg7[%c0_17, %c0_18] : memref<1x24xf32, #tpu.memory_space<vmem>>, vector<1x24xf32>
    %26 = vector.broadcast %25 : vector<1x24xf32> to vector<128x24xf32>
    %27 = arith.mulf %24, %26 : vector<128x24xf32>
    %c0_19 = arith.constant 0 : index
    %c0_20 = arith.constant 0 : index
    %28 = vector.load %arg9[%c0_19, %c0_20] : memref<1x24xf32, #tpu.memory_space<vmem>>, vector<1x24xf32>
    %29 = vector.broadcast %28 : vector<1x24xf32> to vector<128x24xf32>
    %30 = arith.mulf %16, %29 : vector<128x24xf32>
    %31 = math.exp %30 : vector<128x24xf32>
    %c0_21 = arith.constant 0 : index
    %c0_22 = arith.constant 0 : index
    %32 = vector.load %arg8[%c0_21, %c0_22] : memref<1x24xf32, #tpu.memory_space<vmem>>, vector<1x24xf32>
    %33 = vector.broadcast %32 : vector<1x24xf32> to vector<128x24xf32>
    %34 = arith.mulf %31, %33 : vector<128x24xf32>
    %35 = arith.addf %27, %34 : vector<128x24xf32>
    %c0_23 = arith.constant 0 : index
    %c0_24 = arith.constant 0 : index
    %36 = vector.load %arg11[%c0_23, %c0_24] : memref<128x24xf32, #tpu.memory_space<vmem>>, vector<128x24xf32>
    tpu.vector_store %arg11[%c0_23, %c0_24], %35 {strides = array<i32>} : memref<128x24xf32, #tpu.memory_space<vmem>>, vector<128x24xf32>,
    return
  }
  func.func @transform_0(%arg0: i32) -> (i32, i32) {
    %c0_i32 = arith.constant 0 : i32
    %c0_i32_0 = arith.constant 0 : i32
    return %arg0, %c0_i32 : i32, i32
  }
  func.func @transform_1(%arg0: i32) -> (i32, i32) {
    %c0_i32 = arith.constant 0 : i32
    %c0_i32_0 = arith.constant 0 : i32
    %c0_i32_1 = arith.constant 0 : i32
    return %c0_i32, %c0_i32_0 : i32, i32
  }
  func.func @transform_2(%arg0: i32) -> (i32, i32) {
    %c0_i32 = arith.constant 0 : i32
    %c0_i32_0 = arith.constant 0 : i32
    %c0_i32_1 = arith.constant 0 : i32
    return %c0_i32, %c0_i32_0 : i32, i32
  }
  func.func @transform_3(%arg0: i32) -> (i32, i32) {
    %c0_i32 = arith.constant 0 : i32
    %c0_i32_0 = arith.constant 0 : i32
    %c0_i32_1 = arith.constant 0 : i32
    return %c0_i32, %c0_i32_0 : i32, i32
  }
  func.func @transform_4(%arg0: i32) -> (i32, i32) {
    %c0_i32 = arith.constant 0 : i32
    %c0_i32_0 = arith.constant 0 : i32
    %c0_i32_1 = arith.constant 0 : i32
    return %c0_i32, %c0_i32_0 : i32, i32
  }
  func.func @transform_5(%arg0: i32) -> (i32, i32) {
    %c0_i32 = arith.constant 0 : i32
    %c0_i32_0 = arith.constant 0 : i32
    return %arg0, %c0_i32 : i32, i32
  }
  func.func @transform_6(%arg0: i32) -> (i32, i32) {
    %c0_i32 = arith.constant 0 : i32
    %c0_i32_0 = arith.constant 0 : i32
    %c0_i32_1 = arith.constant 0 : i32
    return %c0_i32, %c0_i32_0 : i32, i32
  }
  func.func @transform_7(%arg0: i32) -> (i32, i32) {
    %c0_i32 = arith.constant 0 : i32
    %c0_i32_0 = arith.constant 0 : i32
    %c0_i32_1 = arith.constant 0 : i32
    return %c0_i32, %c0_i32_0 : i32, i32
  }
  func.func @transform_8(%arg0: i32) -> (i32, i32) {
    %c0_i32 = arith.constant 0 : i32
    %c0_i32_0 = arith.constant 0 : i32
    %c0_i32_1 = arith.constant 0 : i32
    return %c0_i32, %c0_i32_0 : i32, i32
  }
  func.func @transform_9(%arg0: i32) -> (i32, i32) {
    %c0_i32 = arith.constant 0 : i32
    %c0_i32_0 = arith.constant 0 : i32
    return %arg0, %c0_i32 : i32, i32
  }
  func.func @transform_10(%arg0: i32) -> (i32, i32) {
    %c0_i32 = arith.constant 0 : i32
    %c0_i32_0 = arith.constant 0 : i32
    return %arg0, %c0_i32 : i32, i32
  }
}

</mosaic_0001>

<bundles_post_ra>
// kernel: build_model_forward.17
= control target key start
LH: loop header
LB: loop body
LE: loop exit
PB: predicated region body
PF: predicated region fallthrough
CT: control target
= control target key end

     0   :  { %vm1307_vm0 = vcmask 1045504   ;;  %vm922_vm1 = vcmask 97280   ;;  %vm2984_vm4 = vcmask 125952   ;;  %s5863_s1 = inlined_call_operand.vmem [shape: bf16[12,16], index: 1, kind: input, shape index: {}]   ;;  %s5864_s0 = inlined_call_operand.vmem [shape: bf16[2048,12], index: 0, kind: input, shape index: {}]   ;;  %s5865_s2 = inlined_call_operand.vmem [shape: f32[1,16], index: 2, kind: input, shape index: {}]   ;;  %s5866_s3 = inlined_call_operand.vmem [shape: bf16[2048,16], index: 3, kind: output, shape index: {}]  }
   0x1   :  { %v3759_v0 = vld [vmem:[%s5863_s1] sm:$0xf]  ;;  %v4017_v1 = vld [vmem:[%s5863_s1] sm:$0x30]  ;;  %v3890_v8 = vld [vmem:[%s5864_s0 + $0x8] sm:$0xff] }
   0x2   :  { %v3760_v2 = vor.u32 %v4017_v1, %v3759_v0  ;;  %v3889_v4 = vld [vmem:[%s5864_s0] sm:$0xff]  ;;  %v3922_v9 = vld [vmem:[%s5864_s0 + $0x108] sm:$0xff]  ;;  %v3891_v12 = vld [vmem:[%s5864_s0 + $0x10] sm:$0xff] }
   0x3   :  { %v3921_v5 = vld [vmem:[%s5864_s0 + $0x100] sm:$0xff]  ;;  %v3954_v10 = vld [vmem:[%s5864_s0 + $0x208] sm:$0xff]  ;;  %v3923_v13 = vld [vmem:[%s5864_s0 + $0x110] sm:$0xff] }
   0x4   :  { %v1309_v3 = vsel %vm1307_vm0, %v3760_v2, 0  ;;  %v3953_v6 = vld [vmem:[%s5864_s0 + $0x200] sm:$0xff]  ;;  %v3986_v11 = vld [vmem:[%s5864_s0 + $0x308] sm:$0xff]  ;;  %v3955_v14 = vld [vmem:[%s5864_s0 + $0x210] sm:$0xff] }
   0x5   :  { %1318 = vmatpush.bf16.msra.mxu0 %v1309_v3  ;;  %4018 = vmatpush.bf16.msra.mxu1 %v1309_v3  ;;  %v3985_v7 = vld [vmem:[%s5864_s0 + $0x300] sm:$0xff]  ;;  %v3987_v15 = vld [vmem:[%s5864_s0 + $0x310] sm:$0xff]  ;;  %v3892_v16 = vld [vmem:[%s5864_s0 + $0x18] sm:$0xff] }
   0x6   :  { %4019 = vmatpush.bf16.msra.mxu2 %v1309_v3  ;;  %4020 = vmatpush.bf16.msra.mxu3 %v1309_v3  ;;  %v3924_v17 = vld [vmem:[%s5864_s0 + $0x118] sm:$0xff]  ;;  %v3893_v20 = vld [vmem:[%s5864_s0 + $0x20] sm:$0xff]  ;;  %v3894_v24 = vld [vmem:[%s5864_s0 + $0x28] sm:$0xff] }
   0x7   :  { %v3956_v18 = vld [vmem:[%s5864_s0 + $0x218] sm:$0xff]  ;;  %v3925_v21 = vld [vmem:[%s5864_s0 + $0x120] sm:$0xff]  ;;  %v3926_v25 = vld [vmem:[%s5864_s0 + $0x128] sm:$0xff] }
   0x8   :  { %3761 = vmatmul.msk.bf16.vlgmr.msra.gmra.mxu0 %vm922_vm1, %v3889_v4  ;;  %3793 = vmatmul.msk.bf16.vlgmr.msra.gmra.mxu1 %vm922_vm1, %v3921_v5  ;;  %v3988_v19 = vld [vmem:[%s5864_s0 + $0x318] sm:$0xff]  ;;  %v3957_v22 = vld [vmem:[%s5864_s0 + $0x220] sm:$0xff]  ;;  %v3958_v26 = vld [vmem:[%s5864_s0 + $0x228] sm:$0xff] }
   0x9   :  { %3825 = vmatmul.msk.bf16.vlgmr.msra.gmra.mxu2 %vm922_vm1, %v3953_v6  ;;  %3857 = vmatmul.msk.bf16.vlgmr.msra.gmra.mxu3 %vm922_vm1, %v3985_v7  ;;  %v3989_v23 = vld [vmem:[%s5864_s0 + $0x320] sm:$0xff]  ;;  %v3990_v27 = vld [vmem:[%s5864_s0 + $0x328] sm:$0xff]  ;;  %v3895_v28 = vld [vmem:[%s5864_s0 + $0x30] sm:$0xff] }
   0xa   :  { %v3927_v29 = vld [vmem:[%s5864_s0 + $0x130] sm:$0xff]  ;;  %v3896_v32 = vld [vmem:[%s5864_s0 + $0x38] sm:$0xff]  ;;  %v4182_v36 = vld [vmem:[%s5865_s2] ss:$0 sm:$0xff] }
   0xb   :  { %v3959_v30 = vld [vmem:[%s5864_s0 + $0x230] sm:$0xff]  ;;  %v3928_v33 = vld [vmem:[%s5864_s0 + $0x138] sm:$0xff]  ;;  %v3897_v37 = vld [vmem:[%s5864_s0 + $0x40] sm:$0xff] }
   0xc   :  { %v3991_v31 = vld [vmem:[%s5864_s0 + $0x330] sm:$0xff]  ;;  %v3960_v34 = vld [vmem:[%s5864_s0 + $0x238] sm:$0xff]  ;;  %v3929_v38 = vld [vmem:[%s5864_s0 + $0x140] sm:$0xff] }
   0xd   :  { %v3992_v35 = vld [vmem:[%s5864_s0 + $0x338] sm:$0xff]  ;;  %v3961_v41 = vld [vmem:[%s5864_s0 + $0x240] sm:$0xff] }
   0xe   :  { %v3993_v42 = vld [vmem:[%s5864_s0 + $0x340] sm:$0xff] }
  0x18   :  { %3762 = vmatmul.msk.bf16.gmra.mxu0 %vm922_vm1, %v3890_v8  ;;  %3794 = vmatmul.msk.bf16.gmra.mxu1 %vm922_vm1, %v3922_v9  ;;  %v3898_v9 = vld [vmem:[%s5864_s0 + $0x48] sm:$0xff] }
  0x19   :  { %3826 = vmatmul.msk.bf16.gmra.mxu2 %vm922_vm1, %v3954_v10  ;;  %3858 = vmatmul.msk.bf16.gmra.mxu3 %vm922_vm1, %v3986_v11  ;;  %v3930_v10 = vld [vmem:[%s5864_s0 + $0x148] sm:$0xff] }
  0x28   :  { %3763 = vmatmul.msk.bf16.gmra.mxu0 %vm922_vm1, %v3891_v12  ;;  %3795 = vmatmul.msk.bf16.gmra.mxu1 %vm922_vm1, %v3923_v13 }
  0x29   :  { %3827 = vmatmul.msk.bf16.gmra.mxu2 %vm922_vm1, %v3955_v14  ;;  %3859 = vmatmul.msk.bf16.gmra.mxu3 %vm922_vm1, %v3987_v15  ;;  %v3962_v15 = vld [vmem:[%s5864_s0 + $0x248] sm:$0xff] }
  0x38   :  { %3764 = vmatmul.msk.bf16.gmra.mxu0 %vm922_vm1, %v3892_v16  ;;  %3796 = vmatmul.msk.bf16.gmra.mxu1 %vm922_vm1, %v3924_v17  ;;  %v3994_v16 = vld [vmem:[%s5864_s0 + $0x348] sm:$0xff] }
  0x39   :  { %3828 = vmatmul.msk.bf16.gmra.mxu2 %vm922_vm1, %v3956_v18  ;;  %3860 = vmatmul.msk.bf16.gmra.mxu3 %vm922_vm1, %v3988_v19 }
  0x48   :  { %3765 = vmatmul.msk.bf16.gmra.mxu0 %vm922_vm1, %v3893_v20  ;;  %3797 = vmatmul.msk.bf16.gmra.mxu1 %vm922_vm1, %v3925_v21 }
  0x49   :  { %3829 = vmatmul.msk.bf16.gmra.mxu2 %vm922_vm1, %v3957_v22  ;;  %3861 = vmatmul.msk.bf16.gmra.mxu3 %vm922_vm1, %v3989_v23 }
  0x58   :  { %3766 = vmatmul.msk.bf16.gmra.mxu0 %vm922_vm1, %v3894_v24  ;;  %3798 = vmatmul.msk.bf16.gmra.mxu1 %vm922_vm1, %v3926_v25 }
  0x59   :  { %3830 = vmatmul.msk.bf16.gmra.mxu2 %vm922_vm1, %v3958_v26  ;;  %3862 = vmatmul.msk.bf16.gmra.mxu3 %vm922_vm1, %v3990_v27 }
  0x68   :  { %3767 = vmatmul.msk.bf16.gmra.mxu0 %vm922_vm1, %v3895_v28  ;;  %3799 = vmatmul.msk.bf16.gmra.mxu1 %vm922_vm1, %v3927_v29 }
  0x69   :  { %3831 = vmatmul.msk.bf16.gmra.mxu2 %vm922_vm1, %v3959_v30  ;;  %3863 = vmatmul.msk.bf16.gmra.mxu3 %vm922_vm1, %v3991_v31 }
  0x78   :  { %3768 = vmatmul.msk.bf16.gmra.mxu0 %vm922_vm1, %v3896_v32  ;;  %3800 = vmatmul.msk.bf16.gmra.mxu1 %vm922_vm1, %v3928_v33 }
  0x79   :  { %3832 = vmatmul.msk.bf16.gmra.mxu2 %vm922_vm1, %v3960_v34  ;;  %3864 = vmatmul.msk.bf16.gmra.mxu3 %vm922_vm1, %v3992_v35 }
  0x85   :  { %v1320_v39 = vpop.f32.mrf.mxu0  ;;  %v1480_v40 = vpop.f32.mrf.mxu1 }
  0x86   :  { %v1321_v43 = vadd.f32 %v4182_v36, %v1320_v39  ;;  %v1481_v44 = vadd.f32 %v4182_v36, %v1480_v40 }
  0x88   :  { %vm1960_vm2 = vcmp.gt.f32.partialorder %v1321_v43, 0.0  ;;  %v2216_v45 = vmul.f32 0.1, %v1321_v43  ;;  %vm2024_vm3 = vcmp.gt.f32.partialorder %v1481_v44, 0.0  ;;  %v2280_v46 = vmul.f32 0.1, %v1481_v44  ;;  %3769 = vmatmul.msk.bf16.gmra.mxu0 %vm922_vm1, %v3897_v37  ;;  %3801 = vmatmul.msk.bf16.gmra.mxu1 %vm922_vm1, %v3929_v38 }
  0x89   :  { %3833 = vmatmul.msk.bf16.gmra.mxu2 %vm922_vm1, %v3961_v41  ;;  %3865 = vmatmul.msk.bf16.gmra.mxu3 %vm922_vm1, %v3993_v42 }
  0x8a   :  { %v2472_v47 = vsel %vm1960_vm2, %v1321_v43, %v2216_v45  ;;  %v2536_v48 = vsel %vm2024_vm3, %v1481_v44, %v2280_v46 }
  0x8b   :  { %v2728_v49 = vpack.c.bf16 %v2472_v47, %v2472_v47  ;;  %v2792_v50 = vpack.c.bf16 %v2536_v48, %v2536_v48 }
  0x8c   :  { %v1640_v51 = vpop.f32.mrf.mxu2  ;;  %v1800_v52 = vpop.f32.mrf.mxu3 }
  0x8d   :  { %2985 = vst.msk [vmem:[%s5866_s3] sm:$0xf] %vm2984_vm4, %v2728_v49  ;;  %v1641_v53 = vadd.f32 %v4182_v36, %v1640_v51  ;;  %v1801_v54 = vadd.f32 %v4182_v36, %v1800_v52  ;;  %v1322_v55 = vpop.f32.mrf.mxu0  ;;  %v1482_v56 = vpop.f32.mrf.mxu1 }
  0x8e   :  { %3049 = vst.msk [vmem:[%s5866_s3 + $0x100] sm:$0xf] %vm2984_vm4, %v2792_v50  ;;  %v1323_v57 = vadd.f32 %v4182_v36, %v1322_v55  ;;  %v1483_v58 = vadd.f32 %v4182_v36, %v1482_v56  ;;  %v3931_v55 = vld [vmem:[%s5864_s0 + $0x150] sm:$0xff] }
  0x8f   :  { %vm2088_vm5 = vcmp.gt.f32.partialorder %v1641_v53, 0.0  ;;  %v2344_v59 = vmul.f32 0.1, %v1641_v53  ;;  %vm2152_vm6 = vcmp.gt.f32.partialorder %v1801_v54, 0.0  ;;  %v2408_v60 = vmul.f32 0.1, %v1801_v54 }
  0x90   :  { %vm1961_vm7 = vcmp.gt.f32.partialorder %v1323_v57, 0.0  ;;  %v2217_v61 = vmul.f32 0.1, %v1323_v57  ;;  %vm2025_vm8 = vcmp.gt.f32.partialorder %v1483_v58, 0.0  ;;  %v2281_v62 = vmul.f32 0.1, %v1483_v58 }
  0x91   :  { %v2600_v63 = vsel %vm2088_vm5, %v1641_v53, %v2344_v59  ;;  %v2664_v0 = vsel %vm2152_vm6, %v1801_v54, %v2408_v60  ;;  %v3899_v54 = vld [vmem:[%s5864_s0 + $0x50] sm:$0xff] }
  0x92   :  { %v2856_v1 = vpack.c.bf16 %v2600_v63, %v2600_v63  ;;  %v2920_v2 = vpack.c.bf16 %v2664_v0, %v2664_v0  ;;  %v2473_v3 = vsel %vm1961_vm7, %v1323_v57, %v2217_v61  ;;  %v2537_v4 = vsel %vm2025_vm8, %v1483_v58, %v2281_v62  ;;  %v3963_v60 = vld [vmem:[%s5864_s0 + $0x250] sm:$0xff] }
  0x93   :  { %v2729_v5 = vpack.c.bf16 %v2473_v3, %v2473_v3  ;;  %v2793_v6 = vpack.c.bf16 %v2537_v4, %v2537_v4  ;;  %v3995_v61 = vld [vmem:[%s5864_s0 + $0x350] sm:$0xff] }
  0x94   :  { %3113 = vst.msk [vmem:[%s5866_s3 + $0x200] sm:$0xf] %vm2984_vm4, %v2856_v1  ;;  %v1642_v7 = vpop.f32.mrf.mxu2  ;;  %v1802_v8 = vpop.f32.mrf.mxu3 }
  0x95   :  { %3177 = vst.msk [vmem:[%s5866_s3 + $0x300] sm:$0xf] %vm2984_vm4, %v2920_v2  ;;  %v1643_v11 = vadd.f32 %v4182_v36, %v1642_v7  ;;  %v1803_v12 = vadd.f32 %v4182_v36, %v1802_v8  ;;  %v1325_v13 = vpop.f32.mrf.mxu0  ;;  %v1485_v14 = vpop.f32.mrf.mxu1 }
  0x96   :  { %2986 = vst.msk [vmem:[%s5866_s3 + $0x4] sm:$0xf] %vm2984_vm4, %v2729_v5  ;;  %v1326_v17 = vadd.f32 %v4182_v36, %v1325_v13  ;;  %v1486_v18 = vadd.f32 %v4182_v36, %v1485_v14 }
  0x97   :  { %3050 = vst.msk [vmem:[%s5866_s3 + $0x104] sm:$0xf] %vm2984_vm4, %v2793_v6  ;;  %vm2089_vm9 = vcmp.gt.f32.partialorder %v1643_v11, 0.0  ;;  %v2345_v19 = vmul.f32 0.1, %v1643_v11  ;;  %vm2153_vm10 = vcmp.gt.f32.partialorder %v1803_v12, 0.0 }
  0x98   :  { %v2409_v20 = vmul.f32 0.1, %v1803_v12  ;;  %vm1962_vm11 = vcmp.gt.f32.partialorder %v1326_v17, 0.0  ;;  %v2218_v21 = vmul.f32 0.1, %v1326_v17  ;;  %vm2026_vm12 = vcmp.gt.f32.partialorder %v1486_v18, 0.0  ;;  %3770 = vmatmul.msk.bf16.gmra.mxu0 %vm922_vm1, %v3898_v9  ;;  %3802 = vmatmul.msk.bf16.gmra.mxu1 %vm922_vm1, %v3930_v10 }
  0x99   :  { %v2601_v22 = vsel %vm2089_vm9, %v1643_v11, %v2345_v19  ;;  %v2282_v23 = vmul.f32 0.1, %v1486_v18  ;;  %3834 = vmatmul.msk.bf16.gmra.mxu2 %vm922_vm1, %v3962_v15  ;;  %3866 = vmatmul.msk.bf16.gmra.mxu3 %vm922_vm1, %v3994_v16 }
  0x9a   :  { %v2857_v24 = vpack.c.bf16 %v2601_v22, %v2601_v22  ;;  %v2665_v25 = vsel %vm2153_vm10, %v1803_v12, %v2409_v20  ;;  %v2474_v26 = vsel %vm1962_vm11, %v1326_v17, %v2218_v21 }
  0x9b   :  { %v2921_v27 = vpack.c.bf16 %v2665_v25, %v2665_v25  ;;  %v2730_v28 = vpack.c.bf16 %v2474_v26, %v2474_v26  ;;  %v2538_v29 = vsel %vm2026_vm12, %v1486_v18, %v2282_v23 }
  0x9c   :  { %3114 = vst.msk [vmem:[%s5866_s3 + $0x204] sm:$0xf] %vm2984_vm4, %v2857_v24  ;;  %v2794_v30 = vpack.c.bf16 %v2538_v29, %v2538_v29  ;;  %v1645_v31 = vpop.f32.mrf.mxu2  ;;  %v1805_v32 = vpop.f32.mrf.mxu3 }
  0x9d   :  { %3178 = vst.msk [vmem:[%s5866_s3 + $0x304] sm:$0xf] %vm2984_vm4, %v2921_v27  ;;  %v1646_v33 = vadd.f32 %v4182_v36, %v1645_v31  ;;  %v1806_v34 = vadd.f32 %v4182_v36, %v1805_v32  ;;  %v1327_v35 = vpop.f32.mrf.mxu0  ;;  %v1487_v37 = vpop.f32.mrf.mxu1 }
  0x9e   :  { %2987 = vst.msk [vmem:[%s5866_s3 + $0x8] sm:$0xf] %vm2984_vm4, %v2730_v28  ;;  %v1328_v38 = vadd.f32 %v4182_v36, %v1327_v35  ;;  %v1488_v39 = vadd.f32 %v4182_v36, %v1487_v37  ;;  %v3932_v35 = vld [vmem:[%s5864_s0 + $0x158] sm:$0xff] }
  0x9f   :  { %3051 = vst.msk [vmem:[%s5866_s3 + $0x108] sm:$0xf] %vm2984_vm4, %v2794_v30  ;;  %vm2090_vm13 = vcmp.gt.f32.partialorder %v1646_v33, 0.0  ;;  %v2346_v40 = vmul.f32 0.1, %v1646_v33  ;;  %vm2154_vm14 = vcmp.gt.f32.partialorder %v1806_v34, 0.0 }
  0xa0   :  { %v2410_v41 = vmul.f32 0.1, %v1806_v34  ;;  %vm1963_vm15 = vcmp.gt.f32.partialorder %v1328_v38, 0.0  ;;  %v2219_v42 = vmul.f32 0.1, %v1328_v38  ;;  %vm2027_vm0 = vcmp.gt.f32.partialorder %v1488_v39, 0.0 }
  0xa1   :  { %v2602_v43 = vsel %vm2090_vm13, %v1646_v33, %v2346_v40  ;;  %v2283_v44 = vmul.f32 0.1, %v1488_v39 }
  0xa2   :  { %v2858_v45 = vpack.c.bf16 %v2602_v43, %v2602_v43  ;;  %v2666_v46 = vsel %vm2154_vm14, %v1806_v34, %v2410_v41  ;;  %v2475_v47 = vsel %vm1963_vm15, %v1328_v38, %v2219_v42  ;;  %v3900_v34 = vld [vmem:[%s5864_s0 + $0x58] sm:$0xff] }
  0xa3   :  { %v2922_v48 = vpack.c.bf16 %v2666_v46, %v2666_v46  ;;  %v2731_v49 = vpack.c.bf16 %v2475_v47, %v2475_v47  ;;  %v2539_v50 = vsel %vm2027_vm0, %v1488_v39, %v2283_v44  ;;  %v3964_v41 = vld [vmem:[%s5864_s0 + $0x258] sm:$0xff] }
  0xa4   :  { %3115 = vst.msk [vmem:[%s5866_s3 + $0x208] sm:$0xf] %vm2984_vm4, %v2858_v45  ;;  %v2795_v51 = vpack.c.bf16 %v2539_v50, %v2539_v50  ;;  %v1647_v52 = vpop.f32.mrf.mxu2  ;;  %v1807_v53 = vpop.f32.mrf.mxu3  ;;  %v3996_v42 = vld [vmem:[%s5864_s0 + $0x358] sm:$0xff] }
  0xa5   :  { %3179 = vst.msk [vmem:[%s5866_s3 + $0x308] sm:$0xf] %vm2984_vm4, %v2922_v48  ;;  %v1648_v56 = vadd.f32 %v4182_v36, %v1647_v52  ;;  %v1808_v57 = vadd.f32 %v4182_v36, %v1807_v53  ;;  %v1330_v58 = vpop.f32.mrf.mxu0  ;;  %v1490_v59 = vpop.f32.mrf.mxu1 }
  0xa6   :  { %2988 = vst.msk [vmem:[%s5866_s3 + $0xc] sm:$0xf] %vm2984_vm4, %v2731_v49  ;;  %v1331_v62 = vadd.f32 %v4182_v36, %v1330_v58  ;;  %v1491_v63 = vadd.f32 %v4182_v36, %v1490_v59 }
  0xa7   :  { %3052 = vst.msk [vmem:[%s5866_s3 + $0x10c] sm:$0xf] %vm2984_vm4, %v2795_v51  ;;  %vm2091_vm2 = vcmp.gt.f32.partialorder %v1648_v56, 0.0  ;;  %v2347_v0 = vmul.f32 0.1, %v1648_v56  ;;  %vm2155_vm3 = vcmp.gt.f32.partialorder %v1808_v57, 0.0 }
  0xa8   :  { %v2411_v1 = vmul.f32 0.1, %v1808_v57  ;;  %vm1964_vm5 = vcmp.gt.f32.partialorder %v1331_v62, 0.0  ;;  %v2220_v2 = vmul.f32 0.1, %v1331_v62  ;;  %vm2028_vm6 = vcmp.gt.f32.partialorder %v1491_v63, 0.0  ;;  %3771 = vmatmul.msk.bf16.gmra.mxu0 %vm922_vm1, %v3899_v54  ;;  %3803 = vmatmul.msk.bf16.gmra.mxu1 %vm922_vm1, %v3931_v55 }
  0xa9   :  { %v2603_v3 = vsel %vm2091_vm2, %v1648_v56, %v2347_v0  ;;  %v2284_v4 = vmul.f32 0.1, %v1491_v63  ;;  %3835 = vmatmul.msk.bf16.gmra.mxu2 %vm922_vm1, %v3963_v60  ;;  %3867 = vmatmul.msk.bf16.gmra.mxu3 %vm922_vm1, %v3995_v61 }
  0xaa   :  { %v2859_v5 = vpack.c.bf16 %v2603_v3, %v2603_v3  ;;  %v2667_v6 = vsel %vm2155_vm3, %v1808_v57, %v2411_v1  ;;  %v2476_v7 = vsel %vm1964_vm5, %v1331_v62, %v2220_v2 }
  0xab   :  { %v2923_v8 = vpack.c.bf16 %v2667_v6, %v2667_v6  ;;  %v2732_v9 = vpack.c.bf16 %v2476_v7, %v2476_v7  ;;  %v2540_v10 = vsel %vm2028_vm6, %v1491_v63, %v2284_v4 }
  0xac   :  { %3116 = vst.msk [vmem:[%s5866_s3 + $0x20c] sm:$0xf] %vm2984_vm4, %v2859_v5  ;;  %v2796_v11 = vpack.c.bf16 %v2540_v10, %v2540_v10  ;;  %v1650_v12 = vpop.f32.mrf.mxu2  ;;  %v1810_v13 = vpop.f32.mrf.mxu3 }
  0xad   :  { %3180 = vst.msk [vmem:[%s5866_s3 + $0x30c] sm:$0xf] %vm2984_vm4, %v2923_v8  ;;  %v1651_v14 = vadd.f32 %v4182_v36, %v1650_v12  ;;  %v1811_v15 = vadd.f32 %v4182_v36, %v1810_v13  ;;  %v1332_v16 = vpop.f32.mrf.mxu0  ;;  %v1492_v17 = vpop.f32.mrf.mxu1 }
  0xae   :  { %2989 = vst.msk [vmem:[%s5866_s3 + $0x10] sm:$0xf] %vm2984_vm4, %v2732_v9  ;;  %v1333_v18 = vadd.f32 %v4182_v36, %v1332_v16  ;;  %v1493_v19 = vadd.f32 %v4182_v36, %v1492_v17  ;;  %v3933_v16 = vld [vmem:[%s5864_s0 + $0x160] sm:$0xff] }
  0xaf   :  { %3053 = vst.msk [vmem:[%s5866_s3 + $0x110] sm:$0xf] %vm2984_vm4, %v2796_v11  ;;  %vm2092_vm7 = vcmp.gt.f32.partialorder %v1651_v14, 0.0  ;;  %v2348_v20 = vmul.f32 0.1, %v1651_v14  ;;  %vm2156_vm8 = vcmp.gt.f32.partialorder %v1811_v15, 0.0 }
  0xb0   :  { %v2412_v21 = vmul.f32 0.1, %v1811_v15  ;;  %vm1965_vm9 = vcmp.gt.f32.partialorder %v1333_v18, 0.0  ;;  %v2221_v22 = vmul.f32 0.1, %v1333_v18  ;;  %vm2029_vm10 = vcmp.gt.f32.partialorder %v1493_v19, 0.0 }
  0xb1   :  { %v2604_v23 = vsel %vm2092_vm7, %v1651_v14, %v2348_v20  ;;  %v2285_v24 = vmul.f32 0.1, %v1493_v19 }
  0xb2   :  { %v2860_v25 = vpack.c.bf16 %v2604_v23, %v2604_v23  ;;  %v2668_v26 = vsel %vm2156_vm8, %v1811_v15, %v2412_v21  ;;  %v2477_v27 = vsel %vm1965_vm9, %v1333_v18, %v2221_v22  ;;  %v3901_v15 = vld [vmem:[%s5864_s0 + $0x60] sm:$0xff] }
  0xb3   :  { %v2924_v28 = vpack.c.bf16 %v2668_v26, %v2668_v26  ;;  %v2733_v29 = vpack.c.bf16 %v2477_v27, %v2477_v27  ;;  %v2541_v30 = vsel %vm2029_vm10, %v1493_v19, %v2285_v24  ;;  %v3965_v21 = vld [vmem:[%s5864_s0 + $0x260] sm:$0xff] }
  0xb4   :  { %3117 = vst.msk [vmem:[%s5866_s3 + $0x210] sm:$0xf] %vm2984_vm4, %v2860_v25  ;;  %v2797_v31 = vpack.c.bf16 %v2541_v30, %v2541_v30  ;;  %v1652_v32 = vpop.f32.mrf.mxu2  ;;  %v1812_v33 = vpop.f32.mrf.mxu3  ;;  %v3997_v22 = vld [vmem:[%s5864_s0 + $0x360] sm:$0xff] }
  0xb5   :  { %3181 = vst.msk [vmem:[%s5866_s3 + $0x310] sm:$0xf] %vm2984_vm4, %v2924_v28  ;;  %v1653_v37 = vadd.f32 %v4182_v36, %v1652_v32  ;;  %v1813_v38 = vadd.f32 %v4182_v36, %v1812_v33  ;;  %v1335_v39 = vpop.f32.mrf.mxu0  ;;  %v1495_v40 = vpop.f32.mrf.mxu1 }
  0xb6   :  { %2990 = vst.msk [vmem:[%s5866_s3 + $0x14] sm:$0xf] %vm2984_vm4, %v2733_v29  ;;  %v1336_v43 = vadd.f32 %v4182_v36, %v1335_v39  ;;  %v1496_v44 = vadd.f32 %v4182_v36, %v1495_v40 }
  0xb7   :  { %3054 = vst.msk [vmem:[%s5866_s3 + $0x114] sm:$0xf] %vm2984_vm4, %v2797_v31  ;;  %vm2093_vm11 = vcmp.gt.f32.partialorder %v1653_v37, 0.0  ;;  %v2349_v45 = vmul.f32 0.1, %v1653_v37  ;;  %vm2157_vm12 = vcmp.gt.f32.partialorder %v1813_v38, 0.0 }
  0xb8   :  { %v2413_v46 = vmul.f32 0.1, %v1813_v38  ;;  %vm1966_vm13 = vcmp.gt.f32.partialorder %v1336_v43, 0.0  ;;  %v2222_v47 = vmul.f32 0.1, %v1336_v43  ;;  %vm2030_vm14 = vcmp.gt.f32.partialorder %v1496_v44, 0.0  ;;  %3772 = vmatmul.msk.bf16.gmra.mxu0 %vm922_vm1, %v3900_v34  ;;  %3804 = vmatmul.msk.bf16.gmra.mxu1 %vm922_vm1, %v3932_v35 }
  0xb9   :  { %v2605_v48 = vsel %vm2093_vm11, %v1653_v37, %v2349_v45  ;;  %v2286_v49 = vmul.f32 0.1, %v1496_v44  ;;  %3836 = vmatmul.msk.bf16.gmra.mxu2 %vm922_vm1, %v3964_v41  ;;  %3868 = vmatmul.msk.bf16.gmra.mxu3 %vm922_vm1, %v3996_v42 }
  0xba   :  { %v2861_v50 = vpack.c.bf16 %v2605_v48, %v2605_v48  ;;  %v2669_v51 = vsel %vm2157_vm12, %v1813_v38, %v2413_v46  ;;  %v2478_v52 = vsel %vm1966_vm13, %v1336_v43, %v2222_v47 }
  0xbb   :  { %v2925_v53 = vpack.c.bf16 %v2669_v51, %v2669_v51  ;;  %v2734_v54 = vpack.c.bf16 %v2478_v52, %v2478_v52  ;;  %v2542_v55 = vsel %vm2030_vm14, %v1496_v44, %v2286_v49 }
  0xbc   :  { %3118 = vst.msk [vmem:[%s5866_s3 + $0x214] sm:$0xf] %vm2984_vm4, %v2861_v50  ;;  %v2798_v56 = vpack.c.bf16 %v2542_v55, %v2542_v55  ;;  %v1655_v57 = vpop.f32.mrf.mxu2  ;;  %v1815_v58 = vpop.f32.mrf.mxu3 }
  0xbd   :  { %3182 = vst.msk [vmem:[%s5866_s3 + $0x314] sm:$0xf] %vm2984_vm4, %v2925_v53  ;;  %v1656_v59 = vadd.f32 %v4182_v36, %v1655_v57  ;;  %v1816_v60 = vadd.f32 %v4182_v36, %v1815_v58  ;;  %v1337_v61 = vpop.f32.mrf.mxu0  ;;  %v1497_v62 = vpop.f32.mrf.mxu1 }
  0xbe   :  { %2991 = vst.msk [vmem:[%s5866_s3 + $0x18] sm:$0xf] %vm2984_vm4, %v2734_v54  ;;  %v1338_v63 = vadd.f32 %v4182_v36, %v1337_v61  ;;  %v1498_v0 = vadd.f32 %v4182_v36, %v1497_v62  ;;  %v3934_v61 = vld [vmem:[%s5864_s0 + $0x168] sm:$0xff] }
  0xbf   :  { %3055 = vst.msk [vmem:[%s5866_s3 + $0x118] sm:$0xf] %vm2984_vm4, %v2798_v56  ;;  %vm2094_vm15 = vcmp.gt.f32.partialorder %v1656_v59, 0.0  ;;  %v2350_v1 = vmul.f32 0.1, %v1656_v59  ;;  %vm2158_vm0 = vcmp.gt.f32.partialorder %v1816_v60, 0.0 }
  0xc0   :  { %v2414_v2 = vmul.f32 0.1, %v1816_v60  ;;  %vm1967_vm2 = vcmp.gt.f32.partialorder %v1338_v63, 0.0  ;;  %v2223_v3 = vmul.f32 0.1, %v1338_v63  ;;  %vm2031_vm3 = vcmp.gt.f32.partialorder %v1498_v0, 0.0 }
  0xc1   :  { %v2606_v4 = vsel %vm2094_vm15, %v1656_v59, %v2350_v1  ;;  %v2287_v5 = vmul.f32 0.1, %v1498_v0 }
  0xc2   :  { %v2862_v6 = vpack.c.bf16 %v2606_v4, %v2606_v4  ;;  %v2670_v7 = vsel %vm2158_vm0, %v1816_v60, %v2414_v2  ;;  %v2479_v8 = vsel %vm1967_vm2, %v1338_v63, %v2223_v3  ;;  %v3902_v60 = vld [vmem:[%s5864_s0 + $0x68] sm:$0xff] }
  0xc3   :  { %v2926_v9 = vpack.c.bf16 %v2670_v7, %v2670_v7  ;;  %v2735_v10 = vpack.c.bf16 %v2479_v8, %v2479_v8  ;;  %v2543_v11 = vsel %vm2031_vm3, %v1498_v0, %v2287_v5  ;;  %v3966_v2 = vld [vmem:[%s5864_s0 + $0x268] sm:$0xff] }
  0xc4   :  { %3119 = vst.msk [vmem:[%s5866_s3 + $0x218] sm:$0xf] %vm2984_vm4, %v2862_v6  ;;  %v2799_v12 = vpack.c.bf16 %v2543_v11, %v2543_v11  ;;  %v1657_v13 = vpop.f32.mrf.mxu2  ;;  %v1817_v14 = vpop.f32.mrf.mxu3  ;;  %v3998_v3 = vld [vmem:[%s5864_s0 + $0x368] sm:$0xff] }
  0xc5   :  { %3183 = vst.msk [vmem:[%s5866_s3 + $0x318] sm:$0xf] %vm2984_vm4, %v2926_v9  ;;  %v1658_v17 = vadd.f32 %v4182_v36, %v1657_v13  ;;  %v1818_v18 = vadd.f32 %v4182_v36, %v1817_v14  ;;  %v1340_v19 = vpop.f32.mrf.mxu0  ;;  %v1500_v20 = vpop.f32.mrf.mxu1 }
  0xc6   :  { %2992 = vst.msk [vmem:[%s5866_s3 + $0x1c] sm:$0xf] %vm2984_vm4, %v2735_v10  ;;  %v1341_v23 = vadd.f32 %v4182_v36, %v1340_v19  ;;  %v1501_v24 = vadd.f32 %v4182_v36, %v1500_v20 }
  0xc7   :  { %3056 = vst.msk [vmem:[%s5866_s3 + $0x11c] sm:$0xf] %vm2984_vm4, %v2799_v12  ;;  %vm2095_vm5 = vcmp.gt.f32.partialorder %v1658_v17, 0.0  ;;  %v2351_v25 = vmul.f32 0.1, %v1658_v17  ;;  %vm2159_vm6 = vcmp.gt.f32.partialorder %v1818_v18, 0.0 }
  0xc8   :  { %v2415_v26 = vmul.f32 0.1, %v1818_v18  ;;  %vm1968_vm7 = vcmp.gt.f32.partialorder %v1341_v23, 0.0  ;;  %v2224_v27 = vmul.f32 0.1, %v1341_v23  ;;  %vm2032_vm8 = vcmp.gt.f32.partialorder %v1501_v24, 0.0  ;;  %3773 = vmatmul.msk.bf16.gmra.mxu0 %vm922_vm1, %v3901_v15  ;;  %3805 = vmatmul.msk.bf16.gmra.mxu1 %vm922_vm1, %v3933_v16 }
  0xc9   :  { %v2607_v28 = vsel %vm2095_vm5, %v1658_v17, %v2351_v25  ;;  %v2288_v29 = vmul.f32 0.1, %v1501_v24  ;;  %3837 = vmatmul.msk.bf16.gmra.mxu2 %vm922_vm1, %v3965_v21  ;;  %3869 = vmatmul.msk.bf16.gmra.mxu3 %vm922_vm1, %v3997_v22 }
  0xca   :  { %v2863_v30 = vpack.c.bf16 %v2607_v28, %v2607_v28  ;;  %v2671_v31 = vsel %vm2159_vm6, %v1818_v18, %v2415_v26  ;;  %v2480_v32 = vsel %vm1968_vm7, %v1341_v23, %v2224_v27 }
  0xcb   :  { %v2927_v33 = vpack.c.bf16 %v2671_v31, %v2671_v31  ;;  %v2736_v34 = vpack.c.bf16 %v2480_v32, %v2480_v32  ;;  %v2544_v35 = vsel %vm2032_vm8, %v1501_v24, %v2288_v29 }
  0xcc   :  { %3120 = vst.msk [vmem:[%s5866_s3 + $0x21c] sm:$0xf] %vm2984_vm4, %v2863_v30  ;;  %v2800_v37 = vpack.c.bf16 %v2544_v35, %v2544_v35  ;;  %v1660_v38 = vpop.f32.mrf.mxu2  ;;  %v1820_v39 = vpop.f32.mrf.mxu3 }
  0xcd   :  { %3184 = vst.msk [vmem:[%s5866_s3 + $0x31c] sm:$0xf] %vm2984_vm4, %v2927_v33  ;;  %v1661_v40 = vadd.f32 %v4182_v36, %v1660_v38  ;;  %v1821_v41 = vadd.f32 %v4182_v36, %v1820_v39  ;;  %v1342_v42 = vpop.f32.mrf.mxu0  ;;  %v1502_v43 = vpop.f32.mrf.mxu1 }
  0xce   :  { %2993 = vst.msk [vmem:[%s5866_s3 + $0x20] sm:$0xf] %vm2984_vm4, %v2736_v34  ;;  %v1343_v44 = vadd.f32 %v4182_v36, %v1342_v42  ;;  %v1503_v45 = vadd.f32 %v4182_v36, %v1502_v43  ;;  %v3935_v42 = vld [vmem:[%s5864_s0 + $0x170] sm:$0xff] }
  0xcf   :  { %3057 = vst.msk [vmem:[%s5866_s3 + $0x120] sm:$0xf] %vm2984_vm4, %v2800_v37  ;;  %vm2096_vm9 = vcmp.gt.f32.partialorder %v1661_v40, 0.0  ;;  %v2352_v46 = vmul.f32 0.1, %v1661_v40  ;;  %vm2160_vm10 = vcmp.gt.f32.partialorder %v1821_v41, 0.0 }
  0xd0   :  { %v2416_v47 = vmul.f32 0.1, %v1821_v41  ;;  %vm1969_vm11 = vcmp.gt.f32.partialorder %v1343_v44, 0.0  ;;  %v2225_v48 = vmul.f32 0.1, %v1343_v44  ;;  %vm2033_vm12 = vcmp.gt.f32.partialorder %v1503_v45, 0.0 }
  0xd1   :  { %v2608_v49 = vsel %vm2096_vm9, %v1661_v40, %v2352_v46  ;;  %v2289_v50 = vmul.f32 0.1, %v1503_v45 }
  0xd2   :  { %v2864_v51 = vpack.c.bf16 %v2608_v49, %v2608_v49  ;;  %v2672_v52 = vsel %vm2160_vm10, %v1821_v41, %v2416_v47  ;;  %v2481_v53 = vsel %vm1969_vm11, %v1343_v44, %v2225_v48  ;;  %v3903_v41 = vld [vmem:[%s5864_s0 + $0x70] sm:$0xff] }
  0xd3   :  { %v2928_v54 = vpack.c.bf16 %v2672_v52, %v2672_v52  ;;  %v2737_v55 = vpack.c.bf16 %v2481_v53, %v2481_v53  ;;  %v2545_v56 = vsel %vm2033_vm12, %v1503_v45, %v2289_v50  ;;  %v3967_v47 = vld [vmem:[%s5864_s0 + $0x270] sm:$0xff] }
  0xd4   :  { %3121 = vst.msk [vmem:[%s5866_s3 + $0x220] sm:$0xf] %vm2984_vm4, %v2864_v51  ;;  %v2801_v57 = vpack.c.bf16 %v2545_v56, %v2545_v56  ;;  %v1662_v58 = vpop.f32.mrf.mxu2  ;;  %v1822_v59 = vpop.f32.mrf.mxu3  ;;  %v3999_v48 = vld [vmem:[%s5864_s0 + $0x370] sm:$0xff] }
  0xd5   :  { %3185 = vst.msk [vmem:[%s5866_s3 + $0x320] sm:$0xf] %vm2984_vm4, %v2928_v54  ;;  %v1663_v62 = vadd.f32 %v4182_v36, %v1662_v58  ;;  %v1823_v63 = vadd.f32 %v4182_v36, %v1822_v59  ;;  %v1345_v0 = vpop.f32.mrf.mxu0  ;;  %v1505_v1 = vpop.f32.mrf.mxu1 }
  0xd6   :  { %2994 = vst.msk [vmem:[%s5866_s3 + $0x24] sm:$0xf] %vm2984_vm4, %v2737_v55  ;;  %v1346_v4 = vadd.f32 %v4182_v36, %v1345_v0  ;;  %v1506_v5 = vadd.f32 %v4182_v36, %v1505_v1 }
  0xd7   :  { %3058 = vst.msk [vmem:[%s5866_s3 + $0x124] sm:$0xf] %vm2984_vm4, %v2801_v57  ;;  %vm2097_vm13 = vcmp.gt.f32.partialorder %v1663_v62, 0.0  ;;  %v2353_v6 = vmul.f32 0.1, %v1663_v62  ;;  %vm2161_vm14 = vcmp.gt.f32.partialorder %v1823_v63, 0.0 }
  0xd8   :  { %v2417_v7 = vmul.f32 0.1, %v1823_v63  ;;  %vm1970_vm15 = vcmp.gt.f32.partialorder %v1346_v4, 0.0  ;;  %v2226_v8 = vmul.f32 0.1, %v1346_v4  ;;  %vm2034_vm0 = vcmp.gt.f32.partialorder %v1506_v5, 0.0  ;;  %3774 = vmatmul.msk.bf16.gmra.mxu0 %vm922_vm1, %v3902_v60  ;;  %3806 = vmatmul.msk.bf16.gmra.mxu1 %vm922_vm1, %v3934_v61 }
  0xd9   :  { %v2609_v9 = vsel %vm2097_vm13, %v1663_v62, %v2353_v6  ;;  %v2290_v10 = vmul.f32 0.1, %v1506_v5  ;;  %3838 = vmatmul.msk.bf16.gmra.mxu2 %vm922_vm1, %v3966_v2  ;;  %3870 = vmatmul.msk.bf16.gmra.mxu3 %vm922_vm1, %v3998_v3 }
  0xda   :  { %v2865_v11 = vpack.c.bf16 %v2609_v9, %v2609_v9  ;;  %v2673_v12 = vsel %vm2161_vm14, %v1823_v63, %v2417_v7  ;;  %v2482_v13 = vsel %vm1970_vm15, %v1346_v4, %v2226_v8 }
  0xdb   :  { %v2929_v14 = vpack.c.bf16 %v2673_v12, %v2673_v12  ;;  %v2738_v15 = vpack.c.bf16 %v2482_v13, %v2482_v13  ;;  %v2546_v16 = vsel %vm2034_vm0, %v1506_v5, %v2290_v10 }
  0xdc   :  { %3122 = vst.msk [vmem:[%s5866_s3 + $0x224] sm:$0xf] %vm2984_vm4, %v2865_v11  ;;  %v2802_v17 = vpack.c.bf16 %v2546_v16, %v2546_v16  ;;  %v1665_v18 = vpop.f32.mrf.mxu2  ;;  %v1825_v19 = vpop.f32.mrf.mxu3 }
  0xdd   :  { %3186 = vst.msk [vmem:[%s5866_s3 + $0x324] sm:$0xf] %vm2984_vm4, %v2929_v14  ;;  %v1666_v20 = vadd.f32 %v4182_v36, %v1665_v18  ;;  %v1826_v21 = vadd.f32 %v4182_v36, %v1825_v19  ;;  %v1347_v22 = vpop.f32.mrf.mxu0  ;;  %v1507_v23 = vpop.f32.mrf.mxu1 }
  0xde   :  { %2995 = vst.msk [vmem:[%s5866_s3 + $0x28] sm:$0xf] %vm2984_vm4, %v2738_v15  ;;  %v1348_v24 = vadd.f32 %v4182_v36, %v1347_v22  ;;  %v1508_v25 = vadd.f32 %v4182_v36, %v1507_v23  ;;  %v3936_v22 = vld [vmem:[%s5864_s0 + $0x178] sm:$0xff] }
  0xdf   :  { %3059 = vst.msk [vmem:[%s5866_s3 + $0x128] sm:$0xf] %vm2984_vm4, %v2802_v17  ;;  %vm2098_vm2 = vcmp.gt.f32.partialorder %v1666_v20, 0.0  ;;  %v2354_v26 = vmul.f32 0.1, %v1666_v20  ;;  %vm2162_vm3 = vcmp.gt.f32.partialorder %v1826_v21, 0.0 }
  0xe0   :  { %v2418_v27 = vmul.f32 0.1, %v1826_v21  ;;  %vm1971_vm5 = vcmp.gt.f32.partialorder %v1348_v24, 0.0  ;;  %v2227_v28 = vmul.f32 0.1, %v1348_v24  ;;  %vm2035_vm6 = vcmp.gt.f32.partialorder %v1508_v25, 0.0 }
  0xe1   :  { %v2610_v29 = vsel %vm2098_vm2, %v1666_v20, %v2354_v26  ;;  %v2291_v30 = vmul.f32 0.1, %v1508_v25 }
  0xe2   :  { %v2866_v31 = vpack.c.bf16 %v2610_v29, %v2610_v29  ;;  %v2674_v32 = vsel %vm2162_vm3, %v1826_v21, %v2418_v27  ;;  %v2483_v33 = vsel %vm1971_vm5, %v1348_v24, %v2227_v28  ;;  %v3904_v21 = vld [vmem:[%s5864_s0 + $0x78] sm:$0xff] }
  0xe3   :  { %v2930_v34 = vpack.c.bf16 %v2674_v32, %v2674_v32  ;;  %v2739_v35 = vpack.c.bf16 %v2483_v33, %v2483_v33  ;;  %v2547_v37 = vsel %vm2035_vm6, %v1508_v25, %v2291_v30  ;;  %v3968_v27 = vld [vmem:[%s5864_s0 + $0x278] sm:$0xff] }
  0xe4   :  { %3123 = vst.msk [vmem:[%s5866_s3 + $0x228] sm:$0xf] %vm2984_vm4, %v2866_v31  ;;  %v2803_v38 = vpack.c.bf16 %v2547_v37, %v2547_v37  ;;  %v1667_v39 = vpop.f32.mrf.mxu2  ;;  %v1827_v40 = vpop.f32.mrf.mxu3  ;;  %v4000_v28 = vld [vmem:[%s5864_s0 + $0x378] sm:$0xff] }
  0xe5   :  { %3187 = vst.msk [vmem:[%s5866_s3 + $0x328] sm:$0xf] %vm2984_vm4, %v2930_v34  ;;  %v1668_v43 = vadd.f32 %v4182_v36, %v1667_v39  ;;  %v1828_v44 = vadd.f32 %v4182_v36, %v1827_v40  ;;  %v1350_v45 = vpop.f32.mrf.mxu0  ;;  %v1510_v46 = vpop.f32.mrf.mxu1 }
  0xe6   :  { %2996 = vst.msk [vmem:[%s5866_s3 + $0x2c] sm:$0xf] %vm2984_vm4, %v2739_v35  ;;  %v1351_v49 = vadd.f32 %v4182_v36, %v1350_v45  ;;  %v1511_v50 = vadd.f32 %v4182_v36, %v1510_v46 }
  0xe7   :  { %3060 = vst.msk [vmem:[%s5866_s3 + $0x12c] sm:$0xf] %vm2984_vm4, %v2803_v38  ;;  %vm2099_vm7 = vcmp.gt.f32.partialorder %v1668_v43, 0.0  ;;  %v2355_v51 = vmul.f32 0.1, %v1668_v43  ;;  %vm2163_vm8 = vcmp.gt.f32.partialorder %v1828_v44, 0.0 }
  0xe8   :  { %v2419_v52 = vmul.f32 0.1, %v1828_v44  ;;  %vm1972_vm9 = vcmp.gt.f32.partialorder %v1351_v49, 0.0  ;;  %v2228_v53 = vmul.f32 0.1, %v1351_v49  ;;  %vm2036_vm10 = vcmp.gt.f32.partialorder %v1511_v50, 0.0  ;;  %3775 = vmatmul.msk.bf16.gmra.mxu0 %vm922_vm1, %v3903_v41  ;;  %3807 = vmatmul.msk.bf16.gmra.mxu1 %vm922_vm1, %v3935_v42 }
  0xe9   :  { %v2611_v54 = vsel %vm2099_vm7, %v1668_v43, %v2355_v51  ;;  %v2292_v55 = vmul.f32 0.1, %v1511_v50  ;;  %3839 = vmatmul.msk.bf16.gmra.mxu2 %vm922_vm1, %v3967_v47  ;;  %3871 = vmatmul.msk.bf16.gmra.mxu3 %vm922_vm1, %v3999_v48 }
  0xea   :  { %v2867_v56 = vpack.c.bf16 %v2611_v54, %v2611_v54  ;;  %v2675_v57 = vsel %vm2163_vm8, %v1828_v44, %v2419_v52  ;;  %v2484_v58 = vsel %vm1972_vm9, %v1351_v49, %v2228_v53 }
  0xeb   :  { %v2931_v59 = vpack.c.bf16 %v2675_v57, %v2675_v57  ;;  %v2740_v60 = vpack.c.bf16 %v2484_v58, %v2484_v58  ;;  %v2548_v61 = vsel %vm2036_vm10, %v1511_v50, %v2292_v55 }
  0xec   :  { %3124 = vst.msk [vmem:[%s5866_s3 + $0x22c] sm:$0xf] %vm2984_vm4, %v2867_v56  ;;  %v2804_v62 = vpack.c.bf16 %v2548_v61, %v2548_v61  ;;  %v1670_v63 = vpop.f32.mrf.mxu2  ;;  %v1830_v0 = vpop.f32.mrf.mxu3 }
  0xed   :  { %3188 = vst.msk [vmem:[%s5866_s3 + $0x32c] sm:$0xf] %vm2984_vm4, %v2931_v59  ;;  %v1671_v1 = vadd.f32 %v4182_v36, %v1670_v63  ;;  %v1831_v2 = vadd.f32 %v4182_v36, %v1830_v0  ;;  %v1352_v3 = vpop.f32.mrf.mxu0  ;;  %v1512_v4 = vpop.f32.mrf.mxu1 }
  0xee   :  { %2997 = vst.msk [vmem:[%s5866_s3 + $0x30] sm:$0xf] %vm2984_vm4, %v2740_v60  ;;  %v1353_v5 = vadd.f32 %v4182_v36, %v1352_v3  ;;  %v1513_v6 = vadd.f32 %v4182_v36, %v1512_v4  ;;  %v3937_v3 = vld [vmem:[%s5864_s0 + $0x180] sm:$0xff] }
  0xef   :  { %3061 = vst.msk [vmem:[%s5866_s3 + $0x130] sm:$0xf] %vm2984_vm4, %v2804_v62  ;;  %vm2100_vm11 = vcmp.gt.f32.partialorder %v1671_v1, 0.0  ;;  %v2356_v7 = vmul.f32 0.1, %v1671_v1  ;;  %vm2164_vm12 = vcmp.gt.f32.partialorder %v1831_v2, 0.0 }
  0xf0   :  { %v2420_v8 = vmul.f32 0.1, %v1831_v2  ;;  %vm1973_vm13 = vcmp.gt.f32.partialorder %v1353_v5, 0.0  ;;  %v2229_v9 = vmul.f32 0.1, %v1353_v5  ;;  %vm2037_vm14 = vcmp.gt.f32.partialorder %v1513_v6, 0.0 }
  0xf1   :  { %v2612_v10 = vsel %vm2100_vm11, %v1671_v1, %v2356_v7  ;;  %v2293_v11 = vmul.f32 0.1, %v1513_v6 }
  0xf2   :  { %v2868_v12 = vpack.c.bf16 %v2612_v10, %v2612_v10  ;;  %v2676_v13 = vsel %vm2164_vm12, %v1831_v2, %v2420_v8  ;;  %v2485_v14 = vsel %vm1973_vm13, %v1353_v5, %v2229_v9  ;;  %v3905_v2 = vld [vmem:[%s5864_s0 + $0x80] sm:$0xff] }
  0xf3   :  { %v2932_v15 = vpack.c.bf16 %v2676_v13, %v2676_v13  ;;  %v2741_v16 = vpack.c.bf16 %v2485_v14, %v2485_v14  ;;  %v2549_v17 = vsel %vm2037_vm14, %v1513_v6, %v2293_v11  ;;  %v3969_v8 = vld [vmem:[%s5864_s0 + $0x280] sm:$0xff] }
  0xf4   :  { %3125 = vst.msk [vmem:[%s5866_s3 + $0x230] sm:$0xf] %vm2984_vm4, %v2868_v12  ;;  %v2805_v18 = vpack.c.bf16 %v2549_v17, %v2549_v17  ;;  %v1672_v19 = vpop.f32.mrf.mxu2  ;;  %v1832_v20 = vpop.f32.mrf.mxu3  ;;  %v4001_v9 = vld [vmem:[%s5864_s0 + $0x380] sm:$0xff] }
  0xf5   :  { %3189 = vst.msk [vmem:[%s5866_s3 + $0x330] sm:$0xf] %vm2984_vm4, %v2932_v15  ;;  %v1673_v23 = vadd.f32 %v4182_v36, %v1672_v19  ;;  %v1833_v24 = vadd.f32 %v4182_v36, %v1832_v20  ;;  %v1355_v25 = vpop.f32.mrf.mxu0  ;;  %v1515_v26 = vpop.f32.mrf.mxu1 }
  0xf6   :  { %2998 = vst.msk [vmem:[%s5866_s3 + $0x34] sm:$0xf] %vm2984_vm4, %v2741_v16  ;;  %v1356_v29 = vadd.f32 %v4182_v36, %v1355_v25  ;;  %v1516_v30 = vadd.f32 %v4182_v36, %v1515_v26  ;;  %v4653_v25 = vld [vmem:[%s5865_s2] ss:$0 sm:$0xff] }
  0xf7   :  { %3062 = vst.msk [vmem:[%s5866_s3 + $0x134] sm:$0xf] %vm2984_vm4, %v2805_v18  ;;  %vm2101_vm15 = vcmp.gt.f32.partialorder %v1673_v23, 0.0  ;;  %v2357_v31 = vmul.f32 0.1, %v1673_v23  ;;  %vm2165_vm0 = vcmp.gt.f32.partialorder %v1833_v24, 0.0 }
  0xf8   :  { %v2421_v32 = vmul.f32 0.1, %v1833_v24  ;;  %vm1974_vm2 = vcmp.gt.f32.partialorder %v1356_v29, 0.0  ;;  %v2230_v33 = vmul.f32 0.1, %v1356_v29  ;;  %vm2038_vm3 = vcmp.gt.f32.partialorder %v1516_v30, 0.0  ;;  %3776 = vmatmul.msk.bf16.gmra.mxu0 %vm922_vm1, %v3904_v21  ;;  %3808 = vmatmul.msk.bf16.gmra.mxu1 %vm922_vm1, %v3936_v22 }
  0xf9   :  { %v2613_v34 = vsel %vm2101_vm15, %v1673_v23, %v2357_v31  ;;  %v2294_v35 = vmul.f32 0.1, %v1516_v30  ;;  %3840 = vmatmul.msk.bf16.gmra.mxu2 %vm922_vm1, %v3968_v27  ;;  %3872 = vmatmul.msk.bf16.gmra.mxu3 %vm922_vm1, %v4000_v28 }
  0xfa   :  { %v2869_v37 = vpack.c.bf16 %v2613_v34, %v2613_v34  ;;  %v2677_v38 = vsel %vm2165_vm0, %v1833_v24, %v2421_v32  ;;  %v2486_v39 = vsel %vm1974_vm2, %v1356_v29, %v2230_v33 }
  0xfb   :  { %v2933_v40 = vpack.c.bf16 %v2677_v38, %v2677_v38  ;;  %v2742_v41 = vpack.c.bf16 %v2486_v39, %v2486_v39  ;;  %v2550_v42 = vsel %vm2038_vm3, %v1516_v30, %v2294_v35 }
  0xfc   :  { %3126 = vst.msk [vmem:[%s5866_s3 + $0x234] sm:$0xf] %vm2984_vm4, %v2869_v37  ;;  %v2806_v43 = vpack.c.bf16 %v2550_v42, %v2550_v42  ;;  %v1675_v44 = vpop.f32.mrf.mxu2  ;;  %v1835_v45 = vpop.f32.mrf.mxu3 }
  0xfd   :  { %3190 = vst.msk [vmem:[%s5866_s3 + $0x334] sm:$0xf] %vm2984_vm4, %v2933_v40  ;;  %v1676_v46 = vadd.f32 %v4182_v36, %v1675_v44  ;;  %v1836_v47 = vadd.f32 %v4182_v36, %v1835_v45  ;;  %v1357_v48 = vpop.f32.mrf.mxu0  ;;  %v1517_v49 = vpop.f32.mrf.mxu1 }
  0xfe   :  { %2999 = vst.msk [vmem:[%s5866_s3 + $0x38] sm:$0xf] %vm2984_vm4, %v2742_v41  ;;  %v1358_v50 = vadd.f32 %v4182_v36, %v1357_v48  ;;  %v1518_v51 = vadd.f32 %v4182_v36, %v1517_v49  ;;  %v3938_v48 = vld [vmem:[%s5864_s0 + $0x188] sm:$0xff] }
  0xff   :  { %3063 = vst.msk [vmem:[%s5866_s3 + $0x138] sm:$0xf] %vm2984_vm4, %v2806_v43  ;;  %vm2102_vm5 = vcmp.gt.f32.partialorder %v1676_v46, 0.0  ;;  %v2358_v52 = vmul.f32 0.1, %v1676_v46  ;;  %vm2166_vm6 = vcmp.gt.f32.partialorder %v1836_v47, 0.0 }
 0x100   :  { %v2422_v53 = vmul.f32 0.1, %v1836_v47  ;;  %vm1975_vm7 = vcmp.gt.f32.partialorder %v1358_v50, 0.0  ;;  %v2231_v54 = vmul.f32 0.1, %v1358_v50  ;;  %vm2039_vm8 = vcmp.gt.f32.partialorder %v1518_v51, 0.0 }
 0x101   :  { %v2614_v55 = vsel %vm2102_vm5, %v1676_v46, %v2358_v52  ;;  %v2295_v56 = vmul.f32 0.1, %v1518_v51 }
 0x102   :  { %v2870_v57 = vpack.c.bf16 %v2614_v55, %v2614_v55  ;;  %v2678_v58 = vsel %vm2166_vm6, %v1836_v47, %v2422_v53  ;;  %v2487_v59 = vsel %vm1975_vm7, %v1358_v50, %v2231_v54  ;;  %v3906_v47 = vld [vmem:[%s5864_s0 + $0x88] sm:$0xff] }
 0x103   :  { %v2934_v60 = vpack.c.bf16 %v2678_v58, %v2678_v58  ;;  %v2743_v61 = vpack.c.bf16 %v2487_v59, %v2487_v59  ;;  %v2551_v62 = vsel %vm2039_vm8, %v1518_v51, %v2295_v56  ;;  %v3970_v53 = vld [vmem:[%s5864_s0 + $0x288] sm:$0xff] }
 0x104   :  { %3127 = vst.msk [vmem:[%s5866_s3 + $0x238] sm:$0xf] %vm2984_vm4, %v2870_v57  ;;  %v2807_v63 = vpack.c.bf16 %v2551_v62, %v2551_v62  ;;  %v1677_v0 = vpop.f32.mrf.mxu2  ;;  %v1837_v1 = vpop.f32.mrf.mxu3  ;;  %v4002_v54 = vld [vmem:[%s5864_s0 + $0x388] sm:$0xff] }
 0x105   :  { %3191 = vst.msk [vmem:[%s5866_s3 + $0x338] sm:$0xf] %vm2984_vm4, %v2934_v60  ;;  %v1678_v4 = vadd.f32 %v4182_v36, %v1677_v0  ;;  %v1838_v5 = vadd.f32 %v4182_v36, %v1837_v1  ;;  %v1360_v6 = vpop.f32.mrf.mxu0  ;;  %v1520_v7 = vpop.f32.mrf.mxu1 }
 0x106   :  { %3000 = vst.msk [vmem:[%s5866_s3 + $0x3c] sm:$0xf] %vm2984_vm4, %v2743_v61  ;;  %v1361_v10 = vadd.f32 %v4182_v36, %v1360_v6  ;;  %v1521_v11 = vadd.f32 %v4182_v36, %v1520_v7 }
 0x107   :  { %3064 = vst.msk [vmem:[%s5866_s3 + $0x13c] sm:$0xf] %vm2984_vm4, %v2807_v63  ;;  %vm2103_vm9 = vcmp.gt.f32.partialorder %v1678_v4, 0.0  ;;  %v2359_v12 = vmul.f32 0.1, %v1678_v4  ;;  %vm2167_vm10 = vcmp.gt.f32.partialorder %v1838_v5, 0.0 }
 0x108   :  { %v2423_v13 = vmul.f32 0.1, %v1838_v5  ;;  %vm1976_vm11 = vcmp.gt.f32.partialorder %v1361_v10, 0.0  ;;  %v2232_v14 = vmul.f32 0.1, %v1361_v10  ;;  %vm2040_vm12 = vcmp.gt.f32.partialorder %v1521_v11, 0.0  ;;  %3777 = vmatmul.msk.bf16.gmra.mxu0 %vm922_vm1, %v3905_v2  ;;  %3809 = vmatmul.msk.bf16.gmra.mxu1 %vm922_vm1, %v3937_v3 }
 0x109   :  { %v2615_v15 = vsel %vm2103_vm9, %v1678_v4, %v2359_v12  ;;  %v2296_v16 = vmul.f32 0.1, %v1521_v11  ;;  %3841 = vmatmul.msk.bf16.gmra.mxu2 %vm922_vm1, %v3969_v8  ;;  %3873 = vmatmul.msk.bf16.gmra.mxu3 %vm922_vm1, %v4001_v9 }
 0x10a   :  { %v2871_v36 = vpack.c.bf16 %v2615_v15, %v2615_v15  ;;  %v2679_v17 = vsel %vm2167_vm10, %v1838_v5, %v2423_v13  ;;  %v2488_v18 = vsel %vm1976_vm11, %v1361_v10, %v2232_v14 }
 0x10b   :  { %v2935_v19 = vpack.c.bf16 %v2679_v17, %v2679_v17  ;;  %v2744_v20 = vpack.c.bf16 %v2488_v18, %v2488_v18  ;;  %v2552_v21 = vsel %vm2040_vm12, %v1521_v11, %v2296_v16 }
 0x10c   :  { %3128 = vst.msk [vmem:[%s5866_s3 + $0x23c] sm:$0xf] %vm2984_vm4, %v2871_v36  ;;  %v2808_v22 = vpack.c.bf16 %v2552_v21, %v2552_v21  ;;  %v1680_v23 = vpop.f32.mrf.mxu2  ;;  %v1840_v24 = vpop.f32.mrf.mxu3 }
 0x10d   :  { %3192 = vst.msk [vmem:[%s5866_s3 + $0x33c] sm:$0xf] %vm2984_vm4, %v2935_v19  ;;  %v1681_v26 = vadd.f32 %v4653_v25, %v1680_v23  ;;  %v1841_v27 = vadd.f32 %v4653_v25, %v1840_v24  ;;  %v1362_v28 = vpop.f32.mrf.mxu0  ;;  %v1522_v29 = vpop.f32.mrf.mxu1 }
 0x10e   :  { %3001 = vst.msk [vmem:[%s5866_s3 + $0x40] sm:$0xf] %vm2984_vm4, %v2744_v20  ;;  %v1363_v30 = vadd.f32 %v4653_v25, %v1362_v28  ;;  %v1523_v31 = vadd.f32 %v4653_v25, %v1522_v29  ;;  %v3939_v28 = vld [vmem:[%s5864_s0 + $0x190] sm:$0xff] }
 0x10f   :  { %3065 = vst.msk [vmem:[%s5866_s3 + $0x140] sm:$0xf] %vm2984_vm4, %v2808_v22  ;;  %vm2104_vm13 = vcmp.gt.f32.partialorder %v1681_v26, 0.0  ;;  %v2360_v32 = vmul.f32 0.1, %v1681_v26  ;;  %vm2168_vm14 = vcmp.gt.f32.partialorder %v1841_v27, 0.0 }
 0x110   :  { %v2424_v33 = vmul.f32 0.1, %v1841_v27  ;;  %vm1977_vm15 = vcmp.gt.f32.partialorder %v1363_v30, 0.0  ;;  %v2233_v34 = vmul.f32 0.1, %v1363_v30  ;;  %vm2041_vm0 = vcmp.gt.f32.partialorder %v1523_v31, 0.0 }
 0x111   :  { %v2616_v35 = vsel %vm2104_vm13, %v1681_v26, %v2360_v32  ;;  %v2297_v37 = vmul.f32 0.1, %v1523_v31 }
 0x112   :  { %v2872_v38 = vpack.c.bf16 %v2616_v35, %v2616_v35  ;;  %v2680_v39 = vsel %vm2168_vm14, %v1841_v27, %v2424_v33  ;;  %v2489_v40 = vsel %vm1977_vm15, %v1363_v30, %v2233_v34  ;;  %v3907_v27 = vld [vmem:[%s5864_s0 + $0x90] sm:$0xff] }
 0x113   :  { %v2936_v41 = vpack.c.bf16 %v2680_v39, %v2680_v39  ;;  %v2745_v42 = vpack.c.bf16 %v2489_v40, %v2489_v40  ;;  %v2553_v43 = vsel %vm2041_vm0, %v1523_v31, %v2297_v37  ;;  %v3971_v33 = vld [vmem:[%s5864_s0 + $0x290] sm:$0xff] }
 0x114   :  { %3129 = vst.msk [vmem:[%s5866_s3 + $0x240] sm:$0xf] %vm2984_vm4, %v2872_v38  ;;  %v2809_v44 = vpack.c.bf16 %v2553_v43, %v2553_v43  ;;  %v1682_v45 = vpop.f32.mrf.mxu2  ;;  %v1842_v46 = vpop.f32.mrf.mxu3  ;;  %v4003_v34 = vld [vmem:[%s5864_s0 + $0x390] sm:$0xff] }
 0x115   :  { %3193 = vst.msk [vmem:[%s5866_s3 + $0x340] sm:$0xf] %vm2984_vm4, %v2936_v41  ;;  %v1683_v49 = vadd.f32 %v4653_v25, %v1682_v45  ;;  %v1843_v50 = vadd.f32 %v4653_v25, %v1842_v46  ;;  %v1365_v51 = vpop.f32.mrf.mxu0  ;;  %v1525_v52 = vpop.f32.mrf.mxu1 }
 0x116   :  { %3002 = vst.msk [vmem:[%s5866_s3 + $0x44] sm:$0xf] %vm2984_vm4, %v2745_v42  ;;  %v1366_v55 = vadd.f32 %v4653_v25, %v1365_v51  ;;  %v1526_v56 = vadd.f32 %v4653_v25, %v1525_v52 }
 0x117   :  { %3066 = vst.msk [vmem:[%s5866_s3 + $0x144] sm:$0xf] %vm2984_vm4, %v2809_v44  ;;  %vm2105_vm2 = vcmp.gt.f32.partialorder %v1683_v49, 0.0  ;;  %v2361_v57 = vmul.f32 0.1, %v1683_v49  ;;  %vm2169_vm3 = vcmp.gt.f32.partialorder %v1843_v50, 0.0 }
 0x118   :  { %v2425_v58 = vmul.f32 0.1, %v1843_v50  ;;  %vm1978_vm5 = vcmp.gt.f32.partialorder %v1366_v55, 0.0  ;;  %v2234_v59 = vmul.f32 0.1, %v1366_v55  ;;  %vm2042_vm6 = vcmp.gt.f32.partialorder %v1526_v56, 0.0  ;;  %3778 = vmatmul.msk.bf16.gmra.mxu0 %vm922_vm1, %v3906_v47  ;;  %3810 = vmatmul.msk.bf16.gmra.mxu1 %vm922_vm1, %v3938_v48 }
 0x119   :  { %v2617_v60 = vsel %vm2105_vm2, %v1683_v49, %v2361_v57  ;;  %v2298_v61 = vmul.f32 0.1, %v1526_v56  ;;  %3842 = vmatmul.msk.bf16.gmra.mxu2 %vm922_vm1, %v3970_v53  ;;  %3874 = vmatmul.msk.bf16.gmra.mxu3 %vm922_vm1, %v4002_v54 }
 0x11a   :  { %v2873_v62 = vpack.c.bf16 %v2617_v60, %v2617_v60  ;;  %v2681_v63 = vsel %vm2169_vm3, %v1843_v50, %v2425_v58  ;;  %v2490_v0 = vsel %vm1978_vm5, %v1366_v55, %v2234_v59 }
 0x11b   :  { %v2937_v1 = vpack.c.bf16 %v2681_v63, %v2681_v63  ;;  %v2746_v2 = vpack.c.bf16 %v2490_v0, %v2490_v0  ;;  %v2554_v3 = vsel %vm2042_vm6, %v1526_v56, %v2298_v61 }
 0x11c   :  { %3130 = vst.msk [vmem:[%s5866_s3 + $0x244] sm:$0xf] %vm2984_vm4, %v2873_v62  ;;  %v2810_v4 = vpack.c.bf16 %v2554_v3, %v2554_v3  ;;  %v1685_v5 = vpop.f32.mrf.mxu2  ;;  %v1845_v6 = vpop.f32.mrf.mxu3 }
 0x11d   :  { %3194 = vst.msk [vmem:[%s5866_s3 + $0x344] sm:$0xf] %vm2984_vm4, %v2937_v1  ;;  %v1686_v7 = vadd.f32 %v4653_v25, %v1685_v5  ;;  %v1846_v8 = vadd.f32 %v4653_v25, %v1845_v6  ;;  %v1367_v9 = vpop.f32.mrf.mxu0  ;;  %v1527_v10 = vpop.f32.mrf.mxu1 }
 0x11e   :  { %3003 = vst.msk [vmem:[%s5866_s3 + $0x48] sm:$0xf] %vm2984_vm4, %v2746_v2  ;;  %v1368_v11 = vadd.f32 %v4653_v25, %v1367_v9  ;;  %v1528_v12 = vadd.f32 %v4653_v25, %v1527_v10  ;;  %v3940_v9 = vld [vmem:[%s5864_s0 + $0x198] sm:$0xff] }
 0x11f   :  { %3067 = vst.msk [vmem:[%s5866_s3 + $0x148] sm:$0xf] %vm2984_vm4, %v2810_v4  ;;  %vm2106_vm7 = vcmp.gt.f32.partialorder %v1686_v7, 0.0  ;;  %v2362_v13 = vmul.f32 0.1, %v1686_v7  ;;  %vm2170_vm8 = vcmp.gt.f32.partialorder %v1846_v8, 0.0 }
 0x120   :  { %v2426_v14 = vmul.f32 0.1, %v1846_v8  ;;  %vm1979_vm9 = vcmp.gt.f32.partialorder %v1368_v11, 0.0  ;;  %v2235_v15 = vmul.f32 0.1, %v1368_v11  ;;  %vm2043_vm10 = vcmp.gt.f32.partialorder %v1528_v12, 0.0 }
 0x121   :  { %v2618_v16 = vsel %vm2106_vm7, %v1686_v7, %v2362_v13  ;;  %v2299_v36 = vmul.f32 0.1, %v1528_v12 }
 0x122   :  { %v2874_v17 = vpack.c.bf16 %v2618_v16, %v2618_v16  ;;  %v2682_v18 = vsel %vm2170_vm8, %v1846_v8, %v2426_v14  ;;  %v2491_v19 = vsel %vm1979_vm9, %v1368_v11, %v2235_v15  ;;  %v3908_v8 = vld [vmem:[%s5864_s0 + $0x98] sm:$0xff] }
 0x123   :  { %v2938_v20 = vpack.c.bf16 %v2682_v18, %v2682_v18  ;;  %v2747_v21 = vpack.c.bf16 %v2491_v19, %v2491_v19  ;;  %v2555_v22 = vsel %vm2043_vm10, %v1528_v12, %v2299_v36  ;;  %v3972_v14 = vld [vmem:[%s5864_s0 + $0x298] sm:$0xff] }
 0x124   :  { %3131 = vst.msk [vmem:[%s5866_s3 + $0x248] sm:$0xf] %vm2984_vm4, %v2874_v17  ;;  %v2811_v23 = vpack.c.bf16 %v2555_v22, %v2555_v22  ;;  %v1687_v24 = vpop.f32.mrf.mxu2  ;;  %v1847_v26 = vpop.f32.mrf.mxu3  ;;  %v4004_v15 = vld [vmem:[%s5864_s0 + $0x398] sm:$0xff] }
 0x125   :  { %3195 = vst.msk [vmem:[%s5866_s3 + $0x348] sm:$0xf] %vm2984_vm4, %v2938_v20  ;;  %v1688_v29 = vadd.f32 %v4653_v25, %v1687_v24  ;;  %v1848_v30 = vadd.f32 %v4653_v25, %v1847_v26  ;;  %v1370_v31 = vpop.f32.mrf.mxu0  ;;  %v1530_v32 = vpop.f32.mrf.mxu1 }
 0x126   :  { %3004 = vst.msk [vmem:[%s5866_s3 + $0x4c] sm:$0xf] %vm2984_vm4, %v2747_v21  ;;  %v1371_v35 = vadd.f32 %v4653_v25, %v1370_v31  ;;  %v1531_v37 = vadd.f32 %v4653_v25, %v1530_v32 }
 0x127   :  { %3068 = vst.msk [vmem:[%s5866_s3 + $0x14c] sm:$0xf] %vm2984_vm4, %v2811_v23  ;;  %vm2107_vm11 = vcmp.gt.f32.partialorder %v1688_v29, 0.0  ;;  %v2363_v38 = vmul.f32 0.1, %v1688_v29  ;;  %vm2171_vm12 = vcmp.gt.f32.partialorder %v1848_v30, 0.0 }
 0x128   :  { %v2427_v39 = vmul.f32 0.1, %v1848_v30  ;;  %vm1980_vm13 = vcmp.gt.f32.partialorder %v1371_v35, 0.0  ;;  %v2236_v40 = vmul.f32 0.1, %v1371_v35  ;;  %vm2044_vm14 = vcmp.gt.f32.partialorder %v1531_v37, 0.0  ;;  %3779 = vmatmul.msk.bf16.gmra.mxu0 %vm922_vm1, %v3907_v27  ;;  %3811 = vmatmul.msk.bf16.gmra.mxu1 %vm922_vm1, %v3939_v28 }
 0x129   :  { %v2619_v41 = vsel %vm2107_vm11, %v1688_v29, %v2363_v38  ;;  %v2300_v42 = vmul.f32 0.1, %v1531_v37  ;;  %3843 = vmatmul.msk.bf16.gmra.mxu2 %vm922_vm1, %v3971_v33  ;;  %3875 = vmatmul.msk.bf16.gmra.mxu3 %vm922_vm1, %v4003_v34 }
 0x12a   :  { %v2875_v43 = vpack.c.bf16 %v2619_v41, %v2619_v41  ;;  %v2683_v44 = vsel %vm2171_vm12, %v1848_v30, %v2427_v39  ;;  %v2492_v45 = vsel %vm1980_vm13, %v1371_v35, %v2236_v40 }
 0x12b   :  { %v2939_v46 = vpack.c.bf16 %v2683_v44, %v2683_v44  ;;  %v2748_v47 = vpack.c.bf16 %v2492_v45, %v2492_v45  ;;  %v2556_v48 = vsel %vm2044_vm14, %v1531_v37, %v2300_v42 }
 0x12c   :  { %3132 = vst.msk [vmem:[%s5866_s3 + $0x24c] sm:$0xf] %vm2984_vm4, %v2875_v43  ;;  %v2812_v49 = vpack.c.bf16 %v2556_v48, %v2556_v48  ;;  %v1690_v50 = vpop.f32.mrf.mxu2  ;;  %v1850_v51 = vpop.f32.mrf.mxu3 }
 0x12d   :  { %3196 = vst.msk [vmem:[%s5866_s3 + $0x34c] sm:$0xf] %vm2984_vm4, %v2939_v46  ;;  %v1691_v52 = vadd.f32 %v4653_v25, %v1690_v50  ;;  %v1851_v53 = vadd.f32 %v4653_v25, %v1850_v51  ;;  %v1372_v54 = vpop.f32.mrf.mxu0  ;;  %v1532_v55 = vpop.f32.mrf.mxu1 }
 0x12e   :  { %3005 = vst.msk [vmem:[%s5866_s3 + $0x50] sm:$0xf] %vm2984_vm4, %v2748_v47  ;;  %v1373_v56 = vadd.f32 %v4653_v25, %v1372_v54  ;;  %v1533_v57 = vadd.f32 %v4653_v25, %v1532_v55  ;;  %v3941_v54 = vld [vmem:[%s5864_s0 + $0x1a0] sm:$0xff] }
 0x12f   :  { %3069 = vst.msk [vmem:[%s5866_s3 + $0x150] sm:$0xf] %vm2984_vm4, %v2812_v49  ;;  %vm2108_vm15 = vcmp.gt.f32.partialorder %v1691_v52, 0.0  ;;  %v2364_v58 = vmul.f32 0.1, %v1691_v52  ;;  %vm2172_vm0 = vcmp.gt.f32.partialorder %v1851_v53, 0.0 }
 0x130   :  { %v2428_v59 = vmul.f32 0.1, %v1851_v53  ;;  %vm1981_vm2 = vcmp.gt.f32.partialorder %v1373_v56, 0.0  ;;  %v2237_v60 = vmul.f32 0.1, %v1373_v56  ;;  %vm2045_vm3 = vcmp.gt.f32.partialorder %v1533_v57, 0.0 }
 0x131   :  { %v2620_v61 = vsel %vm2108_vm15, %v1691_v52, %v2364_v58  ;;  %v2301_v62 = vmul.f32 0.1, %v1533_v57 }
 0x132   :  { %v2876_v63 = vpack.c.bf16 %v2620_v61, %v2620_v61  ;;  %v2684_v0 = vsel %vm2172_vm0, %v1851_v53, %v2428_v59  ;;  %v2493_v1 = vsel %vm1981_vm2, %v1373_v56, %v2237_v60  ;;  %v3909_v53 = vld [vmem:[%s5864_s0 + $0xa0] sm:$0xff] }
 0x133   :  { %v2940_v2 = vpack.c.bf16 %v2684_v0, %v2684_v0  ;;  %v2749_v3 = vpack.c.bf16 %v2493_v1, %v2493_v1  ;;  %v2557_v4 = vsel %vm2045_vm3, %v1533_v57, %v2301_v62  ;;  %v3973_v59 = vld [vmem:[%s5864_s0 + $0x2a0] sm:$0xff] }
 0x134   :  { %3133 = vst.msk [vmem:[%s5866_s3 + $0x250] sm:$0xf] %vm2984_vm4, %v2876_v63  ;;  %v2813_v5 = vpack.c.bf16 %v2557_v4, %v2557_v4  ;;  %v1692_v6 = vpop.f32.mrf.mxu2  ;;  %v1852_v7 = vpop.f32.mrf.mxu3  ;;  %v4005_v60 = vld [vmem:[%s5864_s0 + $0x3a0] sm:$0xff] }
 0x135   :  { %3197 = vst.msk [vmem:[%s5866_s3 + $0x350] sm:$0xf] %vm2984_vm4, %v2940_v2  ;;  %v1693_v10 = vadd.f32 %v4653_v25, %v1692_v6  ;;  %v1853_v11 = vadd.f32 %v4653_v25, %v1852_v7  ;;  %v1375_v12 = vpop.f32.mrf.mxu0  ;;  %v1535_v13 = vpop.f32.mrf.mxu1 }
 0x136   :  { %3006 = vst.msk [vmem:[%s5866_s3 + $0x54] sm:$0xf] %vm2984_vm4, %v2749_v3  ;;  %v1376_v16 = vadd.f32 %v4653_v25, %v1375_v12  ;;  %v1536_v36 = vadd.f32 %v4653_v25, %v1535_v13 }
 0x137   :  { %3070 = vst.msk [vmem:[%s5866_s3 + $0x154] sm:$0xf] %vm2984_vm4, %v2813_v5  ;;  %vm2109_vm5 = vcmp.gt.f32.partialorder %v1693_v10, 0.0  ;;  %v2365_v17 = vmul.f32 0.1, %v1693_v10  ;;  %vm2173_vm6 = vcmp.gt.f32.partialorder %v1853_v11, 0.0 }
 0x138   :  { %v2429_v18 = vmul.f32 0.1, %v1853_v11  ;;  %vm1982_vm7 = vcmp.gt.f32.partialorder %v1376_v16, 0.0  ;;  %v2238_v19 = vmul.f32 0.1, %v1376_v16  ;;  %vm2046_vm8 = vcmp.gt.f32.partialorder %v1536_v36, 0.0  ;;  %3780 = vmatmul.msk.bf16.gmra.mxu0 %vm922_vm1, %v3908_v8  ;;  %3812 = vmatmul.msk.bf16.gmra.mxu1 %vm922_vm1, %v3940_v9 }
 0x139   :  { %v2621_v20 = vsel %vm2109_vm5, %v1693_v10, %v2365_v17  ;;  %v2302_v21 = vmul.f32 0.1, %v1536_v36  ;;  %3844 = vmatmul.msk.bf16.gmra.mxu2 %vm922_vm1, %v3972_v14  ;;  %3876 = vmatmul.msk.bf16.gmra.mxu3 %vm922_vm1, %v4004_v15 }
 0x13a   :  { %v2877_v22 = vpack.c.bf16 %v2621_v20, %v2621_v20  ;;  %v2685_v23 = vsel %vm2173_vm6, %v1853_v11, %v2429_v18  ;;  %v2494_v24 = vsel %vm1982_vm7, %v1376_v16, %v2238_v19 }
 0x13b   :  { %v2941_v26 = vpack.c.bf16 %v2685_v23, %v2685_v23  ;;  %v2750_v27 = vpack.c.bf16 %v2494_v24, %v2494_v24  ;;  %v2558_v28 = vsel %vm2046_vm8, %v1536_v36, %v2302_v21 }
 0x13c   :  { %3134 = vst.msk [vmem:[%s5866_s3 + $0x254] sm:$0xf] %vm2984_vm4, %v2877_v22  ;;  %v2814_v29 = vpack.c.bf16 %v2558_v28, %v2558_v28  ;;  %v1695_v30 = vpop.f32.mrf.mxu2  ;;  %v1855_v31 = vpop.f32.mrf.mxu3 }
 0x13d   :  { %3198 = vst.msk [vmem:[%s5866_s3 + $0x354] sm:$0xf] %vm2984_vm4, %v2941_v26  ;;  %v1696_v32 = vadd.f32 %v4653_v25, %v1695_v30  ;;  %v1856_v33 = vadd.f32 %v4653_v25, %v1855_v31  ;;  %v1377_v34 = vpop.f32.mrf.mxu0  ;;  %v1537_v35 = vpop.f32.mrf.mxu1 }
 0x13e   :  { %3007 = vst.msk [vmem:[%s5866_s3 + $0x58] sm:$0xf] %vm2984_vm4, %v2750_v27  ;;  %v1378_v37 = vadd.f32 %v4653_v25, %v1377_v34  ;;  %v1538_v38 = vadd.f32 %v4653_v25, %v1537_v35  ;;  %v3942_v34 = vld [vmem:[%s5864_s0 + $0x1a8] sm:$0xff] }
 0x13f   :  { %3071 = vst.msk [vmem:[%s5866_s3 + $0x158] sm:$0xf] %vm2984_vm4, %v2814_v29  ;;  %vm2110_vm9 = vcmp.gt.f32.partialorder %v1696_v32, 0.0  ;;  %v2366_v39 = vmul.f32 0.1, %v1696_v32  ;;  %vm2174_vm10 = vcmp.gt.f32.partialorder %v1856_v33, 0.0 }
 0x140   :  { %v2430_v40 = vmul.f32 0.1, %v1856_v33  ;;  %vm1983_vm11 = vcmp.gt.f32.partialorder %v1378_v37, 0.0  ;;  %v2239_v41 = vmul.f32 0.1, %v1378_v37  ;;  %vm2047_vm12 = vcmp.gt.f32.partialorder %v1538_v38, 0.0 }
 0x141   :  { %v2622_v42 = vsel %vm2110_vm9, %v1696_v32, %v2366_v39  ;;  %v2303_v43 = vmul.f32 0.1, %v1538_v38 }
 0x142   :  { %v2878_v44 = vpack.c.bf16 %v2622_v42, %v2622_v42  ;;  %v2686_v45 = vsel %vm2174_vm10, %v1856_v33, %v2430_v40  ;;  %v2495_v46 = vsel %vm1983_vm11, %v1378_v37, %v2239_v41  ;;  %v3910_v33 = vld [vmem:[%s5864_s0 + $0xa8] sm:$0xff] }
 0x143   :  { %v2942_v47 = vpack.c.bf16 %v2686_v45, %v2686_v45  ;;  %v2751_v48 = vpack.c.bf16 %v2495_v46, %v2495_v46  ;;  %v2559_v49 = vsel %vm2047_vm12, %v1538_v38, %v2303_v43  ;;  %v3974_v40 = vld [vmem:[%s5864_s0 + $0x2a8] sm:$0xff] }
 0x144   :  { %3135 = vst.msk [vmem:[%s5866_s3 + $0x258] sm:$0xf] %vm2984_vm4, %v2878_v44  ;;  %v2815_v50 = vpack.c.bf16 %v2559_v49, %v2559_v49  ;;  %v1697_v51 = vpop.f32.mrf.mxu2  ;;  %v1857_v52 = vpop.f32.mrf.mxu3  ;;  %v4006_v41 = vld [vmem:[%s5864_s0 + $0x3a8] sm:$0xff] }
 0x145   :  { %3199 = vst.msk [vmem:[%s5866_s3 + $0x358] sm:$0xf] %vm2984_vm4, %v2942_v47  ;;  %v1698_v55 = vadd.f32 %v4653_v25, %v1697_v51  ;;  %v1858_v56 = vadd.f32 %v4653_v25, %v1857_v52  ;;  %v1380_v57 = vpop.f32.mrf.mxu0  ;;  %v1540_v58 = vpop.f32.mrf.mxu1 }
 0x146   :  { %3008 = vst.msk [vmem:[%s5866_s3 + $0x5c] sm:$0xf] %vm2984_vm4, %v2751_v48  ;;  %v1381_v61 = vadd.f32 %v4653_v25, %v1380_v57  ;;  %v1541_v62 = vadd.f32 %v4653_v25, %v1540_v58 }
 0x147   :  { %3072 = vst.msk [vmem:[%s5866_s3 + $0x15c] sm:$0xf] %vm2984_vm4, %v2815_v50  ;;  %vm2111_vm13 = vcmp.gt.f32.partialorder %v1698_v55, 0.0  ;;  %v2367_v63 = vmul.f32 0.1, %v1698_v55  ;;  %vm2175_vm14 = vcmp.gt.f32.partialorder %v1858_v56, 0.0 }
 0x148   :  { %v2431_v0 = vmul.f32 0.1, %v1858_v56  ;;  %vm1984_vm15 = vcmp.gt.f32.partialorder %v1381_v61, 0.0  ;;  %v2240_v1 = vmul.f32 0.1, %v1381_v61  ;;  %vm2048_vm0 = vcmp.gt.f32.partialorder %v1541_v62, 0.0  ;;  %3781 = vmatmul.msk.bf16.gmra.mxu0 %vm922_vm1, %v3909_v53  ;;  %3813 = vmatmul.msk.bf16.gmra.mxu1 %vm922_vm1, %v3941_v54 }
 0x149   :  { %v2623_v2 = vsel %vm2111_vm13, %v1698_v55, %v2367_v63  ;;  %v2304_v3 = vmul.f32 0.1, %v1541_v62  ;;  %3845 = vmatmul.msk.bf16.gmra.mxu2 %vm922_vm1, %v3973_v59  ;;  %3877 = vmatmul.msk.bf16.gmra.mxu3 %vm922_vm1, %v4005_v60 }
 0x14a   :  { %v2879_v4 = vpack.c.bf16 %v2623_v2, %v2623_v2  ;;  %v2687_v5 = vsel %vm2175_vm14, %v1858_v56, %v2431_v0  ;;  %v2496_v6 = vsel %vm1984_vm15, %v1381_v61, %v2240_v1 }
 0x14b   :  { %v2943_v7 = vpack.c.bf16 %v2687_v5, %v2687_v5  ;;  %v2752_v8 = vpack.c.bf16 %v2496_v6, %v2496_v6  ;;  %v2560_v9 = vsel %vm2048_vm0, %v1541_v62, %v2304_v3 }
 0x14c   :  { %3136 = vst.msk [vmem:[%s5866_s3 + $0x25c] sm:$0xf] %vm2984_vm4, %v2879_v4  ;;  %v2816_v10 = vpack.c.bf16 %v2560_v9, %v2560_v9  ;;  %v1700_v11 = vpop.f32.mrf.mxu2  ;;  %v1860_v12 = vpop.f32.mrf.mxu3 }
 0x14d   :  { %3200 = vst.msk [vmem:[%s5866_s3 + $0x35c] sm:$0xf] %vm2984_vm4, %v2943_v7  ;;  %v1701_v13 = vadd.f32 %v4653_v25, %v1700_v11  ;;  %v1861_v14 = vadd.f32 %v4653_v25, %v1860_v12  ;;  %v1382_v15 = vpop.f32.mrf.mxu0  ;;  %v1542_v16 = vpop.f32.mrf.mxu1 }
 0x14e   :  { %3009 = vst.msk [vmem:[%s5866_s3 + $0x60] sm:$0xf] %vm2984_vm4, %v2752_v8  ;;  %v1383_v36 = vadd.f32 %v4653_v25, %v1382_v15  ;;  %v1543_v17 = vadd.f32 %v4653_v25, %v1542_v16  ;;  %v3943_v15 = vld [vmem:[%s5864_s0 + $0x1b0] sm:$0xff] }
 0x14f   :  { %3073 = vst.msk [vmem:[%s5866_s3 + $0x160] sm:$0xf] %vm2984_vm4, %v2816_v10  ;;  %vm2112_vm2 = vcmp.gt.f32.partialorder %v1701_v13, 0.0  ;;  %v2368_v18 = vmul.f32 0.1, %v1701_v13  ;;  %vm2176_vm3 = vcmp.gt.f32.partialorder %v1861_v14, 0.0 }
 0x150   :  { %v2432_v19 = vmul.f32 0.1, %v1861_v14  ;;  %vm1985_vm5 = vcmp.gt.f32.partialorder %v1383_v36, 0.0  ;;  %v2241_v20 = vmul.f32 0.1, %v1383_v36  ;;  %vm2049_vm6 = vcmp.gt.f32.partialorder %v1543_v17, 0.0 }
 0x151   :  { %v2624_v21 = vsel %vm2112_vm2, %v1701_v13, %v2368_v18  ;;  %v2305_v22 = vmul.f32 0.1, %v1543_v17 }
 0x152   :  { %v2880_v23 = vpack.c.bf16 %v2624_v21, %v2624_v21  ;;  %v2688_v24 = vsel %vm2176_vm3, %v1861_v14, %v2432_v19  ;;  %v2497_v26 = vsel %vm1985_vm5, %v1383_v36, %v2241_v20  ;;  %v3911_v14 = vld [vmem:[%s5864_s0 + $0xb0] sm:$0xff] }
 0x153   :  { %v2944_v27 = vpack.c.bf16 %v2688_v24, %v2688_v24  ;;  %v2753_v28 = vpack.c.bf16 %v2497_v26, %v2497_v26  ;;  %v2561_v29 = vsel %vm2049_vm6, %v1543_v17, %v2305_v22  ;;  %v3975_v19 = vld [vmem:[%s5864_s0 + $0x2b0] sm:$0xff] }
 0x154   :  { %3137 = vst.msk [vmem:[%s5866_s3 + $0x260] sm:$0xf] %vm2984_vm4, %v2880_v23  ;;  %v2817_v30 = vpack.c.bf16 %v2561_v29, %v2561_v29  ;;  %v1702_v31 = vpop.f32.mrf.mxu2  ;;  %v1862_v32 = vpop.f32.mrf.mxu3  ;;  %v4007_v20 = vld [vmem:[%s5864_s0 + $0x3b0] sm:$0xff] }
 0x155   :  { %3201 = vst.msk [vmem:[%s5866_s3 + $0x360] sm:$0xf] %vm2984_vm4, %v2944_v27  ;;  %v1703_v35 = vadd.f32 %v4653_v25, %v1702_v31  ;;  %v1863_v37 = vadd.f32 %v4653_v25, %v1862_v32  ;;  %v1385_v38 = vpop.f32.mrf.mxu0  ;;  %v1545_v39 = vpop.f32.mrf.mxu1 }
 0x156   :  { %3010 = vst.msk [vmem:[%s5866_s3 + $0x64] sm:$0xf] %vm2984_vm4, %v2753_v28  ;;  %v1386_v42 = vadd.f32 %v4653_v25, %v1385_v38  ;;  %v1546_v43 = vadd.f32 %v4653_v25, %v1545_v39 }
 0x157   :  { %3074 = vst.msk [vmem:[%s5866_s3 + $0x164] sm:$0xf] %vm2984_vm4, %v2817_v30  ;;  %vm2113_vm7 = vcmp.gt.f32.partialorder %v1703_v35, 0.0  ;;  %v2369_v44 = vmul.f32 0.1, %v1703_v35  ;;  %vm2177_vm8 = vcmp.gt.f32.partialorder %v1863_v37, 0.0 }
 0x158   :  { %v2433_v45 = vmul.f32 0.1, %v1863_v37  ;;  %vm1986_vm9 = vcmp.gt.f32.partialorder %v1386_v42, 0.0  ;;  %v2242_v46 = vmul.f32 0.1, %v1386_v42  ;;  %vm2050_vm10 = vcmp.gt.f32.partialorder %v1546_v43, 0.0  ;;  %3782 = vmatmul.msk.bf16.gmra.mxu0 %vm922_vm1, %v3910_v33  ;;  %3814 = vmatmul.msk.bf16.gmra.mxu1 %vm922_vm1, %v3942_v34 }
 0x159   :  { %v2625_v47 = vsel %vm2113_vm7, %v1703_v35, %v2369_v44  ;;  %v2306_v48 = vmul.f32 0.1, %v1546_v43  ;;  %3846 = vmatmul.msk.bf16.gmra.mxu2 %vm922_vm1, %v3974_v40  ;;  %3878 = vmatmul.msk.bf16.gmra.mxu3 %vm922_vm1, %v4006_v41 }
 0x15a   :  { %v2881_v49 = vpack.c.bf16 %v2625_v47, %v2625_v47  ;;  %v2689_v50 = vsel %vm2177_vm8, %v1863_v37, %v2433_v45  ;;  %v2498_v51 = vsel %vm1986_vm9, %v1386_v42, %v2242_v46 }
 0x15b   :  { %v2945_v52 = vpack.c.bf16 %v2689_v50, %v2689_v50  ;;  %v2754_v53 = vpack.c.bf16 %v2498_v51, %v2498_v51  ;;  %v2562_v54 = vsel %vm2050_vm10, %v1546_v43, %v2306_v48 }
 0x15c   :  { %3138 = vst.msk [vmem:[%s5866_s3 + $0x264] sm:$0xf] %vm2984_vm4, %v2881_v49  ;;  %v2818_v55 = vpack.c.bf16 %v2562_v54, %v2562_v54  ;;  %v1705_v56 = vpop.f32.mrf.mxu2  ;;  %v1865_v57 = vpop.f32.mrf.mxu3 }
 0x15d   :  { %3202 = vst.msk [vmem:[%s5866_s3 + $0x364] sm:$0xf] %vm2984_vm4, %v2945_v52  ;;  %v1706_v58 = vadd.f32 %v4653_v25, %v1705_v56  ;;  %v1866_v59 = vadd.f32 %v4653_v25, %v1865_v57  ;;  %v1387_v60 = vpop.f32.mrf.mxu0  ;;  %v1547_v61 = vpop.f32.mrf.mxu1 }
 0x15e   :  { %3011 = vst.msk [vmem:[%s5866_s3 + $0x68] sm:$0xf] %vm2984_vm4, %v2754_v53  ;;  %v1388_v62 = vadd.f32 %v4653_v25, %v1387_v60  ;;  %v1548_v63 = vadd.f32 %v4653_v25, %v1547_v61  ;;  %v3944_v60 = vld [vmem:[%s5864_s0 + $0x1b8] sm:$0xff] }
 0x15f   :  { %3075 = vst.msk [vmem:[%s5866_s3 + $0x168] sm:$0xf] %vm2984_vm4, %v2818_v55  ;;  %vm2114_vm11 = vcmp.gt.f32.partialorder %v1706_v58, 0.0  ;;  %v2370_v0 = vmul.f32 0.1, %v1706_v58  ;;  %vm2178_vm12 = vcmp.gt.f32.partialorder %v1866_v59, 0.0 }
 0x160   :  { %v2434_v1 = vmul.f32 0.1, %v1866_v59  ;;  %vm1987_vm13 = vcmp.gt.f32.partialorder %v1388_v62, 0.0  ;;  %v2243_v2 = vmul.f32 0.1, %v1388_v62  ;;  %vm2051_vm14 = vcmp.gt.f32.partialorder %v1548_v63, 0.0 }
 0x161   :  { %v2626_v3 = vsel %vm2114_vm11, %v1706_v58, %v2370_v0  ;;  %v2307_v4 = vmul.f32 0.1, %v1548_v63 }
 0x162   :  { %v2882_v5 = vpack.c.bf16 %v2626_v3, %v2626_v3  ;;  %v2690_v6 = vsel %vm2178_vm12, %v1866_v59, %v2434_v1  ;;  %v2499_v7 = vsel %vm1987_vm13, %v1388_v62, %v2243_v2  ;;  %v3912_v59 = vld [vmem:[%s5864_s0 + $0xb8] sm:$0xff] }
 0x163   :  { %v2946_v8 = vpack.c.bf16 %v2690_v6, %v2690_v6  ;;  %v2755_v9 = vpack.c.bf16 %v2499_v7, %v2499_v7  ;;  %v2563_v10 = vsel %vm2051_vm14, %v1548_v63, %v2307_v4  ;;  %v3976_v1 = vld [vmem:[%s5864_s0 + $0x2b8] sm:$0xff] }
 0x164   :  { %3139 = vst.msk [vmem:[%s5866_s3 + $0x268] sm:$0xf] %vm2984_vm4, %v2882_v5  ;;  %v2819_v11 = vpack.c.bf16 %v2563_v10, %v2563_v10  ;;  %v1707_v12 = vpop.f32.mrf.mxu2  ;;  %v1867_v13 = vpop.f32.mrf.mxu3  ;;  %v4008_v2 = vld [vmem:[%s5864_s0 + $0x3b8] sm:$0xff] }
 0x165   :  { %3203 = vst.msk [vmem:[%s5866_s3 + $0x368] sm:$0xf] %vm2984_vm4, %v2946_v8  ;;  %v1708_v16 = vadd.f32 %v4653_v25, %v1707_v12  ;;  %v1868_v36 = vadd.f32 %v4653_v25, %v1867_v13  ;;  %v1390_v17 = vpop.f32.mrf.mxu0  ;;  %v1550_v18 = vpop.f32.mrf.mxu1 }
 0x166   :  { %3012 = vst.msk [vmem:[%s5866_s3 + $0x6c] sm:$0xf] %vm2984_vm4, %v2755_v9  ;;  %v1391_v21 = vadd.f32 %v4653_v25, %v1390_v17  ;;  %v1551_v22 = vadd.f32 %v4653_v25, %v1550_v18 }
 0x167   :  { %3076 = vst.msk [vmem:[%s5866_s3 + $0x16c] sm:$0xf] %vm2984_vm4, %v2819_v11  ;;  %vm2115_vm15 = vcmp.gt.f32.partialorder %v1708_v16, 0.0  ;;  %v2371_v23 = vmul.f32 0.1, %v1708_v16  ;;  %vm2179_vm0 = vcmp.gt.f32.partialorder %v1868_v36, 0.0 }
 0x168   :  { %v2435_v24 = vmul.f32 0.1, %v1868_v36  ;;  %vm1988_vm2 = vcmp.gt.f32.partialorder %v1391_v21, 0.0  ;;  %v2244_v26 = vmul.f32 0.1, %v1391_v21  ;;  %vm2052_vm3 = vcmp.gt.f32.partialorder %v1551_v22, 0.0  ;;  %3783 = vmatmul.msk.bf16.gmra.mxu0 %vm922_vm1, %v3911_v14  ;;  %3815 = vmatmul.msk.bf16.gmra.mxu1 %vm922_vm1, %v3943_v15 }
 0x169   :  { %v2627_v27 = vsel %vm2115_vm15, %v1708_v16, %v2371_v23  ;;  %v2308_v28 = vmul.f32 0.1, %v1551_v22  ;;  %3847 = vmatmul.msk.bf16.gmra.mxu2 %vm922_vm1, %v3975_v19  ;;  %3879 = vmatmul.msk.bf16.gmra.mxu3 %vm922_vm1, %v4007_v20 }
 0x16a   :  { %v2883_v29 = vpack.c.bf16 %v2627_v27, %v2627_v27  ;;  %v2691_v30 = vsel %vm2179_vm0, %v1868_v36, %v2435_v24  ;;  %v2500_v31 = vsel %vm1988_vm2, %v1391_v21, %v2244_v26 }
 0x16b   :  { %v2947_v32 = vpack.c.bf16 %v2691_v30, %v2691_v30  ;;  %v2756_v33 = vpack.c.bf16 %v2500_v31, %v2500_v31  ;;  %v2564_v34 = vsel %vm2052_vm3, %v1551_v22, %v2308_v28 }
 0x16c   :  { %3140 = vst.msk [vmem:[%s5866_s3 + $0x26c] sm:$0xf] %vm2984_vm4, %v2883_v29  ;;  %v2820_v35 = vpack.c.bf16 %v2564_v34, %v2564_v34  ;;  %v1710_v37 = vpop.f32.mrf.mxu2  ;;  %v1870_v38 = vpop.f32.mrf.mxu3 }
 0x16d   :  { %3204 = vst.msk [vmem:[%s5866_s3 + $0x36c] sm:$0xf] %vm2984_vm4, %v2947_v32  ;;  %v1711_v39 = vadd.f32 %v4653_v25, %v1710_v37  ;;  %v1871_v40 = vadd.f32 %v4653_v25, %v1870_v38  ;;  %v1392_v41 = vpop.f32.mrf.mxu0  ;;  %v1552_v42 = vpop.f32.mrf.mxu1 }
 0x16e   :  { %3013 = vst.msk [vmem:[%s5866_s3 + $0x70] sm:$0xf] %vm2984_vm4, %v2756_v33  ;;  %v1393_v43 = vadd.f32 %v4653_v25, %v1392_v41  ;;  %v1553_v44 = vadd.f32 %v4653_v25, %v1552_v42  ;;  %v3945_v41 = vld [vmem:[%s5864_s0 + $0x1c0] sm:$0xff] }
 0x16f   :  { %3077 = vst.msk [vmem:[%s5866_s3 + $0x170] sm:$0xf] %vm2984_vm4, %v2820_v35  ;;  %vm2116_vm5 = vcmp.gt.f32.partialorder %v1711_v39, 0.0  ;;  %v2372_v45 = vmul.f32 0.1, %v1711_v39  ;;  %vm2180_vm6 = vcmp.gt.f32.partialorder %v1871_v40, 0.0 }
 0x170   :  { %v2436_v46 = vmul.f32 0.1, %v1871_v40  ;;  %vm1989_vm7 = vcmp.gt.f32.partialorder %v1393_v43, 0.0  ;;  %v2245_v47 = vmul.f32 0.1, %v1393_v43  ;;  %vm2053_vm8 = vcmp.gt.f32.partialorder %v1553_v44, 0.0 }
 0x171   :  { %v2628_v48 = vsel %vm2116_vm5, %v1711_v39, %v2372_v45  ;;  %v2309_v49 = vmul.f32 0.1, %v1553_v44 }
 0x172   :  { %v2884_v50 = vpack.c.bf16 %v2628_v48, %v2628_v48  ;;  %v2692_v51 = vsel %vm2180_vm6, %v1871_v40, %v2436_v46  ;;  %v2501_v52 = vsel %vm1989_vm7, %v1393_v43, %v2245_v47  ;;  %v3913_v40 = vld [vmem:[%s5864_s0 + $0xc0] sm:$0xff] }
 0x173   :  { %v2948_v53 = vpack.c.bf16 %v2692_v51, %v2692_v51  ;;  %v2757_v54 = vpack.c.bf16 %v2501_v52, %v2501_v52  ;;  %v2565_v55 = vsel %vm2053_vm8, %v1553_v44, %v2309_v49  ;;  %v3977_v46 = vld [vmem:[%s5864_s0 + $0x2c0] sm:$0xff] }
 0x174   :  { %3141 = vst.msk [vmem:[%s5866_s3 + $0x270] sm:$0xf] %vm2984_vm4, %v2884_v50  ;;  %v2821_v56 = vpack.c.bf16 %v2565_v55, %v2565_v55  ;;  %v1712_v57 = vpop.f32.mrf.mxu2  ;;  %v1872_v58 = vpop.f32.mrf.mxu3  ;;  %v4009_v47 = vld [vmem:[%s5864_s0 + $0x3c0] sm:$0xff] }
 0x175   :  { %3205 = vst.msk [vmem:[%s5866_s3 + $0x370] sm:$0xf] %vm2984_vm4, %v2948_v53  ;;  %v1713_v61 = vadd.f32 %v4653_v25, %v1712_v57  ;;  %v1873_v62 = vadd.f32 %v4653_v25, %v1872_v58  ;;  %v1395_v63 = vpop.f32.mrf.mxu0  ;;  %v1555_v0 = vpop.f32.mrf.mxu1 }
 0x176   :  { %3014 = vst.msk [vmem:[%s5866_s3 + $0x74] sm:$0xf] %vm2984_vm4, %v2757_v54  ;;  %v1396_v3 = vadd.f32 %v4653_v25, %v1395_v63  ;;  %v1556_v4 = vadd.f32 %v4653_v25, %v1555_v0  ;;  %v5106_v63 = vld [vmem:[%s5865_s2] ss:$0 sm:$0xff] }
 0x177   :  { %3078 = vst.msk [vmem:[%s5866_s3 + $0x174] sm:$0xf] %vm2984_vm4, %v2821_v56  ;;  %vm2117_vm9 = vcmp.gt.f32.partialorder %v1713_v61, 0.0  ;;  %v2373_v5 = vmul.f32 0.1, %v1713_v61  ;;  %vm2181_vm10 = vcmp.gt.f32.partialorder %v1873_v62, 0.0 }
 0x178   :  { %v2437_v6 = vmul.f32 0.1, %v1873_v62  ;;  %vm1990_vm11 = vcmp.gt.f32.partialorder %v1396_v3, 0.0  ;;  %v2246_v7 = vmul.f32 0.1, %v1396_v3  ;;  %vm2054_vm12 = vcmp.gt.f32.partialorder %v1556_v4, 0.0  ;;  %3784 = vmatmul.msk.bf16.gmra.mxu0 %vm922_vm1, %v3912_v59  ;;  %3816 = vmatmul.msk.bf16.gmra.mxu1 %vm922_vm1, %v3944_v60 }
 0x179   :  { %v2629_v8 = vsel %vm2117_vm9, %v1713_v61, %v2373_v5  ;;  %v2310_v9 = vmul.f32 0.1, %v1556_v4  ;;  %3848 = vmatmul.msk.bf16.gmra.mxu2 %vm922_vm1, %v3976_v1  ;;  %3880 = vmatmul.msk.bf16.gmra.mxu3 %vm922_vm1, %v4008_v2 }
 0x17a   :  { %v2885_v10 = vpack.c.bf16 %v2629_v8, %v2629_v8  ;;  %v2693_v11 = vsel %vm2181_vm10, %v1873_v62, %v2437_v6  ;;  %v2502_v12 = vsel %vm1990_vm11, %v1396_v3, %v2246_v7 }
 0x17b   :  { %v2949_v13 = vpack.c.bf16 %v2693_v11, %v2693_v11  ;;  %v2758_v14 = vpack.c.bf16 %v2502_v12, %v2502_v12  ;;  %v2566_v15 = vsel %vm2054_vm12, %v1556_v4, %v2310_v9 }
 0x17c   :  { %3142 = vst.msk [vmem:[%s5866_s3 + $0x274] sm:$0xf] %vm2984_vm4, %v2885_v10  ;;  %v2822_v16 = vpack.c.bf16 %v2566_v15, %v2566_v15  ;;  %v1715_v36 = vpop.f32.mrf.mxu2  ;;  %v1875_v17 = vpop.f32.mrf.mxu3 }
 0x17d   :  { %3206 = vst.msk [vmem:[%s5866_s3 + $0x374] sm:$0xf] %vm2984_vm4, %v2949_v13  ;;  %v1716_v18 = vadd.f32 %v4653_v25, %v1715_v36  ;;  %v1876_v19 = vadd.f32 %v4653_v25, %v1875_v17  ;;  %v1397_v20 = vpop.f32.mrf.mxu0  ;;  %v1557_v21 = vpop.f32.mrf.mxu1 }
 0x17e   :  { %3015 = vst.msk [vmem:[%s5866_s3 + $0x78] sm:$0xf] %vm2984_vm4, %v2758_v14  ;;  %v1398_v22 = vadd.f32 %v4653_v25, %v1397_v20  ;;  %v1558_v23 = vadd.f32 %v4653_v25, %v1557_v21  ;;  %v3946_v20 = vld [vmem:[%s5864_s0 + $0x1c8] sm:$0xff] }
 0x17f   :  { %3079 = vst.msk [vmem:[%s5866_s3 + $0x178] sm:$0xf] %vm2984_vm4, %v2822_v16  ;;  %vm2118_vm13 = vcmp.gt.f32.partialorder %v1716_v18, 0.0  ;;  %v2374_v24 = vmul.f32 0.1, %v1716_v18  ;;  %vm2182_vm14 = vcmp.gt.f32.partialorder %v1876_v19, 0.0 }
 0x180   :  { %v2438_v26 = vmul.f32 0.1, %v1876_v19  ;;  %vm1991_vm15 = vcmp.gt.f32.partialorder %v1398_v22, 0.0  ;;  %v2247_v27 = vmul.f32 0.1, %v1398_v22  ;;  %vm2055_vm0 = vcmp.gt.f32.partialorder %v1558_v23, 0.0 }
 0x181   :  { %v2630_v28 = vsel %vm2118_vm13, %v1716_v18, %v2374_v24  ;;  %v2311_v29 = vmul.f32 0.1, %v1558_v23 }
 0x182   :  { %v2886_v30 = vpack.c.bf16 %v2630_v28, %v2630_v28  ;;  %v2694_v31 = vsel %vm2182_vm14, %v1876_v19, %v2438_v26  ;;  %v2503_v32 = vsel %vm1991_vm15, %v1398_v22, %v2247_v27  ;;  %v3914_v19 = vld [vmem:[%s5864_s0 + $0xc8] sm:$0xff] }
 0x183   :  { %v2950_v33 = vpack.c.bf16 %v2694_v31, %v2694_v31  ;;  %v2759_v34 = vpack.c.bf16 %v2503_v32, %v2503_v32  ;;  %v2567_v35 = vsel %vm2055_vm0, %v1558_v23, %v2311_v29  ;;  %v3978_v26 = vld [vmem:[%s5864_s0 + $0x2c8] sm:$0xff] }
 0x184   :  { %3143 = vst.msk [vmem:[%s5866_s3 + $0x278] sm:$0xf] %vm2984_vm4, %v2886_v30  ;;  %v2823_v37 = vpack.c.bf16 %v2567_v35, %v2567_v35  ;;  %v1717_v38 = vpop.f32.mrf.mxu2  ;;  %v1877_v39 = vpop.f32.mrf.mxu3  ;;  %v4010_v27 = vld [vmem:[%s5864_s0 + $0x3c8] sm:$0xff] }
 0x185   :  { %3207 = vst.msk [vmem:[%s5866_s3 + $0x378] sm:$0xf] %vm2984_vm4, %v2950_v33  ;;  %v1718_v42 = vadd.f32 %v4653_v25, %v1717_v38  ;;  %v1878_v43 = vadd.f32 %v4653_v25, %v1877_v39  ;;  %v1400_v44 = vpop.f32.mrf.mxu0  ;;  %v1560_v45 = vpop.f32.mrf.mxu1 }
 0x186   :  { %3016 = vst.msk [vmem:[%s5866_s3 + $0x7c] sm:$0xf] %vm2984_vm4, %v2759_v34  ;;  %v1401_v48 = vadd.f32 %v4653_v25, %v1400_v44  ;;  %v1561_v49 = vadd.f32 %v4653_v25, %v1560_v45 }
 0x187   :  { %3080 = vst.msk [vmem:[%s5866_s3 + $0x17c] sm:$0xf] %vm2984_vm4, %v2823_v37  ;;  %vm2119_vm2 = vcmp.gt.f32.partialorder %v1718_v42, 0.0  ;;  %v2375_v50 = vmul.f32 0.1, %v1718_v42  ;;  %vm2183_vm3 = vcmp.gt.f32.partialorder %v1878_v43, 0.0 }
 0x188   :  { %v2439_v51 = vmul.f32 0.1, %v1878_v43  ;;  %vm1992_vm5 = vcmp.gt.f32.partialorder %v1401_v48, 0.0  ;;  %v2248_v52 = vmul.f32 0.1, %v1401_v48  ;;  %vm2056_vm6 = vcmp.gt.f32.partialorder %v1561_v49, 0.0  ;;  %3785 = vmatmul.msk.bf16.gmra.mxu0 %vm922_vm1, %v3913_v40  ;;  %3817 = vmatmul.msk.bf16.gmra.mxu1 %vm922_vm1, %v3945_v41 }
 0x189   :  { %v2631_v53 = vsel %vm2119_vm2, %v1718_v42, %v2375_v50  ;;  %v2312_v54 = vmul.f32 0.1, %v1561_v49  ;;  %3849 = vmatmul.msk.bf16.gmra.mxu2 %vm922_vm1, %v3977_v46  ;;  %3881 = vmatmul.msk.bf16.gmra.mxu3 %vm922_vm1, %v4009_v47 }
 0x18a   :  { %v2887_v25 = vpack.c.bf16 %v2631_v53, %v2631_v53  ;;  %v2695_v55 = vsel %vm2183_vm3, %v1878_v43, %v2439_v51  ;;  %v2504_v56 = vsel %vm1992_vm5, %v1401_v48, %v2248_v52 }
 0x18b   :  { %v2951_v57 = vpack.c.bf16 %v2695_v55, %v2695_v55  ;;  %v2760_v58 = vpack.c.bf16 %v2504_v56, %v2504_v56  ;;  %v2568_v59 = vsel %vm2056_vm6, %v1561_v49, %v2312_v54 }
 0x18c   :  { %3144 = vst.msk [vmem:[%s5866_s3 + $0x27c] sm:$0xf] %vm2984_vm4, %v2887_v25  ;;  %v2824_v60 = vpack.c.bf16 %v2568_v59, %v2568_v59  ;;  %v1720_v61 = vpop.f32.mrf.mxu2  ;;  %v1880_v62 = vpop.f32.mrf.mxu3 }
 0x18d   :  { %3208 = vst.msk [vmem:[%s5866_s3 + $0x37c] sm:$0xf] %vm2984_vm4, %v2951_v57  ;;  %v1721_v0 = vadd.f32 %v5106_v63, %v1720_v61  ;;  %v1881_v1 = vadd.f32 %v5106_v63, %v1880_v62  ;;  %v1402_v2 = vpop.f32.mrf.mxu0  ;;  %v1562_v3 = vpop.f32.mrf.mxu1 }
 0x18e   :  { %3017 = vst.msk [vmem:[%s5866_s3 + $0x80] sm:$0xf] %vm2984_vm4, %v2760_v58  ;;  %v1403_v4 = vadd.f32 %v5106_v63, %v1402_v2  ;;  %v1563_v5 = vadd.f32 %v5106_v63, %v1562_v3  ;;  %v3947_v2 = vld [vmem:[%s5864_s0 + $0x1d0] sm:$0xff] }
 0x18f   :  { %3081 = vst.msk [vmem:[%s5866_s3 + $0x180] sm:$0xf] %vm2984_vm4, %v2824_v60  ;;  %vm2120_vm7 = vcmp.gt.f32.partialorder %v1721_v0, 0.0  ;;  %v2376_v6 = vmul.f32 0.1, %v1721_v0  ;;  %vm2184_vm8 = vcmp.gt.f32.partialorder %v1881_v1, 0.0 }
 0x190   :  { %v2440_v7 = vmul.f32 0.1, %v1881_v1  ;;  %vm1993_vm9 = vcmp.gt.f32.partialorder %v1403_v4, 0.0  ;;  %v2249_v8 = vmul.f32 0.1, %v1403_v4  ;;  %vm2057_vm10 = vcmp.gt.f32.partialorder %v1563_v5, 0.0 }
 0x191   :  { %v2632_v9 = vsel %vm2120_vm7, %v1721_v0, %v2376_v6  ;;  %v2313_v10 = vmul.f32 0.1, %v1563_v5 }
 0x192   :  { %v2888_v11 = vpack.c.bf16 %v2632_v9, %v2632_v9  ;;  %v2696_v12 = vsel %vm2184_vm8, %v1881_v1, %v2440_v7  ;;  %v2505_v13 = vsel %vm1993_vm9, %v1403_v4, %v2249_v8  ;;  %v3915_v1 = vld [vmem:[%s5864_s0 + $0xd0] sm:$0xff] }
 0x193   :  { %v2952_v14 = vpack.c.bf16 %v2696_v12, %v2696_v12  ;;  %v2761_v15 = vpack.c.bf16 %v2505_v13, %v2505_v13  ;;  %v2569_v16 = vsel %vm2057_vm10, %v1563_v5, %v2313_v10  ;;  %v3979_v7 = vld [vmem:[%s5864_s0 + $0x2d0] sm:$0xff] }
 0x194   :  { %3145 = vst.msk [vmem:[%s5866_s3 + $0x280] sm:$0xf] %vm2984_vm4, %v2888_v11  ;;  %v2825_v36 = vpack.c.bf16 %v2569_v16, %v2569_v16  ;;  %v1722_v17 = vpop.f32.mrf.mxu2  ;;  %v1882_v18 = vpop.f32.mrf.mxu3  ;;  %v4011_v8 = vld [vmem:[%s5864_s0 + $0x3d0] sm:$0xff] }
 0x195   :  { %3209 = vst.msk [vmem:[%s5866_s3 + $0x380] sm:$0xf] %vm2984_vm4, %v2952_v14  ;;  %v1723_v21 = vadd.f32 %v5106_v63, %v1722_v17  ;;  %v1883_v22 = vadd.f32 %v5106_v63, %v1882_v18  ;;  %v1405_v23 = vpop.f32.mrf.mxu0  ;;  %v1565_v24 = vpop.f32.mrf.mxu1 }
 0x196   :  { %3018 = vst.msk [vmem:[%s5866_s3 + $0x84] sm:$0xf] %vm2984_vm4, %v2761_v15  ;;  %v1406_v28 = vadd.f32 %v5106_v63, %v1405_v23  ;;  %v1566_v29 = vadd.f32 %v5106_v63, %v1565_v24 }
 0x197   :  { %3082 = vst.msk [vmem:[%s5866_s3 + $0x184] sm:$0xf] %vm2984_vm4, %v2825_v36  ;;  %vm2121_vm11 = vcmp.gt.f32.partialorder %v1723_v21, 0.0  ;;  %v2377_v30 = vmul.f32 0.1, %v1723_v21  ;;  %vm2185_vm12 = vcmp.gt.f32.partialorder %v1883_v22, 0.0 }
 0x198   :  { %v2441_v31 = vmul.f32 0.1, %v1883_v22  ;;  %vm1994_vm13 = vcmp.gt.f32.partialorder %v1406_v28, 0.0  ;;  %v2250_v32 = vmul.f32 0.1, %v1406_v28  ;;  %vm2058_vm14 = vcmp.gt.f32.partialorder %v1566_v29, 0.0  ;;  %3786 = vmatmul.msk.bf16.gmra.mxu0 %vm922_vm1, %v3914_v19  ;;  %3818 = vmatmul.msk.bf16.gmra.mxu1 %vm922_vm1, %v3946_v20 }
 0x199   :  { %v2633_v33 = vsel %vm2121_vm11, %v1723_v21, %v2377_v30  ;;  %v2314_v34 = vmul.f32 0.1, %v1566_v29  ;;  %3850 = vmatmul.msk.bf16.gmra.mxu2 %vm922_vm1, %v3978_v26  ;;  %3882 = vmatmul.msk.bf16.gmra.mxu3 %vm922_vm1, %v4010_v27 }
 0x19a   :  { %v2889_v35 = vpack.c.bf16 %v2633_v33, %v2633_v33  ;;  %v2697_v37 = vsel %vm2185_vm12, %v1883_v22, %v2441_v31  ;;  %v2506_v38 = vsel %vm1994_vm13, %v1406_v28, %v2250_v32 }
 0x19b   :  { %v2953_v39 = vpack.c.bf16 %v2697_v37, %v2697_v37  ;;  %v2762_v40 = vpack.c.bf16 %v2506_v38, %v2506_v38  ;;  %v2570_v41 = vsel %vm2058_vm14, %v1566_v29, %v2314_v34 }
 0x19c   :  { %3146 = vst.msk [vmem:[%s5866_s3 + $0x284] sm:$0xf] %vm2984_vm4, %v2889_v35  ;;  %v2826_v42 = vpack.c.bf16 %v2570_v41, %v2570_v41  ;;  %v1725_v43 = vpop.f32.mrf.mxu2  ;;  %v1885_v44 = vpop.f32.mrf.mxu3 }
 0x19d   :  { %3210 = vst.msk [vmem:[%s5866_s3 + $0x384] sm:$0xf] %vm2984_vm4, %v2953_v39  ;;  %v1726_v45 = vadd.f32 %v5106_v63, %v1725_v43  ;;  %v1886_v46 = vadd.f32 %v5106_v63, %v1885_v44  ;;  %v1407_v47 = vpop.f32.mrf.mxu0  ;;  %v1567_v48 = vpop.f32.mrf.mxu1 }
 0x19e   :  { %3019 = vst.msk [vmem:[%s5866_s3 + $0x88] sm:$0xf] %vm2984_vm4, %v2762_v40  ;;  %v1408_v49 = vadd.f32 %v5106_v63, %v1407_v47  ;;  %v1568_v50 = vadd.f32 %v5106_v63, %v1567_v48  ;;  %v3948_v47 = vld [vmem:[%s5864_s0 + $0x1d8] sm:$0xff] }
 0x19f   :  { %3083 = vst.msk [vmem:[%s5866_s3 + $0x188] sm:$0xf] %vm2984_vm4, %v2826_v42  ;;  %vm2122_vm15 = vcmp.gt.f32.partialorder %v1726_v45, 0.0  ;;  %v2378_v51 = vmul.f32 0.1, %v1726_v45  ;;  %vm2186_vm0 = vcmp.gt.f32.partialorder %v1886_v46, 0.0 }
 0x1a0   :  { %v2442_v52 = vmul.f32 0.1, %v1886_v46  ;;  %vm1995_vm2 = vcmp.gt.f32.partialorder %v1408_v49, 0.0  ;;  %v2251_v53 = vmul.f32 0.1, %v1408_v49  ;;  %vm2059_vm3 = vcmp.gt.f32.partialorder %v1568_v50, 0.0 }
 0x1a1   :  { %v2634_v54 = vsel %vm2122_vm15, %v1726_v45, %v2378_v51  ;;  %v2315_v25 = vmul.f32 0.1, %v1568_v50 }
 0x1a2   :  { %v2890_v55 = vpack.c.bf16 %v2634_v54, %v2634_v54  ;;  %v2698_v56 = vsel %vm2186_vm0, %v1886_v46, %v2442_v52  ;;  %v2507_v57 = vsel %vm1995_vm2, %v1408_v49, %v2251_v53  ;;  %v3916_v46 = vld [vmem:[%s5864_s0 + $0xd8] sm:$0xff] }
 0x1a3   :  { %v2954_v58 = vpack.c.bf16 %v2698_v56, %v2698_v56  ;;  %v2763_v59 = vpack.c.bf16 %v2507_v57, %v2507_v57  ;;  %v2571_v60 = vsel %vm2059_vm3, %v1568_v50, %v2315_v25  ;;  %v3980_v52 = vld [vmem:[%s5864_s0 + $0x2d8] sm:$0xff] }
 0x1a4   :  { %3147 = vst.msk [vmem:[%s5866_s3 + $0x288] sm:$0xf] %vm2984_vm4, %v2890_v55  ;;  %v2827_v61 = vpack.c.bf16 %v2571_v60, %v2571_v60  ;;  %v1727_v62 = vpop.f32.mrf.mxu2  ;;  %v1887_v0 = vpop.f32.mrf.mxu3  ;;  %v4012_v53 = vld [vmem:[%s5864_s0 + $0x3d8] sm:$0xff] }
 0x1a5   :  { %3211 = vst.msk [vmem:[%s5866_s3 + $0x388] sm:$0xf] %vm2984_vm4, %v2954_v58  ;;  %v1728_v3 = vadd.f32 %v5106_v63, %v1727_v62  ;;  %v1888_v4 = vadd.f32 %v5106_v63, %v1887_v0  ;;  %v1410_v5 = vpop.f32.mrf.mxu0  ;;  %v1570_v6 = vpop.f32.mrf.mxu1 }
 0x1a6   :  { %3020 = vst.msk [vmem:[%s5866_s3 + $0x8c] sm:$0xf] %vm2984_vm4, %v2763_v59  ;;  %v1411_v9 = vadd.f32 %v5106_v63, %v1410_v5  ;;  %v1571_v10 = vadd.f32 %v5106_v63, %v1570_v6 }
 0x1a7   :  { %3084 = vst.msk [vmem:[%s5866_s3 + $0x18c] sm:$0xf] %vm2984_vm4, %v2827_v61  ;;  %vm2123_vm5 = vcmp.gt.f32.partialorder %v1728_v3, 0.0  ;;  %v2379_v11 = vmul.f32 0.1, %v1728_v3  ;;  %vm2187_vm6 = vcmp.gt.f32.partialorder %v1888_v4, 0.0 }
 0x1a8   :  { %v2443_v12 = vmul.f32 0.1, %v1888_v4  ;;  %vm1996_vm7 = vcmp.gt.f32.partialorder %v1411_v9, 0.0  ;;  %v2252_v13 = vmul.f32 0.1, %v1411_v9  ;;  %vm2060_vm8 = vcmp.gt.f32.partialorder %v1571_v10, 0.0  ;;  %3787 = vmatmul.msk.bf16.gmra.mxu0 %vm922_vm1, %v3915_v1  ;;  %3819 = vmatmul.msk.bf16.gmra.mxu1 %vm922_vm1, %v3947_v2 }
 0x1a9   :  { %v2635_v14 = vsel %vm2123_vm5, %v1728_v3, %v2379_v11  ;;  %v2316_v15 = vmul.f32 0.1, %v1571_v10  ;;  %3851 = vmatmul.msk.bf16.gmra.mxu2 %vm922_vm1, %v3979_v7  ;;  %3883 = vmatmul.msk.bf16.gmra.mxu3 %vm922_vm1, %v4011_v8 }
 0x1aa   :  { %v2891_v16 = vpack.c.bf16 %v2635_v14, %v2635_v14  ;;  %v2699_v36 = vsel %vm2187_vm6, %v1888_v4, %v2443_v12  ;;  %v2508_v17 = vsel %vm1996_vm7, %v1411_v9, %v2252_v13 }
 0x1ab   :  { %v2955_v18 = vpack.c.bf16 %v2699_v36, %v2699_v36  ;;  %v2764_v19 = vpack.c.bf16 %v2508_v17, %v2508_v17  ;;  %v2572_v20 = vsel %vm2060_vm8, %v1571_v10, %v2316_v15 }
 0x1ac   :  { %3148 = vst.msk [vmem:[%s5866_s3 + $0x28c] sm:$0xf] %vm2984_vm4, %v2891_v16  ;;  %v2828_v21 = vpack.c.bf16 %v2572_v20, %v2572_v20  ;;  %v1730_v22 = vpop.f32.mrf.mxu2  ;;  %v1890_v23 = vpop.f32.mrf.mxu3 }
 0x1ad   :  { %3212 = vst.msk [vmem:[%s5866_s3 + $0x38c] sm:$0xf] %vm2984_vm4, %v2955_v18  ;;  %v1731_v24 = vadd.f32 %v5106_v63, %v1730_v22  ;;  %v1891_v26 = vadd.f32 %v5106_v63, %v1890_v23  ;;  %v1412_v27 = vpop.f32.mrf.mxu0  ;;  %v1572_v28 = vpop.f32.mrf.mxu1 }
 0x1ae   :  { %3021 = vst.msk [vmem:[%s5866_s3 + $0x90] sm:$0xf] %vm2984_vm4, %v2764_v19  ;;  %v1413_v29 = vadd.f32 %v5106_v63, %v1412_v27  ;;  %v1573_v30 = vadd.f32 %v5106_v63, %v1572_v28  ;;  %v3949_v27 = vld [vmem:[%s5864_s0 + $0x1e0] sm:$0xff] }
 0x1af   :  { %3085 = vst.msk [vmem:[%s5866_s3 + $0x190] sm:$0xf] %vm2984_vm4, %v2828_v21  ;;  %vm2124_vm9 = vcmp.gt.f32.partialorder %v1731_v24, 0.0  ;;  %v2380_v31 = vmul.f32 0.1, %v1731_v24  ;;  %vm2188_vm10 = vcmp.gt.f32.partialorder %v1891_v26, 0.0 }
 0x1b0   :  { %v2444_v32 = vmul.f32 0.1, %v1891_v26  ;;  %vm1997_vm11 = vcmp.gt.f32.partialorder %v1413_v29, 0.0  ;;  %v2253_v33 = vmul.f32 0.1, %v1413_v29  ;;  %vm2061_vm12 = vcmp.gt.f32.partialorder %v1573_v30, 0.0 }
 0x1b1   :  { %v2636_v34 = vsel %vm2124_vm9, %v1731_v24, %v2380_v31  ;;  %v2317_v35 = vmul.f32 0.1, %v1573_v30 }
 0x1b2   :  { %v2892_v37 = vpack.c.bf16 %v2636_v34, %v2636_v34  ;;  %v2700_v38 = vsel %vm2188_vm10, %v1891_v26, %v2444_v32  ;;  %v2509_v39 = vsel %vm1997_vm11, %v1413_v29, %v2253_v33  ;;  %v3917_v26 = vld [vmem:[%s5864_s0 + $0xe0] sm:$0xff] }
 0x1b3   :  { %v2956_v40 = vpack.c.bf16 %v2700_v38, %v2700_v38  ;;  %v2765_v41 = vpack.c.bf16 %v2509_v39, %v2509_v39  ;;  %v2573_v42 = vsel %vm2061_vm12, %v1573_v30, %v2317_v35  ;;  %v3981_v32 = vld [vmem:[%s5864_s0 + $0x2e0] sm:$0xff] }
 0x1b4   :  { %3149 = vst.msk [vmem:[%s5866_s3 + $0x290] sm:$0xf] %vm2984_vm4, %v2892_v37  ;;  %v2829_v43 = vpack.c.bf16 %v2573_v42, %v2573_v42  ;;  %v1732_v44 = vpop.f32.mrf.mxu2  ;;  %v1892_v45 = vpop.f32.mrf.mxu3  ;;  %v4013_v33 = vld [vmem:[%s5864_s0 + $0x3e0] sm:$0xff] }
 0x1b5   :  { %3213 = vst.msk [vmem:[%s5866_s3 + $0x390] sm:$0xf] %vm2984_vm4, %v2956_v40  ;;  %v1733_v48 = vadd.f32 %v5106_v63, %v1732_v44  ;;  %v1893_v49 = vadd.f32 %v5106_v63, %v1892_v45  ;;  %v1415_v50 = vpop.f32.mrf.mxu0  ;;  %v1575_v51 = vpop.f32.mrf.mxu1 }
 0x1b6   :  { %3022 = vst.msk [vmem:[%s5866_s3 + $0x94] sm:$0xf] %vm2984_vm4, %v2765_v41  ;;  %v1416_v54 = vadd.f32 %v5106_v63, %v1415_v50  ;;  %v1576_v25 = vadd.f32 %v5106_v63, %v1575_v51 }
 0x1b7   :  { %3086 = vst.msk [vmem:[%s5866_s3 + $0x194] sm:$0xf] %vm2984_vm4, %v2829_v43  ;;  %vm2125_vm13 = vcmp.gt.f32.partialorder %v1733_v48, 0.0  ;;  %v2381_v55 = vmul.f32 0.1, %v1733_v48  ;;  %vm2189_vm14 = vcmp.gt.f32.partialorder %v1893_v49, 0.0 }
 0x1b8   :  { %v2445_v56 = vmul.f32 0.1, %v1893_v49  ;;  %vm1998_vm15 = vcmp.gt.f32.partialorder %v1416_v54, 0.0  ;;  %v2254_v57 = vmul.f32 0.1, %v1416_v54  ;;  %vm2062_vm0 = vcmp.gt.f32.partialorder %v1576_v25, 0.0  ;;  %3788 = vmatmul.msk.bf16.gmra.mxu0 %vm922_vm1, %v3916_v46  ;;  %3820 = vmatmul.msk.bf16.gmra.mxu1 %vm922_vm1, %v3948_v47 }
 0x1b9   :  { %v2637_v58 = vsel %vm2125_vm13, %v1733_v48, %v2381_v55  ;;  %v2318_v59 = vmul.f32 0.1, %v1576_v25  ;;  %3852 = vmatmul.msk.bf16.gmra.mxu2 %vm922_vm1, %v3980_v52  ;;  %3884 = vmatmul.msk.bf16.gmra.mxu3 %vm922_vm1, %v4012_v53 }
 0x1ba   :  { %v2893_v60 = vpack.c.bf16 %v2637_v58, %v2637_v58  ;;  %v2701_v61 = vsel %vm2189_vm14, %v1893_v49, %v2445_v56  ;;  %v2510_v62 = vsel %vm1998_vm15, %v1416_v54, %v2254_v57 }
 0x1bb   :  { %v2957_v0 = vpack.c.bf16 %v2701_v61, %v2701_v61  ;;  %v2766_v1 = vpack.c.bf16 %v2510_v62, %v2510_v62  ;;  %v2574_v2 = vsel %vm2062_vm0, %v1576_v25, %v2318_v59 }
 0x1bc   :  { %3150 = vst.msk [vmem:[%s5866_s3 + $0x294] sm:$0xf] %vm2984_vm4, %v2893_v60  ;;  %v2830_v3 = vpack.c.bf16 %v2574_v2, %v2574_v2  ;;  %v1735_v4 = vpop.f32.mrf.mxu2  ;;  %v1895_v5 = vpop.f32.mrf.mxu3 }
 0x1bd   :  { %3214 = vst.msk [vmem:[%s5866_s3 + $0x394] sm:$0xf] %vm2984_vm4, %v2957_v0  ;;  %v1736_v6 = vadd.f32 %v5106_v63, %v1735_v4  ;;  %v1896_v7 = vadd.f32 %v5106_v63, %v1895_v5  ;;  %v1417_v8 = vpop.f32.mrf.mxu0  ;;  %v1577_v9 = vpop.f32.mrf.mxu1 }
 0x1be   :  { %3023 = vst.msk [vmem:[%s5866_s3 + $0x98] sm:$0xf] %vm2984_vm4, %v2766_v1  ;;  %v1418_v10 = vadd.f32 %v5106_v63, %v1417_v8  ;;  %v1578_v11 = vadd.f32 %v5106_v63, %v1577_v9  ;;  %v3950_v8 = vld [vmem:[%s5864_s0 + $0x1e8] sm:$0xff] }
 0x1bf   :  { %3087 = vst.msk [vmem:[%s5866_s3 + $0x198] sm:$0xf] %vm2984_vm4, %v2830_v3  ;;  %vm2126_vm2 = vcmp.gt.f32.partialorder %v1736_v6, 0.0  ;;  %v2382_v12 = vmul.f32 0.1, %v1736_v6  ;;  %vm2190_vm3 = vcmp.gt.f32.partialorder %v1896_v7, 0.0 }
 0x1c0   :  { %v2446_v13 = vmul.f32 0.1, %v1896_v7  ;;  %vm1999_vm5 = vcmp.gt.f32.partialorder %v1418_v10, 0.0  ;;  %v2255_v14 = vmul.f32 0.1, %v1418_v10  ;;  %vm2063_vm6 = vcmp.gt.f32.partialorder %v1578_v11, 0.0 }
 0x1c1   :  { %v2638_v15 = vsel %vm2126_vm2, %v1736_v6, %v2382_v12  ;;  %v2319_v16 = vmul.f32 0.1, %v1578_v11 }
 0x1c2   :  { %v2894_v36 = vpack.c.bf16 %v2638_v15, %v2638_v15  ;;  %v2702_v17 = vsel %vm2190_vm3, %v1896_v7, %v2446_v13  ;;  %v2511_v18 = vsel %vm1999_vm5, %v1418_v10, %v2255_v14  ;;  %v3918_v7 = vld [vmem:[%s5864_s0 + $0xe8] sm:$0xff] }
 0x1c3   :  { %v2958_v19 = vpack.c.bf16 %v2702_v17, %v2702_v17  ;;  %v2767_v20 = vpack.c.bf16 %v2511_v18, %v2511_v18  ;;  %v2575_v21 = vsel %vm2063_vm6, %v1578_v11, %v2319_v16  ;;  %v3982_v13 = vld [vmem:[%s5864_s0 + $0x2e8] sm:$0xff] }
 0x1c4   :  { %3151 = vst.msk [vmem:[%s5866_s3 + $0x298] sm:$0xf] %vm2984_vm4, %v2894_v36  ;;  %v2831_v22 = vpack.c.bf16 %v2575_v21, %v2575_v21  ;;  %v1737_v23 = vpop.f32.mrf.mxu2  ;;  %v1897_v24 = vpop.f32.mrf.mxu3  ;;  %v4014_v14 = vld [vmem:[%s5864_s0 + $0x3e8] sm:$0xff] }
 0x1c5   :  { %3215 = vst.msk [vmem:[%s5866_s3 + $0x398] sm:$0xf] %vm2984_vm4, %v2958_v19  ;;  %v1738_v28 = vadd.f32 %v5106_v63, %v1737_v23  ;;  %v1898_v29 = vadd.f32 %v5106_v63, %v1897_v24  ;;  %v1420_v30 = vpop.f32.mrf.mxu0  ;;  %v1580_v31 = vpop.f32.mrf.mxu1 }
 0x1c6   :  { %3024 = vst.msk [vmem:[%s5866_s3 + $0x9c] sm:$0xf] %vm2984_vm4, %v2767_v20  ;;  %v1421_v34 = vadd.f32 %v5106_v63, %v1420_v30  ;;  %v1581_v35 = vadd.f32 %v5106_v63, %v1580_v31 }
 0x1c7   :  { %3088 = vst.msk [vmem:[%s5866_s3 + $0x19c] sm:$0xf] %vm2984_vm4, %v2831_v22  ;;  %vm2127_vm7 = vcmp.gt.f32.partialorder %v1738_v28, 0.0  ;;  %v2383_v37 = vmul.f32 0.1, %v1738_v28  ;;  %vm2191_vm8 = vcmp.gt.f32.partialorder %v1898_v29, 0.0 }
 0x1c8   :  { %v2447_v38 = vmul.f32 0.1, %v1898_v29  ;;  %vm2000_vm9 = vcmp.gt.f32.partialorder %v1421_v34, 0.0  ;;  %v2256_v39 = vmul.f32 0.1, %v1421_v34  ;;  %vm2064_vm10 = vcmp.gt.f32.partialorder %v1581_v35, 0.0  ;;  %3789 = vmatmul.msk.bf16.gmra.mxu0 %vm922_vm1, %v3917_v26  ;;  %3821 = vmatmul.msk.bf16.gmra.mxu1 %vm922_vm1, %v3949_v27 }
 0x1c9   :  { %v2639_v40 = vsel %vm2127_vm7, %v1738_v28, %v2383_v37  ;;  %v2320_v41 = vmul.f32 0.1, %v1581_v35  ;;  %3853 = vmatmul.msk.bf16.gmra.mxu2 %vm922_vm1, %v3981_v32  ;;  %3885 = vmatmul.msk.bf16.gmra.mxu3 %vm922_vm1, %v4013_v33 }
 0x1ca   :  { %v2895_v42 = vpack.c.bf16 %v2639_v40, %v2639_v40  ;;  %v2703_v43 = vsel %vm2191_vm8, %v1898_v29, %v2447_v38  ;;  %v2512_v44 = vsel %vm2000_vm9, %v1421_v34, %v2256_v39 }
 0x1cb   :  { %v2959_v45 = vpack.c.bf16 %v2703_v43, %v2703_v43  ;;  %v2768_v46 = vpack.c.bf16 %v2512_v44, %v2512_v44  ;;  %v2576_v47 = vsel %vm2064_vm10, %v1581_v35, %v2320_v41 }
 0x1cc   :  { %3152 = vst.msk [vmem:[%s5866_s3 + $0x29c] sm:$0xf] %vm2984_vm4, %v2895_v42  ;;  %v2832_v48 = vpack.c.bf16 %v2576_v47, %v2576_v47  ;;  %v1740_v49 = vpop.f32.mrf.mxu2  ;;  %v1900_v50 = vpop.f32.mrf.mxu3 }
 0x1cd   :  { %3216 = vst.msk [vmem:[%s5866_s3 + $0x39c] sm:$0xf] %vm2984_vm4, %v2959_v45  ;;  %v1741_v51 = vadd.f32 %v5106_v63, %v1740_v49  ;;  %v1901_v52 = vadd.f32 %v5106_v63, %v1900_v50  ;;  %v1422_v53 = vpop.f32.mrf.mxu0  ;;  %v1582_v54 = vpop.f32.mrf.mxu1 }
 0x1ce   :  { %3025 = vst.msk [vmem:[%s5866_s3 + $0xa0] sm:$0xf] %vm2984_vm4, %v2768_v46  ;;  %v1423_v25 = vadd.f32 %v5106_v63, %v1422_v53  ;;  %v1583_v55 = vadd.f32 %v5106_v63, %v1582_v54  ;;  %v3951_v53 = vld [vmem:[%s5864_s0 + $0x1f0] sm:$0xff] }
 0x1cf   :  { %3089 = vst.msk [vmem:[%s5866_s3 + $0x1a0] sm:$0xf] %vm2984_vm4, %v2832_v48  ;;  %vm2128_vm11 = vcmp.gt.f32.partialorder %v1741_v51, 0.0  ;;  %v2384_v56 = vmul.f32 0.1, %v1741_v51  ;;  %vm2192_vm12 = vcmp.gt.f32.partialorder %v1901_v52, 0.0 }
 0x1d0   :  { %v2448_v57 = vmul.f32 0.1, %v1901_v52  ;;  %vm2001_vm13 = vcmp.gt.f32.partialorder %v1423_v25, 0.0  ;;  %v2257_v58 = vmul.f32 0.1, %v1423_v25  ;;  %vm2065_vm14 = vcmp.gt.f32.partialorder %v1583_v55, 0.0 }
 0x1d1   :  { %v2640_v59 = vsel %vm2128_vm11, %v1741_v51, %v2384_v56  ;;  %v2321_v60 = vmul.f32 0.1, %v1583_v55 }
 0x1d2   :  { %v2896_v61 = vpack.c.bf16 %v2640_v59, %v2640_v59  ;;  %v2704_v62 = vsel %vm2192_vm12, %v1901_v52, %v2448_v57  ;;  %v2513_v0 = vsel %vm2001_vm13, %v1423_v25, %v2257_v58  ;;  %v3919_v52 = vld [vmem:[%s5864_s0 + $0xf0] sm:$0xff] }
 0x1d3   :  { %v2960_v1 = vpack.c.bf16 %v2704_v62, %v2704_v62  ;;  %v2769_v2 = vpack.c.bf16 %v2513_v0, %v2513_v0  ;;  %v2577_v3 = vsel %vm2065_vm14, %v1583_v55, %v2321_v60  ;;  %v3983_v57 = vld [vmem:[%s5864_s0 + $0x2f0] sm:$0xff] }
 0x1d4   :  { %3153 = vst.msk [vmem:[%s5866_s3 + $0x2a0] sm:$0xf] %vm2984_vm4, %v2896_v61  ;;  %v2833_v4 = vpack.c.bf16 %v2577_v3, %v2577_v3  ;;  %v1742_v5 = vpop.f32.mrf.mxu2  ;;  %v1902_v6 = vpop.f32.mrf.mxu3  ;;  %v4015_v58 = vld [vmem:[%s5864_s0 + $0x3f0] sm:$0xff] }
 0x1d5   :  { %3217 = vst.msk [vmem:[%s5866_s3 + $0x3a0] sm:$0xf] %vm2984_vm4, %v2960_v1  ;;  %v1743_v9 = vadd.f32 %v5106_v63, %v1742_v5  ;;  %v1903_v10 = vadd.f32 %v5106_v63, %v1902_v6  ;;  %v1425_v11 = vpop.f32.mrf.mxu0  ;;  %v1585_v12 = vpop.f32.mrf.mxu1 }
 0x1d6   :  { %3026 = vst.msk [vmem:[%s5866_s3 + $0xa4] sm:$0xf] %vm2984_vm4, %v2769_v2  ;;  %v1426_v15 = vadd.f32 %v5106_v63, %v1425_v11  ;;  %v1586_v16 = vadd.f32 %v5106_v63, %v1585_v12 }
 0x1d7   :  { %3090 = vst.msk [vmem:[%s5866_s3 + $0x1a4] sm:$0xf] %vm2984_vm4, %v2833_v4  ;;  %vm2129_vm15 = vcmp.gt.f32.partialorder %v1743_v9, 0.0  ;;  %v2385_v36 = vmul.f32 0.1, %v1743_v9  ;;  %vm2193_vm0 = vcmp.gt.f32.partialorder %v1903_v10, 0.0 }
 0x1d8   :  { %v2449_v17 = vmul.f32 0.1, %v1903_v10  ;;  %vm2002_vm2 = vcmp.gt.f32.partialorder %v1426_v15, 0.0  ;;  %v2258_v18 = vmul.f32 0.1, %v1426_v15  ;;  %vm2066_vm3 = vcmp.gt.f32.partialorder %v1586_v16, 0.0  ;;  %3790 = vmatmul.msk.bf16.gmra.mxu0 %vm922_vm1, %v3918_v7  ;;  %3822 = vmatmul.msk.bf16.gmra.mxu1 %vm922_vm1, %v3950_v8 }
 0x1d9   :  { %v2641_v19 = vsel %vm2129_vm15, %v1743_v9, %v2385_v36  ;;  %v2322_v20 = vmul.f32 0.1, %v1586_v16  ;;  %3854 = vmatmul.msk.bf16.gmra.mxu2 %vm922_vm1, %v3982_v13  ;;  %3886 = vmatmul.msk.bf16.gmra.mxu3 %vm922_vm1, %v4014_v14 }
 0x1da   :  { %v2897_v21 = vpack.c.bf16 %v2641_v19, %v2641_v19  ;;  %v2705_v22 = vsel %vm2193_vm0, %v1903_v10, %v2449_v17  ;;  %v2514_v23 = vsel %vm2002_vm2, %v1426_v15, %v2258_v18 }
 0x1db   :  { %v2961_v24 = vpack.c.bf16 %v2705_v22, %v2705_v22  ;;  %v2770_v26 = vpack.c.bf16 %v2514_v23, %v2514_v23  ;;  %v2578_v27 = vsel %vm2066_vm3, %v1586_v16, %v2322_v20 }
 0x1dc   :  { %3154 = vst.msk [vmem:[%s5866_s3 + $0x2a4] sm:$0xf] %vm2984_vm4, %v2897_v21  ;;  %v2834_v28 = vpack.c.bf16 %v2578_v27, %v2578_v27  ;;  %v1745_v29 = vpop.f32.mrf.mxu2  ;;  %v1905_v30 = vpop.f32.mrf.mxu3 }
 0x1dd   :  { %3218 = vst.msk [vmem:[%s5866_s3 + $0x3a4] sm:$0xf] %vm2984_vm4, %v2961_v24  ;;  %v1746_v31 = vadd.f32 %v5106_v63, %v1745_v29  ;;  %v1906_v32 = vadd.f32 %v5106_v63, %v1905_v30  ;;  %v1427_v33 = vpop.f32.mrf.mxu0  ;;  %v1587_v34 = vpop.f32.mrf.mxu1 }
 0x1de   :  { %3027 = vst.msk [vmem:[%s5866_s3 + $0xa8] sm:$0xf] %vm2984_vm4, %v2770_v26  ;;  %v1428_v35 = vadd.f32 %v5106_v63, %v1427_v33  ;;  %v1588_v37 = vadd.f32 %v5106_v63, %v1587_v34  ;;  %v3952_v33 = vld [vmem:[%s5864_s0 + $0x1f8] sm:$0xff] }
 0x1df   :  { %3091 = vst.msk [vmem:[%s5866_s3 + $0x1a8] sm:$0xf] %vm2984_vm4, %v2834_v28  ;;  %vm2130_vm5 = vcmp.gt.f32.partialorder %v1746_v31, 0.0  ;;  %v2386_v38 = vmul.f32 0.1, %v1746_v31  ;;  %vm2194_vm6 = vcmp.gt.f32.partialorder %v1906_v32, 0.0 }
 0x1e0   :  { %v2450_v39 = vmul.f32 0.1, %v1906_v32  ;;  %vm2003_vm7 = vcmp.gt.f32.partialorder %v1428_v35, 0.0  ;;  %v2259_v40 = vmul.f32 0.1, %v1428_v35  ;;  %vm2067_vm8 = vcmp.gt.f32.partialorder %v1588_v37, 0.0 }
 0x1e1   :  { %v2642_v41 = vsel %vm2130_vm5, %v1746_v31, %v2386_v38  ;;  %v2323_v42 = vmul.f32 0.1, %v1588_v37 }
 0x1e2   :  { %v2898_v43 = vpack.c.bf16 %v2642_v41, %v2642_v41  ;;  %v2706_v44 = vsel %vm2194_vm6, %v1906_v32, %v2450_v39  ;;  %v2515_v45 = vsel %vm2003_vm7, %v1428_v35, %v2259_v40  ;;  %v3920_v32 = vld [vmem:[%s5864_s0 + $0xf8] sm:$0xff] }
 0x1e3   :  { %v2962_v46 = vpack.c.bf16 %v2706_v44, %v2706_v44  ;;  %v2771_v47 = vpack.c.bf16 %v2515_v45, %v2515_v45  ;;  %v2579_v48 = vsel %vm2067_vm8, %v1588_v37, %v2323_v42  ;;  %v3984_v39 = vld [vmem:[%s5864_s0 + $0x2f8] sm:$0xff] }
 0x1e4   :  { %3155 = vst.msk [vmem:[%s5866_s3 + $0x2a8] sm:$0xf] %vm2984_vm4, %v2898_v43  ;;  %v2835_v49 = vpack.c.bf16 %v2579_v48, %v2579_v48  ;;  %v1747_v50 = vpop.f32.mrf.mxu2  ;;  %v1907_v51 = vpop.f32.mrf.mxu3  ;;  %v4016_v40 = vld [vmem:[%s5864_s0 + $0x3f8] sm:$0xff] }
 0x1e5   :  { %3219 = vst.msk [vmem:[%s5866_s3 + $0x3a8] sm:$0xf] %vm2984_vm4, %v2962_v46  ;;  %v1748_v54 = vadd.f32 %v5106_v63, %v1747_v50  ;;  %v1908_v25 = vadd.f32 %v5106_v63, %v1907_v51  ;;  %v1430_v55 = vpop.f32.mrf.mxu0  ;;  %v1590_v56 = vpop.f32.mrf.mxu1 }
 0x1e6   :  { %3028 = vst.msk [vmem:[%s5866_s3 + $0xac] sm:$0xf] %vm2984_vm4, %v2771_v47  ;;  %v1431_v59 = vadd.f32 %v5106_v63, %v1430_v55  ;;  %v1591_v60 = vadd.f32 %v5106_v63, %v1590_v56 }
 0x1e7   :  { %3092 = vst.msk [vmem:[%s5866_s3 + $0x1ac] sm:$0xf] %vm2984_vm4, %v2835_v49  ;;  %vm2131_vm9 = vcmp.gt.f32.partialorder %v1748_v54, 0.0  ;;  %v2387_v61 = vmul.f32 0.1, %v1748_v54  ;;  %vm2195_vm10 = vcmp.gt.f32.partialorder %v1908_v25, 0.0 }
 0x1e8   :  { %v2451_v62 = vmul.f32 0.1, %v1908_v25  ;;  %vm2004_vm11 = vcmp.gt.f32.partialorder %v1431_v59, 0.0  ;;  %v2260_v0 = vmul.f32 0.1, %v1431_v59  ;;  %vm2068_vm12 = vcmp.gt.f32.partialorder %v1591_v60, 0.0  ;;  %3791 = vmatmul.msk.bf16.gmra.mxu0 %vm922_vm1, %v3919_v52  ;;  %3823 = vmatmul.msk.bf16.gmra.mxu1 %vm922_vm1, %v3951_v53 }
 0x1e9   :  { %v2643_v1 = vsel %vm2131_vm9, %v1748_v54, %v2387_v61  ;;  %v2324_v2 = vmul.f32 0.1, %v1591_v60  ;;  %3855 = vmatmul.msk.bf16.gmra.mxu2 %vm922_vm1, %v3983_v57  ;;  %3887 = vmatmul.msk.bf16.gmra.mxu3 %vm922_vm1, %v4015_v58 }
 0x1ea   :  { %v2899_v3 = vpack.c.bf16 %v2643_v1, %v2643_v1  ;;  %v2707_v4 = vsel %vm2195_vm10, %v1908_v25, %v2451_v62  ;;  %v2516_v5 = vsel %vm2004_vm11, %v1431_v59, %v2260_v0 }
 0x1eb   :  { %v2963_v6 = vpack.c.bf16 %v2707_v4, %v2707_v4  ;;  %v2772_v7 = vpack.c.bf16 %v2516_v5, %v2516_v5  ;;  %v2580_v8 = vsel %vm2068_vm12, %v1591_v60, %v2324_v2 }
 0x1ec   :  { %3156 = vst.msk [vmem:[%s5866_s3 + $0x2ac] sm:$0xf] %vm2984_vm4, %v2899_v3  ;;  %v2836_v9 = vpack.c.bf16 %v2580_v8, %v2580_v8  ;;  %v1750_v10 = vpop.f32.mrf.mxu2  ;;  %v1910_v11 = vpop.f32.mrf.mxu3 }
 0x1ed   :  { %3220 = vst.msk [vmem:[%s5866_s3 + $0x3ac] sm:$0xf] %vm2984_vm4, %v2963_v6  ;;  %v1751_v12 = vadd.f32 %v5106_v63, %v1750_v10  ;;  %v1911_v13 = vadd.f32 %v5106_v63, %v1910_v11  ;;  %v1432_v14 = vpop.f32.mrf.mxu0  ;;  %v1592_v15 = vpop.f32.mrf.mxu1 }
 0x1ee   :  { %3029 = vst.msk [vmem:[%s5866_s3 + $0xb0] sm:$0xf] %vm2984_vm4, %v2772_v7  ;;  %v1433_v16 = vadd.f32 %v5106_v63, %v1432_v14  ;;  %v1593_v36 = vadd.f32 %v5106_v63, %v1592_v15 }
 0x1ef   :  { %3093 = vst.msk [vmem:[%s5866_s3 + $0x1b0] sm:$0xf] %vm2984_vm4, %v2836_v9  ;;  %vm2132_vm13 = vcmp.gt.f32.partialorder %v1751_v12, 0.0  ;;  %v2388_v17 = vmul.f32 0.1, %v1751_v12  ;;  %vm2196_vm14 = vcmp.gt.f32.partialorder %v1911_v13, 0.0 }
 0x1f0   :  { %v2452_v18 = vmul.f32 0.1, %v1911_v13  ;;  %vm2005_vm15 = vcmp.gt.f32.partialorder %v1433_v16, 0.0  ;;  %v2261_v19 = vmul.f32 0.1, %v1433_v16  ;;  %vm2069_vm0 = vcmp.gt.f32.partialorder %v1593_v36, 0.0 }
 0x1f1   :  { %v2644_v20 = vsel %vm2132_vm13, %v1751_v12, %v2388_v17  ;;  %v2325_v21 = vmul.f32 0.1, %v1593_v36 }
 0x1f2   :  { %v2900_v22 = vpack.c.bf16 %v2644_v20, %v2644_v20  ;;  %v2708_v23 = vsel %vm2196_vm14, %v1911_v13, %v2452_v18  ;;  %v2517_v24 = vsel %vm2005_vm15, %v1433_v16, %v2261_v19 }
 0x1f3   :  { %v2964_v26 = vpack.c.bf16 %v2708_v23, %v2708_v23  ;;  %v2773_v27 = vpack.c.bf16 %v2517_v24, %v2517_v24  ;;  %v2581_v28 = vsel %vm2069_vm0, %v1593_v36, %v2325_v21 }
 0x1f4   :  { %3157 = vst.msk [vmem:[%s5866_s3 + $0x2b0] sm:$0xf] %vm2984_vm4, %v2900_v22  ;;  %v2837_v29 = vpack.c.bf16 %v2581_v28, %v2581_v28  ;;  %v1752_v30 = vpop.f32.mrf.mxu2  ;;  %v1912_v31 = vpop.f32.mrf.mxu3 }
 0x1f5   :  { %3221 = vst.msk [vmem:[%s5866_s3 + $0x3b0] sm:$0xf] %vm2984_vm4, %v2964_v26  ;;  %v1753_v34 = vadd.f32 %v5106_v63, %v1752_v30  ;;  %v1913_v35 = vadd.f32 %v5106_v63, %v1912_v31  ;;  %v1435_v37 = vpop.f32.mrf.mxu0  ;;  %v1595_v38 = vpop.f32.mrf.mxu1 }
 0x1f6   :  { %3030 = vst.msk [vmem:[%s5866_s3 + $0xb4] sm:$0xf] %vm2984_vm4, %v2773_v27  ;;  %v1436_v41 = vadd.f32 %v5106_v63, %v1435_v37  ;;  %v1596_v42 = vadd.f32 %v5106_v63, %v1595_v38 }
 0x1f7   :  { %3094 = vst.msk [vmem:[%s5866_s3 + $0x1b4] sm:$0xf] %vm2984_vm4, %v2837_v29  ;;  %vm2133_vm2 = vcmp.gt.f32.partialorder %v1753_v34, 0.0  ;;  %v2389_v43 = vmul.f32 0.1, %v1753_v34  ;;  %vm2197_vm3 = vcmp.gt.f32.partialorder %v1913_v35, 0.0 }
 0x1f8   :  { %v2453_v44 = vmul.f32 0.1, %v1913_v35  ;;  %vm2006_vm5 = vcmp.gt.f32.partialorder %v1436_v41, 0.0  ;;  %v2262_v45 = vmul.f32 0.1, %v1436_v41  ;;  %vm2070_vm6 = vcmp.gt.f32.partialorder %v1596_v42, 0.0  ;;  %3792 = vmatmul.msk.bf16.gmra.mxu0 %vm922_vm1, %v3920_v32  ;;  %3824 = vmatmul.msk.bf16.gmra.mxu1 %vm922_vm1, %v3952_v33 }
 0x1f9   :  { %v2645_v46 = vsel %vm2133_vm2, %v1753_v34, %v2389_v43  ;;  %v2326_v47 = vmul.f32 0.1, %v1596_v42  ;;  %3856 = vmatmul.msk.bf16.gmra.mxu2 %vm922_vm1, %v3984_v39  ;;  %3888 = vmatmul.msk.bf16.gmra.mxu3 %vm922_vm1, %v4016_v40 }
 0x1fa   :  { %v2901_v48 = vpack.c.bf16 %v2645_v46, %v2645_v46  ;;  %v2709_v49 = vsel %vm2197_vm3, %v1913_v35, %v2453_v44  ;;  %v2518_v50 = vsel %vm2006_vm5, %v1436_v41, %v2262_v45 }
 0x1fb   :  { %v2965_v51 = vpack.c.bf16 %v2709_v49, %v2709_v49  ;;  %v2774_v52 = vpack.c.bf16 %v2518_v50, %v2518_v50  ;;  %v2582_v53 = vsel %vm2070_vm6, %v1596_v42, %v2326_v47 }
 0x1fc   :  { %3158 = vst.msk [vmem:[%s5866_s3 + $0x2b4] sm:$0xf] %vm2984_vm4, %v2901_v48  ;;  %v2838_v54 = vpack.c.bf16 %v2582_v53, %v2582_v53  ;;  %v1755_v25 = vpop.f32.mrf.mxu2  ;;  %v1915_v55 = vpop.f32.mrf.mxu3  ;;  %v5563_v53 = vld [vmem:[%s5865_s2] ss:$0 sm:$0xff] }
 0x1fd   :  { %3222 = vst.msk [vmem:[%s5866_s3 + $0x3b4] sm:$0xf] %vm2984_vm4, %v2965_v51  ;;  %v1756_v56 = vadd.f32 %v5106_v63, %v1755_v25  ;;  %v1916_v57 = vadd.f32 %v5106_v63, %v1915_v55  ;;  %v1437_v58 = vpop.f32.mrf.mxu0  ;;  %v1597_v59 = vpop.f32.mrf.mxu1 }
 0x1fe   :  { %3031 = vst.msk [vmem:[%s5866_s3 + $0xb8] sm:$0xf] %vm2984_vm4, %v2774_v52  ;;  %v1438_v60 = vadd.f32 %v5106_v63, %v1437_v58  ;;  %v1598_v61 = vadd.f32 %v5106_v63, %v1597_v59 }
 0x1ff   :  { %3095 = vst.msk [vmem:[%s5866_s3 + $0x1b8] sm:$0xf] %vm2984_vm4, %v2838_v54  ;;  %vm2134_vm1 = vcmp.gt.f32.partialorder %v1756_v56, 0.0  ;;  %v2390_v62 = vmul.f32 0.1, %v1756_v56  ;;  %vm2198_vm7 = vcmp.gt.f32.partialorder %v1916_v57, 0.0 }
 0x200   :  { %v2454_v0 = vmul.f32 0.1, %v1916_v57  ;;  %vm2007_vm8 = vcmp.gt.f32.partialorder %v1438_v60, 0.0  ;;  %v2263_v1 = vmul.f32 0.1, %v1438_v60  ;;  %vm2071_vm9 = vcmp.gt.f32.partialorder %v1598_v61, 0.0 }
 0x201   :  { %v2646_v2 = vsel %vm2134_vm1, %v1756_v56, %v2390_v62  ;;  %v2327_v3 = vmul.f32 0.1, %v1598_v61 }
 0x202   :  { %v2902_v4 = vpack.c.bf16 %v2646_v2, %v2646_v2  ;;  %v2710_v5 = vsel %vm2198_vm7, %v1916_v57, %v2454_v0  ;;  %v2519_v6 = vsel %vm2007_vm8, %v1438_v60, %v2263_v1 }
 0x203   :  { %v2966_v7 = vpack.c.bf16 %v2710_v5, %v2710_v5  ;;  %v2775_v8 = vpack.c.bf16 %v2519_v6, %v2519_v6  ;;  %v2583_v9 = vsel %vm2071_vm9, %v1598_v61, %v2327_v3 }
 0x204   :  { %3159 = vst.msk [vmem:[%s5866_s3 + $0x2b8] sm:$0xf] %vm2984_vm4, %v2902_v4  ;;  %v2839_v10 = vpack.c.bf16 %v2583_v9, %v2583_v9  ;;  %v1757_v11 = vpop.f32.mrf.mxu2  ;;  %v1917_v12 = vpop.f32.mrf.mxu3 }
 0x205   :  { %3223 = vst.msk [vmem:[%s5866_s3 + $0x3b8] sm:$0xf] %vm2984_vm4, %v2966_v7  ;;  %v1758_v13 = vadd.f32 %v5106_v63, %v1757_v11  ;;  %v1918_v14 = vadd.f32 %v5106_v63, %v1917_v12  ;;  %v1440_v15 = vpop.f32.mrf.mxu0  ;;  %v1600_v16 = vpop.f32.mrf.mxu1 }
 0x206   :  { %3032 = vst.msk [vmem:[%s5866_s3 + $0xbc] sm:$0xf] %vm2984_vm4, %v2775_v8  ;;  %v1441_v36 = vadd.f32 %v5106_v63, %v1440_v15  ;;  %v1601_v17 = vadd.f32 %v5106_v63, %v1600_v16 }
 0x207   :  { %3096 = vst.msk [vmem:[%s5866_s3 + $0x1bc] sm:$0xf] %vm2984_vm4, %v2839_v10  ;;  %vm2135_vm10 = vcmp.gt.f32.partialorder %v1758_v13, 0.0  ;;  %v2391_v18 = vmul.f32 0.1, %v1758_v13  ;;  %vm2199_vm11 = vcmp.gt.f32.partialorder %v1918_v14, 0.0 }
 0x208   :  { %v2455_v19 = vmul.f32 0.1, %v1918_v14  ;;  %vm2008_vm12 = vcmp.gt.f32.partialorder %v1441_v36, 0.0  ;;  %v2264_v20 = vmul.f32 0.1, %v1441_v36  ;;  %vm2072_vm13 = vcmp.gt.f32.partialorder %v1601_v17, 0.0 }
 0x209   :  { %v2647_v21 = vsel %vm2135_vm10, %v1758_v13, %v2391_v18  ;;  %v2328_v22 = vmul.f32 0.1, %v1601_v17 }
 0x20a   :  { %v2903_v23 = vpack.c.bf16 %v2647_v21, %v2647_v21  ;;  %v2711_v24 = vsel %vm2199_vm11, %v1918_v14, %v2455_v19  ;;  %v2520_v26 = vsel %vm2008_vm12, %v1441_v36, %v2264_v20 }
 0x20b   :  { %v2967_v27 = vpack.c.bf16 %v2711_v24, %v2711_v24  ;;  %v2776_v28 = vpack.c.bf16 %v2520_v26, %v2520_v26  ;;  %v2584_v29 = vsel %vm2072_vm13, %v1601_v17, %v2328_v22 }
 0x20c   :  { %3160 = vst.msk [vmem:[%s5866_s3 + $0x2bc] sm:$0xf] %vm2984_vm4, %v2903_v23  ;;  %v2840_v30 = vpack.c.bf16 %v2584_v29, %v2584_v29  ;;  %v1760_v31 = vpop.f32.mrf.mxu2  ;;  %v1920_v32 = vpop.f32.mrf.mxu3 }
 0x20d   :  { %3224 = vst.msk [vmem:[%s5866_s3 + $0x3bc] sm:$0xf] %vm2984_vm4, %v2967_v27  ;;  %v1761_v33 = vadd.f32 %v5106_v63, %v1760_v31  ;;  %v1921_v34 = vadd.f32 %v5106_v63, %v1920_v32  ;;  %v1442_v35 = vpop.f32.mrf.mxu0  ;;  %v1602_v37 = vpop.f32.mrf.mxu1 }
 0x20e   :  { %3033 = vst.msk [vmem:[%s5866_s3 + $0xc0] sm:$0xf] %vm2984_vm4, %v2776_v28  ;;  %v1443_v38 = vadd.f32 %v5106_v63, %v1442_v35  ;;  %v1603_v39 = vadd.f32 %v5106_v63, %v1602_v37 }
 0x20f   :  { %3097 = vst.msk [vmem:[%s5866_s3 + $0x1c0] sm:$0xf] %vm2984_vm4, %v2840_v30  ;;  %vm2136_vm14 = vcmp.gt.f32.partialorder %v1761_v33, 0.0  ;;  %v2392_v40 = vmul.f32 0.1, %v1761_v33  ;;  %vm2200_vm15 = vcmp.gt.f32.partialorder %v1921_v34, 0.0 }
 0x210   :  { %v2456_v41 = vmul.f32 0.1, %v1921_v34  ;;  %vm2009_vm0 = vcmp.gt.f32.partialorder %v1443_v38, 0.0  ;;  %v2265_v42 = vmul.f32 0.1, %v1443_v38  ;;  %vm2073_vm2 = vcmp.gt.f32.partialorder %v1603_v39, 0.0 }
 0x211   :  { %v2648_v43 = vsel %vm2136_vm14, %v1761_v33, %v2392_v40  ;;  %v2329_v44 = vmul.f32 0.1, %v1603_v39 }
 0x212   :  { %v2904_v45 = vpack.c.bf16 %v2648_v43, %v2648_v43  ;;  %v2712_v46 = vsel %vm2200_vm15, %v1921_v34, %v2456_v41  ;;  %v2521_v47 = vsel %vm2009_vm0, %v1443_v38, %v2265_v42 }
 0x213   :  { %v2968_v48 = vpack.c.bf16 %v2712_v46, %v2712_v46  ;;  %v2777_v49 = vpack.c.bf16 %v2521_v47, %v2521_v47  ;;  %v2585_v63 = vsel %vm2073_vm2, %v1603_v39, %v2329_v44 }
 0x214   :  { %3161 = vst.msk [vmem:[%s5866_s3 + $0x2c0] sm:$0xf] %vm2984_vm4, %v2904_v45  ;;  %v2841_v50 = vpack.c.bf16 %v2585_v63, %v2585_v63  ;;  %v1762_v51 = vpop.f32.mrf.mxu2  ;;  %v1922_v52 = vpop.f32.mrf.mxu3 }
 0x215   :  { %3225 = vst.msk [vmem:[%s5866_s3 + $0x3c0] sm:$0xf] %vm2984_vm4, %v2968_v48  ;;  %v1763_v54 = vadd.f32 %v5563_v53, %v1762_v51  ;;  %v1923_v25 = vadd.f32 %v5563_v53, %v1922_v52  ;;  %v1445_v55 = vpop.f32.mrf.mxu0  ;;  %v1605_v56 = vpop.f32.mrf.mxu1 }
 0x216   :  { %3034 = vst.msk [vmem:[%s5866_s3 + $0xc4] sm:$0xf] %vm2984_vm4, %v2777_v49  ;;  %v1446_v57 = vadd.f32 %v5563_v53, %v1445_v55  ;;  %v1606_v58 = vadd.f32 %v5563_v53, %v1605_v56 }
 0x217   :  { %3098 = vst.msk [vmem:[%s5866_s3 + $0x1c4] sm:$0xf] %vm2984_vm4, %v2841_v50  ;;  %vm2137_vm3 = vcmp.gt.f32.partialorder %v1763_v54, 0.0  ;;  %v2393_v59 = vmul.f32 0.1, %v1763_v54  ;;  %vm2201_vm5 = vcmp.gt.f32.partialorder %v1923_v25, 0.0 }
 0x218   :  { %v2457_v60 = vmul.f32 0.1, %v1923_v25  ;;  %vm2010_vm6 = vcmp.gt.f32.partialorder %v1446_v57, 0.0  ;;  %v2266_v61 = vmul.f32 0.1, %v1446_v57  ;;  %vm2074_vm1 = vcmp.gt.f32.partialorder %v1606_v58, 0.0 }
 0x219   :  { %v2649_v62 = vsel %vm2137_vm3, %v1763_v54, %v2393_v59  ;;  %v2330_v0 = vmul.f32 0.1, %v1606_v58 }
 0x21a   :  { %v2905_v1 = vpack.c.bf16 %v2649_v62, %v2649_v62  ;;  %v2713_v2 = vsel %vm2201_vm5, %v1923_v25, %v2457_v60  ;;  %v2522_v3 = vsel %vm2010_vm6, %v1446_v57, %v2266_v61 }
 0x21b   :  { %v2969_v4 = vpack.c.bf16 %v2713_v2, %v2713_v2  ;;  %v2778_v5 = vpack.c.bf16 %v2522_v3, %v2522_v3  ;;  %v2586_v6 = vsel %vm2074_vm1, %v1606_v58, %v2330_v0 }
 0x21c   :  { %3162 = vst.msk [vmem:[%s5866_s3 + $0x2c4] sm:$0xf] %vm2984_vm4, %v2905_v1  ;;  %v2842_v7 = vpack.c.bf16 %v2586_v6, %v2586_v6  ;;  %v1765_v8 = vpop.f32.mrf.mxu2  ;;  %v1925_v9 = vpop.f32.mrf.mxu3 }
 0x21d   :  { %3226 = vst.msk [vmem:[%s5866_s3 + $0x3c4] sm:$0xf] %vm2984_vm4, %v2969_v4  ;;  %v1766_v10 = vadd.f32 %v5563_v53, %v1765_v8  ;;  %v1926_v11 = vadd.f32 %v5563_v53, %v1925_v9  ;;  %v1447_v12 = vpop.f32.mrf.mxu0  ;;  %v1607_v13 = vpop.f32.mrf.mxu1 }
 0x21e   :  { %3035 = vst.msk [vmem:[%s5866_s3 + $0xc8] sm:$0xf] %vm2984_vm4, %v2778_v5  ;;  %v1448_v14 = vadd.f32 %v5563_v53, %v1447_v12  ;;  %v1608_v15 = vadd.f32 %v5563_v53, %v1607_v13 }
 0x21f   :  { %3099 = vst.msk [vmem:[%s5866_s3 + $0x1c8] sm:$0xf] %vm2984_vm4, %v2842_v7  ;;  %vm2138_vm7 = vcmp.gt.f32.partialorder %v1766_v10, 0.0  ;;  %v2394_v16 = vmul.f32 0.1, %v1766_v10  ;;  %vm2202_vm8 = vcmp.gt.f32.partialorder %v1926_v11, 0.0 }
 0x220   :  { %v2458_v36 = vmul.f32 0.1, %v1926_v11  ;;  %vm2011_vm9 = vcmp.gt.f32.partialorder %v1448_v14, 0.0  ;;  %v2267_v17 = vmul.f32 0.1, %v1448_v14  ;;  %vm2075_vm10 = vcmp.gt.f32.partialorder %v1608_v15, 0.0 }
 0x221   :  { %v2650_v18 = vsel %vm2138_vm7, %v1766_v10, %v2394_v16  ;;  %v2331_v19 = vmul.f32 0.1, %v1608_v15 }
 0x222   :  { %v2906_v20 = vpack.c.bf16 %v2650_v18, %v2650_v18  ;;  %v2714_v21 = vsel %vm2202_vm8, %v1926_v11, %v2458_v36  ;;  %v2523_v22 = vsel %vm2011_vm9, %v1448_v14, %v2267_v17 }
 0x223   :  { %v2970_v23 = vpack.c.bf16 %v2714_v21, %v2714_v21  ;;  %v2779_v24 = vpack.c.bf16 %v2523_v22, %v2523_v22  ;;  %v2587_v26 = vsel %vm2075_vm10, %v1608_v15, %v2331_v19 }
 0x224   :  { %3163 = vst.msk [vmem:[%s5866_s3 + $0x2c8] sm:$0xf] %vm2984_vm4, %v2906_v20  ;;  %v2843_v27 = vpack.c.bf16 %v2587_v26, %v2587_v26  ;;  %v1767_v28 = vpop.f32.mrf.mxu2  ;;  %v1927_v29 = vpop.f32.mrf.mxu3 }
 0x225   :  { %3227 = vst.msk [vmem:[%s5866_s3 + $0x3c8] sm:$0xf] %vm2984_vm4, %v2970_v23  ;;  %v1768_v30 = vadd.f32 %v5563_v53, %v1767_v28  ;;  %v1928_v31 = vadd.f32 %v5563_v53, %v1927_v29  ;;  %v1450_v32 = vpop.f32.mrf.mxu0  ;;  %v1610_v33 = vpop.f32.mrf.mxu1 }
 0x226   :  { %3036 = vst.msk [vmem:[%s5866_s3 + $0xcc] sm:$0xf] %vm2984_vm4, %v2779_v24  ;;  %v1451_v34 = vadd.f32 %v5563_v53, %v1450_v32  ;;  %v1611_v35 = vadd.f32 %v5563_v53, %v1610_v33 }
 0x227   :  { %3100 = vst.msk [vmem:[%s5866_s3 + $0x1cc] sm:$0xf] %vm2984_vm4, %v2843_v27  ;;  %vm2139_vm11 = vcmp.gt.f32.partialorder %v1768_v30, 0.0  ;;  %v2395_v37 = vmul.f32 0.1, %v1768_v30  ;;  %vm2203_vm12 = vcmp.gt.f32.partialorder %v1928_v31, 0.0 }
 0x228   :  { %v2459_v38 = vmul.f32 0.1, %v1928_v31  ;;  %vm2012_vm13 = vcmp.gt.f32.partialorder %v1451_v34, 0.0  ;;  %v2268_v39 = vmul.f32 0.1, %v1451_v34  ;;  %vm2076_vm14 = vcmp.gt.f32.partialorder %v1611_v35, 0.0 }
 0x229   :  { %v2651_v40 = vsel %vm2139_vm11, %v1768_v30, %v2395_v37  ;;  %v2332_v41 = vmul.f32 0.1, %v1611_v35 }
 0x22a   :  { %v2907_v42 = vpack.c.bf16 %v2651_v40, %v2651_v40  ;;  %v2715_v43 = vsel %vm2203_vm12, %v1928_v31, %v2459_v38  ;;  %v2524_v44 = vsel %vm2012_vm13, %v1451_v34, %v2268_v39 }
 0x22b   :  { %v2971_v45 = vpack.c.bf16 %v2715_v43, %v2715_v43  ;;  %v2780_v46 = vpack.c.bf16 %v2524_v44, %v2524_v44  ;;  %v2588_v47 = vsel %vm2076_vm14, %v1611_v35, %v2332_v41 }
 0x22c   :  { %3164 = vst.msk [vmem:[%s5866_s3 + $0x2cc] sm:$0xf] %vm2984_vm4, %v2907_v42  ;;  %v2844_v48 = vpack.c.bf16 %v2588_v47, %v2588_v47  ;;  %v1770_v49 = vpop.f32.mrf.mxu2  ;;  %v1930_v63 = vpop.f32.mrf.mxu3 }
 0x22d   :  { %3228 = vst.msk [vmem:[%s5866_s3 + $0x3cc] sm:$0xf] %vm2984_vm4, %v2971_v45  ;;  %v1771_v50 = vadd.f32 %v5563_v53, %v1770_v49  ;;  %v1931_v51 = vadd.f32 %v5563_v53, %v1930_v63  ;;  %v1452_v52 = vpop.f32.mrf.mxu0  ;;  %v1612_v54 = vpop.f32.mrf.mxu1 }
 0x22e   :  { %3037 = vst.msk [vmem:[%s5866_s3 + $0xd0] sm:$0xf] %vm2984_vm4, %v2780_v46  ;;  %v1453_v25 = vadd.f32 %v5563_v53, %v1452_v52  ;;  %v1613_v55 = vadd.f32 %v5563_v53, %v1612_v54 }
 0x22f   :  { %3101 = vst.msk [vmem:[%s5866_s3 + $0x1d0] sm:$0xf] %vm2984_vm4, %v2844_v48  ;;  %vm2140_vm15 = vcmp.gt.f32.partialorder %v1771_v50, 0.0  ;;  %v2396_v56 = vmul.f32 0.1, %v1771_v50  ;;  %vm2204_vm0 = vcmp.gt.f32.partialorder %v1931_v51, 0.0 }
 0x230   :  { %v2460_v57 = vmul.f32 0.1, %v1931_v51  ;;  %vm2013_vm2 = vcmp.gt.f32.partialorder %v1453_v25, 0.0  ;;  %v2269_v58 = vmul.f32 0.1, %v1453_v25  ;;  %vm2077_vm3 = vcmp.gt.f32.partialorder %v1613_v55, 0.0 }
 0x231   :  { %v2652_v59 = vsel %vm2140_vm15, %v1771_v50, %v2396_v56  ;;  %v2333_v60 = vmul.f32 0.1, %v1613_v55 }
 0x232   :  { %v2908_v61 = vpack.c.bf16 %v2652_v59, %v2652_v59  ;;  %v2716_v62 = vsel %vm2204_vm0, %v1931_v51, %v2460_v57  ;;  %v2525_v0 = vsel %vm2013_vm2, %v1453_v25, %v2269_v58 }
 0x233   :  { %v2972_v1 = vpack.c.bf16 %v2716_v62, %v2716_v62  ;;  %v2781_v2 = vpack.c.bf16 %v2525_v0, %v2525_v0  ;;  %v2589_v3 = vsel %vm2077_vm3, %v1613_v55, %v2333_v60 }
 0x234   :  { %3165 = vst.msk [vmem:[%s5866_s3 + $0x2d0] sm:$0xf] %vm2984_vm4, %v2908_v61  ;;  %v2845_v4 = vpack.c.bf16 %v2589_v3, %v2589_v3  ;;  %v1772_v5 = vpop.f32.mrf.mxu2  ;;  %v1932_v6 = vpop.f32.mrf.mxu3 }
 0x235   :  { %3229 = vst.msk [vmem:[%s5866_s3 + $0x3d0] sm:$0xf] %vm2984_vm4, %v2972_v1  ;;  %v1773_v7 = vadd.f32 %v5563_v53, %v1772_v5  ;;  %v1933_v8 = vadd.f32 %v5563_v53, %v1932_v6  ;;  %v1455_v9 = vpop.f32.mrf.mxu0  ;;  %v1615_v10 = vpop.f32.mrf.mxu1 }
 0x236   :  { %3038 = vst.msk [vmem:[%s5866_s3 + $0xd4] sm:$0xf] %vm2984_vm4, %v2781_v2  ;;  %v1456_v11 = vadd.f32 %v5563_v53, %v1455_v9  ;;  %v1616_v12 = vadd.f32 %v5563_v53, %v1615_v10 }
 0x237   :  { %3102 = vst.msk [vmem:[%s5866_s3 + $0x1d4] sm:$0xf] %vm2984_vm4, %v2845_v4  ;;  %vm2141_vm5 = vcmp.gt.f32.partialorder %v1773_v7, 0.0  ;;  %v2397_v13 = vmul.f32 0.1, %v1773_v7  ;;  %vm2205_vm6 = vcmp.gt.f32.partialorder %v1933_v8, 0.0 }
 0x238   :  { %v2461_v14 = vmul.f32 0.1, %v1933_v8  ;;  %vm2014_vm1 = vcmp.gt.f32.partialorder %v1456_v11, 0.0  ;;  %v2270_v15 = vmul.f32 0.1, %v1456_v11  ;;  %vm2078_vm7 = vcmp.gt.f32.partialorder %v1616_v12, 0.0 }
 0x239   :  { %v2653_v16 = vsel %vm2141_vm5, %v1773_v7, %v2397_v13  ;;  %v2334_v36 = vmul.f32 0.1, %v1616_v12 }
 0x23a   :  { %v2909_v17 = vpack.c.bf16 %v2653_v16, %v2653_v16  ;;  %v2717_v18 = vsel %vm2205_vm6, %v1933_v8, %v2461_v14  ;;  %v2526_v19 = vsel %vm2014_vm1, %v1456_v11, %v2270_v15 }
 0x23b   :  { %v2973_v20 = vpack.c.bf16 %v2717_v18, %v2717_v18  ;;  %v2782_v21 = vpack.c.bf16 %v2526_v19, %v2526_v19  ;;  %v2590_v22 = vsel %vm2078_vm7, %v1616_v12, %v2334_v36 }
 0x23c   :  { %3166 = vst.msk [vmem:[%s5866_s3 + $0x2d4] sm:$0xf] %vm2984_vm4, %v2909_v17  ;;  %v2846_v23 = vpack.c.bf16 %v2590_v22, %v2590_v22  ;;  %v1775_v24 = vpop.f32.mrf.mxu2  ;;  %v1935_v26 = vpop.f32.mrf.mxu3 }
 0x23d   :  { %3230 = vst.msk [vmem:[%s5866_s3 + $0x3d4] sm:$0xf] %vm2984_vm4, %v2973_v20  ;;  %v1776_v27 = vadd.f32 %v5563_v53, %v1775_v24  ;;  %v1936_v28 = vadd.f32 %v5563_v53, %v1935_v26  ;;  %v1457_v29 = vpop.f32.mrf.mxu0  ;;  %v1617_v30 = vpop.f32.mrf.mxu1 }
 0x23e   :  { %3039 = vst.msk [vmem:[%s5866_s3 + $0xd8] sm:$0xf] %vm2984_vm4, %v2782_v21  ;;  %v1458_v31 = vadd.f32 %v5563_v53, %v1457_v29  ;;  %v1618_v32 = vadd.f32 %v5563_v53, %v1617_v30 }
 0x23f   :  { %3103 = vst.msk [vmem:[%s5866_s3 + $0x1d8] sm:$0xf] %vm2984_vm4, %v2846_v23  ;;  %vm2142_vm8 = vcmp.gt.f32.partialorder %v1776_v27, 0.0  ;;  %v2398_v33 = vmul.f32 0.1, %v1776_v27  ;;  %vm2206_vm9 = vcmp.gt.f32.partialorder %v1936_v28, 0.0 }
 0x240   :  { %v2462_v34 = vmul.f32 0.1, %v1936_v28  ;;  %vm2015_vm10 = vcmp.gt.f32.partialorder %v1458_v31, 0.0  ;;  %v2271_v35 = vmul.f32 0.1, %v1458_v31  ;;  %vm2079_vm11 = vcmp.gt.f32.partialorder %v1618_v32, 0.0 }
 0x241   :  { %v2654_v37 = vsel %vm2142_vm8, %v1776_v27, %v2398_v33  ;;  %v2335_v38 = vmul.f32 0.1, %v1618_v32 }
 0x242   :  { %v2910_v39 = vpack.c.bf16 %v2654_v37, %v2654_v37  ;;  %v2718_v40 = vsel %vm2206_vm9, %v1936_v28, %v2462_v34  ;;  %v2527_v41 = vsel %vm2015_vm10, %v1458_v31, %v2271_v35 }
 0x243   :  { %v2974_v42 = vpack.c.bf16 %v2718_v40, %v2718_v40  ;;  %v2783_v43 = vpack.c.bf16 %v2527_v41, %v2527_v41  ;;  %v2591_v44 = vsel %vm2079_vm11, %v1618_v32, %v2335_v38 }
 0x244   :  { %3167 = vst.msk [vmem:[%s5866_s3 + $0x2d8] sm:$0xf] %vm2984_vm4, %v2910_v39  ;;  %v2847_v45 = vpack.c.bf16 %v2591_v44, %v2591_v44  ;;  %v1777_v46 = vpop.f32.mrf.mxu2  ;;  %v1937_v47 = vpop.f32.mrf.mxu3 }
 0x245   :  { %3231 = vst.msk [vmem:[%s5866_s3 + $0x3d8] sm:$0xf] %vm2984_vm4, %v2974_v42  ;;  %v1778_v48 = vadd.f32 %v5563_v53, %v1777_v46  ;;  %v1938_v49 = vadd.f32 %v5563_v53, %v1937_v47  ;;  %v1460_v63 = vpop.f32.mrf.mxu0  ;;  %v1620_v50 = vpop.f32.mrf.mxu1 }
 0x246   :  { %3040 = vst.msk [vmem:[%s5866_s3 + $0xdc] sm:$0xf] %vm2984_vm4, %v2783_v43  ;;  %v1461_v51 = vadd.f32 %v5563_v53, %v1460_v63  ;;  %v1621_v52 = vadd.f32 %v5563_v53, %v1620_v50 }
 0x247   :  { %3104 = vst.msk [vmem:[%s5866_s3 + $0x1dc] sm:$0xf] %vm2984_vm4, %v2847_v45  ;;  %vm2143_vm12 = vcmp.gt.f32.partialorder %v1778_v48, 0.0  ;;  %v2399_v54 = vmul.f32 0.1, %v1778_v48  ;;  %vm2207_vm13 = vcmp.gt.f32.partialorder %v1938_v49, 0.0 }
 0x248   :  { %v2463_v25 = vmul.f32 0.1, %v1938_v49  ;;  %vm2016_vm14 = vcmp.gt.f32.partialorder %v1461_v51, 0.0  ;;  %v2272_v55 = vmul.f32 0.1, %v1461_v51  ;;  %vm2080_vm15 = vcmp.gt.f32.partialorder %v1621_v52, 0.0 }
 0x249   :  { %v2655_v56 = vsel %vm2143_vm12, %v1778_v48, %v2399_v54  ;;  %v2336_v57 = vmul.f32 0.1, %v1621_v52 }
 0x24a   :  { %v2911_v58 = vpack.c.bf16 %v2655_v56, %v2655_v56  ;;  %v2719_v59 = vsel %vm2207_vm13, %v1938_v49, %v2463_v25  ;;  %v2528_v60 = vsel %vm2016_vm14, %v1461_v51, %v2272_v55 }
 0x24b   :  { %v2975_v61 = vpack.c.bf16 %v2719_v59, %v2719_v59  ;;  %v2784_v62 = vpack.c.bf16 %v2528_v60, %v2528_v60  ;;  %v2592_v0 = vsel %vm2080_vm15, %v1621_v52, %v2336_v57 }
 0x24c   :  { %3168 = vst.msk [vmem:[%s5866_s3 + $0x2dc] sm:$0xf] %vm2984_vm4, %v2911_v58  ;;  %v2848_v1 = vpack.c.bf16 %v2592_v0, %v2592_v0  ;;  %v1780_v2 = vpop.f32.mrf.mxu2  ;;  %v1940_v3 = vpop.f32.mrf.mxu3 }
 0x24d   :  { %3232 = vst.msk [vmem:[%s5866_s3 + $0x3dc] sm:$0xf] %vm2984_vm4, %v2975_v61  ;;  %v1781_v4 = vadd.f32 %v5563_v53, %v1780_v2  ;;  %v1941_v5 = vadd.f32 %v5563_v53, %v1940_v3  ;;  %v1462_v6 = vpop.f32.mrf.mxu0  ;;  %v1622_v7 = vpop.f32.mrf.mxu1 }
 0x24e   :  { %3041 = vst.msk [vmem:[%s5866_s3 + $0xe0] sm:$0xf] %vm2984_vm4, %v2784_v62  ;;  %v1463_v8 = vadd.f32 %v5563_v53, %v1462_v6  ;;  %v1623_v9 = vadd.f32 %v5563_v53, %v1622_v7 }
 0x24f   :  { %3105 = vst.msk [vmem:[%s5866_s3 + $0x1e0] sm:$0xf] %vm2984_vm4, %v2848_v1  ;;  %vm2144_vm0 = vcmp.gt.f32.partialorder %v1781_v4, 0.0  ;;  %v2400_v10 = vmul.f32 0.1, %v1781_v4  ;;  %vm2208_vm2 = vcmp.gt.f32.partialorder %v1941_v5, 0.0 }
 0x250   :  { %v2464_v11 = vmul.f32 0.1, %v1941_v5  ;;  %vm2017_vm3 = vcmp.gt.f32.partialorder %v1463_v8, 0.0  ;;  %v2273_v12 = vmul.f32 0.1, %v1463_v8  ;;  %vm2081_vm5 = vcmp.gt.f32.partialorder %v1623_v9, 0.0 }
 0x251   :  { %v2656_v13 = vsel %vm2144_vm0, %v1781_v4, %v2400_v10  ;;  %v2337_v14 = vmul.f32 0.1, %v1623_v9 }
 0x252   :  { %v2912_v15 = vpack.c.bf16 %v2656_v13, %v2656_v13  ;;  %v2720_v16 = vsel %vm2208_vm2, %v1941_v5, %v2464_v11  ;;  %v2529_v36 = vsel %vm2017_vm3, %v1463_v8, %v2273_v12 }
 0x253   :  { %v2976_v17 = vpack.c.bf16 %v2720_v16, %v2720_v16  ;;  %v2785_v18 = vpack.c.bf16 %v2529_v36, %v2529_v36  ;;  %v2593_v19 = vsel %vm2081_vm5, %v1623_v9, %v2337_v14 }
 0x254   :  { %3169 = vst.msk [vmem:[%s5866_s3 + $0x2e0] sm:$0xf] %vm2984_vm4, %v2912_v15  ;;  %v2849_v20 = vpack.c.bf16 %v2593_v19, %v2593_v19  ;;  %v1782_v21 = vpop.f32.mrf.mxu2  ;;  %v1942_v22 = vpop.f32.mrf.mxu3 }
 0x255   :  { %3233 = vst.msk [vmem:[%s5866_s3 + $0x3e0] sm:$0xf] %vm2984_vm4, %v2976_v17  ;;  %v1783_v23 = vadd.f32 %v5563_v53, %v1782_v21  ;;  %v1943_v24 = vadd.f32 %v5563_v53, %v1942_v22  ;;  %v1465_v26 = vpop.f32.mrf.mxu0  ;;  %v1625_v27 = vpop.f32.mrf.mxu1 }
 0x256   :  { %3042 = vst.msk [vmem:[%s5866_s3 + $0xe4] sm:$0xf] %vm2984_vm4, %v2785_v18  ;;  %v1466_v28 = vadd.f32 %v5563_v53, %v1465_v26  ;;  %v1626_v29 = vadd.f32 %v5563_v53, %v1625_v27 }
 0x257   :  { %3106 = vst.msk [vmem:[%s5866_s3 + $0x1e4] sm:$0xf] %vm2984_vm4, %v2849_v20  ;;  %vm2145_vm6 = vcmp.gt.f32.partialorder %v1783_v23, 0.0  ;;  %v2401_v30 = vmul.f32 0.1, %v1783_v23  ;;  %vm2209_vm1 = vcmp.gt.f32.partialorder %v1943_v24, 0.0 }
 0x258   :  { %v2465_v31 = vmul.f32 0.1, %v1943_v24  ;;  %vm2018_vm7 = vcmp.gt.f32.partialorder %v1466_v28, 0.0  ;;  %v2274_v32 = vmul.f32 0.1, %v1466_v28  ;;  %vm2082_vm8 = vcmp.gt.f32.partialorder %v1626_v29, 0.0 }
 0x259   :  { %v2657_v33 = vsel %vm2145_vm6, %v1783_v23, %v2401_v30  ;;  %v2338_v34 = vmul.f32 0.1, %v1626_v29 }
 0x25a   :  { %v2913_v35 = vpack.c.bf16 %v2657_v33, %v2657_v33  ;;  %v2721_v37 = vsel %vm2209_vm1, %v1943_v24, %v2465_v31  ;;  %v2530_v38 = vsel %vm2018_vm7, %v1466_v28, %v2274_v32 }
 0x25b   :  { %v2977_v39 = vpack.c.bf16 %v2721_v37, %v2721_v37  ;;  %v2786_v40 = vpack.c.bf16 %v2530_v38, %v2530_v38  ;;  %v2594_v41 = vsel %vm2082_vm8, %v1626_v29, %v2338_v34 }
 0x25c   :  { %3170 = vst.msk [vmem:[%s5866_s3 + $0x2e4] sm:$0xf] %vm2984_vm4, %v2913_v35  ;;  %v2850_v42 = vpack.c.bf16 %v2594_v41, %v2594_v41  ;;  %v1785_v43 = vpop.f32.mrf.mxu2  ;;  %v1945_v44 = vpop.f32.mrf.mxu3 }
 0x25d   :  { %3234 = vst.msk [vmem:[%s5866_s3 + $0x3e4] sm:$0xf] %vm2984_vm4, %v2977_v39  ;;  %v1786_v45 = vadd.f32 %v5563_v53, %v1785_v43  ;;  %v1946_v46 = vadd.f32 %v5563_v53, %v1945_v44  ;;  %v1467_v47 = vpop.f32.mrf.mxu0  ;;  %v1627_v48 = vpop.f32.mrf.mxu1 }
 0x25e   :  { %3043 = vst.msk [vmem:[%s5866_s3 + $0xe8] sm:$0xf] %vm2984_vm4, %v2786_v40  ;;  %v1468_v49 = vadd.f32 %v5563_v53, %v1467_v47  ;;  %v1628_v63 = vadd.f32 %v5563_v53, %v1627_v48 }
 0x25f   :  { %3107 = vst.msk [vmem:[%s5866_s3 + $0x1e8] sm:$0xf] %vm2984_vm4, %v2850_v42  ;;  %vm2146_vm9 = vcmp.gt.f32.partialorder %v1786_v45, 0.0  ;;  %v2402_v50 = vmul.f32 0.1, %v1786_v45  ;;  %vm2210_vm10 = vcmp.gt.f32.partialorder %v1946_v46, 0.0 }
 0x260   :  { %v2466_v51 = vmul.f32 0.1, %v1946_v46  ;;  %vm2019_vm11 = vcmp.gt.f32.partialorder %v1468_v49, 0.0  ;;  %v2275_v52 = vmul.f32 0.1, %v1468_v49  ;;  %vm2083_vm12 = vcmp.gt.f32.partialorder %v1628_v63, 0.0 }
 0x261   :  { %v2658_v54 = vsel %vm2146_vm9, %v1786_v45, %v2402_v50  ;;  %v2339_v25 = vmul.f32 0.1, %v1628_v63 }
 0x262   :  { %v2914_v55 = vpack.c.bf16 %v2658_v54, %v2658_v54  ;;  %v2722_v56 = vsel %vm2210_vm10, %v1946_v46, %v2466_v51  ;;  %v2531_v57 = vsel %vm2019_vm11, %v1468_v49, %v2275_v52 }
 0x263   :  { %v2978_v58 = vpack.c.bf16 %v2722_v56, %v2722_v56  ;;  %v2787_v59 = vpack.c.bf16 %v2531_v57, %v2531_v57  ;;  %v2595_v60 = vsel %vm2083_vm12, %v1628_v63, %v2339_v25 }
 0x264   :  { %3171 = vst.msk [vmem:[%s5866_s3 + $0x2e8] sm:$0xf] %vm2984_vm4, %v2914_v55  ;;  %v2851_v61 = vpack.c.bf16 %v2595_v60, %v2595_v60  ;;  %v1787_v62 = vpop.f32.mrf.mxu2  ;;  %v1947_v0 = vpop.f32.mrf.mxu3 }
 0x265   :  { %3235 = vst.msk [vmem:[%s5866_s3 + $0x3e8] sm:$0xf] %vm2984_vm4, %v2978_v58  ;;  %v1788_v1 = vadd.f32 %v5563_v53, %v1787_v62  ;;  %v1948_v2 = vadd.f32 %v5563_v53, %v1947_v0  ;;  %v1470_v3 = vpop.f32.mrf.mxu0  ;;  %v1630_v4 = vpop.f32.mrf.mxu1 }
 0x266   :  { %3044 = vst.msk [vmem:[%s5866_s3 + $0xec] sm:$0xf] %vm2984_vm4, %v2787_v59  ;;  %v1471_v5 = vadd.f32 %v5563_v53, %v1470_v3  ;;  %v1631_v6 = vadd.f32 %v5563_v53, %v1630_v4 }
 0x267   :  { %3108 = vst.msk [vmem:[%s5866_s3 + $0x1ec] sm:$0xf] %vm2984_vm4, %v2851_v61  ;;  %vm2147_vm13 = vcmp.gt.f32.partialorder %v1788_v1, 0.0  ;;  %v2403_v7 = vmul.f32 0.1, %v1788_v1  ;;  %vm2211_vm14 = vcmp.gt.f32.partialorder %v1948_v2, 0.0 }
 0x268   :  { %v2467_v8 = vmul.f32 0.1, %v1948_v2  ;;  %vm2020_vm15 = vcmp.gt.f32.partialorder %v1471_v5, 0.0  ;;  %v2276_v9 = vmul.f32 0.1, %v1471_v5  ;;  %vm2084_vm0 = vcmp.gt.f32.partialorder %v1631_v6, 0.0 }
 0x269   :  { %v2659_v10 = vsel %vm2147_vm13, %v1788_v1, %v2403_v7  ;;  %v2340_v11 = vmul.f32 0.1, %v1631_v6 }
 0x26a   :  { %v2915_v12 = vpack.c.bf16 %v2659_v10, %v2659_v10  ;;  %v2723_v13 = vsel %vm2211_vm14, %v1948_v2, %v2467_v8  ;;  %v2532_v14 = vsel %vm2020_vm15, %v1471_v5, %v2276_v9 }
 0x26b   :  { %v2979_v15 = vpack.c.bf16 %v2723_v13, %v2723_v13  ;;  %v2788_v16 = vpack.c.bf16 %v2532_v14, %v2532_v14  ;;  %v2596_v36 = vsel %vm2084_vm0, %v1631_v6, %v2340_v11 }
 0x26c   :  { %3172 = vst.msk [vmem:[%s5866_s3 + $0x2ec] sm:$0xf] %vm2984_vm4, %v2915_v12  ;;  %v2852_v17 = vpack.c.bf16 %v2596_v36, %v2596_v36  ;;  %v1790_v18 = vpop.f32.mrf.mxu2  ;;  %v1950_v19 = vpop.f32.mrf.mxu3 }
 0x26d   :  { %3236 = vst.msk [vmem:[%s5866_s3 + $0x3ec] sm:$0xf] %vm2984_vm4, %v2979_v15  ;;  %v1791_v20 = vadd.f32 %v5563_v53, %v1790_v18  ;;  %v1951_v21 = vadd.f32 %v5563_v53, %v1950_v19  ;;  %v1472_v22 = vpop.f32.mrf.mxu0  ;;  %v1632_v23 = vpop.f32.mrf.mxu1 }
 0x26e   :  { %3045 = vst.msk [vmem:[%s5866_s3 + $0xf0] sm:$0xf] %vm2984_vm4, %v2788_v16  ;;  %v1473_v24 = vadd.f32 %v5563_v53, %v1472_v22  ;;  %v1633_v26 = vadd.f32 %v5563_v53, %v1632_v23 }
 0x26f   :  { %3109 = vst.msk [vmem:[%s5866_s3 + $0x1f0] sm:$0xf] %vm2984_vm4, %v2852_v17  ;;  %vm2148_vm2 = vcmp.gt.f32.partialorder %v1791_v20, 0.0  ;;  %v2404_v27 = vmul.f32 0.1, %v1791_v20  ;;  %vm2212_vm3 = vcmp.gt.f32.partialorder %v1951_v21, 0.0 }
 0x270   :  { %v2468_v28 = vmul.f32 0.1, %v1951_v21  ;;  %vm2021_vm5 = vcmp.gt.f32.partialorder %v1473_v24, 0.0  ;;  %v2277_v29 = vmul.f32 0.1, %v1473_v24  ;;  %vm2085_vm6 = vcmp.gt.f32.partialorder %v1633_v26, 0.0 }
 0x271   :  { %v2660_v30 = vsel %vm2148_vm2, %v1791_v20, %v2404_v27  ;;  %v2341_v31 = vmul.f32 0.1, %v1633_v26 }
 0x272   :  { %v2916_v32 = vpack.c.bf16 %v2660_v30, %v2660_v30  ;;  %v2724_v33 = vsel %vm2212_vm3, %v1951_v21, %v2468_v28  ;;  %v2533_v34 = vsel %vm2021_vm5, %v1473_v24, %v2277_v29 }
 0x273   :  { %v2980_v35 = vpack.c.bf16 %v2724_v33, %v2724_v33  ;;  %v2789_v37 = vpack.c.bf16 %v2533_v34, %v2533_v34  ;;  %v2597_v38 = vsel %vm2085_vm6, %v1633_v26, %v2341_v31 }
 0x274   :  { %3173 = vst.msk [vmem:[%s5866_s3 + $0x2f0] sm:$0xf] %vm2984_vm4, %v2916_v32  ;;  %v2853_v39 = vpack.c.bf16 %v2597_v38, %v2597_v38  ;;  %v1792_v40 = vpop.f32.mrf.mxu2  ;;  %v1952_v41 = vpop.f32.mrf.mxu3 }
 0x275   :  { %3237 = vst.msk [vmem:[%s5866_s3 + $0x3f0] sm:$0xf] %vm2984_vm4, %v2980_v35  ;;  %v1793_v42 = vadd.f32 %v5563_v53, %v1792_v40  ;;  %v1953_v43 = vadd.f32 %v5563_v53, %v1952_v41  ;;  %v1475_v44 = vpop.f32.mrf.mxu0  ;;  %v1635_v45 = vpop.f32.mrf.mxu1 }
 0x276   :  { %3046 = vst.msk [vmem:[%s5866_s3 + $0xf4] sm:$0xf] %vm2984_vm4, %v2789_v37  ;;  %v1476_v46 = vadd.f32 %v5563_v53, %v1475_v44  ;;  %v1636_v47 = vadd.f32 %v5563_v53, %v1635_v45 }
 0x277   :  { %3110 = vst.msk [vmem:[%s5866_s3 + $0x1f4] sm:$0xf] %vm2984_vm4, %v2853_v39  ;;  %vm2149_vm1 = vcmp.gt.f32.partialorder %v1793_v42, 0.0  ;;  %v2405_v48 = vmul.f32 0.1, %v1793_v42  ;;  %vm2213_vm7 = vcmp.gt.f32.partialorder %v1953_v43, 0.0 }
 0x278   :  { %v2469_v49 = vmul.f32 0.1, %v1953_v43  ;;  %vm2022_vm8 = vcmp.gt.f32.partialorder %v1476_v46, 0.0  ;;  %v2278_v63 = vmul.f32 0.1, %v1476_v46  ;;  %vm2086_vm9 = vcmp.gt.f32.partialorder %v1636_v47, 0.0 }
 0x279   :  { %v2661_v50 = vsel %vm2149_vm1, %v1793_v42, %v2405_v48  ;;  %v2342_v51 = vmul.f32 0.1, %v1636_v47 }
 0x27a   :  { %v2917_v52 = vpack.c.bf16 %v2661_v50, %v2661_v50  ;;  %v2725_v54 = vsel %vm2213_vm7, %v1953_v43, %v2469_v49  ;;  %v2534_v25 = vsel %vm2022_vm8, %v1476_v46, %v2278_v63 }
 0x27b   :  { %v2981_v55 = vpack.c.bf16 %v2725_v54, %v2725_v54  ;;  %v2790_v56 = vpack.c.bf16 %v2534_v25, %v2534_v25  ;;  %v2598_v57 = vsel %vm2086_vm9, %v1636_v47, %v2342_v51 }
 0x27c   :  { %3174 = vst.msk [vmem:[%s5866_s3 + $0x2f4] sm:$0xf] %vm2984_vm4, %v2917_v52  ;;  %v2854_v58 = vpack.c.bf16 %v2598_v57, %v2598_v57  ;;  %v1795_v59 = vpop.f32.mrf.mxu2  ;;  %v1955_v60 = vpop.f32.mrf.mxu3 }
 0x27d   :  { %3238 = vst.msk [vmem:[%s5866_s3 + $0x3f4] sm:$0xf] %vm2984_vm4, %v2981_v55  ;;  %v1796_v61 = vadd.f32 %v5563_v53, %v1795_v59  ;;  %v1956_v62 = vadd.f32 %v5563_v53, %v1955_v60  ;;  %v1477_v0 = vpop.f32.mrf.mxu0  ;;  %v1637_v1 = vpop.f32.mrf.mxu1 }
 0x27e   :  { %3047 = vst.msk [vmem:[%s5866_s3 + $0xf8] sm:$0xf] %vm2984_vm4, %v2790_v56  ;;  %v1478_v2 = vadd.f32 %v5563_v53, %v1477_v0  ;;  %v1638_v3 = vadd.f32 %v5563_v53, %v1637_v1 }
 0x27f   :  { %3111 = vst.msk [vmem:[%s5866_s3 + $0x1f8] sm:$0xf] %vm2984_vm4, %v2854_v58  ;;  %vm2150_vm10 = vcmp.gt.f32.partialorder %v1796_v61, 0.0  ;;  %v2406_v4 = vmul.f32 0.1, %v1796_v61  ;;  %vm2214_vm11 = vcmp.gt.f32.partialorder %v1956_v62, 0.0 }
 0x280   :  { %v2470_v5 = vmul.f32 0.1, %v1956_v62  ;;  %vm2023_vm12 = vcmp.gt.f32.partialorder %v1478_v2, 0.0  ;;  %v2279_v6 = vmul.f32 0.1, %v1478_v2  ;;  %vm2087_vm13 = vcmp.gt.f32.partialorder %v1638_v3, 0.0 }
 0x281   :  { %v2662_v7 = vsel %vm2150_vm10, %v1796_v61, %v2406_v4  ;;  %v2343_v8 = vmul.f32 0.1, %v1638_v3 }
 0x282   :  { %v2918_v9 = vpack.c.bf16 %v2662_v7, %v2662_v7  ;;  %v2726_v10 = vsel %vm2214_vm11, %v1956_v62, %v2470_v5  ;;  %v2535_v11 = vsel %vm2023_vm12, %v1478_v2, %v2279_v6 }
 0x283   :  { %v2982_v12 = vpack.c.bf16 %v2726_v10, %v2726_v10  ;;  %v2791_v13 = vpack.c.bf16 %v2535_v11, %v2535_v11  ;;  %v2599_v14 = vsel %vm2087_vm13, %v1638_v3, %v2343_v8 }
 0x284   :  { %3175 = vst.msk [vmem:[%s5866_s3 + $0x2f8] sm:$0xf] %vm2984_vm4, %v2918_v9  ;;  %v2855_v15 = vpack.c.bf16 %v2599_v14, %v2599_v14  ;;  %v1797_v16 = vpop.f32.mrf.mxu2  ;;  %v1957_v36 = vpop.f32.mrf.mxu3 }
 0x285   :  { %3239 = vst.msk [vmem:[%s5866_s3 + $0x3f8] sm:$0xf] %vm2984_vm4, %v2982_v12  ;;  %v1798_v17 = vadd.f32 %v5563_v53, %v1797_v16  ;;  %v1958_v18 = vadd.f32 %v5563_v53, %v1957_v36 }
 0x286   :  { %3048 = vst.msk [vmem:[%s5866_s3 + $0xfc] sm:$0xf] %vm2984_vm4, %v2791_v13 }
 0x287   :  { %3112 = vst.msk [vmem:[%s5866_s3 + $0x1fc] sm:$0xf] %vm2984_vm4, %v2855_v15  ;;  %vm2151_vm14 = vcmp.gt.f32.partialorder %v1798_v17, 0.0  ;;  %v2407_v19 = vmul.f32 0.1, %v1798_v17  ;;  %vm2215_vm15 = vcmp.gt.f32.partialorder %v1958_v18, 0.0 }
 0x288   :  { %v2471_v20 = vmul.f32 0.1, %v1958_v18 }
 0x289   :  { %v2663_v21 = vsel %vm2151_vm14, %v1798_v17, %v2407_v19 }
 0x28a   :  { %v2919_v22 = vpack.c.bf16 %v2663_v21, %v2663_v21  ;;  %v2727_v23 = vsel %vm2215_vm15, %v1958_v18, %v2471_v20 }
 0x28b   :  { %v2983_v24 = vpack.c.bf16 %v2727_v23, %v2727_v23 }
 0x28c   :  { %3176 = vst.msk [vmem:[%s5866_s3 + $0x2fc] sm:$0xf] %vm2984_vm4, %v2919_v22 }
 0x28d   :  { %3240 = vst.msk [vmem:[%s5866_s3 + $0x3fc] sm:$0xf] %vm2984_vm4, %v2983_v24 }

// kernel: build_model_forward.18
= control target key start
LH: loop header
LB: loop body
LE: loop exit
PB: predicated region body
PF: predicated region fallthrough
CT: control target
= control target key end

     0   :  { %vm275_vm0 = vcmask 523264   ;;  %vm797_vm3 = vcmask 257024   ;;  %s1576_s1 = inlined_call_operand.vmem [shape: bf16[64,32], index: 1, kind: input, shape index: {}]   ;;  %s1577_s2 = inlined_call_operand.vmem [shape: f32[1,32], index: 2, kind: input, shape index: {}]   ;;  %s1578_s0 = inlined_call_operand.vmem [shape: bf16[512,64], index: 0, kind: input, shape index: {}]   ;;  %s1579_s3 = inlined_call_operand.vmem [shape: bf16[512,32], index: 3, kind: output, shape index: {}]  }
   0x1   :  { %v1077_v0 = vld [vmem:[%s1576_s1 + $0x18] sm:$0xff]  ;;  %v1076_v1 = vld [vmem:[%s1576_s1 + $0x10] sm:$0xff]  ;;  %v1075_v2 = vld [vmem:[%s1576_s1 + $0x8] sm:$0xff] }
   0x2   :  { %376 = vmatpush.bf16.msra.mxu0 %v1077_v0  ;;  %1078 = vmatpush.bf16.msra.mxu1 %v1077_v0  ;;  %v1074_v3 = vld [vmem:[%s1576_s1] sm:$0xff]  ;;  %v1043_v8 = vld [vmem:[%s1578_s0 + $0x8] sm:$0xff]  ;;  %v1044_v12 = vld [vmem:[%s1578_s0 + $0x10] sm:$0xff] }
   0x3   :  { %1079 = vmatpush.bf16.msra.mxu2 %v1077_v0  ;;  %1080 = vmatpush.bf16.msra.mxu3 %v1077_v0  ;;  %v1042_v4 = vld [vmem:[%s1578_s0] sm:$0xff]  ;;  %v1051_v9 = vld [vmem:[%s1578_s0 + $0x48] sm:$0xff]  ;;  %v1052_v13 = vld [vmem:[%s1578_s0 + $0x50] sm:$0xff] }
   0x4   :  { %v1050_v5 = vld [vmem:[%s1578_s0 + $0x40] sm:$0xff]  ;;  %v1059_v10 = vld [vmem:[%s1578_s0 + $0x88] sm:$0xff]  ;;  %v1060_v14 = vld [vmem:[%s1578_s0 + $0x90] sm:$0xff] }
   0x5   :  { %v1058_v6 = vld [vmem:[%s1578_s0 + $0x80] sm:$0xff]  ;;  %v1067_v11 = vld [vmem:[%s1578_s0 + $0xc8] sm:$0xff]  ;;  %v1068_v15 = vld [vmem:[%s1578_s0 + $0xd0] sm:$0xff] }
   0x6   :  { %377 = vmatpush.bf16.msra.mxu0 %v1076_v1  ;;  %1081 = vmatpush.bf16.msra.mxu1 %v1076_v1  ;;  %v1066_v7 = vld [vmem:[%s1578_s0 + $0xc0] sm:$0xff]  ;;  %v1045_v16 = vld [vmem:[%s1578_s0 + $0x18] sm:$0xff]  ;;  %v1047_v24 = vld [vmem:[%s1578_s0 + $0x28] sm:$0xff] }
   0x7   :  { %1082 = vmatpush.bf16.msra.mxu2 %v1076_v1  ;;  %1083 = vmatpush.bf16.msra.mxu3 %v1076_v1  ;;  %v1053_v17 = vld [vmem:[%s1578_s0 + $0x58] sm:$0xff]  ;;  %v1046_v20 = vld [vmem:[%s1578_s0 + $0x20] sm:$0xff]  ;;  %v1055_v25 = vld [vmem:[%s1578_s0 + $0x68] sm:$0xff] }
   0x8   :  { %v1061_v18 = vld [vmem:[%s1578_s0 + $0x98] sm:$0xff]  ;;  %v1054_v21 = vld [vmem:[%s1578_s0 + $0x60] sm:$0xff]  ;;  %v1063_v26 = vld [vmem:[%s1578_s0 + $0xa8] sm:$0xff] }
   0x9   :  { %v1069_v19 = vld [vmem:[%s1578_s0 + $0xd8] sm:$0xff]  ;;  %v1062_v22 = vld [vmem:[%s1578_s0 + $0xa0] sm:$0xff]  ;;  %v1071_v27 = vld [vmem:[%s1578_s0 + $0xe8] sm:$0xff] }
   0xa   :  { %378 = vmatpush.bf16.msra.mxu0 %v1075_v2  ;;  %1084 = vmatpush.bf16.msra.mxu1 %v1075_v2  ;;  %v1070_v23 = vld [vmem:[%s1578_s0 + $0xe0] sm:$0xff]  ;;  %v1048_v28 = vld [vmem:[%s1578_s0 + $0x30] sm:$0xff]  ;;  %v1049_v32 = vld [vmem:[%s1578_s0 + $0x38] sm:$0xff] }
   0xb   :  { %1085 = vmatpush.bf16.msra.mxu2 %v1075_v2  ;;  %1086 = vmatpush.bf16.msra.mxu3 %v1075_v2  ;;  %v1056_v29 = vld [vmem:[%s1578_s0 + $0x70] sm:$0xff]  ;;  %v1057_v33 = vld [vmem:[%s1578_s0 + $0x78] sm:$0xff]  ;;  %v1254_v36 = vld [vmem:[%s1577_s2] ss:$0 sm:$0xff] }
   0xc   :  { %v1064_v30 = vld [vmem:[%s1578_s0 + $0xb0] sm:$0xff]  ;;  %v1065_v34 = vld [vmem:[%s1578_s0 + $0xb8] sm:$0xff] }
   0xd   :  { %v1072_v31 = vld [vmem:[%s1578_s0 + $0xf0] sm:$0xff]  ;;  %v1073_v35 = vld [vmem:[%s1578_s0 + $0xf8] sm:$0xff] }
   0xe   :  { %379 = vmatpush.bf16.msra.mxu0 %v1074_v3  ;;  %1087 = vmatpush.bf16.msra.mxu1 %v1074_v3 }
   0xf   :  { %1088 = vmatpush.bf16.msra.mxu2 %v1074_v3  ;;  %1089 = vmatpush.bf16.msra.mxu3 %v1074_v3 }
  0x11   :  { %1010 = vmatmul.msk.bf16.vlgmr.msra.gmra.mxu0 %vm275_vm0, %v1042_v4  ;;  %1018 = vmatmul.msk.bf16.vlgmr.msra.gmra.mxu1 %vm275_vm0, %v1050_v5 }
  0x12   :  { %1026 = vmatmul.msk.bf16.vlgmr.msra.gmra.mxu2 %vm275_vm0, %v1058_v6  ;;  %1034 = vmatmul.msk.bf16.vlgmr.msra.gmra.mxu3 %vm275_vm0, %v1066_v7 }
  0x21   :  { %1011 = vmatmul.msk.bf16.gmra.mxu0 %vm275_vm0, %v1043_v8  ;;  %1019 = vmatmul.msk.bf16.gmra.mxu1 %vm275_vm0, %v1051_v9 }
  0x22   :  { %1027 = vmatmul.msk.bf16.gmra.mxu2 %vm275_vm0, %v1059_v10  ;;  %1035 = vmatmul.msk.bf16.gmra.mxu3 %vm275_vm0, %v1067_v11 }
  0x31   :  { %1012 = vmatmul.msk.bf16.gmra.mxu0 %vm275_vm0, %v1044_v12  ;;  %1020 = vmatmul.msk.bf16.gmra.mxu1 %vm275_vm0, %v1052_v13 }
  0x32   :  { %1028 = vmatmul.msk.bf16.gmra.mxu2 %vm275_vm0, %v1060_v14  ;;  %1036 = vmatmul.msk.bf16.gmra.mxu3 %vm275_vm0, %v1068_v15 }
  0x41   :  { %1013 = vmatmul.msk.bf16.gmra.mxu0 %vm275_vm0, %v1045_v16  ;;  %1021 = vmatmul.msk.bf16.gmra.mxu1 %vm275_vm0, %v1053_v17 }
  0x42   :  { %1029 = vmatmul.msk.bf16.gmra.mxu2 %vm275_vm0, %v1061_v18  ;;  %1037 = vmatmul.msk.bf16.gmra.mxu3 %vm275_vm0, %v1069_v19 }
  0x51   :  { %1014 = vmatmul.msk.bf16.gmra.mxu0 %vm275_vm0, %v1046_v20  ;;  %1022 = vmatmul.msk.bf16.gmra.mxu1 %vm275_vm0, %v1054_v21 }
  0x52   :  { %1030 = vmatmul.msk.bf16.gmra.mxu2 %vm275_vm0, %v1062_v22  ;;  %1038 = vmatmul.msk.bf16.gmra.mxu3 %vm275_vm0, %v1070_v23 }
  0x61   :  { %1015 = vmatmul.msk.bf16.gmra.mxu0 %vm275_vm0, %v1047_v24  ;;  %1023 = vmatmul.msk.bf16.gmra.mxu1 %vm275_vm0, %v1055_v25 }
  0x62   :  { %1031 = vmatmul.msk.bf16.gmra.mxu2 %vm275_vm0, %v1063_v26  ;;  %1039 = vmatmul.msk.bf16.gmra.mxu3 %vm275_vm0, %v1071_v27 }
  0x71   :  { %1016 = vmatmul.msk.bf16.gmra.mxu0 %vm275_vm0, %v1048_v28  ;;  %1024 = vmatmul.msk.bf16.gmra.mxu1 %vm275_vm0, %v1056_v29 }
  0x72   :  { %1032 = vmatmul.msk.bf16.gmra.mxu2 %vm275_vm0, %v1064_v30  ;;  %1040 = vmatmul.msk.bf16.gmra.mxu3 %vm275_vm0, %v1072_v31 }
  0x81   :  { %1017 = vmatmul.msk.bf16.gmra.mxu0 %vm275_vm0, %v1049_v32  ;;  %1025 = vmatmul.msk.bf16.gmra.mxu1 %vm275_vm0, %v1057_v33 }
  0x82   :  { %1033 = vmatmul.msk.bf16.gmra.mxu2 %vm275_vm0, %v1065_v34  ;;  %1041 = vmatmul.msk.bf16.gmra.mxu3 %vm275_vm0, %v1073_v35 }
  0x8e   :  { %v381_v37 = vpop.f32.mrf.mxu0  ;;  %v421_v38 = vpop.f32.mrf.mxu1 }
  0x8f   :  { %v382_v39 = vadd.f32 %v1254_v36, %v381_v37  ;;  %v422_v40 = vadd.f32 %v1254_v36, %v421_v38 }
  0x91   :  { %vm541_vm1 = vcmp.gt.f32.partialorder %v382_v39, 0.0  ;;  %v605_v41 = vmul.f32 0.1, %v382_v39  ;;  %vm557_vm2 = vcmp.gt.f32.partialorder %v422_v40, 0.0  ;;  %v621_v42 = vmul.f32 0.1, %v422_v40 }
  0x93   :  { %v669_v43 = vsel %vm541_vm1, %v382_v39, %v605_v41  ;;  %v685_v44 = vsel %vm557_vm2, %v422_v40, %v621_v42 }
  0x94   :  { %v733_v45 = vpack.c.bf16 %v669_v43, %v669_v43  ;;  %v749_v46 = vpack.c.bf16 %v685_v44, %v685_v44 }
  0x95   :  { %v461_v47 = vpop.f32.mrf.mxu2  ;;  %v501_v48 = vpop.f32.mrf.mxu3 }
  0x96   :  { %798 = vst.msk [vmem:[%s1579_s3] sm:$0xf] %vm797_vm3, %v733_v45  ;;  %v462_v49 = vadd.f32 %v1254_v36, %v461_v47  ;;  %v502_v50 = vadd.f32 %v1254_v36, %v501_v48  ;;  %v383_v51 = vpop.f32.mrf.mxu0  ;;  %v423_v52 = vpop.f32.mrf.mxu1 }
  0x97   :  { %814 = vst.msk [vmem:[%s1579_s3 + $0x40] sm:$0xf] %vm797_vm3, %v749_v46  ;;  %v384_v53 = vadd.f32 %v1254_v36, %v383_v51  ;;  %v424_v54 = vadd.f32 %v1254_v36, %v423_v52 }
  0x98   :  { %vm573_vm4 = vcmp.gt.f32.partialorder %v462_v49, 0.0  ;;  %v637_v55 = vmul.f32 0.1, %v462_v49  ;;  %vm589_vm5 = vcmp.gt.f32.partialorder %v502_v50, 0.0  ;;  %v653_v56 = vmul.f32 0.1, %v502_v50 }
  0x99   :  { %vm542_vm6 = vcmp.gt.f32.partialorder %v384_v53, 0.0  ;;  %v606_v57 = vmul.f32 0.1, %v384_v53  ;;  %vm558_vm7 = vcmp.gt.f32.partialorder %v424_v54, 0.0  ;;  %v622_v58 = vmul.f32 0.1, %v424_v54 }
  0x9a   :  { %v701_v59 = vsel %vm573_vm4, %v462_v49, %v637_v55  ;;  %v717_v60 = vsel %vm589_vm5, %v502_v50, %v653_v56 }
  0x9b   :  { %v765_v61 = vpack.c.bf16 %v701_v59, %v701_v59  ;;  %v781_v62 = vpack.c.bf16 %v717_v60, %v717_v60  ;;  %v670_v63 = vsel %vm542_vm6, %v384_v53, %v606_v57  ;;  %v686_v0 = vsel %vm558_vm7, %v424_v54, %v622_v58 }
  0x9c   :  { %v734_v1 = vpack.c.bf16 %v670_v63, %v670_v63  ;;  %v750_v2 = vpack.c.bf16 %v686_v0, %v686_v0 }
  0x9d   :  { %830 = vst.msk [vmem:[%s1579_s3 + $0x80] sm:$0xf] %vm797_vm3, %v765_v61  ;;  %v463_v3 = vpop.f32.mrf.mxu2  ;;  %v503_v4 = vpop.f32.mrf.mxu3 }
  0x9e   :  { %846 = vst.msk [vmem:[%s1579_s3 + $0xc0] sm:$0xf] %vm797_vm3, %v781_v62  ;;  %v464_v5 = vadd.f32 %v1254_v36, %v463_v3  ;;  %v504_v6 = vadd.f32 %v1254_v36, %v503_v4  ;;  %v386_v7 = vpop.f32.mrf.mxu0  ;;  %v426_v8 = vpop.f32.mrf.mxu1 }
  0x9f   :  { %799 = vst.msk [vmem:[%s1579_s3 + $0x4] sm:$0xf] %vm797_vm3, %v734_v1  ;;  %v387_v9 = vadd.f32 %v1254_v36, %v386_v7  ;;  %v427_v10 = vadd.f32 %v1254_v36, %v426_v8 }
  0xa0   :  { %815 = vst.msk [vmem:[%s1579_s3 + $0x44] sm:$0xf] %vm797_vm3, %v750_v2  ;;  %vm574_vm8 = vcmp.gt.f32.partialorder %v464_v5, 0.0  ;;  %v638_v11 = vmul.f32 0.1, %v464_v5  ;;  %vm590_vm9 = vcmp.gt.f32.partialorder %v504_v6, 0.0 }
  0xa1   :  { %v654_v12 = vmul.f32 0.1, %v504_v6  ;;  %vm543_vm10 = vcmp.gt.f32.partialorder %v387_v9, 0.0  ;;  %v607_v13 = vmul.f32 0.1, %v387_v9  ;;  %vm559_vm11 = vcmp.gt.f32.partialorder %v427_v10, 0.0 }
  0xa2   :  { %v702_v14 = vsel %vm574_vm8, %v464_v5, %v638_v11  ;;  %v623_v15 = vmul.f32 0.1, %v427_v10 }
  0xa3   :  { %v766_v16 = vpack.c.bf16 %v702_v14, %v702_v14  ;;  %v718_v17 = vsel %vm590_vm9, %v504_v6, %v654_v12  ;;  %v671_v18 = vsel %vm543_vm10, %v387_v9, %v607_v13 }
  0xa4   :  { %v782_v19 = vpack.c.bf16 %v718_v17, %v718_v17  ;;  %v735_v20 = vpack.c.bf16 %v671_v18, %v671_v18  ;;  %v687_v21 = vsel %vm559_vm11, %v427_v10, %v623_v15 }
  0xa5   :  { %831 = vst.msk [vmem:[%s1579_s3 + $0x84] sm:$0xf] %vm797_vm3, %v766_v16  ;;  %v751_v22 = vpack.c.bf16 %v687_v21, %v687_v21  ;;  %v466_v23 = vpop.f32.mrf.mxu2  ;;  %v506_v24 = vpop.f32.mrf.mxu3 }
  0xa6   :  { %847 = vst.msk [vmem:[%s1579_s3 + $0xc4] sm:$0xf] %vm797_vm3, %v782_v19  ;;  %v467_v25 = vadd.f32 %v1254_v36, %v466_v23  ;;  %v507_v26 = vadd.f32 %v1254_v36, %v506_v24  ;;  %v388_v27 = vpop.f32.mrf.mxu0  ;;  %v428_v28 = vpop.f32.mrf.mxu1 }
  0xa7   :  { %800 = vst.msk [vmem:[%s1579_s3 + $0x8] sm:$0xf] %vm797_vm3, %v735_v20  ;;  %v389_v29 = vadd.f32 %v1254_v36, %v388_v27  ;;  %v429_v30 = vadd.f32 %v1254_v36, %v428_v28 }
  0xa8   :  { %816 = vst.msk [vmem:[%s1579_s3 + $0x48] sm:$0xf] %vm797_vm3, %v751_v22  ;;  %vm575_vm12 = vcmp.gt.f32.partialorder %v467_v25, 0.0  ;;  %v639_v31 = vmul.f32 0.1, %v467_v25  ;;  %vm591_vm13 = vcmp.gt.f32.partialorder %v507_v26, 0.0 }
  0xa9   :  { %v655_v32 = vmul.f32 0.1, %v507_v26  ;;  %vm544_vm14 = vcmp.gt.f32.partialorder %v389_v29, 0.0  ;;  %v608_v33 = vmul.f32 0.1, %v389_v29  ;;  %vm560_vm15 = vcmp.gt.f32.partialorder %v429_v30, 0.0 }
  0xaa   :  { %v703_v34 = vsel %vm575_vm12, %v467_v25, %v639_v31  ;;  %v624_v35 = vmul.f32 0.1, %v429_v30 }
  0xab   :  { %v767_v37 = vpack.c.bf16 %v703_v34, %v703_v34  ;;  %v719_v38 = vsel %vm591_vm13, %v507_v26, %v655_v32  ;;  %v672_v39 = vsel %vm544_vm14, %v389_v29, %v608_v33 }
  0xac   :  { %v783_v40 = vpack.c.bf16 %v719_v38, %v719_v38  ;;  %v736_v41 = vpack.c.bf16 %v672_v39, %v672_v39  ;;  %v688_v42 = vsel %vm560_vm15, %v429_v30, %v624_v35 }
  0xad   :  { %832 = vst.msk [vmem:[%s1579_s3 + $0x88] sm:$0xf] %vm797_vm3, %v767_v37  ;;  %v752_v43 = vpack.c.bf16 %v688_v42, %v688_v42  ;;  %v468_v44 = vpop.f32.mrf.mxu2  ;;  %v508_v45 = vpop.f32.mrf.mxu3 }
  0xae   :  { %848 = vst.msk [vmem:[%s1579_s3 + $0xc8] sm:$0xf] %vm797_vm3, %v783_v40  ;;  %v469_v46 = vadd.f32 %v1254_v36, %v468_v44  ;;  %v509_v47 = vadd.f32 %v1254_v36, %v508_v45  ;;  %v391_v48 = vpop.f32.mrf.mxu0  ;;  %v431_v49 = vpop.f32.mrf.mxu1 }
  0xaf   :  { %801 = vst.msk [vmem:[%s1579_s3 + $0xc] sm:$0xf] %vm797_vm3, %v736_v41  ;;  %v392_v50 = vadd.f32 %v1254_v36, %v391_v48  ;;  %v432_v51 = vadd.f32 %v1254_v36, %v431_v49 }
  0xb0   :  { %817 = vst.msk [vmem:[%s1579_s3 + $0x4c] sm:$0xf] %vm797_vm3, %v752_v43  ;;  %vm576_vm0 = vcmp.gt.f32.partialorder %v469_v46, 0.0  ;;  %v640_v52 = vmul.f32 0.1, %v469_v46  ;;  %vm592_vm1 = vcmp.gt.f32.partialorder %v509_v47, 0.0 }
  0xb1   :  { %v656_v53 = vmul.f32 0.1, %v509_v47  ;;  %vm545_vm2 = vcmp.gt.f32.partialorder %v392_v50, 0.0  ;;  %v609_v54 = vmul.f32 0.1, %v392_v50  ;;  %vm561_vm4 = vcmp.gt.f32.partialorder %v432_v51, 0.0 }
  0xb2   :  { %v704_v55 = vsel %vm576_vm0, %v469_v46, %v640_v52  ;;  %v625_v56 = vmul.f32 0.1, %v432_v51 }
  0xb3   :  { %v768_v57 = vpack.c.bf16 %v704_v55, %v704_v55  ;;  %v720_v58 = vsel %vm592_vm1, %v509_v47, %v656_v53  ;;  %v673_v59 = vsel %vm545_vm2, %v392_v50, %v609_v54 }
  0xb4   :  { %v784_v60 = vpack.c.bf16 %v720_v58, %v720_v58  ;;  %v737_v61 = vpack.c.bf16 %v673_v59, %v673_v59  ;;  %v689_v62 = vsel %vm561_vm4, %v432_v51, %v625_v56 }
  0xb5   :  { %833 = vst.msk [vmem:[%s1579_s3 + $0x8c] sm:$0xf] %vm797_vm3, %v768_v57  ;;  %v753_v63 = vpack.c.bf16 %v689_v62, %v689_v62  ;;  %v471_v0 = vpop.f32.mrf.mxu2  ;;  %v511_v1 = vpop.f32.mrf.mxu3 }
  0xb6   :  { %849 = vst.msk [vmem:[%s1579_s3 + $0xcc] sm:$0xf] %vm797_vm3, %v784_v60  ;;  %v472_v2 = vadd.f32 %v1254_v36, %v471_v0  ;;  %v512_v3 = vadd.f32 %v1254_v36, %v511_v1  ;;  %v393_v4 = vpop.f32.mrf.mxu0  ;;  %v433_v5 = vpop.f32.mrf.mxu1 }
  0xb7   :  { %802 = vst.msk [vmem:[%s1579_s3 + $0x10] sm:$0xf] %vm797_vm3, %v737_v61  ;;  %v394_v6 = vadd.f32 %v1254_v36, %v393_v4  ;;  %v434_v7 = vadd.f32 %v1254_v36, %v433_v5 }
  0xb8   :  { %818 = vst.msk [vmem:[%s1579_s3 + $0x50] sm:$0xf] %vm797_vm3, %v753_v63  ;;  %vm577_vm5 = vcmp.gt.f32.partialorder %v472_v2, 0.0  ;;  %v641_v8 = vmul.f32 0.1, %v472_v2  ;;  %vm593_vm6 = vcmp.gt.f32.partialorder %v512_v3, 0.0 }
  0xb9   :  { %v657_v9 = vmul.f32 0.1, %v512_v3  ;;  %vm546_vm7 = vcmp.gt.f32.partialorder %v394_v6, 0.0  ;;  %v610_v10 = vmul.f32 0.1, %v394_v6  ;;  %vm562_vm8 = vcmp.gt.f32.partialorder %v434_v7, 0.0 }
  0xba   :  { %v705_v11 = vsel %vm577_vm5, %v472_v2, %v641_v8  ;;  %v626_v12 = vmul.f32 0.1, %v434_v7 }
  0xbb   :  { %v769_v13 = vpack.c.bf16 %v705_v11, %v705_v11  ;;  %v721_v14 = vsel %vm593_vm6, %v512_v3, %v657_v9  ;;  %v674_v15 = vsel %vm546_vm7, %v394_v6, %v610_v10 }
  0xbc   :  { %v785_v16 = vpack.c.bf16 %v721_v14, %v721_v14  ;;  %v738_v17 = vpack.c.bf16 %v674_v15, %v674_v15  ;;  %v690_v18 = vsel %vm562_vm8, %v434_v7, %v626_v12 }
  0xbd   :  { %834 = vst.msk [vmem:[%s1579_s3 + $0x90] sm:$0xf] %vm797_vm3, %v769_v13  ;;  %v754_v19 = vpack.c.bf16 %v690_v18, %v690_v18  ;;  %v473_v20 = vpop.f32.mrf.mxu2  ;;  %v513_v21 = vpop.f32.mrf.mxu3 }
  0xbe   :  { %850 = vst.msk [vmem:[%s1579_s3 + $0xd0] sm:$0xf] %vm797_vm3, %v785_v16  ;;  %v474_v22 = vadd.f32 %v1254_v36, %v473_v20  ;;  %v514_v23 = vadd.f32 %v1254_v36, %v513_v21  ;;  %v396_v24 = vpop.f32.mrf.mxu0  ;;  %v436_v25 = vpop.f32.mrf.mxu1 }
  0xbf   :  { %803 = vst.msk [vmem:[%s1579_s3 + $0x14] sm:$0xf] %vm797_vm3, %v738_v17  ;;  %v397_v26 = vadd.f32 %v1254_v36, %v396_v24  ;;  %v437_v27 = vadd.f32 %v1254_v36, %v436_v25 }
  0xc0   :  { %819 = vst.msk [vmem:[%s1579_s3 + $0x54] sm:$0xf] %vm797_vm3, %v754_v19  ;;  %vm578_vm9 = vcmp.gt.f32.partialorder %v474_v22, 0.0  ;;  %v642_v28 = vmul.f32 0.1, %v474_v22  ;;  %vm594_vm10 = vcmp.gt.f32.partialorder %v514_v23, 0.0 }
  0xc1   :  { %v658_v29 = vmul.f32 0.1, %v514_v23  ;;  %vm547_vm11 = vcmp.gt.f32.partialorder %v397_v26, 0.0  ;;  %v611_v30 = vmul.f32 0.1, %v397_v26  ;;  %vm563_vm12 = vcmp.gt.f32.partialorder %v437_v27, 0.0 }
  0xc2   :  { %v706_v31 = vsel %vm578_vm9, %v474_v22, %v642_v28  ;;  %v627_v32 = vmul.f32 0.1, %v437_v27 }
  0xc3   :  { %v770_v33 = vpack.c.bf16 %v706_v31, %v706_v31  ;;  %v722_v34 = vsel %vm594_vm10, %v514_v23, %v658_v29  ;;  %v675_v35 = vsel %vm547_vm11, %v397_v26, %v611_v30 }
  0xc4   :  { %v786_v37 = vpack.c.bf16 %v722_v34, %v722_v34  ;;  %v739_v38 = vpack.c.bf16 %v675_v35, %v675_v35  ;;  %v691_v39 = vsel %vm563_vm12, %v437_v27, %v627_v32 }
  0xc5   :  { %835 = vst.msk [vmem:[%s1579_s3 + $0x94] sm:$0xf] %vm797_vm3, %v770_v33  ;;  %v755_v40 = vpack.c.bf16 %v691_v39, %v691_v39  ;;  %v476_v41 = vpop.f32.mrf.mxu2  ;;  %v516_v42 = vpop.f32.mrf.mxu3 }
  0xc6   :  { %851 = vst.msk [vmem:[%s1579_s3 + $0xd4] sm:$0xf] %vm797_vm3, %v786_v37  ;;  %v477_v43 = vadd.f32 %v1254_v36, %v476_v41  ;;  %v517_v44 = vadd.f32 %v1254_v36, %v516_v42  ;;  %v398_v45 = vpop.f32.mrf.mxu0  ;;  %v438_v46 = vpop.f32.mrf.mxu1 }
  0xc7   :  { %804 = vst.msk [vmem:[%s1579_s3 + $0x18] sm:$0xf] %vm797_vm3, %v739_v38  ;;  %v399_v47 = vadd.f32 %v1254_v36, %v398_v45  ;;  %v439_v48 = vadd.f32 %v1254_v36, %v438_v46 }
  0xc8   :  { %820 = vst.msk [vmem:[%s1579_s3 + $0x58] sm:$0xf] %vm797_vm3, %v755_v40  ;;  %vm579_vm13 = vcmp.gt.f32.partialorder %v477_v43, 0.0  ;;  %v643_v49 = vmul.f32 0.1, %v477_v43  ;;  %vm595_vm14 = vcmp.gt.f32.partialorder %v517_v44, 0.0 }
  0xc9   :  { %v659_v50 = vmul.f32 0.1, %v517_v44  ;;  %vm548_vm15 = vcmp.gt.f32.partialorder %v399_v47, 0.0  ;;  %v612_v51 = vmul.f32 0.1, %v399_v47  ;;  %vm564_vm0 = vcmp.gt.f32.partialorder %v439_v48, 0.0 }
  0xca   :  { %v707_v52 = vsel %vm579_vm13, %v477_v43, %v643_v49  ;;  %v628_v53 = vmul.f32 0.1, %v439_v48 }
  0xcb   :  { %v771_v54 = vpack.c.bf16 %v707_v52, %v707_v52  ;;  %v723_v55 = vsel %vm595_vm14, %v517_v44, %v659_v50  ;;  %v676_v56 = vsel %vm548_vm15, %v399_v47, %v612_v51 }
  0xcc   :  { %v787_v57 = vpack.c.bf16 %v723_v55, %v723_v55  ;;  %v740_v58 = vpack.c.bf16 %v676_v56, %v676_v56  ;;  %v692_v59 = vsel %vm564_vm0, %v439_v48, %v628_v53 }
  0xcd   :  { %836 = vst.msk [vmem:[%s1579_s3 + $0x98] sm:$0xf] %vm797_vm3, %v771_v54  ;;  %v756_v60 = vpack.c.bf16 %v692_v59, %v692_v59  ;;  %v478_v61 = vpop.f32.mrf.mxu2  ;;  %v518_v62 = vpop.f32.mrf.mxu3 }
  0xce   :  { %852 = vst.msk [vmem:[%s1579_s3 + $0xd8] sm:$0xf] %vm797_vm3, %v787_v57  ;;  %v479_v63 = vadd.f32 %v1254_v36, %v478_v61  ;;  %v519_v0 = vadd.f32 %v1254_v36, %v518_v62  ;;  %v401_v1 = vpop.f32.mrf.mxu0  ;;  %v441_v2 = vpop.f32.mrf.mxu1 }
  0xcf   :  { %805 = vst.msk [vmem:[%s1579_s3 + $0x1c] sm:$0xf] %vm797_vm3, %v740_v58  ;;  %v402_v3 = vadd.f32 %v1254_v36, %v401_v1  ;;  %v442_v4 = vadd.f32 %v1254_v36, %v441_v2 }
  0xd0   :  { %821 = vst.msk [vmem:[%s1579_s3 + $0x5c] sm:$0xf] %vm797_vm3, %v756_v60  ;;  %vm580_vm1 = vcmp.gt.f32.partialorder %v479_v63, 0.0  ;;  %v644_v5 = vmul.f32 0.1, %v479_v63  ;;  %vm596_vm2 = vcmp.gt.f32.partialorder %v519_v0, 0.0 }
  0xd1   :  { %v660_v6 = vmul.f32 0.1, %v519_v0  ;;  %vm549_vm4 = vcmp.gt.f32.partialorder %v402_v3, 0.0  ;;  %v613_v7 = vmul.f32 0.1, %v402_v3  ;;  %vm565_vm5 = vcmp.gt.f32.partialorder %v442_v4, 0.0 }
  0xd2   :  { %v708_v8 = vsel %vm580_vm1, %v479_v63, %v644_v5  ;;  %v629_v9 = vmul.f32 0.1, %v442_v4 }
  0xd3   :  { %v772_v10 = vpack.c.bf16 %v708_v8, %v708_v8  ;;  %v724_v11 = vsel %vm596_vm2, %v519_v0, %v660_v6  ;;  %v677_v12 = vsel %vm549_vm4, %v402_v3, %v613_v7 }
  0xd4   :  { %v788_v13 = vpack.c.bf16 %v724_v11, %v724_v11  ;;  %v741_v14 = vpack.c.bf16 %v677_v12, %v677_v12  ;;  %v693_v15 = vsel %vm565_vm5, %v442_v4, %v629_v9 }
  0xd5   :  { %837 = vst.msk [vmem:[%s1579_s3 + $0x9c] sm:$0xf] %vm797_vm3, %v772_v10  ;;  %v757_v16 = vpack.c.bf16 %v693_v15, %v693_v15  ;;  %v481_v17 = vpop.f32.mrf.mxu2  ;;  %v521_v18 = vpop.f32.mrf.mxu3 }
  0xd6   :  { %853 = vst.msk [vmem:[%s1579_s3 + $0xdc] sm:$0xf] %vm797_vm3, %v788_v13  ;;  %v482_v19 = vadd.f32 %v1254_v36, %v481_v17  ;;  %v522_v20 = vadd.f32 %v1254_v36, %v521_v18  ;;  %v403_v21 = vpop.f32.mrf.mxu0  ;;  %v443_v22 = vpop.f32.mrf.mxu1 }
  0xd7   :  { %806 = vst.msk [vmem:[%s1579_s3 + $0x20] sm:$0xf] %vm797_vm3, %v741_v14  ;;  %v404_v23 = vadd.f32 %v1254_v36, %v403_v21  ;;  %v444_v24 = vadd.f32 %v1254_v36, %v443_v22 }
  0xd8   :  { %822 = vst.msk [vmem:[%s1579_s3 + $0x60] sm:$0xf] %vm797_vm3, %v757_v16  ;;  %vm581_vm6 = vcmp.gt.f32.partialorder %v482_v19, 0.0  ;;  %v645_v25 = vmul.f32 0.1, %v482_v19  ;;  %vm597_vm7 = vcmp.gt.f32.partialorder %v522_v20, 0.0 }
  0xd9   :  { %v661_v26 = vmul.f32 0.1, %v522_v20  ;;  %vm550_vm8 = vcmp.gt.f32.partialorder %v404_v23, 0.0  ;;  %v614_v27 = vmul.f32 0.1, %v404_v23  ;;  %vm566_vm9 = vcmp.gt.f32.partialorder %v444_v24, 0.0 }
  0xda   :  { %v709_v28 = vsel %vm581_vm6, %v482_v19, %v645_v25  ;;  %v630_v29 = vmul.f32 0.1, %v444_v24 }
  0xdb   :  { %v773_v30 = vpack.c.bf16 %v709_v28, %v709_v28  ;;  %v725_v31 = vsel %vm597_vm7, %v522_v20, %v661_v26  ;;  %v678_v32 = vsel %vm550_vm8, %v404_v23, %v614_v27 }
  0xdc   :  { %v789_v33 = vpack.c.bf16 %v725_v31, %v725_v31  ;;  %v742_v34 = vpack.c.bf16 %v678_v32, %v678_v32  ;;  %v694_v35 = vsel %vm566_vm9, %v444_v24, %v630_v29 }
  0xdd   :  { %838 = vst.msk [vmem:[%s1579_s3 + $0xa0] sm:$0xf] %vm797_vm3, %v773_v30  ;;  %v758_v37 = vpack.c.bf16 %v694_v35, %v694_v35  ;;  %v483_v38 = vpop.f32.mrf.mxu2  ;;  %v523_v39 = vpop.f32.mrf.mxu3 }
  0xde   :  { %854 = vst.msk [vmem:[%s1579_s3 + $0xe0] sm:$0xf] %vm797_vm3, %v789_v33  ;;  %v484_v40 = vadd.f32 %v1254_v36, %v483_v38  ;;  %v524_v41 = vadd.f32 %v1254_v36, %v523_v39  ;;  %v406_v42 = vpop.f32.mrf.mxu0  ;;  %v446_v43 = vpop.f32.mrf.mxu1 }
  0xdf   :  { %807 = vst.msk [vmem:[%s1579_s3 + $0x24] sm:$0xf] %vm797_vm3, %v742_v34  ;;  %v407_v44 = vadd.f32 %v1254_v36, %v406_v42  ;;  %v447_v45 = vadd.f32 %v1254_v36, %v446_v43 }
  0xe0   :  { %823 = vst.msk [vmem:[%s1579_s3 + $0x64] sm:$0xf] %vm797_vm3, %v758_v37  ;;  %vm582_vm10 = vcmp.gt.f32.partialorder %v484_v40, 0.0  ;;  %v646_v46 = vmul.f32 0.1, %v484_v40  ;;  %vm598_vm11 = vcmp.gt.f32.partialorder %v524_v41, 0.0 }
  0xe1   :  { %v662_v47 = vmul.f32 0.1, %v524_v41  ;;  %vm551_vm12 = vcmp.gt.f32.partialorder %v407_v44, 0.0  ;;  %v615_v48 = vmul.f32 0.1, %v407_v44  ;;  %vm567_vm13 = vcmp.gt.f32.partialorder %v447_v45, 0.0 }
  0xe2   :  { %v710_v49 = vsel %vm582_vm10, %v484_v40, %v646_v46  ;;  %v631_v50 = vmul.f32 0.1, %v447_v45 }
  0xe3   :  { %v774_v51 = vpack.c.bf16 %v710_v49, %v710_v49  ;;  %v726_v52 = vsel %vm598_vm11, %v524_v41, %v662_v47  ;;  %v679_v53 = vsel %vm551_vm12, %v407_v44, %v615_v48 }
  0xe4   :  { %v790_v54 = vpack.c.bf16 %v726_v52, %v726_v52  ;;  %v743_v55 = vpack.c.bf16 %v679_v53, %v679_v53  ;;  %v695_v56 = vsel %vm567_vm13, %v447_v45, %v631_v50 }
  0xe5   :  { %839 = vst.msk [vmem:[%s1579_s3 + $0xa4] sm:$0xf] %vm797_vm3, %v774_v51  ;;  %v759_v57 = vpack.c.bf16 %v695_v56, %v695_v56  ;;  %v486_v58 = vpop.f32.mrf.mxu2  ;;  %v526_v59 = vpop.f32.mrf.mxu3 }
  0xe6   :  { %855 = vst.msk [vmem:[%s1579_s3 + $0xe4] sm:$0xf] %vm797_vm3, %v790_v54  ;;  %v487_v60 = vadd.f32 %v1254_v36, %v486_v58  ;;  %v527_v61 = vadd.f32 %v1254_v36, %v526_v59  ;;  %v408_v62 = vpop.f32.mrf.mxu0  ;;  %v448_v63 = vpop.f32.mrf.mxu1 }
  0xe7   :  { %808 = vst.msk [vmem:[%s1579_s3 + $0x28] sm:$0xf] %vm797_vm3, %v743_v55  ;;  %v409_v0 = vadd.f32 %v1254_v36, %v408_v62  ;;  %v449_v1 = vadd.f32 %v1254_v36, %v448_v63 }
  0xe8   :  { %824 = vst.msk [vmem:[%s1579_s3 + $0x68] sm:$0xf] %vm797_vm3, %v759_v57  ;;  %vm583_vm14 = vcmp.gt.f32.partialorder %v487_v60, 0.0  ;;  %v647_v2 = vmul.f32 0.1, %v487_v60  ;;  %vm599_vm15 = vcmp.gt.f32.partialorder %v527_v61, 0.0 }
  0xe9   :  { %v663_v3 = vmul.f32 0.1, %v527_v61  ;;  %vm552_vm0 = vcmp.gt.f32.partialorder %v409_v0, 0.0  ;;  %v616_v4 = vmul.f32 0.1, %v409_v0  ;;  %vm568_vm1 = vcmp.gt.f32.partialorder %v449_v1, 0.0 }
  0xea   :  { %v711_v5 = vsel %vm583_vm14, %v487_v60, %v647_v2  ;;  %v632_v6 = vmul.f32 0.1, %v449_v1 }
  0xeb   :  { %v775_v7 = vpack.c.bf16 %v711_v5, %v711_v5  ;;  %v727_v8 = vsel %vm599_vm15, %v527_v61, %v663_v3  ;;  %v680_v9 = vsel %vm552_vm0, %v409_v0, %v616_v4 }
  0xec   :  { %v791_v10 = vpack.c.bf16 %v727_v8, %v727_v8  ;;  %v744_v11 = vpack.c.bf16 %v680_v9, %v680_v9  ;;  %v696_v12 = vsel %vm568_vm1, %v449_v1, %v632_v6 }
  0xed   :  { %840 = vst.msk [vmem:[%s1579_s3 + $0xa8] sm:$0xf] %vm797_vm3, %v775_v7  ;;  %v760_v13 = vpack.c.bf16 %v696_v12, %v696_v12  ;;  %v488_v14 = vpop.f32.mrf.mxu2  ;;  %v528_v15 = vpop.f32.mrf.mxu3 }
  0xee   :  { %856 = vst.msk [vmem:[%s1579_s3 + $0xe8] sm:$0xf] %vm797_vm3, %v791_v10  ;;  %v489_v16 = vadd.f32 %v1254_v36, %v488_v14  ;;  %v529_v17 = vadd.f32 %v1254_v36, %v528_v15  ;;  %v411_v18 = vpop.f32.mrf.mxu0  ;;  %v451_v19 = vpop.f32.mrf.mxu1 }
  0xef   :  { %809 = vst.msk [vmem:[%s1579_s3 + $0x2c] sm:$0xf] %vm797_vm3, %v744_v11  ;;  %v412_v20 = vadd.f32 %v1254_v36, %v411_v18  ;;  %v452_v21 = vadd.f32 %v1254_v36, %v451_v19 }
  0xf0   :  { %825 = vst.msk [vmem:[%s1579_s3 + $0x6c] sm:$0xf] %vm797_vm3, %v760_v13  ;;  %vm584_vm2 = vcmp.gt.f32.partialorder %v489_v16, 0.0  ;;  %v648_v22 = vmul.f32 0.1, %v489_v16  ;;  %vm600_vm4 = vcmp.gt.f32.partialorder %v529_v17, 0.0 }
  0xf1   :  { %v664_v23 = vmul.f32 0.1, %v529_v17  ;;  %vm553_vm5 = vcmp.gt.f32.partialorder %v412_v20, 0.0  ;;  %v617_v24 = vmul.f32 0.1, %v412_v20  ;;  %vm569_vm6 = vcmp.gt.f32.partialorder %v452_v21, 0.0 }
  0xf2   :  { %v712_v25 = vsel %vm584_vm2, %v489_v16, %v648_v22  ;;  %v633_v26 = vmul.f32 0.1, %v452_v21 }
  0xf3   :  { %v776_v27 = vpack.c.bf16 %v712_v25, %v712_v25  ;;  %v728_v28 = vsel %vm600_vm4, %v529_v17, %v664_v23  ;;  %v681_v29 = vsel %vm553_vm5, %v412_v20, %v617_v24 }
  0xf4   :  { %v792_v30 = vpack.c.bf16 %v728_v28, %v728_v28  ;;  %v745_v31 = vpack.c.bf16 %v681_v29, %v681_v29  ;;  %v697_v32 = vsel %vm569_vm6, %v452_v21, %v633_v26 }
  0xf5   :  { %841 = vst.msk [vmem:[%s1579_s3 + $0xac] sm:$0xf] %vm797_vm3, %v776_v27  ;;  %v761_v33 = vpack.c.bf16 %v697_v32, %v697_v32  ;;  %v491_v34 = vpop.f32.mrf.mxu2  ;;  %v531_v35 = vpop.f32.mrf.mxu3 }
  0xf6   :  { %857 = vst.msk [vmem:[%s1579_s3 + $0xec] sm:$0xf] %vm797_vm3, %v792_v30  ;;  %v492_v37 = vadd.f32 %v1254_v36, %v491_v34  ;;  %v532_v38 = vadd.f32 %v1254_v36, %v531_v35  ;;  %v413_v39 = vpop.f32.mrf.mxu0  ;;  %v453_v40 = vpop.f32.mrf.mxu1 }
  0xf7   :  { %810 = vst.msk [vmem:[%s1579_s3 + $0x30] sm:$0xf] %vm797_vm3, %v745_v31  ;;  %v414_v41 = vadd.f32 %v1254_v36, %v413_v39  ;;  %v454_v42 = vadd.f32 %v1254_v36, %v453_v40 }
  0xf8   :  { %826 = vst.msk [vmem:[%s1579_s3 + $0x70] sm:$0xf] %vm797_vm3, %v761_v33  ;;  %vm585_vm7 = vcmp.gt.f32.partialorder %v492_v37, 0.0  ;;  %v649_v43 = vmul.f32 0.1, %v492_v37  ;;  %vm601_vm8 = vcmp.gt.f32.partialorder %v532_v38, 0.0 }
  0xf9   :  { %v665_v44 = vmul.f32 0.1, %v532_v38  ;;  %vm554_vm9 = vcmp.gt.f32.partialorder %v414_v41, 0.0  ;;  %v618_v45 = vmul.f32 0.1, %v414_v41  ;;  %vm570_vm10 = vcmp.gt.f32.partialorder %v454_v42, 0.0 }
  0xfa   :  { %v713_v46 = vsel %vm585_vm7, %v492_v37, %v649_v43  ;;  %v634_v47 = vmul.f32 0.1, %v454_v42 }
  0xfb   :  { %v777_v48 = vpack.c.bf16 %v713_v46, %v713_v46  ;;  %v729_v49 = vsel %vm601_vm8, %v532_v38, %v665_v44  ;;  %v682_v50 = vsel %vm554_vm9, %v414_v41, %v618_v45 }
  0xfc   :  { %v793_v51 = vpack.c.bf16 %v729_v49, %v729_v49  ;;  %v746_v52 = vpack.c.bf16 %v682_v50, %v682_v50  ;;  %v698_v53 = vsel %vm570_vm10, %v454_v42, %v634_v47 }
  0xfd   :  { %842 = vst.msk [vmem:[%s1579_s3 + $0xb0] sm:$0xf] %vm797_vm3, %v777_v48  ;;  %v762_v54 = vpack.c.bf16 %v698_v53, %v698_v53  ;;  %v493_v55 = vpop.f32.mrf.mxu2  ;;  %v533_v56 = vpop.f32.mrf.mxu3 }
  0xfe   :  { %858 = vst.msk [vmem:[%s1579_s3 + $0xf0] sm:$0xf] %vm797_vm3, %v793_v51  ;;  %v494_v57 = vadd.f32 %v1254_v36, %v493_v55  ;;  %v534_v58 = vadd.f32 %v1254_v36, %v533_v56  ;;  %v416_v59 = vpop.f32.mrf.mxu0  ;;  %v456_v60 = vpop.f32.mrf.mxu1 }
  0xff   :  { %811 = vst.msk [vmem:[%s1579_s3 + $0x34] sm:$0xf] %vm797_vm3, %v746_v52  ;;  %v417_v61 = vadd.f32 %v1254_v36, %v416_v59  ;;  %v457_v62 = vadd.f32 %v1254_v36, %v456_v60 }
 0x100   :  { %827 = vst.msk [vmem:[%s1579_s3 + $0x74] sm:$0xf] %vm797_vm3, %v762_v54  ;;  %vm586_vm11 = vcmp.gt.f32.partialorder %v494_v57, 0.0  ;;  %v650_v63 = vmul.f32 0.1, %v494_v57  ;;  %vm602_vm12 = vcmp.gt.f32.partialorder %v534_v58, 0.0 }
 0x101   :  { %v666_v0 = vmul.f32 0.1, %v534_v58  ;;  %vm555_vm13 = vcmp.gt.f32.partialorder %v417_v61, 0.0  ;;  %v619_v1 = vmul.f32 0.1, %v417_v61  ;;  %vm571_vm14 = vcmp.gt.f32.partialorder %v457_v62, 0.0 }
 0x102   :  { %v714_v2 = vsel %vm586_vm11, %v494_v57, %v650_v63  ;;  %v635_v3 = vmul.f32 0.1, %v457_v62 }
 0x103   :  { %v778_v4 = vpack.c.bf16 %v714_v2, %v714_v2  ;;  %v730_v5 = vsel %vm602_vm12, %v534_v58, %v666_v0  ;;  %v683_v6 = vsel %vm555_vm13, %v417_v61, %v619_v1 }
 0x104   :  { %v794_v7 = vpack.c.bf16 %v730_v5, %v730_v5  ;;  %v747_v8 = vpack.c.bf16 %v683_v6, %v683_v6  ;;  %v699_v9 = vsel %vm571_vm14, %v457_v62, %v635_v3 }
 0x105   :  { %843 = vst.msk [vmem:[%s1579_s3 + $0xb4] sm:$0xf] %vm797_vm3, %v778_v4  ;;  %v763_v10 = vpack.c.bf16 %v699_v9, %v699_v9  ;;  %v496_v11 = vpop.f32.mrf.mxu2  ;;  %v536_v12 = vpop.f32.mrf.mxu3 }
 0x106   :  { %859 = vst.msk [vmem:[%s1579_s3 + $0xf4] sm:$0xf] %vm797_vm3, %v794_v7  ;;  %v497_v13 = vadd.f32 %v1254_v36, %v496_v11  ;;  %v537_v14 = vadd.f32 %v1254_v36, %v536_v12  ;;  %v418_v15 = vpop.f32.mrf.mxu0  ;;  %v458_v16 = vpop.f32.mrf.mxu1 }
 0x107   :  { %812 = vst.msk [vmem:[%s1579_s3 + $0x38] sm:$0xf] %vm797_vm3, %v747_v8  ;;  %v419_v17 = vadd.f32 %v1254_v36, %v418_v15  ;;  %v459_v18 = vadd.f32 %v1254_v36, %v458_v16 }
 0x108   :  { %828 = vst.msk [vmem:[%s1579_s3 + $0x78] sm:$0xf] %vm797_vm3, %v763_v10  ;;  %vm587_vm15 = vcmp.gt.f32.partialorder %v497_v13, 0.0  ;;  %v651_v19 = vmul.f32 0.1, %v497_v13  ;;  %vm603_vm0 = vcmp.gt.f32.partialorder %v537_v14, 0.0 }
 0x109   :  { %v667_v20 = vmul.f32 0.1, %v537_v14  ;;  %vm556_vm1 = vcmp.gt.f32.partialorder %v419_v17, 0.0  ;;  %v620_v21 = vmul.f32 0.1, %v419_v17  ;;  %vm572_vm2 = vcmp.gt.f32.partialorder %v459_v18, 0.0 }
 0x10a   :  { %v715_v22 = vsel %vm587_vm15, %v497_v13, %v651_v19  ;;  %v636_v23 = vmul.f32 0.1, %v459_v18 }
 0x10b   :  { %v779_v24 = vpack.c.bf16 %v715_v22, %v715_v22  ;;  %v731_v25 = vsel %vm603_vm0, %v537_v14, %v667_v20  ;;  %v684_v26 = vsel %vm556_vm1, %v419_v17, %v620_v21 }
 0x10c   :  { %v795_v27 = vpack.c.bf16 %v731_v25, %v731_v25  ;;  %v748_v28 = vpack.c.bf16 %v684_v26, %v684_v26  ;;  %v700_v29 = vsel %vm572_vm2, %v459_v18, %v636_v23 }
 0x10d   :  { %844 = vst.msk [vmem:[%s1579_s3 + $0xb8] sm:$0xf] %vm797_vm3, %v779_v24  ;;  %v764_v30 = vpack.c.bf16 %v700_v29, %v700_v29  ;;  %v498_v31 = vpop.f32.mrf.mxu2  ;;  %v538_v32 = vpop.f32.mrf.mxu3 }
 0x10e   :  { %860 = vst.msk [vmem:[%s1579_s3 + $0xf8] sm:$0xf] %vm797_vm3, %v795_v27  ;;  %v499_v33 = vadd.f32 %v1254_v36, %v498_v31  ;;  %v539_v34 = vadd.f32 %v1254_v36, %v538_v32 }
 0x10f   :  { %813 = vst.msk [vmem:[%s1579_s3 + $0x3c] sm:$0xf] %vm797_vm3, %v748_v28 }
 0x110   :  { %829 = vst.msk [vmem:[%s1579_s3 + $0x7c] sm:$0xf] %vm797_vm3, %v764_v30  ;;  %vm588_vm4 = vcmp.gt.f32.partialorder %v499_v33, 0.0  ;;  %v652_v35 = vmul.f32 0.1, %v499_v33  ;;  %vm604_vm5 = vcmp.gt.f32.partialorder %v539_v34, 0.0 }
 0x111   :  { %v668_v37 = vmul.f32 0.1, %v539_v34 }
 0x112   :  { %v716_v38 = vsel %vm588_vm4, %v499_v33, %v652_v35 }
 0x113   :  { %v780_v39 = vpack.c.bf16 %v716_v38, %v716_v38  ;;  %v732_v40 = vsel %vm604_vm5, %v539_v34, %v668_v37 }
 0x114   :  { %v796_v41 = vpack.c.bf16 %v732_v40, %v732_v40 }
 0x115   :  { %845 = vst.msk [vmem:[%s1579_s3 + $0xbc] sm:$0xf] %vm797_vm3, %v780_v39 }
 0x116   :  { %861 = vst.msk [vmem:[%s1579_s3 + $0xfc] sm:$0xf] %vm797_vm3, %v796_v41 }

// kernel: build_model_forward.19
= control target key start
LH: loop header
LB: loop body
LE: loop exit
PB: predicated region body
PF: predicated region fallthrough
CT: control target
= control target key end

     0   :  { %vm259_vm2 = vcmask 519168   ;;  %s538_s1 = inlined_call_operand.vmem [shape: bf16[128,64], index: 1, kind: input, shape index: {}]   ;;  %s539_s2 = inlined_call_operand.vmem [shape: f32[1,64], index: 2, kind: input, shape index: {}]   ;;  %s540_s0 = inlined_call_operand.vmem [shape: bf16[128,128], index: 0, kind: input, shape index: {}]   ;;  %s541_s3 = inlined_call_operand.vmem [shape: bf16[128,64], index: 3, kind: output, shape index: {}]  }
   0x1   :  { %v359_v0 = vld [vmem:[%s538_s1 + $0x38] sm:$0xff]  ;;  %v358_v1 = vld [vmem:[%s538_s1 + $0x30] sm:$0xff]  ;;  %v357_v2 = vld [vmem:[%s538_s1 + $0x28] sm:$0xff] }
   0x2   :  { %146 = vmatpush.bf16.msra.mxu0 %v359_v0  ;;  %360 = vmatpush.bf16.msra.mxu1 %v359_v0  ;;  %v356_v3 = vld [vmem:[%s538_s1 + $0x20] sm:$0xff]  ;;  %v355_v4 = vld [vmem:[%s538_s1 + $0x18] sm:$0xff]  ;;  %v354_v5 = vld [vmem:[%s538_s1 + $0x10] sm:$0xff] }
   0x3   :  { %361 = vmatpush.bf16.msra.mxu2 %v359_v0  ;;  %362 = vmatpush.bf16.msra.mxu3 %v359_v0  ;;  %v353_v6 = vld [vmem:[%s538_s1 + $0x8] sm:$0xff]  ;;  %v352_v7 = vld [vmem:[%s538_s1] sm:$0xff]  ;;  %v346_v9 = vld [vmem:[%s540_s0 + $0x10] sm:$0xff] }
   0x4   :  { %v344_v8 = vld [vmem:[%s540_s0] sm:$0xff]  ;;  %v350_v11 = vld [vmem:[%s540_s0 + $0x30] sm:$0xff]  ;;  %v345_v12 = vld [vmem:[%s540_s0 + $0x8] sm:$0xff] }
   0x5   :  { %v348_v10 = vld [vmem:[%s540_s0 + $0x20] sm:$0xff]  ;;  %v347_v13 = vld [vmem:[%s540_s0 + $0x18] sm:$0xff]  ;;  %v349_v14 = vld [vmem:[%s540_s0 + $0x28] sm:$0xff] }
   0x6   :  { %147 = vmatpush.bf16.msra.mxu0 %v358_v1  ;;  %363 = vmatpush.bf16.msra.mxu1 %v358_v1  ;;  %v351_v15 = vld [vmem:[%s540_s0 + $0x38] sm:$0xff]  ;;  %v456_v16 = vld [vmem:[%s539_s2] ss:$0 sm:$0xff] }
   0x7   :  { %364 = vmatpush.bf16.msra.mxu2 %v358_v1  ;;  %365 = vmatpush.bf16.msra.mxu3 %v358_v1 }
   0xa   :  { %148 = vmatpush.bf16.msra.mxu0 %v357_v2  ;;  %366 = vmatpush.bf16.msra.mxu1 %v357_v2 }
   0xb   :  { %367 = vmatpush.bf16.msra.mxu2 %v357_v2  ;;  %368 = vmatpush.bf16.msra.mxu3 %v357_v2 }
   0xe   :  { %149 = vmatpush.bf16.msra.mxu0 %v356_v3  ;;  %369 = vmatpush.bf16.msra.mxu1 %v356_v3 }
   0xf   :  { %370 = vmatpush.bf16.msra.mxu2 %v356_v3  ;;  %371 = vmatpush.bf16.msra.mxu3 %v356_v3 }
  0x12   :  { %150 = vmatpush.bf16.msra.mxu0 %v355_v4  ;;  %372 = vmatpush.bf16.msra.mxu1 %v355_v4 }
  0x13   :  { %373 = vmatpush.bf16.msra.mxu2 %v355_v4  ;;  %374 = vmatpush.bf16.msra.mxu3 %v355_v4 }
  0x16   :  { %151 = vmatpush.bf16.msra.mxu0 %v354_v5  ;;  %375 = vmatpush.bf16.msra.mxu1 %v354_v5 }
  0x17   :  { %376 = vmatpush.bf16.msra.mxu2 %v354_v5  ;;  %377 = vmatpush.bf16.msra.mxu3 %v354_v5 }
  0x1a   :  { %152 = vmatpush.bf16.msra.mxu0 %v353_v6  ;;  %378 = vmatpush.bf16.msra.mxu1 %v353_v6 }
  0x1b   :  { %379 = vmatpush.bf16.msra.mxu2 %v353_v6  ;;  %380 = vmatpush.bf16.msra.mxu3 %v353_v6 }
  0x1e   :  { %153 = vmatpush.bf16.msra.mxu0 %v352_v7  ;;  %381 = vmatpush.bf16.msra.mxu1 %v352_v7 }
  0x1f   :  { %382 = vmatpush.bf16.msra.mxu2 %v352_v7  ;;  %383 = vmatpush.bf16.msra.mxu3 %v352_v7 }
  0x21   :  { %154 = vmatmul.bf16.vlgmr.msra.gmra.mxu0 %v344_v8  ;;  %164 = vmatmul.bf16.vlgmr.msra.gmra.mxu1 %v346_v9 }
  0x22   :  { %174 = vmatmul.bf16.vlgmr.msra.gmra.mxu2 %v348_v10  ;;  %184 = vmatmul.bf16.vlgmr.msra.gmra.mxu3 %v350_v11 }
  0x31   :  { %159 = vmatmul.bf16.gmra.mxu0 %v345_v12  ;;  %169 = vmatmul.bf16.gmra.mxu1 %v347_v13 }
  0x32   :  { %179 = vmatmul.bf16.gmra.mxu2 %v349_v14  ;;  %189 = vmatmul.bf16.gmra.mxu3 %v351_v15 }
  0x9e   :  { %v155_v17 = vpop.f32.mrf.mxu0  ;;  %v165_v18 = vpop.f32.mrf.mxu1 }
  0x9f   :  { %v156_v19 = vadd.f32 %v456_v16, %v155_v17  ;;  %v166_v20 = vadd.f32 %v456_v16, %v165_v18 }
  0xa1   :  { %vm195_vm0 = vcmp.gt.f32.partialorder %v156_v19, 0.0  ;;  %v211_v21 = vmul.f32 0.1, %v156_v19  ;;  %vm199_vm1 = vcmp.gt.f32.partialorder %v166_v20, 0.0  ;;  %v215_v22 = vmul.f32 0.1, %v166_v20 }
  0xa3   :  { %v227_v23 = vsel %vm195_vm0, %v156_v19, %v211_v21  ;;  %v231_v24 = vsel %vm199_vm1, %v166_v20, %v215_v22 }
  0xa4   :  { %v243_v25 = vpack.c.bf16 %v227_v23, %v227_v23  ;;  %v247_v26 = vpack.c.bf16 %v231_v24, %v231_v24 }
  0xa5   :  { %v175_v27 = vpop.f32.mrf.mxu2  ;;  %v185_v28 = vpop.f32.mrf.mxu3 }
  0xa6   :  { %260 = vst.msk [vmem:[%s541_s3] sm:$0xf] %vm259_vm2, %v243_v25  ;;  %v176_v29 = vadd.f32 %v456_v16, %v175_v27  ;;  %v186_v30 = vadd.f32 %v456_v16, %v185_v28  ;;  %v157_v31 = vpop.f32.mrf.mxu0  ;;  %v167_v32 = vpop.f32.mrf.mxu1 }
  0xa7   :  { %264 = vst.msk [vmem:[%s541_s3 + $0x10] sm:$0xf] %vm259_vm2, %v247_v26  ;;  %v158_v33 = vadd.f32 %v456_v16, %v157_v31  ;;  %v168_v34 = vadd.f32 %v456_v16, %v167_v32 }
  0xa8   :  { %vm203_vm3 = vcmp.gt.f32.partialorder %v176_v29, 0.0  ;;  %v219_v35 = vmul.f32 0.1, %v176_v29  ;;  %vm207_vm4 = vcmp.gt.f32.partialorder %v186_v30, 0.0  ;;  %v223_v36 = vmul.f32 0.1, %v186_v30 }
  0xa9   :  { %vm196_vm5 = vcmp.gt.f32.partialorder %v158_v33, 0.0  ;;  %v212_v37 = vmul.f32 0.1, %v158_v33  ;;  %vm200_vm6 = vcmp.gt.f32.partialorder %v168_v34, 0.0  ;;  %v216_v38 = vmul.f32 0.1, %v168_v34 }
  0xaa   :  { %v235_v39 = vsel %vm203_vm3, %v176_v29, %v219_v35  ;;  %v239_v40 = vsel %vm207_vm4, %v186_v30, %v223_v36 }
  0xab   :  { %v251_v41 = vpack.c.bf16 %v235_v39, %v235_v39  ;;  %v255_v42 = vpack.c.bf16 %v239_v40, %v239_v40  ;;  %v228_v43 = vsel %vm196_vm5, %v158_v33, %v212_v37  ;;  %v232_v44 = vsel %vm200_vm6, %v168_v34, %v216_v38 }
  0xac   :  { %v244_v45 = vpack.c.bf16 %v228_v43, %v228_v43  ;;  %v248_v46 = vpack.c.bf16 %v232_v44, %v232_v44 }
  0xad   :  { %268 = vst.msk [vmem:[%s541_s3 + $0x20] sm:$0xf] %vm259_vm2, %v251_v41  ;;  %v177_v47 = vpop.f32.mrf.mxu2  ;;  %v187_v48 = vpop.f32.mrf.mxu3 }
  0xae   :  { %272 = vst.msk [vmem:[%s541_s3 + $0x30] sm:$0xf] %vm259_vm2, %v255_v42  ;;  %v178_v49 = vadd.f32 %v456_v16, %v177_v47  ;;  %v188_v50 = vadd.f32 %v456_v16, %v187_v48  ;;  %v160_v51 = vpop.f32.mrf.mxu0  ;;  %v170_v52 = vpop.f32.mrf.mxu1 }
  0xaf   :  { %261 = vst.msk [vmem:[%s541_s3 + $0x4] sm:$0xf] %vm259_vm2, %v244_v45  ;;  %v161_v53 = vadd.f32 %v456_v16, %v160_v51  ;;  %v171_v54 = vadd.f32 %v456_v16, %v170_v52 }
  0xb0   :  { %265 = vst.msk [vmem:[%s541_s3 + $0x14] sm:$0xf] %vm259_vm2, %v248_v46  ;;  %vm204_vm7 = vcmp.gt.f32.partialorder %v178_v49, 0.0  ;;  %v220_v55 = vmul.f32 0.1, %v178_v49  ;;  %vm208_vm8 = vcmp.gt.f32.partialorder %v188_v50, 0.0 }
  0xb1   :  { %v224_v56 = vmul.f32 0.1, %v188_v50  ;;  %vm197_vm9 = vcmp.gt.f32.partialorder %v161_v53, 0.0  ;;  %v213_v57 = vmul.f32 0.1, %v161_v53  ;;  %vm201_vm10 = vcmp.gt.f32.partialorder %v171_v54, 0.0 }
  0xb2   :  { %v236_v58 = vsel %vm204_vm7, %v178_v49, %v220_v55  ;;  %v217_v59 = vmul.f32 0.1, %v171_v54 }
  0xb3   :  { %v252_v60 = vpack.c.bf16 %v236_v58, %v236_v58  ;;  %v240_v61 = vsel %vm208_vm8, %v188_v50, %v224_v56  ;;  %v229_v62 = vsel %vm197_vm9, %v161_v53, %v213_v57 }
  0xb4   :  { %v256_v63 = vpack.c.bf16 %v240_v61, %v240_v61  ;;  %v245_v0 = vpack.c.bf16 %v229_v62, %v229_v62  ;;  %v233_v1 = vsel %vm201_vm10, %v171_v54, %v217_v59 }
  0xb5   :  { %269 = vst.msk [vmem:[%s541_s3 + $0x24] sm:$0xf] %vm259_vm2, %v252_v60  ;;  %v249_v2 = vpack.c.bf16 %v233_v1, %v233_v1  ;;  %v180_v3 = vpop.f32.mrf.mxu2  ;;  %v190_v4 = vpop.f32.mrf.mxu3 }
  0xb6   :  { %273 = vst.msk [vmem:[%s541_s3 + $0x34] sm:$0xf] %vm259_vm2, %v256_v63  ;;  %v181_v5 = vadd.f32 %v456_v16, %v180_v3  ;;  %v191_v6 = vadd.f32 %v456_v16, %v190_v4  ;;  %v162_v7 = vpop.f32.mrf.mxu0  ;;  %v172_v8 = vpop.f32.mrf.mxu1 }
  0xb7   :  { %262 = vst.msk [vmem:[%s541_s3 + $0x8] sm:$0xf] %vm259_vm2, %v245_v0  ;;  %v163_v9 = vadd.f32 %v456_v16, %v162_v7  ;;  %v173_v10 = vadd.f32 %v456_v16, %v172_v8 }
  0xb8   :  { %266 = vst.msk [vmem:[%s541_s3 + $0x18] sm:$0xf] %vm259_vm2, %v249_v2  ;;  %vm205_vm11 = vcmp.gt.f32.partialorder %v181_v5, 0.0  ;;  %v221_v11 = vmul.f32 0.1, %v181_v5  ;;  %vm209_vm12 = vcmp.gt.f32.partialorder %v191_v6, 0.0 }
  0xb9   :  { %v225_v12 = vmul.f32 0.1, %v191_v6  ;;  %vm198_vm13 = vcmp.gt.f32.partialorder %v163_v9, 0.0  ;;  %v214_v13 = vmul.f32 0.1, %v163_v9  ;;  %vm202_vm14 = vcmp.gt.f32.partialorder %v173_v10, 0.0 }
  0xba   :  { %v237_v14 = vsel %vm205_vm11, %v181_v5, %v221_v11  ;;  %v218_v15 = vmul.f32 0.1, %v173_v10 }
  0xbb   :  { %v253_v17 = vpack.c.bf16 %v237_v14, %v237_v14  ;;  %v241_v18 = vsel %vm209_vm12, %v191_v6, %v225_v12  ;;  %v230_v19 = vsel %vm198_vm13, %v163_v9, %v214_v13 }
  0xbc   :  { %v257_v20 = vpack.c.bf16 %v241_v18, %v241_v18  ;;  %v246_v21 = vpack.c.bf16 %v230_v19, %v230_v19  ;;  %v234_v22 = vsel %vm202_vm14, %v173_v10, %v218_v15 }
  0xbd   :  { %270 = vst.msk [vmem:[%s541_s3 + $0x28] sm:$0xf] %vm259_vm2, %v253_v17  ;;  %v250_v23 = vpack.c.bf16 %v234_v22, %v234_v22  ;;  %v182_v24 = vpop.f32.mrf.mxu2  ;;  %v192_v25 = vpop.f32.mrf.mxu3 }
  0xbe   :  { %274 = vst.msk [vmem:[%s541_s3 + $0x38] sm:$0xf] %vm259_vm2, %v257_v20  ;;  %v183_v26 = vadd.f32 %v456_v16, %v182_v24  ;;  %v193_v27 = vadd.f32 %v456_v16, %v192_v25 }
  0xbf   :  { %263 = vst.msk [vmem:[%s541_s3 + $0xc] sm:$0xf] %vm259_vm2, %v246_v21 }
  0xc0   :  { %267 = vst.msk [vmem:[%s541_s3 + $0x1c] sm:$0xf] %vm259_vm2, %v250_v23  ;;  %vm206_vm15 = vcmp.gt.f32.partialorder %v183_v26, 0.0  ;;  %v222_v28 = vmul.f32 0.1, %v183_v26  ;;  %vm210_vm0 = vcmp.gt.f32.partialorder %v193_v27, 0.0 }
  0xc1   :  { %v226_v29 = vmul.f32 0.1, %v193_v27 }
  0xc2   :  { %v238_v30 = vsel %vm206_vm15, %v183_v26, %v222_v28 }
  0xc3   :  { %v254_v31 = vpack.c.bf16 %v238_v30, %v238_v30  ;;  %v242_v32 = vsel %vm210_vm0, %v193_v27, %v226_v29 }
  0xc4   :  { %v258_v33 = vpack.c.bf16 %v242_v32, %v242_v32 }
  0xc5   :  { %271 = vst.msk [vmem:[%s541_s3 + $0x2c] sm:$0xf] %vm259_vm2, %v254_v31 }
  0xc6   :  { %275 = vst.msk [vmem:[%s541_s3 + $0x3c] sm:$0xf] %vm259_vm2, %v258_v33 }

// kernel: build_model_forward.20
= control target key start
LH: loop header
LB: loop body
LE: loop exit
PB: predicated region body
PF: predicated region fallthrough
CT: control target
= control target key end

     0   :  { %s461_s1 = inlined_call_operand.vmem [shape: bf16[256,128], index: 1, kind: input, shape index: {}]   ;;  %s462_s2 = inlined_call_operand.vmem [shape: f32[1,128], index: 2, kind: input, shape index: {}]   ;;  %s463_s0 = inlined_call_operand.vmem [shape: bf16[32,256], index: 0, kind: input, shape index: {}]   ;;  %s464_s3 = inlined_call_operand.vmem [shape: bf16[32,128], index: 3, kind: output, shape index: {}]  }
   0x1   :  { %v323_v0 = vld [vmem:[%s461_s1 + $0x38] sm:$0xff]  ;;  %v322_v2 = vld [vmem:[%s461_s1 + $0x30] sm:$0xff]  ;;  %v321_v4 = vld [vmem:[%s461_s1 + $0x28] sm:$0xff] }
   0x2   :  { %v331_v1 = vld [vmem:[%s461_s1 + $0x78] sm:$0xff]  ;;  %170 = vmatpush.bf16.msra.mxu0 %v323_v0  ;;  %343 = vmatpush.bf16.msra.mxu2 %v323_v0  ;;  %v330_v3 = vld [vmem:[%s461_s1 + $0x70] sm:$0xff]  ;;  %v329_v5 = vld [vmem:[%s461_s1 + $0x68] sm:$0xff] }
   0x3   :  { %189 = vmatpush.bf16.msra.mxu1 %v331_v1  ;;  %351 = vmatpush.bf16.msra.mxu3 %v331_v1  ;;  %v320_v6 = vld [vmem:[%s461_s1 + $0x20] sm:$0xff]  ;;  %v319_v8 = vld [vmem:[%s461_s1 + $0x18] sm:$0xff]  ;;  %v318_v10 = vld [vmem:[%s461_s1 + $0x10] sm:$0xff] }
   0x4   :  { %v328_v7 = vld [vmem:[%s461_s1 + $0x60] sm:$0xff]  ;;  %v327_v9 = vld [vmem:[%s461_s1 + $0x58] sm:$0xff]  ;;  %v326_v11 = vld [vmem:[%s461_s1 + $0x50] sm:$0xff] }
   0x5   :  { %v317_v12 = vld [vmem:[%s461_s1 + $0x8] sm:$0xff]  ;;  %v316_v14 = vld [vmem:[%s461_s1] sm:$0xff]  ;;  %v242_v18 = vld [vmem:[%s463_s0 + $0x10] sm:$0xf] }
   0x6   :  { %171 = vmatpush.bf16.msra.mxu0 %v322_v2  ;;  %344 = vmatpush.bf16.msra.mxu2 %v322_v2  ;;  %v325_v13 = vld [vmem:[%s461_s1 + $0x48] sm:$0xff]  ;;  %v324_v15 = vld [vmem:[%s461_s1 + $0x40] sm:$0xff]  ;;  %v315_v19 = vld [vmem:[%s463_s0 + $0x14] sm:$0xf0] }
   0x7   :  { %190 = vmatpush.bf16.msra.mxu1 %v330_v3  ;;  %352 = vmatpush.bf16.msra.mxu3 %v330_v3  ;;  %v234_v16 = vld [vmem:[%s463_s0] sm:$0xf]  ;;  %v313_v17 = vld [vmem:[%s463_s0 + $0x4] sm:$0xf0]  ;;  %v312_v20 = vld [vmem:[%s463_s0 + $0x4] sm:$0xf]  ;;  %v243_v25 = vor.u32 %v315_v19, %v242_v18 }
   0x8   :  { %v236_v21 = vld [vmem:[%s463_s0 + $0x8] sm:$0xf0]  ;;  %v314_v22 = vld [vmem:[%s463_s0 + $0x14] sm:$0xf]  ;;  %v244_v23 = vld [vmem:[%s463_s0 + $0x18] sm:$0xf0]  ;;  %v235_v24 = vor.u32 %v313_v17, %v234_v16 }
   0x9   :  { %v239_v26 = vor.u32 %v312_v20, %v236_v21  ;;  %v247_v27 = vor.u32 %v314_v22, %v244_v23  ;;  %v359_v28 = vld [vmem:[%s462_s2] ss:$0 sm:$0xff] }
   0xa   :  { %172 = vmatpush.bf16.msra.mxu0 %v321_v4  ;;  %345 = vmatpush.bf16.msra.mxu2 %v321_v4 }
   0xb   :  { %191 = vmatpush.bf16.msra.mxu1 %v329_v5  ;;  %353 = vmatpush.bf16.msra.mxu3 %v329_v5 }
   0xe   :  { %173 = vmatpush.bf16.msra.mxu0 %v320_v6  ;;  %346 = vmatpush.bf16.msra.mxu2 %v320_v6 }
   0xf   :  { %192 = vmatpush.bf16.msra.mxu1 %v328_v7  ;;  %354 = vmatpush.bf16.msra.mxu3 %v328_v7 }
  0x12   :  { %174 = vmatpush.bf16.msra.mxu0 %v319_v8  ;;  %347 = vmatpush.bf16.msra.mxu2 %v319_v8 }
  0x13   :  { %193 = vmatpush.bf16.msra.mxu1 %v327_v9  ;;  %355 = vmatpush.bf16.msra.mxu3 %v327_v9 }
  0x16   :  { %175 = vmatpush.bf16.msra.mxu0 %v318_v10  ;;  %348 = vmatpush.bf16.msra.mxu2 %v318_v10 }
  0x17   :  { %194 = vmatpush.bf16.msra.mxu1 %v326_v11  ;;  %356 = vmatpush.bf16.msra.mxu3 %v326_v11 }
  0x1a   :  { %176 = vmatpush.bf16.msra.mxu0 %v317_v12  ;;  %349 = vmatpush.bf16.msra.mxu2 %v317_v12 }
  0x1b   :  { %195 = vmatpush.bf16.msra.mxu1 %v325_v13  ;;  %357 = vmatpush.bf16.msra.mxu3 %v325_v13 }
  0x1e   :  { %177 = vmatpush.bf16.msra.mxu0 %v316_v14  ;;  %350 = vmatpush.bf16.msra.mxu2 %v316_v14 }
  0x1f   :  { %196 = vmatpush.bf16.msra.mxu1 %v324_v15  ;;  %358 = vmatpush.bf16.msra.mxu3 %v324_v15 }
  0x21   :  { %178 = vmatmul.bf16.vlgmr.msra.gmra.mxu0 %v235_v24  ;;  %183 = vmatmul.bf16.vlgmr.msra.gmra.mxu2 %v243_v25 }
  0x22   :  { %197 = vmatmul.bf16.vlgmr.msra.gmra.mxu1 %v239_v26  ;;  %202 = vmatmul.bf16.vlgmr.msra.gmra.mxu3 %v247_v27 }
  0x9e   :  { %v179_v29 = vpop.f32.mrf.mxu0 }
  0x9f   :  { %v198_v30 = vpop.f32.mrf.mxu1  ;;  %v180_v31 = vadd.f32 %v359_v28, %v179_v29 }
  0xa1   :  { %v199_v33 = vadd.f32 %v198_v30, %v180_v31 }
  0xa3   :  { %v212_v39 = vmul.f32 0.1, %v199_v33  ;;  %vm208_vm0 = vcmp.gt.f32.partialorder %v199_v33, 0.0 }
  0xa4   :  { %v184_v32 = vpop.f32.mrf.mxu2 }
  0xa5   :  { %v203_v34 = vpop.f32.mrf.mxu3  ;;  %v185_v36 = vadd.f32 %v359_v28, %v184_v32  ;;  %v216_v44 = vsel %vm208_vm0, %v199_v33, %v212_v39 }
  0xa6   :  { %v181_v35 = vpop.f32.mrf.mxu0 }
  0xa7   :  { %v182_v37 = vadd.f32 %v359_v28, %v181_v35  ;;  %v200_v38 = vpop.f32.mrf.mxu1  ;;  %v204_v41 = vadd.f32 %v203_v34, %v185_v36 }
  0xa9   :  { %v201_v40 = vadd.f32 %v200_v38, %v182_v37  ;;  %v214_v49 = vmul.f32 0.1, %v204_v41  ;;  %vm210_vm2 = vcmp.gt.f32.partialorder %v204_v41, 0.0 }
  0xab   :  { %vm209_vm1 = vcmp.gt.f32.partialorder %v201_v40, 0.0  ;;  %v213_v42 = vmul.f32 0.1, %v201_v40  ;;  %v218_v52 = vsel %vm210_vm2, %v204_v41, %v214_v49 }
  0xac   :  { %v186_v43 = vpop.f32.mrf.mxu2 }
  0xad   :  { %v217_v45 = vsel %vm209_vm1, %v201_v40, %v213_v42  ;;  %v187_v46 = vadd.f32 %v359_v28, %v186_v43  ;;  %v205_v48 = vpop.f32.mrf.mxu3 }
  0xae   :  { %v335_v47 = vpack.c.bf16 %v217_v45, %v216_v44 }
  0xaf   :  { %v206_v50 = vadd.f32 %v205_v48, %v187_v46 }
  0xb0   :  { %336 = vst [vmem:[%s464_s3] sm:$0xff] %v335_v47  }
  0xb1   :  { %vm211_vm3 = vcmp.gt.f32.partialorder %v206_v50, 0.0  ;;  %v215_v51 = vmul.f32 0.1, %v206_v50 }
  0xb3   :  { %v219_v53 = vsel %vm211_vm3, %v206_v50, %v215_v51 }
  0xb4   :  { %v340_v54 = vpack.c.bf16 %v219_v53, %v218_v52 }
  0xb6   :  { %342 = vst [vmem:[%s464_s3 + $0x8] sm:$0xff] %v340_v54  }

// kernel: build_model_forward.21
= control target key start
LH: loop header
LB: loop body
LE: loop exit
PB: predicated region body
PF: predicated region fallthrough
CT: control target
= control target key end

     0   :  { %s1288_s1 = inlined_call_operand.vmem [shape: bf16[512,256], index: 1, kind: input, shape index: {}]   ;;  %s1289_s0 = inlined_call_operand.vmem [shape: bf16[8,512], index: 0, kind: input, shape index: {}]   ;;  %s1290_s2 = inlined_call_operand.vmem [shape: f32[1,256], index: 2, kind: input, shape index: {}]   ;;  %s1291_s3 = inlined_call_operand.vmem [shape: bf16[8,256], index: 3, kind: output, shape index: {}]  }
   0x1   :  { %v594_v0 = vld [vmem:[%s1288_s1 + $0x70] sm:$0xf]  ;;  %v807_v1 = vld [vmem:[%s1288_s1 + $0x74] sm:$0xf0]  ;;  %v586_v11 = vld [vmem:[%s1288_s1 + $0x60] sm:$0xf] }
   0x2   :  { %v658_v2 = vld [vmem:[%s1288_s1 + $0xf0] sm:$0xf]  ;;  %v595_v3 = vor.u32 %v807_v1, %v594_v0  ;;  %v823_v4 = vld [vmem:[%s1288_s1 + $0xf4] sm:$0xf0]  ;;  %v805_v13 = vld [vmem:[%s1288_s1 + $0x64] sm:$0xf0] }
   0x3   :  { %v722_v5 = vld [vmem:[%s1288_s1 + $0x170] sm:$0xf]  ;;  %v839_v6 = vld [vmem:[%s1288_s1 + $0x174] sm:$0xf0]  ;;  %v659_v7 = vor.u32 %v823_v4, %v658_v2  ;;  %v650_v14 = vld [vmem:[%s1288_s1 + $0xe0] sm:$0xf]  ;;  %v587_v16 = vor.u32 %v805_v13, %v586_v11 }
   0x4   :  { %v723_v8 = vor.u32 %v839_v6, %v722_v5  ;;  %v786_v9 = vld [vmem:[%s1288_s1 + $0x1f0] sm:$0xf]  ;;  %v855_v10 = vld [vmem:[%s1288_s1 + $0x1f4] sm:$0xf0]  ;;  %420 = vmatpush.bf16.msra.mxu0 %v595_v3  ;;  %v821_v15 = vld [vmem:[%s1288_s1 + $0xe4] sm:$0xf0] }
   0x5   :  { %v787_v12 = vor.u32 %v855_v10, %v786_v9  ;;  %433 = vmatpush.bf16.msra.mxu1 %v659_v7  ;;  %v651_v17 = vor.u32 %v821_v15, %v650_v14  ;;  %v714_v18 = vld [vmem:[%s1288_s1 + $0x160] sm:$0xf]  ;;  %v837_v19 = vld [vmem:[%s1288_s1 + $0x164] sm:$0xf0]  ;;  %v578_v23 = vld [vmem:[%s1288_s1 + $0x50] sm:$0xf] }
   0x6   :  { %446 = vmatpush.bf16.msra.mxu2 %v723_v8  ;;  %v778_v20 = vld [vmem:[%s1288_s1 + $0x1e0] sm:$0xf]  ;;  %v715_v21 = vor.u32 %v837_v19, %v714_v18  ;;  %v853_v22 = vld [vmem:[%s1288_s1 + $0x1e4] sm:$0xf0]  ;;  %v803_v24 = vld [vmem:[%s1288_s1 + $0x54] sm:$0xf0] }
   0x7   :  { %459 = vmatpush.bf16.msra.mxu3 %v787_v12  ;;  %v779_v25 = vor.u32 %v853_v22, %v778_v20  ;;  %v642_v26 = vld [vmem:[%s1288_s1 + $0xd0] sm:$0xf]  ;;  %v819_v27 = vld [vmem:[%s1288_s1 + $0xd4] sm:$0xf0]  ;;  %v579_v29 = vor.u32 %v803_v24, %v578_v23  ;;  %v570_v35 = vld [vmem:[%s1288_s1 + $0x40] sm:$0xf] }
   0x8   :  { %v706_v28 = vld [vmem:[%s1288_s1 + $0x150] sm:$0xf]  ;;  %421 = vmatpush.bf16.msra.mxu0 %v587_v16  ;;  %v835_v30 = vld [vmem:[%s1288_s1 + $0x154] sm:$0xf0]  ;;  %v643_v33 = vor.u32 %v819_v27, %v642_v26  ;;  %v801_v36 = vld [vmem:[%s1288_s1 + $0x44] sm:$0xf0] }
   0x9   :  { %v770_v31 = vld [vmem:[%s1288_s1 + $0x1d0] sm:$0xf]  ;;  %v851_v32 = vld [vmem:[%s1288_s1 + $0x1d4] sm:$0xf0]  ;;  %434 = vmatpush.bf16.msra.mxu1 %v651_v17  ;;  %v707_v34 = vor.u32 %v835_v30, %v706_v28  ;;  %v634_v37 = vld [vmem:[%s1288_s1 + $0xc0] sm:$0xf]  ;;  %v571_v44 = vor.u32 %v801_v36, %v570_v35 }
   0xa   :  { %447 = vmatpush.bf16.msra.mxu2 %v715_v21  ;;  %v771_v38 = vor.u32 %v851_v32, %v770_v31  ;;  %v817_v39 = vld [vmem:[%s1288_s1 + $0xc4] sm:$0xf0]  ;;  %v698_v40 = vld [vmem:[%s1288_s1 + $0x140] sm:$0xf]  ;;  %v562_v47 = vld [vmem:[%s1288_s1 + $0x30] sm:$0xf] }
   0xb   :  { %460 = vmatpush.bf16.msra.mxu3 %v779_v25  ;;  %v833_v41 = vld [vmem:[%s1288_s1 + $0x144] sm:$0xf0]  ;;  %v762_v42 = vld [vmem:[%s1288_s1 + $0x1c0] sm:$0xf]  ;;  %v635_v45 = vor.u32 %v817_v39, %v634_v37  ;;  %v799_v48 = vld [vmem:[%s1288_s1 + $0x34] sm:$0xf0] }
   0xc   :  { %v849_v43 = vld [vmem:[%s1288_s1 + $0x1c4] sm:$0xf0]  ;;  %422 = vmatpush.bf16.msra.mxu0 %v579_v29  ;;  %v699_v46 = vor.u32 %v833_v41, %v698_v40  ;;  %v626_v49 = vld [vmem:[%s1288_s1 + $0xb0] sm:$0xf]  ;;  %v815_v51 = vld [vmem:[%s1288_s1 + $0xb4] sm:$0xf0]  ;;  %v563_v56 = vor.u32 %v799_v48, %v562_v47 }
   0xd   :  { %435 = vmatpush.bf16.msra.mxu1 %v643_v33  ;;  %v763_v50 = vor.u32 %v849_v43, %v762_v42  ;;  %v690_v52 = vld [vmem:[%s1288_s1 + $0x130] sm:$0xf]  ;;  %v831_v53 = vld [vmem:[%s1288_s1 + $0x134] sm:$0xf0]  ;;  %v627_v57 = vor.u32 %v815_v51, %v626_v49  ;;  %v554_v59 = vld [vmem:[%s1288_s1 + $0x20] sm:$0xf] }
   0xe   :  { %448 = vmatpush.bf16.msra.mxu2 %v707_v34  ;;  %v754_v54 = vld [vmem:[%s1288_s1 + $0x1b0] sm:$0xf]  ;;  %v847_v55 = vld [vmem:[%s1288_s1 + $0x1b4] sm:$0xf0]  ;;  %v691_v58 = vor.u32 %v831_v53, %v690_v52  ;;  %v797_v60 = vld [vmem:[%s1288_s1 + $0x24] sm:$0xf0] }
   0xf   :  { %461 = vmatpush.bf16.msra.mxu3 %v771_v38  ;;  %v618_v61 = vld [vmem:[%s1288_s1 + $0xa0] sm:$0xf]  ;;  %v755_v62 = vor.u32 %v847_v55, %v754_v54  ;;  %v813_v63 = vld [vmem:[%s1288_s1 + $0xa4] sm:$0xf0]  ;;  %v555_v4 = vor.u32 %v797_v60, %v554_v59  ;;  %v546_v7 = vld [vmem:[%s1288_s1 + $0x10] sm:$0xf] }
  0x10   :  { %423 = vmatpush.bf16.msra.mxu0 %v571_v44  ;;  %v682_v0 = vld [vmem:[%s1288_s1 + $0x120] sm:$0xf]  ;;  %v829_v1 = vld [vmem:[%s1288_s1 + $0x124] sm:$0xf0]  ;;  %v619_v5 = vor.u32 %v813_v63, %v618_v61  ;;  %v795_v8 = vld [vmem:[%s1288_s1 + $0x14] sm:$0xf0] }
  0x11   :  { %436 = vmatpush.bf16.msra.mxu1 %v635_v45  ;;  %v746_v2 = vld [vmem:[%s1288_s1 + $0x1a0] sm:$0xf]  ;;  %v845_v3 = vld [vmem:[%s1288_s1 + $0x1a4] sm:$0xf0]  ;;  %v683_v6 = vor.u32 %v829_v1, %v682_v0  ;;  %v610_v9 = vld [vmem:[%s1288_s1 + $0x90] sm:$0xf]  ;;  %v547_v16 = vor.u32 %v795_v8, %v546_v7 }
  0x12   :  { %449 = vmatpush.bf16.msra.mxu2 %v699_v46  ;;  %v747_v10 = vor.u32 %v845_v3, %v746_v2  ;;  %v811_v11 = vld [vmem:[%s1288_s1 + $0x94] sm:$0xf0]  ;;  %v674_v12 = vld [vmem:[%s1288_s1 + $0x110] sm:$0xf]  ;;  %v538_v17 = vld [vmem:[%s1288_s1] sm:$0xf] }
  0x13   :  { %462 = vmatpush.bf16.msra.mxu3 %v763_v50  ;;  %v827_v13 = vld [vmem:[%s1288_s1 + $0x114] sm:$0xf0]  ;;  %v738_v14 = vld [vmem:[%s1288_s1 + $0x190] sm:$0xf]  ;;  %v793_v18 = vld [vmem:[%s1288_s1 + $0x4] sm:$0xf0]  ;;  %v611_v20 = vor.u32 %v811_v11, %v610_v9 }
  0x14   :  { %424 = vmatpush.bf16.msra.mxu0 %v563_v56  ;;  %v843_v15 = vld [vmem:[%s1288_s1 + $0x194] sm:$0xf0]  ;;  %v602_v19 = vld [vmem:[%s1288_s1 + $0x80] sm:$0xf]  ;;  %v675_v21 = vor.u32 %v827_v13, %v674_v12  ;;  %v809_v22 = vld [vmem:[%s1288_s1 + $0x84] sm:$0xf0]  ;;  %v539_v32 = vor.u32 %v793_v18, %v538_v17 }
  0x15   :  { %437 = vmatpush.bf16.msra.mxu1 %v627_v57  ;;  %v666_v23 = vld [vmem:[%s1288_s1 + $0x100] sm:$0xf]  ;;  %v825_v24 = vld [vmem:[%s1288_s1 + $0x104] sm:$0xf0]  ;;  %v739_v25 = vor.u32 %v843_v15, %v738_v14  ;;  %v806_v28 = vld [vmem:[%s1288_s1 + $0x74] sm:$0xf]  ;;  %v603_v37 = vor.u32 %v809_v22, %v602_v19 }
  0x16   :  { %450 = vmatpush.bf16.msra.mxu2 %v691_v58  ;;  %v730_v26 = vld [vmem:[%s1288_s1 + $0x180] sm:$0xf]  ;;  %v841_v27 = vld [vmem:[%s1288_s1 + $0x184] sm:$0xf0]  ;;  %v596_v29 = vld [vmem:[%s1288_s1 + $0x78] sm:$0xf0]  ;;  %v667_v38 = vor.u32 %v825_v24, %v666_v23 }
  0x17   :  { %463 = vmatpush.bf16.msra.mxu3 %v755_v62  ;;  %v822_v30 = vld [vmem:[%s1288_s1 + $0xf4] sm:$0xf]  ;;  %v15_v31 = vld [vmem:[%s1289_s0 + $0x8] sm:$0xff]  ;;  %v660_v33 = vld [vmem:[%s1288_s1 + $0xf8] sm:$0xf0]  ;;  %v731_v42 = vor.u32 %v841_v27, %v730_v26  ;;  %v599_v43 = vor.u32 %v806_v28, %v596_v29 }
  0x18   :  { %425 = vmatpush.bf16.msra.mxu0 %v555_v4  ;;  %v838_v34 = vld [vmem:[%s1288_s1 + $0x174] sm:$0xf]  ;;  %v724_v35 = vld [vmem:[%s1288_s1 + $0x178] sm:$0xf0]  ;;  %v90_v36 = vunpack.c.l.b16 %v15_v31  ;;  %v91_v41 = vunpack.c.h.b16 %v15_v31  ;;  %v14_v44 = vld [vmem:[%s1289_s0] sm:$0xff]  ;;  %v663_v45 = vor.u32 %v822_v30, %v660_v33 }
  0x19   :  { %438 = vmatpush.bf16.msra.mxu1 %v619_v5  ;;  %v854_v39 = vld [vmem:[%s1288_s1 + $0x1f4] sm:$0xf]  ;;  %v788_v40 = vld [vmem:[%s1288_s1 + $0x1f8] sm:$0xf0]  ;;  %v727_v46 = vor.u32 %v838_v34, %v724_v35  ;;  %v804_v47 = vld [vmem:[%s1288_s1 + $0x64] sm:$0xf]  ;;  %v88_v50 = vunpack.c.l.b16 %v14_v44  ;;  %v89_v51 = vunpack.c.h.b16 %v14_v44 }
  0x1a   :  { %451 = vmatpush.bf16.msra.mxu2 %v683_v6  ;;  %v588_v48 = vld [vmem:[%s1288_s1 + $0x68] sm:$0xf0]  ;;  %v820_v49 = vld [vmem:[%s1288_s1 + $0xe4] sm:$0xf]  ;;  %v791_v52 = vor.u32 %v854_v39, %v788_v40  ;;  %v1116_v56 = vpack.c.b16 %v90_v36, %v90_v36  ;;  %v1126_v60 = vpack.c.b16 %v91_v41, %v91_v41  ;;  %v802_v1 = vld [vmem:[%s1288_s1 + $0x54] sm:$0xf] }
  0x1b   :  { %464 = vmatpush.bf16.msra.mxu3 %v747_v10  ;;  %v652_v53 = vld [vmem:[%s1288_s1 + $0xe8] sm:$0xf0]  ;;  %v836_v54 = vld [vmem:[%s1288_s1 + $0x164] sm:$0xf]  ;;  %v1124_v59 = vpack.c.b16 %v88_v50, %v88_v50  ;;  %v591_v61 = vor.u32 %v804_v47, %v588_v48  ;;  %v1128_v62 = vpack.c.b16 %v89_v51, %v89_v51  ;;  %v580_v2 = vld [vmem:[%s1288_s1 + $0x58] sm:$0xf0] }
  0x1c   :  { %426 = vmatpush.bf16.msra.mxu0 %v547_v16  ;;  %v716_v55 = vld [vmem:[%s1288_s1 + $0x168] sm:$0xf0]  ;;  %v852_v57 = vld [vmem:[%s1288_s1 + $0x1e4] sm:$0xf]  ;;  %v655_v63 = vor.u32 %v820_v49, %v652_v53  ;;  %v818_v3 = vld [vmem:[%s1288_s1 + $0xd4] sm:$0xf]  ;;  %v583_v10 = vor.u32 %v802_v1, %v580_v2 }
  0x1d   :  { %439 = vmatpush.bf16.msra.mxu1 %v611_v20  ;;  %v780_v58 = vld [vmem:[%s1288_s1 + $0x1e8] sm:$0xf0]  ;;  %v719_v0 = vor.u32 %v836_v54, %v716_v55  ;;  %v644_v5 = vld [vmem:[%s1288_s1 + $0xd8] sm:$0xf0]  ;;  %v834_v6 = vld [vmem:[%s1288_s1 + $0x154] sm:$0xf] }
  0x1e   :  { %452 = vmatpush.bf16.msra.mxu2 %v675_v21  ;;  %v783_v4 = vor.u32 %v852_v57, %v780_v58  ;;  %v708_v7 = vld [vmem:[%s1288_s1 + $0x158] sm:$0xf0]  ;;  %v850_v8 = vld [vmem:[%s1288_s1 + $0x1d4] sm:$0xf]  ;;  %v647_v11 = vor.u32 %v818_v3, %v644_v5  ;;  %v800_v13 = vld [vmem:[%s1288_s1 + $0x44] sm:$0xf] }
  0x1f   :  { %465 = vmatpush.bf16.msra.mxu3 %v739_v25  ;;  %v772_v9 = vld [vmem:[%s1288_s1 + $0x1d8] sm:$0xf0]  ;;  %v711_v12 = vor.u32 %v834_v6, %v708_v7  ;;  %v572_v14 = vld [vmem:[%s1288_s1 + $0x48] sm:$0xf0]  ;;  %v816_v15 = vld [vmem:[%s1288_s1 + $0xc4] sm:$0xf] }
  0x20   :  { %427 = vmatpush.bf16.msra.mxu0 %v539_v32  ;;  %v775_v16 = vor.u32 %v850_v8, %v772_v9  ;;  %v636_v17 = vld [vmem:[%s1288_s1 + $0xc8] sm:$0xf0]  ;;  %v832_v18 = vld [vmem:[%s1288_s1 + $0x144] sm:$0xf]  ;;  %v575_v22 = vor.u32 %v800_v13, %v572_v14  ;;  %v798_v25 = vld [vmem:[%s1288_s1 + $0x34] sm:$0xf] }
  0x21   :  { %440 = vmatpush.bf16.msra.mxu1 %v603_v37  ;;  %v700_v19 = vld [vmem:[%s1288_s1 + $0x148] sm:$0xf0]  ;;  %v848_v20 = vld [vmem:[%s1288_s1 + $0x1c4] sm:$0xf]  ;;  %v639_v23 = vor.u32 %v816_v15, %v636_v17  ;;  %v564_v26 = vld [vmem:[%s1288_s1 + $0x38] sm:$0xf0] }
  0x22   :  { %453 = vmatpush.bf16.msra.mxu2 %v667_v38  ;;  %v764_v21 = vld [vmem:[%s1288_s1 + $0x1c8] sm:$0xf0]  ;;  %v703_v24 = vor.u32 %v832_v18, %v700_v19  ;;  %v814_v27 = vld [vmem:[%s1288_s1 + $0xb4] sm:$0xf]  ;;  %v628_v29 = vld [vmem:[%s1288_s1 + $0xb8] sm:$0xf0]  ;;  %v567_v34 = vor.u32 %v798_v25, %v564_v26 }
  0x23   :  { %466 = vmatpush.bf16.msra.mxu3 %v731_v42  ;;  %428 = vmatmul.bf16.vlgmr.msra.gmra.mxu0 %v1124_v59  ;;  %v767_v28 = vor.u32 %v848_v20, %v764_v21  ;;  %v830_v30 = vld [vmem:[%s1288_s1 + $0x134] sm:$0xf]  ;;  %v692_v31 = vld [vmem:[%s1288_s1 + $0x138] sm:$0xf0]  ;;  %v631_v35 = vor.u32 %v814_v27, %v628_v29  ;;  %v796_v37 = vld [vmem:[%s1288_s1 + $0x24] sm:$0xf] }
  0x24   :  { %472 = vmatpush.bf16.msrb.mxu0 %v599_v43  ;;  %441 = vmatmul.bf16.vlgmr.msra.gmra.mxu1 %v1128_v62  ;;  %v846_v32 = vld [vmem:[%s1288_s1 + $0x1b4] sm:$0xf]  ;;  %v756_v33 = vld [vmem:[%s1288_s1 + $0x1b8] sm:$0xf0]  ;;  %v695_v36 = vor.u32 %v830_v30, %v692_v31  ;;  %v556_v38 = vld [vmem:[%s1288_s1 + $0x28] sm:$0xf0] }
  0x25   :  { %485 = vmatpush.bf16.msrb.mxu1 %v663_v45  ;;  %454 = vmatmul.bf16.vlgmr.msra.gmra.mxu2 %v1116_v56  ;;  %v812_v39 = vld [vmem:[%s1288_s1 + $0xa4] sm:$0xf]  ;;  %v759_v40 = vor.u32 %v846_v32, %v756_v33  ;;  %v620_v41 = vld [vmem:[%s1288_s1 + $0xa8] sm:$0xf0]  ;;  %v794_v49 = vld [vmem:[%s1288_s1 + $0x14] sm:$0xf] }
  0x26   :  { %498 = vmatpush.bf16.msrb.mxu2 %v727_v46  ;;  %467 = vmatmul.bf16.vlgmr.msra.gmra.mxu3 %v1126_v60  ;;  %v828_v42 = vld [vmem:[%s1288_s1 + $0x124] sm:$0xf]  ;;  %v684_v43 = vld [vmem:[%s1288_s1 + $0x128] sm:$0xf0]  ;;  %v559_v46 = vor.u32 %v796_v37, %v556_v38  ;;  %v623_v47 = vor.u32 %v812_v39, %v620_v41  ;;  %v548_v50 = vld [vmem:[%s1288_s1 + $0x18] sm:$0xf0] }
  0x27   :  { %511 = vmatpush.bf16.msrb.mxu3 %v791_v52  ;;  %v844_v44 = vld [vmem:[%s1288_s1 + $0x1a4] sm:$0xf]  ;;  %v748_v45 = vld [vmem:[%s1288_s1 + $0x1a8] sm:$0xf0]  ;;  %v687_v48 = vor.u32 %v828_v42, %v684_v43  ;;  %v810_v51 = vld [vmem:[%s1288_s1 + $0x94] sm:$0xf] }
  0x28   :  { %473 = vmatpush.bf16.msrb.mxu0 %v591_v61  ;;  %v751_v52 = vor.u32 %v844_v44, %v748_v45  ;;  %v612_v53 = vld [vmem:[%s1288_s1 + $0x98] sm:$0xf0]  ;;  %v826_v54 = vld [vmem:[%s1288_s1 + $0x114] sm:$0xf]  ;;  %v551_v61 = vor.u32 %v794_v49, %v548_v50  ;;  %v792_v1 = vld [vmem:[%s1288_s1 + $0x4] sm:$0xf] }
  0x29   :  { %486 = vmatpush.bf16.msrb.mxu1 %v655_v63  ;;  %v676_v55 = vld [vmem:[%s1288_s1 + $0x118] sm:$0xf0]  ;;  %v842_v57 = vld [vmem:[%s1288_s1 + $0x194] sm:$0xf]  ;;  %v615_v63 = vor.u32 %v810_v51, %v612_v53  ;;  %v540_v2 = vld [vmem:[%s1288_s1 + $0x8] sm:$0xf0] }
  0x2a   :  { %499 = vmatpush.bf16.msrb.mxu2 %v719_v0  ;;  %v740_v58 = vld [vmem:[%s1288_s1 + $0x198] sm:$0xf0]  ;;  %v679_v0 = vor.u32 %v826_v54, %v676_v55  ;;  %v808_v3 = vld [vmem:[%s1288_s1 + $0x84] sm:$0xf]  ;;  %v604_v5 = vld [vmem:[%s1288_s1 + $0x88] sm:$0xf0] }
  0x2b   :  { %512 = vmatpush.bf16.msrb.mxu3 %v783_v4  ;;  %v743_v4 = vor.u32 %v842_v57, %v740_v58  ;;  %v824_v6 = vld [vmem:[%s1288_s1 + $0x104] sm:$0xf]  ;;  %v668_v7 = vld [vmem:[%s1288_s1 + $0x108] sm:$0xf0] }
  0x2c   :  { %474 = vmatpush.bf16.msrb.mxu0 %v583_v10  ;;  %v840_v8 = vld [vmem:[%s1288_s1 + $0x184] sm:$0xf]  ;;  %v732_v9 = vld [vmem:[%s1288_s1 + $0x188] sm:$0xf0]  ;;  %v543_v10 = vor.u32 %v792_v1, %v540_v2 }
  0x2d   :  { %487 = vmatpush.bf16.msrb.mxu1 %v647_v11  ;;  %v607_v11 = vor.u32 %v808_v3, %v604_v5  ;;  %v735_v13 = vor.u32 %v840_v8, %v732_v9 }
  0x2e   :  { %500 = vmatpush.bf16.msrb.mxu2 %v711_v12  ;;  %v671_v12 = vor.u32 %v824_v6, %v668_v7 }
  0x2f   :  { %513 = vmatpush.bf16.msrb.mxu3 %v775_v16 }
  0x30   :  { %475 = vmatpush.bf16.msrb.mxu0 %v575_v22  ;;  %v80_v22 = vld [vmem:[%s1290_s2] sm:$0x3] }
  0x31   :  { %488 = vmatpush.bf16.msrb.mxu1 %v639_v23  ;;  %v82_v23 = vperm.slane %v80_v22, 0 }
  0x32   :  { %501 = vmatpush.bf16.msrb.mxu2 %v703_v24  ;;  %v83_v24 = vperm.slane %v80_v22, 1 }
  0x33   :  { %514 = vmatpush.bf16.msrb.mxu3 %v767_v28 }
  0x34   :  { %476 = vmatpush.bf16.msrb.mxu0 %v567_v34 }
  0x35   :  { %489 = vmatpush.bf16.msrb.mxu1 %v631_v35 }
  0x36   :  { %502 = vmatpush.bf16.msrb.mxu2 %v695_v36 }
  0x37   :  { %515 = vmatpush.bf16.msrb.mxu3 %v759_v40 }
  0x38   :  { %477 = vmatpush.bf16.msrb.mxu0 %v559_v46 }
  0x39   :  { %490 = vmatpush.bf16.msrb.mxu1 %v623_v47 }
  0x3a   :  { %503 = vmatpush.bf16.msrb.mxu2 %v687_v48 }
  0x3b   :  { %516 = vmatpush.bf16.msrb.mxu3 %v751_v52 }
  0x3c   :  { %478 = vmatpush.bf16.msrb.mxu0 %v551_v61 }
  0x3d   :  { %491 = vmatpush.bf16.msrb.mxu1 %v615_v63 }
  0x3e   :  { %504 = vmatpush.bf16.msrb.mxu2 %v679_v0 }
  0x3f   :  { %517 = vmatpush.bf16.msrb.mxu3 %v743_v4 }
  0x40   :  { %479 = vmatpush.bf16.msrb.mxu0 %v543_v10 }
  0x41   :  { %492 = vmatpush.bf16.msrb.mxu1 %v607_v11 }
  0x42   :  { %505 = vmatpush.bf16.msrb.mxu2 %v671_v12 }
  0x43   :  { %518 = vmatpush.bf16.msrb.mxu3 %v735_v13  ;;  %480 = vmatmul.bf16.vlgmr.msrb.gmra.mxu0 %v1124_v59 }
  0x44   :  { %493 = vmatmul.bf16.vlgmr.msrb.gmra.mxu1 %v1128_v62 }
  0x45   :  { %506 = vmatmul.bf16.vlgmr.msrb.gmra.mxu2 %v1116_v56 }
  0x46   :  { %519 = vmatmul.bf16.vlgmr.msrb.gmra.mxu3 %v1126_v60 }
  0xa0   :  { %v429_v14 = vpop.f32.mrf.mxu0 }
  0xa1   :  { %v442_v15 = vpop.f32.mrf.mxu1  ;;  %v430_v59 = vadd.f32 %v429_v14, %v82_v23 }
  0xa3   :  { %v443_v62 = vadd.f32 %v442_v15, %v430_v59 }
  0xa8   :  { %v455_v16 = vpop.f32.mrf.mxu2  ;;  %v431_v18 = vpop.f32.mrf.mxu0 }
  0xa9   :  { %v468_v17 = vpop.f32.mrf.mxu3  ;;  %v444_v19 = vpop.f32.mrf.mxu1  ;;  %v456_v60 = vadd.f32 %v455_v16, %v443_v62 }
  0xab   :  { %v469_v28 = vadd.f32 %v468_v17, %v456_v60 }
  0xad   :  { %v526_v34 = vmul.f32 0.1, %v469_v28  ;;  %vm524_vm0 = vcmp.gt.f32.partialorder %v469_v28, 0.0 }
  0xaf   :  { %v528_v37 = vsel %vm524_vm0, %v469_v28, %v526_v34 }
  0xb0   :  { %v457_v20 = vpop.f32.mrf.mxu2 }
  0xb1   :  { %v470_v21 = vpop.f32.mrf.mxu3 }
  0xc0   :  { %v481_v25 = vpop.f32.mrf.mxu0 }
  0xc1   :  { %v482_v56 = vadd.f32 %v481_v25, %v83_v24  ;;  %v494_v26 = vpop.f32.mrf.mxu1 }
  0xc3   :  { %v495_v27 = vadd.f32 %v494_v26, %v482_v56 }
  0xc8   :  { %v507_v29 = vpop.f32.mrf.mxu2  ;;  %v483_v32 = vpop.f32.mrf.mxu0 }
  0xc9   :  { %v508_v30 = vadd.f32 %v507_v29, %v495_v27  ;;  %v520_v31 = vpop.f32.mrf.mxu3  ;;  %v496_v33 = vpop.f32.mrf.mxu1 }
  0xcb   :  { %v521_v35 = vadd.f32 %v520_v31, %v508_v30 }
  0xcd   :  { %vm525_vm1 = vcmp.gt.f32.partialorder %v521_v35, 0.0  ;;  %v527_v36 = vmul.f32 0.1, %v521_v35 }
  0xcf   :  { %v529_v38 = vsel %vm525_vm1, %v521_v35, %v527_v36 }
  0xd0   :  { %v530_v39 = vpack.c.bf16 %v529_v38, %v528_v37  ;;  %v509_v40 = vpop.f32.mrf.mxu2 }
  0xd1   :  { %v522_v41 = vpop.f32.mrf.mxu3 }
  0xd2   :  { %531 = vst [vmem:[%s1291_s3] sm:$0xff] %v530_v39 }

// kernel: build_model_forward.23
= control target key start
LH: loop header
LB: loop body
LE: loop exit
PB: predicated region body
PF: predicated region fallthrough
CT: control target
= control target key end

     0   :  { %s497_s1 = inlined_call_operand.vmem [shape: bf16[256,128], index: 1, kind: input, shape index: {}]   ;;  %s498_s3 = inlined_call_operand.vmem [shape: bf16[128,128], index: 3, kind: input, shape index: {}]   ;;  %s499_s2 = inlined_call_operand.vmem [shape: f32[1,128], index: 2, kind: input, shape index: {}]   ;;  %s500_s0 = inlined_call_operand.vmem [shape: bf16[8,256], index: 0, kind: input, shape index: {}]   ;;  %s501_s4 = inlined_call_operand.vmem [shape: bf16[8,128], index: 4, kind: output, shape index: {}]  }
   0x1   :  { %v373_v0 = vld [vmem:[%s497_s1 + $0x38] sm:$0xff]  ;;  %v372_v2 = vld [vmem:[%s497_s1 + $0x30] sm:$0xff]  ;;  %v371_v5 = vld [vmem:[%s497_s1 + $0x28] sm:$0xff] }
   0x2   :  { %v381_v1 = vld [vmem:[%s497_s1 + $0x78] sm:$0xff]  ;;  %157 = vmatpush.bf16.msra.mxu0 %v373_v0  ;;  %v380_v3 = vld [vmem:[%s497_s1 + $0x70] sm:$0xff]  ;;  %v379_v6 = vld [vmem:[%s497_s1 + $0x68] sm:$0xff] }
   0x3   :  { %170 = vmatpush.bf16.msra.mxu1 %v381_v1  ;;  %v389_v4 = vld [vmem:[%s498_s3 + $0x38] sm:$0xff]  ;;  %v388_v7 = vld [vmem:[%s498_s3 + $0x30] sm:$0xff]  ;;  %v370_v8 = vld [vmem:[%s497_s1 + $0x20] sm:$0xff] }
   0x4   :  { %251 = vmatpush.bf16.msra.mxu2 %v389_v4  ;;  %v378_v9 = vld [vmem:[%s497_s1 + $0x60] sm:$0xff]  ;;  %v387_v10 = vld [vmem:[%s498_s3 + $0x28] sm:$0xff]  ;;  %v369_v11 = vld [vmem:[%s497_s1 + $0x18] sm:$0xff] }
   0x5   :  { %v377_v12 = vld [vmem:[%s497_s1 + $0x58] sm:$0xff]  ;;  %v386_v13 = vld [vmem:[%s498_s3 + $0x20] sm:$0xff]  ;;  %v368_v14 = vld [vmem:[%s497_s1 + $0x10] sm:$0xff] }
   0x6   :  { %158 = vmatpush.bf16.msra.mxu0 %v372_v2  ;;  %v376_v15 = vld [vmem:[%s497_s1 + $0x50] sm:$0xff]  ;;  %v385_v16 = vld [vmem:[%s498_s3 + $0x18] sm:$0xff]  ;;  %v367_v17 = vld [vmem:[%s497_s1 + $0x8] sm:$0xff] }
   0x7   :  { %171 = vmatpush.bf16.msra.mxu1 %v380_v3  ;;  %v375_v18 = vld [vmem:[%s497_s1 + $0x48] sm:$0xff]  ;;  %v17_v19 = vld [vmem:[%s500_s0] sm:$0xff]  ;;  %v384_v20 = vld [vmem:[%s498_s3 + $0x10] sm:$0xff] }
   0x8   :  { %252 = vmatpush.bf16.msra.mxu2 %v388_v7  ;;  %v55_v21 = vunpack.c.l.b16 %v17_v19  ;;  %v56_v22 = vunpack.c.h.b16 %v17_v19  ;;  %v366_v23 = vld [vmem:[%s497_s1] sm:$0xff]  ;;  %v383_v27 = vld [vmem:[%s498_s3 + $0x8] sm:$0xff] }
   0x9   :  { %v374_v24 = vld [vmem:[%s497_s1 + $0x40] sm:$0xff] }
   0xa   :  { %159 = vmatpush.bf16.msra.mxu0 %v371_v5  ;;  %v57_v25 = vpack.c.b16 %v55_v21, %v55_v21  ;;  %v58_v26 = vpack.c.b16 %v56_v22, %v56_v22  ;;  %v382_v28 = vld [vmem:[%s498_s3] sm:$0xff] }
   0xb   :  { %172 = vmatpush.bf16.msra.mxu1 %v379_v6  ;;  %v390_v29 = vld [vmem:[%s499_s2] ss:$0 sm:$0xff] }
   0xc   :  { %253 = vmatpush.bf16.msra.mxu2 %v387_v10 }
   0xe   :  { %160 = vmatpush.bf16.msra.mxu0 %v370_v8 }
   0xf   :  { %173 = vmatpush.bf16.msra.mxu1 %v378_v9 }
  0x10   :  { %254 = vmatpush.bf16.msra.mxu2 %v386_v13 }
  0x12   :  { %161 = vmatpush.bf16.msra.mxu0 %v369_v11 }
  0x13   :  { %174 = vmatpush.bf16.msra.mxu1 %v377_v12 }
  0x14   :  { %255 = vmatpush.bf16.msra.mxu2 %v385_v16 }
  0x16   :  { %162 = vmatpush.bf16.msra.mxu0 %v368_v14 }
  0x17   :  { %175 = vmatpush.bf16.msra.mxu1 %v376_v15 }
  0x18   :  { %256 = vmatpush.bf16.msra.mxu2 %v384_v20 }
  0x1a   :  { %163 = vmatpush.bf16.msra.mxu0 %v367_v17 }
  0x1b   :  { %176 = vmatpush.bf16.msra.mxu1 %v375_v18 }
  0x1c   :  { %257 = vmatpush.bf16.msra.mxu2 %v383_v27 }
  0x1e   :  { %164 = vmatpush.bf16.msra.mxu0 %v366_v23 }
  0x1f   :  { %177 = vmatpush.bf16.msra.mxu1 %v374_v24 }
  0x20   :  { %258 = vmatpush.bf16.msra.mxu2 %v382_v28 }
  0x21   :  { %165 = vmatmul.bf16.vlgmr.msra.gmra.mxu0 %v57_v25 }
  0x22   :  { %178 = vmatmul.bf16.vlgmr.msra.gmra.mxu1 %v58_v26 }
  0x9e   :  { %v166_v30 = vpop.f32.mrf.mxu0 }
  0x9f   :  { %v179_v31 = vpop.f32.mrf.mxu1  ;;  %v167_v32 = vadd.f32 %v390_v29, %v166_v30 }
  0xa1   :  { %v180_v33 = vadd.f32 %v179_v31, %v167_v32 }
  0xa3   :  { %v184_v34 = vmul.f32 0.1, %v180_v33  ;;  %vm183_vm0 = vcmp.gt.f32.partialorder %v180_v33, 0.0 }
  0xa5   :  { %v185_v35 = vsel %vm183_vm0, %v180_v33, %v184_v34 }
  0xa6   :  { %v168_v36 = vpop.f32.mrf.mxu0  ;;  %v186_v38 = vpack.c.bf16 %v185_v35, %v185_v35 }
  0xa7   :  { %v181_v37 = vpop.f32.mrf.mxu1 }
  0xa8   :  { %259 = vmatmul.bf16.vlgmr.msra.gmra.mxu2 %v186_v38 }
 0x12b   :  { %v260_v39 = vpop.f32.mrf.mxu2 }
 0x12c   :  { %v264_v40 = vpack.c.bf16 %v260_v39, %v260_v39 }
 0x12e   :  { %265 = vst [vmem:[%s501_s4] sm:$0xf] %v264_v40 }
 0x133   :  { %v262_v41 = vpop.f32.mrf.mxu2 }

// kernel: build_model_forward.22
= control target key start
LH: loop header
LB: loop body
LE: loop exit
PB: predicated region body
PF: predicated region fallthrough
CT: control target
= control target key end

     0   :  { %s2540_s5 = inlined_call_operand.vmem [shape: bf16[256,256], index: 5, kind: input, shape index: {}]   ;;  %s2541_s4 = inlined_call_operand.vmem [shape: bf16[256,256], index: 4, kind: input, shape index: {}]   ;;  %s2542_s1 = inlined_call_operand.vmem [shape: bf16[8,256], index: 1, kind: input, shape index: {}]   ;;  %s2543_s0 = inlined_call_operand.vmem [shape: bf16[8,256], index: 0, kind: input, shape index: {}]   ;;  %s2544_s6 = inlined_call_operand.vmem [shape: bf16[256,256], index: 6, kind: input, shape index: {}]   ;;  %s2545_s2 = inlined_call_operand.vmem [shape: bf16[8,256], index: 2, kind: input, shape index: {}]   ;;  %s2546_s7 = inlined_call_operand.vmem [shape: bf16[256,256], index: 7, kind: input, shape index: {}]   ;;  %s2547_s3 = inlined_call_operand.vmem [shape: bf16[8,256], index: 3, kind: input, shape index: {}]   ;;  %s2548_s8 = inlined_call_operand.vmem [shape: f32[1,256], index: 8, kind: input, shape index: {}]   ;;  %s2549_s9 = inlined_call_operand.vmem [shape: bf16[8,256], index: 9, kind: output, shape index: {}]  }
   0x1   :  { %v1122_v0 = vld [vmem:[%s2540_s5 + $0x70] sm:$0xf]  ;;  %v1623_v1 = vld [vmem:[%s2540_s5 + $0x74] sm:$0xf0]  ;;  %v1622_v5 = vld [vmem:[%s2540_s5 + $0x74] sm:$0xf] }
   0x2   :  { %v1186_v2 = vld [vmem:[%s2540_s5 + $0xf0] sm:$0xf]  ;;  %v1123_v3 = vor.u32 %v1623_v1, %v1122_v0  ;;  %v1639_v4 = vld [vmem:[%s2540_s5 + $0xf4] sm:$0xf0]  ;;  %v1124_v6 = vld [vmem:[%s2540_s5 + $0x78] sm:$0xf0] }
   0x3   :  { %v1187_v7 = vor.u32 %v1639_v4, %v1186_v2  ;;  %v1127_v8 = vor.u32 %v1622_v5, %v1124_v6  ;;  %v1638_v9 = vld [vmem:[%s2540_s5 + $0xf4] sm:$0xf]  ;;  %v1188_v10 = vld [vmem:[%s2540_s5 + $0xf8] sm:$0xf0]  ;;  %v1114_v11 = vld [vmem:[%s2540_s5 + $0x60] sm:$0xf] }
   0x4   :  { %265 = vmatpush.bf16.msra.mxu0 %v1123_v3  ;;  %v1191_v12 = vor.u32 %v1638_v9, %v1188_v10  ;;  %v1621_v13 = vld [vmem:[%s2540_s5 + $0x64] sm:$0xf0]  ;;  %v1178_v14 = vld [vmem:[%s2540_s5 + $0xe0] sm:$0xf]  ;;  %v1620_v18 = vld [vmem:[%s2540_s5 + $0x64] sm:$0xf] }
   0x5   :  { %v1637_v15 = vld [vmem:[%s2540_s5 + $0xe4] sm:$0xf0]  ;;  %278 = vmatpush.bf16.msra.mxu1 %v1187_v7  ;;  %291 = vmatpush.bf16.msra.mxu2 %v1127_v8  ;;  %v1115_v16 = vor.u32 %v1621_v13, %v1114_v11  ;;  %v1116_v19 = vld [vmem:[%s2540_s5 + $0x68] sm:$0xf0]  ;;  %v1636_v20 = vld [vmem:[%s2540_s5 + $0xe4] sm:$0xf] }
   0x6   :  { %v1179_v17 = vor.u32 %v1637_v15, %v1178_v14  ;;  %304 = vmatpush.bf16.msra.mxu3 %v1191_v12  ;;  %v1119_v21 = vor.u32 %v1620_v18, %v1116_v19  ;;  %v1180_v22 = vld [vmem:[%s2540_s5 + $0xe8] sm:$0xf0]  ;;  %v1106_v23 = vld [vmem:[%s2540_s5 + $0x50] sm:$0xf]  ;;  %v1619_v24 = vld [vmem:[%s2540_s5 + $0x54] sm:$0xf0] }
   0x7   :  { %v1183_v25 = vor.u32 %v1636_v20, %v1180_v22  ;;  %v1170_v26 = vld [vmem:[%s2540_s5 + $0xd0] sm:$0xf]  ;;  %v1635_v27 = vld [vmem:[%s2540_s5 + $0xd4] sm:$0xf0]  ;;  %v1618_v28 = vld [vmem:[%s2540_s5 + $0x54] sm:$0xf]  ;;  %v1107_v29 = vor.u32 %v1619_v24, %v1106_v23 }
   0x8   :  { %266 = vmatpush.bf16.msra.mxu0 %v1115_v16  ;;  %v1108_v30 = vld [vmem:[%s2540_s5 + $0x58] sm:$0xf0]  ;;  %v1634_v31 = vld [vmem:[%s2540_s5 + $0xd4] sm:$0xf]  ;;  %v1171_v33 = vor.u32 %v1635_v27, %v1170_v26  ;;  %v1098_v35 = vld [vmem:[%s2540_s5 + $0x40] sm:$0xf] }
   0x9   :  { %v1172_v32 = vld [vmem:[%s2540_s5 + $0xd8] sm:$0xf0]  ;;  %279 = vmatpush.bf16.msra.mxu1 %v1179_v17  ;;  %292 = vmatpush.bf16.msra.mxu2 %v1119_v21  ;;  %v1111_v34 = vor.u32 %v1618_v28, %v1108_v30  ;;  %v1617_v36 = vld [vmem:[%s2540_s5 + $0x44] sm:$0xf0]  ;;  %v1162_v37 = vld [vmem:[%s2540_s5 + $0xc0] sm:$0xf] }
   0xa   :  { %305 = vmatpush.bf16.msra.mxu3 %v1183_v25  ;;  %v1175_v38 = vor.u32 %v1634_v31, %v1172_v32  ;;  %v1633_v39 = vld [vmem:[%s2540_s5 + $0xc4] sm:$0xf0]  ;;  %v1616_v40 = vld [vmem:[%s2540_s5 + $0x44] sm:$0xf]  ;;  %v1100_v41 = vld [vmem:[%s2540_s5 + $0x48] sm:$0xf0]  ;;  %v1099_v44 = vor.u32 %v1617_v36, %v1098_v35 }
   0xb   :  { %v1632_v42 = vld [vmem:[%s2540_s5 + $0xc4] sm:$0xf]  ;;  %v1164_v43 = vld [vmem:[%s2540_s5 + $0xc8] sm:$0xf0]  ;;  %v1163_v45 = vor.u32 %v1633_v39, %v1162_v37  ;;  %v1103_v46 = vor.u32 %v1616_v40, %v1100_v41  ;;  %v1090_v47 = vld [vmem:[%s2540_s5 + $0x30] sm:$0xf] }
   0xc   :  { %267 = vmatpush.bf16.msra.mxu0 %v1107_v29  ;;  %v1615_v48 = vld [vmem:[%s2540_s5 + $0x34] sm:$0xf0]  ;;  %v1154_v49 = vld [vmem:[%s2540_s5 + $0xb0] sm:$0xf]  ;;  %v1167_v50 = vor.u32 %v1632_v42, %v1164_v43  ;;  %v1614_v52 = vld [vmem:[%s2540_s5 + $0x34] sm:$0xf] }
   0xd   :  { %280 = vmatpush.bf16.msra.mxu1 %v1171_v33  ;;  %293 = vmatpush.bf16.msra.mxu2 %v1111_v34  ;;  %v1631_v51 = vld [vmem:[%s2540_s5 + $0xb4] sm:$0xf0]  ;;  %v1092_v53 = vld [vmem:[%s2540_s5 + $0x38] sm:$0xf0]  ;;  %v1630_v54 = vld [vmem:[%s2540_s5 + $0xb4] sm:$0xf]  ;;  %v1091_v56 = vor.u32 %v1615_v48, %v1090_v47 }
   0xe   :  { %306 = vmatpush.bf16.msra.mxu3 %v1175_v38  ;;  %v1156_v55 = vld [vmem:[%s2540_s5 + $0xb8] sm:$0xf0]  ;;  %v1155_v57 = vor.u32 %v1631_v51, %v1154_v49  ;;  %v1095_v58 = vor.u32 %v1614_v52, %v1092_v53  ;;  %v1082_v59 = vld [vmem:[%s2540_s5 + $0x20] sm:$0xf]  ;;  %v1613_v60 = vld [vmem:[%s2540_s5 + $0x24] sm:$0xf0] }
   0xf   :  { %v1146_v61 = vld [vmem:[%s2540_s5 + $0xa0] sm:$0xf]  ;;  %v1159_v62 = vor.u32 %v1630_v54, %v1156_v55  ;;  %v1629_v63 = vld [vmem:[%s2540_s5 + $0xa4] sm:$0xf0]  ;;  %v1612_v0 = vld [vmem:[%s2540_s5 + $0x24] sm:$0xf]  ;;  %v1083_v4 = vor.u32 %v1613_v60, %v1082_v59 }
  0x10   :  { %268 = vmatpush.bf16.msra.mxu0 %v1099_v44  ;;  %v1084_v1 = vld [vmem:[%s2540_s5 + $0x28] sm:$0xf0]  ;;  %v1628_v2 = vld [vmem:[%s2540_s5 + $0xa4] sm:$0xf]  ;;  %v1147_v5 = vor.u32 %v1629_v63, %v1146_v61  ;;  %v1074_v7 = vld [vmem:[%s2540_s5 + $0x10] sm:$0xf] }
  0x11   :  { %281 = vmatpush.bf16.msra.mxu1 %v1163_v45  ;;  %294 = vmatpush.bf16.msra.mxu2 %v1103_v46  ;;  %v1148_v3 = vld [vmem:[%s2540_s5 + $0xa8] sm:$0xf0]  ;;  %v1087_v6 = vor.u32 %v1612_v0, %v1084_v1  ;;  %v1611_v8 = vld [vmem:[%s2540_s5 + $0x14] sm:$0xf0]  ;;  %v1138_v9 = vld [vmem:[%s2540_s5 + $0x90] sm:$0xf] }
  0x12   :  { %307 = vmatpush.bf16.msra.mxu3 %v1167_v50  ;;  %v1151_v10 = vor.u32 %v1628_v2, %v1148_v3  ;;  %v1627_v11 = vld [vmem:[%s2540_s5 + $0x94] sm:$0xf0]  ;;  %v1610_v12 = vld [vmem:[%s2540_s5 + $0x14] sm:$0xf]  ;;  %v1076_v13 = vld [vmem:[%s2540_s5 + $0x18] sm:$0xf0]  ;;  %v1075_v16 = vor.u32 %v1611_v8, %v1074_v7 }
  0x13   :  { %v1626_v14 = vld [vmem:[%s2540_s5 + $0x94] sm:$0xf]  ;;  %v1140_v15 = vld [vmem:[%s2540_s5 + $0x98] sm:$0xf0]  ;;  %v1066_v17 = vld [vmem:[%s2540_s5] sm:$0xf]  ;;  %v1139_v19 = vor.u32 %v1627_v11, %v1138_v9  ;;  %v1079_v20 = vor.u32 %v1610_v12, %v1076_v13 }
  0x14   :  { %269 = vmatpush.bf16.msra.mxu0 %v1091_v56  ;;  %v1609_v18 = vld [vmem:[%s2540_s5 + $0x4] sm:$0xf0]  ;;  %v1130_v21 = vld [vmem:[%s2540_s5 + $0x80] sm:$0xf]  ;;  %v1608_v23 = vld [vmem:[%s2540_s5 + $0x4] sm:$0xf]  ;;  %v1143_v24 = vor.u32 %v1626_v14, %v1140_v15 }
  0x15   :  { %282 = vmatpush.bf16.msra.mxu1 %v1155_v57  ;;  %295 = vmatpush.bf16.msra.mxu2 %v1095_v58  ;;  %v1625_v22 = vld [vmem:[%s2540_s5 + $0x84] sm:$0xf0]  ;;  %v1068_v25 = vld [vmem:[%s2540_s5 + $0x8] sm:$0xf0]  ;;  %v1624_v26 = vld [vmem:[%s2540_s5 + $0x84] sm:$0xf]  ;;  %v1067_v31 = vor.u32 %v1609_v18, %v1066_v17 }
  0x16   :  { %308 = vmatpush.bf16.msra.mxu3 %v1159_v62  ;;  %v1132_v27 = vld [vmem:[%s2540_s5 + $0x88] sm:$0xf0]  ;;  %v1250_v28 = vld [vmem:[%s2541_s4 + $0x70] sm:$0xf]  ;;  %v1591_v29 = vld [vmem:[%s2541_s4 + $0x74] sm:$0xf0]  ;;  %v1131_v35 = vor.u32 %v1625_v22, %v1130_v21  ;;  %v1071_v36 = vor.u32 %v1608_v23, %v1068_v25 }
  0x17   :  { %v1314_v30 = vld [vmem:[%s2541_s4 + $0xf0] sm:$0xf]  ;;  %v1607_v32 = vld [vmem:[%s2541_s4 + $0xf4] sm:$0xf0]  ;;  %v1590_v33 = vld [vmem:[%s2541_s4 + $0x74] sm:$0xf]  ;;  %v1135_v39 = vor.u32 %v1624_v26, %v1132_v27  ;;  %v1251_v40 = vor.u32 %v1591_v29, %v1250_v28 }
  0x18   :  { %270 = vmatpush.bf16.msra.mxu0 %v1083_v4  ;;  %v1252_v34 = vld [vmem:[%s2541_s4 + $0x78] sm:$0xf0]  ;;  %v1606_v37 = vld [vmem:[%s2541_s4 + $0xf4] sm:$0xf]  ;;  %v1315_v41 = vor.u32 %v1607_v32, %v1314_v30  ;;  %v1242_v43 = vld [vmem:[%s2541_s4 + $0x60] sm:$0xf] }
  0x19   :  { %283 = vmatpush.bf16.msra.mxu1 %v1147_v5  ;;  %296 = vmatpush.bf16.msra.mxu2 %v1087_v6  ;;  %v1316_v38 = vld [vmem:[%s2541_s4 + $0xf8] sm:$0xf0]  ;;  %v1255_v42 = vor.u32 %v1590_v33, %v1252_v34  ;;  %v1589_v44 = vld [vmem:[%s2541_s4 + $0x64] sm:$0xf0]  ;;  %v1306_v45 = vld [vmem:[%s2541_s4 + $0xe0] sm:$0xf] }
  0x1a   :  { %309 = vmatpush.bf16.msra.mxu3 %v1151_v10  ;;  %v1319_v46 = vor.u32 %v1606_v37, %v1316_v38  ;;  %v1605_v47 = vld [vmem:[%s2541_s4 + $0xe4] sm:$0xf0]  ;;  %v1588_v48 = vld [vmem:[%s2541_s4 + $0x64] sm:$0xf]  ;;  %v1244_v49 = vld [vmem:[%s2541_s4 + $0x68] sm:$0xf0]  ;;  %v1243_v53 = vor.u32 %v1589_v44, %v1242_v43 }
  0x1b   :  { %v1604_v50 = vld [vmem:[%s2541_s4 + $0xe4] sm:$0xf]  ;;  %v1308_v51 = vld [vmem:[%s2541_s4 + $0xe8] sm:$0xf0]  ;;  %v1307_v56 = vor.u32 %v1605_v47, %v1306_v45  ;;  %v1247_v57 = vor.u32 %v1588_v48, %v1244_v49  ;;  %v1234_v58 = vld [vmem:[%s2541_s4 + $0x50] sm:$0xf] }
  0x1c   :  { %271 = vmatpush.bf16.msra.mxu0 %v1075_v16  ;;  %v65_v52 = vld [vmem:[%s2542_s1] sm:$0xff]  ;;  %v1587_v59 = vld [vmem:[%s2541_s4 + $0x54] sm:$0xf0]  ;;  %v1298_v60 = vld [vmem:[%s2541_s4 + $0xd0] sm:$0xf]  ;;  %v1311_v61 = vor.u32 %v1604_v50, %v1308_v51 }
  0x1d   :  { %284 = vmatpush.bf16.msra.mxu1 %v1139_v19  ;;  %297 = vmatpush.bf16.msra.mxu2 %v1079_v20  ;;  %v99_v54 = vunpack.c.l.b16 %v65_v52  ;;  %v100_v55 = vunpack.c.h.b16 %v65_v52  ;;  %v1603_v62 = vld [vmem:[%s2541_s4 + $0xd4] sm:$0xf0]  ;;  %v1586_v63 = vld [vmem:[%s2541_s4 + $0x54] sm:$0xf]  ;;  %v1236_v0 = vld [vmem:[%s2541_s4 + $0x58] sm:$0xf0]  ;;  %v1235_v5 = vor.u32 %v1587_v59, %v1234_v58 }
  0x1e   :  { %310 = vmatpush.bf16.msra.mxu3 %v1143_v24  ;;  %v1602_v2 = vld [vmem:[%s2541_s4 + $0xd4] sm:$0xf]  ;;  %v1300_v3 = vld [vmem:[%s2541_s4 + $0xd8] sm:$0xf0]  ;;  %v1299_v6 = vor.u32 %v1603_v62, %v1298_v60  ;;  %v1239_v7 = vor.u32 %v1586_v63, %v1236_v0  ;;  %v1226_v8 = vld [vmem:[%s2541_s4 + $0x40] sm:$0xf] }
  0x1f   :  { %v101_v1 = vpack.c.b16 %v99_v54, %v99_v54  ;;  %v102_v4 = vpack.c.b16 %v100_v55, %v100_v55  ;;  %v1585_v9 = vld [vmem:[%s2541_s4 + $0x44] sm:$0xf0]  ;;  %v1290_v10 = vld [vmem:[%s2541_s4 + $0xc0] sm:$0xf]  ;;  %v1303_v11 = vor.u32 %v1602_v2, %v1300_v3  ;;  %v1584_v13 = vld [vmem:[%s2541_s4 + $0x44] sm:$0xf] }
  0x20   :  { %272 = vmatpush.bf16.msra.mxu0 %v1067_v31  ;;  %v1601_v12 = vld [vmem:[%s2541_s4 + $0xc4] sm:$0xf0]  ;;  %v1228_v14 = vld [vmem:[%s2541_s4 + $0x48] sm:$0xf0]  ;;  %v1600_v15 = vld [vmem:[%s2541_s4 + $0xc4] sm:$0xf]  ;;  %v1227_v17 = vor.u32 %v1585_v9, %v1226_v8 }
  0x21   :  { %285 = vmatpush.bf16.msra.mxu1 %v1131_v35  ;;  %298 = vmatpush.bf16.msra.mxu2 %v1071_v36  ;;  %v1292_v16 = vld [vmem:[%s2541_s4 + $0xc8] sm:$0xf0]  ;;  %v1291_v18 = vor.u32 %v1601_v12, %v1290_v10  ;;  %v1231_v19 = vor.u32 %v1584_v13, %v1228_v14  ;;  %v1218_v20 = vld [vmem:[%s2541_s4 + $0x30] sm:$0xf]  ;;  %v1583_v21 = vld [vmem:[%s2541_s4 + $0x34] sm:$0xf0] }
  0x22   :  { %311 = vmatpush.bf16.msra.mxu3 %v1135_v39  ;;  %v1282_v22 = vld [vmem:[%s2541_s4 + $0xb0] sm:$0xf]  ;;  %v1295_v23 = vor.u32 %v1600_v15, %v1292_v16  ;;  %v1599_v24 = vld [vmem:[%s2541_s4 + $0xb4] sm:$0xf0]  ;;  %v1582_v25 = vld [vmem:[%s2541_s4 + $0x34] sm:$0xf]  ;;  %v1219_v29 = vor.u32 %v1583_v21, %v1218_v20 }
  0x23   :  { %273 = vmatmul.bf16.vlgmr.msra.gmra.mxu0 %v101_v1  ;;  %v1220_v26 = vld [vmem:[%s2541_s4 + $0x38] sm:$0xf0]  ;;  %v1598_v27 = vld [vmem:[%s2541_s4 + $0xb4] sm:$0xf]  ;;  %v1283_v30 = vor.u32 %v1599_v24, %v1282_v22  ;;  %v1210_v32 = vld [vmem:[%s2541_s4 + $0x20] sm:$0xf] }
  0x24   :  { %484 = vmatpush.bf16.msrb.mxu0 %v1251_v40  ;;  %299 = vmatmul.bf16.vlgmr.msra.gmra.mxu2 %v101_v1  ;;  %v1284_v28 = vld [vmem:[%s2541_s4 + $0xb8] sm:$0xf0]  ;;  %v1223_v31 = vor.u32 %v1582_v25, %v1220_v26  ;;  %v1581_v33 = vld [vmem:[%s2541_s4 + $0x24] sm:$0xf0]  ;;  %v1274_v34 = vld [vmem:[%s2541_s4 + $0xa0] sm:$0xf] }
  0x25   :  { %497 = vmatpush.bf16.msrb.mxu1 %v1315_v41  ;;  %510 = vmatpush.bf16.msrb.mxu2 %v1255_v42  ;;  %v1287_v35 = vor.u32 %v1598_v27, %v1284_v28  ;;  %v1597_v36 = vld [vmem:[%s2541_s4 + $0xa4] sm:$0xf0]  ;;  %v1580_v37 = vld [vmem:[%s2541_s4 + $0x24] sm:$0xf]  ;;  %v1212_v38 = vld [vmem:[%s2541_s4 + $0x28] sm:$0xf0]  ;;  %v1211_v41 = vor.u32 %v1581_v33, %v1210_v32 }
  0x26   :  { %523 = vmatpush.bf16.msrb.mxu3 %v1319_v46  ;;  %286 = vmatmul.bf16.vlgmr.msra.gmra.mxu1 %v102_v4  ;;  %v1596_v39 = vld [vmem:[%s2541_s4 + $0xa4] sm:$0xf]  ;;  %v1276_v40 = vld [vmem:[%s2541_s4 + $0xa8] sm:$0xf0]  ;;  %v1275_v42 = vor.u32 %v1597_v36, %v1274_v34  ;;  %v1215_v43 = vor.u32 %v1580_v37, %v1212_v38  ;;  %v1202_v44 = vld [vmem:[%s2541_s4 + $0x10] sm:$0xf] }
  0x27   :  { %312 = vmatmul.bf16.vlgmr.msra.gmra.mxu3 %v102_v4  ;;  %v1579_v45 = vld [vmem:[%s2541_s4 + $0x14] sm:$0xf0]  ;;  %v1266_v46 = vld [vmem:[%s2541_s4 + $0x90] sm:$0xf]  ;;  %v1279_v47 = vor.u32 %v1596_v39, %v1276_v40  ;;  %v1578_v49 = vld [vmem:[%s2541_s4 + $0x14] sm:$0xf] }
  0x28   :  { %485 = vmatpush.bf16.msrb.mxu0 %v1243_v53  ;;  %v1595_v48 = vld [vmem:[%s2541_s4 + $0x94] sm:$0xf0]  ;;  %v1204_v50 = vld [vmem:[%s2541_s4 + $0x18] sm:$0xf0]  ;;  %v1594_v51 = vld [vmem:[%s2541_s4 + $0x94] sm:$0xf]  ;;  %v1203_v53 = vor.u32 %v1579_v45, %v1202_v44 }
  0x29   :  { %498 = vmatpush.bf16.msrb.mxu1 %v1307_v56  ;;  %511 = vmatpush.bf16.msrb.mxu2 %v1247_v57  ;;  %v1268_v52 = vld [vmem:[%s2541_s4 + $0x98] sm:$0xf0]  ;;  %v1194_v54 = vld [vmem:[%s2541_s4] sm:$0xf]  ;;  %v1577_v55 = vld [vmem:[%s2541_s4 + $0x4] sm:$0xf0]  ;;  %v1267_v57 = vor.u32 %v1595_v48, %v1266_v46  ;;  %v1207_v58 = vor.u32 %v1578_v49, %v1204_v50 }
  0x2a   :  { %524 = vmatpush.bf16.msrb.mxu3 %v1311_v61  ;;  %v1258_v56 = vld [vmem:[%s2541_s4 + $0x80] sm:$0xf]  ;;  %v1593_v59 = vld [vmem:[%s2541_s4 + $0x84] sm:$0xf0]  ;;  %v1576_v60 = vld [vmem:[%s2541_s4 + $0x4] sm:$0xf]  ;;  %v1271_v62 = vor.u32 %v1594_v51, %v1268_v52 }
  0x2b   :  { %v32_v61 = vld [vmem:[%s2543_s0] sm:$0xff]  ;;  %v1196_v63 = vld [vmem:[%s2541_s4 + $0x8] sm:$0xf0]  ;;  %v1378_v2 = vld [vmem:[%s2544_s6 + $0x70] sm:$0xf]  ;;  %v1259_v10 = vor.u32 %v1593_v59, %v1258_v56 }
  0x2c   :  { %486 = vmatpush.bf16.msrb.mxu0 %v1235_v5  ;;  %v1592_v0 = vld [vmem:[%s2541_s4 + $0x84] sm:$0xf]  ;;  %v1260_v1 = vld [vmem:[%s2541_s4 + $0x88] sm:$0xf0]  ;;  %v1655_v3 = vld [vmem:[%s2544_s6 + $0x74] sm:$0xf0]  ;;  %v1195_v5 = vor.u32 %v1577_v55, %v1194_v54  ;;  %v318_v9 = vunpack.c.l.b16 %v32_v61  ;;  %v319_v14 = vunpack.c.h.b16 %v32_v61 }
  0x2d   :  { %499 = vmatpush.bf16.msrb.mxu1 %v1299_v6  ;;  %512 = vmatpush.bf16.msrb.mxu2 %v1239_v7  ;;  %v1442_v4 = vld [vmem:[%s2544_s6 + $0xf0] sm:$0xf]  ;;  %v1671_v6 = vld [vmem:[%s2544_s6 + $0xf4] sm:$0xf0]  ;;  %v1654_v7 = vld [vmem:[%s2544_s6 + $0x74] sm:$0xf]  ;;  %v1263_v15 = vor.u32 %v1592_v0, %v1260_v1  ;;  %v1379_v16 = vor.u32 %v1655_v3, %v1378_v2 }
  0x2e   :  { %525 = vmatpush.bf16.msrb.mxu3 %v1303_v11  ;;  %v1380_v8 = vld [vmem:[%s2544_s6 + $0x78] sm:$0xf0]  ;;  %v1199_v11 = vor.u32 %v1576_v60, %v1196_v63  ;;  %v1670_v12 = vld [vmem:[%s2544_s6 + $0xf4] sm:$0xf]  ;;  %v1653_v20 = vld [vmem:[%s2544_s6 + $0x64] sm:$0xf0]  ;;  %v321_v27 = vpack.c.b16 %v319_v14, %v319_v14 }
  0x2f   :  { %v1444_v13 = vld [vmem:[%s2544_s6 + $0xf8] sm:$0xf0]  ;;  %v1434_v21 = vld [vmem:[%s2544_s6 + $0xe0] sm:$0xf]  ;;  %v1669_v24 = vld [vmem:[%s2544_s6 + $0xe4] sm:$0xf0] }
  0x30   :  { %487 = vmatpush.bf16.msrb.mxu0 %v1227_v17  ;;  %v1443_v17 = vor.u32 %v1671_v6, %v1442_v4  ;;  %v1447_v22 = vor.u32 %v1670_v12, %v1444_v13  ;;  %v1652_v25 = vld [vmem:[%s2544_s6 + $0x64] sm:$0xf]  ;;  %v1372_v26 = vld [vmem:[%s2544_s6 + $0x68] sm:$0xf0]  ;;  %v1362_v33 = vld [vmem:[%s2544_s6 + $0x50] sm:$0xf] }
  0x31   :  { %500 = vmatpush.bf16.msrb.mxu1 %v1291_v18  ;;  %513 = vmatpush.bf16.msrb.mxu2 %v1231_v19  ;;  %v1383_v18 = vor.u32 %v1654_v7, %v1380_v8  ;;  %v1370_v19 = vld [vmem:[%s2544_s6 + $0x60] sm:$0xf]  ;;  %v1668_v28 = vld [vmem:[%s2544_s6 + $0xe4] sm:$0xf]  ;;  %v1375_v32 = vor.u32 %v1652_v25, %v1372_v26  ;;  %v1651_v34 = vld [vmem:[%s2544_s6 + $0x54] sm:$0xf0] }
  0x32   :  { %526 = vmatpush.bf16.msrb.mxu3 %v1295_v23  ;;  %v320_v23 = vpack.c.b16 %v318_v9, %v318_v9  ;;  %v1667_v37 = vld [vmem:[%s2544_s6 + $0xd4] sm:$0xf0]  ;;  %v1650_v38 = vld [vmem:[%s2544_s6 + $0x54] sm:$0xf]  ;;  %v1364_v39 = vld [vmem:[%s2544_s6 + $0x58] sm:$0xf0] }
  0x33   :  { %v1666_v40 = vld [vmem:[%s2544_s6 + $0xd4] sm:$0xf]  ;;  %v1367_v44 = vor.u32 %v1650_v38, %v1364_v39  ;;  %v1354_v45 = vld [vmem:[%s2544_s6 + $0x40] sm:$0xf]  ;;  %v1649_v46 = vld [vmem:[%s2544_s6 + $0x44] sm:$0xf0] }
  0x34   :  { %488 = vmatpush.bf16.msrb.mxu0 %v1219_v29  ;;  %v1436_v29 = vld [vmem:[%s2544_s6 + $0xe8] sm:$0xf0]  ;;  %v1665_v49 = vld [vmem:[%s2544_s6 + $0xc4] sm:$0xf0]  ;;  %v1648_v50 = vld [vmem:[%s2544_s6 + $0x44] sm:$0xf]  ;;  %v1355_v54 = vor.u32 %v1649_v46, %v1354_v45 }
  0x35   :  { %501 = vmatpush.bf16.msrb.mxu1 %v1283_v30  ;;  %514 = vmatpush.bf16.msrb.mxu2 %v1223_v31  ;;  %v1371_v30 = vor.u32 %v1653_v20, %v1370_v19  ;;  %v1435_v31 = vor.u32 %v1669_v24, %v1434_v21  ;;  %v1439_v36 = vor.u32 %v1668_v28, %v1436_v29  ;;  %v1356_v51 = vld [vmem:[%s2544_s6 + $0x48] sm:$0xf0]  ;;  %v1664_v52 = vld [vmem:[%s2544_s6 + $0xc4] sm:$0xf]  ;;  %v1410_v59 = vld [vmem:[%s2544_s6 + $0xb0] sm:$0xf] }
  0x36   :  { %527 = vmatpush.bf16.msrb.mxu3 %v1287_v35  ;;  %v1426_v35 = vld [vmem:[%s2544_s6 + $0xd0] sm:$0xf]  ;;  %v1359_v56 = vor.u32 %v1648_v50, %v1356_v51  ;;  %v1663_v61 = vld [vmem:[%s2544_s6 + $0xb4] sm:$0xf0]  ;;  %v1348_v63 = vld [vmem:[%s2544_s6 + $0x38] sm:$0xf0] }
  0x37   :  { %v1662_v0 = vld [vmem:[%s2544_s6 + $0xb4] sm:$0xf]  ;;  %v1412_v1 = vld [vmem:[%s2544_s6 + $0xb8] sm:$0xf0]  ;;  %v1411_v3 = vor.u32 %v1663_v61, %v1410_v59  ;;  %v1645_v6 = vld [vmem:[%s2544_s6 + $0x24] sm:$0xf0] }
  0x38   :  { %489 = vmatpush.bf16.msrb.mxu0 %v1211_v41  ;;  %v1428_v41 = vld [vmem:[%s2544_s6 + $0xd8] sm:$0xf0]  ;;  %v1402_v7 = vld [vmem:[%s2544_s6 + $0xa0] sm:$0xf]  ;;  %v1415_v8 = vor.u32 %v1662_v0, %v1412_v1  ;;  %v1661_v9 = vld [vmem:[%s2544_s6 + $0xa4] sm:$0xf0] }
  0x39   :  { %502 = vmatpush.bf16.msrb.mxu1 %v1275_v42  ;;  %515 = vmatpush.bf16.msrb.mxu2 %v1215_v43  ;;  %v1363_v42 = vor.u32 %v1651_v34, %v1362_v33  ;;  %v1427_v43 = vor.u32 %v1667_v37, %v1426_v35  ;;  %v1431_v48 = vor.u32 %v1666_v40, %v1428_v41  ;;  %v1660_v12 = vld [vmem:[%s2544_s6 + $0xa4] sm:$0xf]  ;;  %v1404_v13 = vld [vmem:[%s2544_s6 + $0xa8] sm:$0xf0]  ;;  %v1394_v19 = vld [vmem:[%s2544_s6 + $0x90] sm:$0xf] }
  0x3a   :  { %528 = vmatpush.bf16.msrb.mxu3 %v1279_v47  ;;  %v1418_v47 = vld [vmem:[%s2544_s6 + $0xc0] sm:$0xf]  ;;  %v1407_v20 = vor.u32 %v1660_v12, %v1404_v13  ;;  %v1659_v21 = vld [vmem:[%s2544_s6 + $0x94] sm:$0xf0]  ;;  %v1658_v24 = vld [vmem:[%s2544_s6 + $0x94] sm:$0xf] }
  0x3b   :  { %v1419_v55 = vor.u32 %v1665_v49, %v1418_v47  ;;  %v1396_v25 = vld [vmem:[%s2544_s6 + $0x98] sm:$0xf0]  ;;  %v1641_v28 = vld [vmem:[%s2544_s6 + $0x4] sm:$0xf0]  ;;  %v1386_v29 = vld [vmem:[%s2544_s6 + $0x80] sm:$0xf] }
  0x3c   :  { %490 = vmatpush.bf16.msrb.mxu0 %v1203_v53  ;;  %v1420_v53 = vld [vmem:[%s2544_s6 + $0xc8] sm:$0xf0]  ;;  %v1640_v33 = vld [vmem:[%s2544_s6 + $0x4] sm:$0xf]  ;;  %v1399_v35 = vor.u32 %v1658_v24, %v1396_v25  ;;  %v1506_v39 = vld [vmem:[%s2546_s7 + $0x70] sm:$0xf] }
  0x3d   :  { %503 = vmatpush.bf16.msrb.mxu1 %v1267_v57  ;;  %516 = vmatpush.bf16.msrb.mxu2 %v1207_v58  ;;  %v1346_v57 = vld [vmem:[%s2544_s6 + $0x30] sm:$0xf]  ;;  %v1647_v58 = vld [vmem:[%s2544_s6 + $0x34] sm:$0xf0]  ;;  %v1423_v60 = vor.u32 %v1664_v52, %v1420_v53  ;;  %v536_v34 = vld [vmem:[%s2545_s2] sm:$0xff] }
  0x3e   :  { %529 = vmatpush.bf16.msrb.mxu3 %v1271_v62  ;;  %v1646_v62 = vld [vmem:[%s2544_s6 + $0x34] sm:$0xf]  ;;  %v1347_v2 = vor.u32 %v1647_v58, %v1346_v57  ;;  %v1656_v37 = vld [vmem:[%s2544_s6 + $0x84] sm:$0xf]  ;;  %v1388_v38 = vld [vmem:[%s2544_s6 + $0x88] sm:$0xf0]  ;;  %v570_v46 = vunpack.c.l.b16 %v536_v34  ;;  %v571_v51 = vunpack.c.h.b16 %v536_v34 }
  0x3f   :  { %v1351_v4 = vor.u32 %v1646_v62, %v1348_v63  ;;  %v1687_v40 = vld [vmem:[%s2546_s7 + $0x74] sm:$0xf0]  ;;  %v1570_v41 = vld [vmem:[%s2546_s7 + $0xf0] sm:$0xf]  ;;  %v1508_v45 = vld [vmem:[%s2546_s7 + $0x78] sm:$0xf0]  ;;  %v1391_v52 = vor.u32 %v1656_v37, %v1388_v38 }
  0x40   :  { %491 = vmatpush.bf16.msrb.mxu0 %v1195_v5  ;;  %v1338_v5 = vld [vmem:[%s2544_s6 + $0x20] sm:$0xf]  ;;  %v1702_v49 = vld [vmem:[%s2546_s7 + $0xf4] sm:$0xf]  ;;  %v1572_v50 = vld [vmem:[%s2546_s7 + $0xf8] sm:$0xf0]  ;;  %v1507_v53 = vor.u32 %v1687_v40, %v1506_v39  ;;  %v573_v0 = vpack.c.b16 %v571_v51, %v571_v51 }
  0x41   :  { %504 = vmatpush.bf16.msrb.mxu1 %v1259_v10  ;;  %517 = vmatpush.bf16.msrb.mxu2 %v1199_v11  ;;  %v1644_v10 = vld [vmem:[%s2544_s6 + $0x24] sm:$0xf]  ;;  %v1340_v11 = vld [vmem:[%s2544_s6 + $0x28] sm:$0xf0]  ;;  %v1339_v14 = vor.u32 %v1645_v6, %v1338_v5  ;;  %v1685_v57 = vld [vmem:[%s2546_s7 + $0x64] sm:$0xf0]  ;;  %v1575_v59 = vor.u32 %v1702_v49, %v1572_v50 }
  0x42   :  { %530 = vmatpush.bf16.msrb.mxu3 %v1263_v15  ;;  %v1403_v15 = vor.u32 %v1661_v9, %v1402_v7  ;;  %v1562_v58 = vld [vmem:[%s2546_s7 + $0xe0] sm:$0xf]  ;;  %v1701_v61 = vld [vmem:[%s2546_s7 + $0xe4] sm:$0xf0]  ;;  %v1684_v62 = vld [vmem:[%s2546_s7 + $0x64] sm:$0xf] }
  0x43   :  { %492 = vmatmul.bf16.vlgmr.msrb.gmra.mxu0 %v320_v23  ;;  %v1500_v63 = vld [vmem:[%s2546_s7 + $0x68] sm:$0xf0]  ;;  %v1700_v1 = vld [vmem:[%s2546_s7 + $0xe4] sm:$0xf]  ;;  %v1490_v6 = vld [vmem:[%s2546_s7 + $0x50] sm:$0xf] }
  0x44   :  { %736 = vmatpush.bf16.msra.mxu0 %v1379_v16  ;;  %518 = vmatmul.bf16.vlgmr.msrb.gmra.mxu2 %v320_v23  ;;  %v1343_v16 = vor.u32 %v1644_v10, %v1340_v11  ;;  %v1332_v23 = vld [vmem:[%s2544_s6 + $0x18] sm:$0xf0]  ;;  %v1503_v5 = vor.u32 %v1684_v62, %v1500_v63  ;;  %v1683_v7 = vld [vmem:[%s2546_s7 + $0x54] sm:$0xf0]  ;;  %v1682_v11 = vld [vmem:[%s2546_s7 + $0x54] sm:$0xf] }
  0x45   :  { %749 = vmatpush.bf16.msra.mxu1 %v1443_v17  ;;  %762 = vmatpush.bf16.msra.mxu2 %v1383_v18  ;;  %v1330_v17 = vld [vmem:[%s2544_s6 + $0x10] sm:$0xf]  ;;  %v1643_v18 = vld [vmem:[%s2544_s6 + $0x14] sm:$0xf0]  ;;  %v1492_v12 = vld [vmem:[%s2546_s7 + $0x58] sm:$0xf0] }
  0x46   :  { %775 = vmatpush.bf16.msra.mxu3 %v1447_v22  ;;  %505 = vmatmul.bf16.vlgmr.msrb.gmra.mxu1 %v321_v27  ;;  %v1642_v22 = vld [vmem:[%s2544_s6 + $0x14] sm:$0xf]  ;;  %v1331_v26 = vor.u32 %v1643_v18, %v1330_v17  ;;  %v1699_v10 = vld [vmem:[%s2546_s7 + $0xd4] sm:$0xf0]  ;;  %v1495_v17 = vor.u32 %v1682_v11, %v1492_v12  ;;  %v1482_v18 = vld [vmem:[%s2546_s7 + $0x40] sm:$0xf] }
  0x47   :  { %531 = vmatmul.bf16.vlgmr.msrb.gmra.mxu3 %v321_v27  ;;  %v1322_v27 = vld [vmem:[%s2544_s6] sm:$0xf]  ;;  %v1698_v13 = vld [vmem:[%s2546_s7 + $0xd4] sm:$0xf]  ;;  %v1484_v24 = vld [vmem:[%s2546_s7 + $0x48] sm:$0xf0] }
  0x48   :  { %737 = vmatpush.bf16.msra.mxu0 %v1371_v30  ;;  %v1395_v30 = vor.u32 %v1659_v21, %v1394_v19  ;;  %v1681_v19 = vld [vmem:[%s2546_s7 + $0x44] sm:$0xf0]  ;;  %v1696_v25 = vld [vmem:[%s2546_s7 + $0xc4] sm:$0xf]  ;;  %v1695_v34 = vld [vmem:[%s2546_s7 + $0xb4] sm:$0xf0] }
  0x49   :  { %750 = vmatpush.bf16.msra.mxu1 %v1435_v31  ;;  %763 = vmatpush.bf16.msra.mxu2 %v1375_v32  ;;  %v1335_v31 = vor.u32 %v1642_v22, %v1332_v23  ;;  %v1657_v32 = vld [vmem:[%s2544_s6 + $0x84] sm:$0xf0]  ;;  %v1680_v23 = vld [vmem:[%s2546_s7 + $0x44] sm:$0xf]  ;;  %v1694_v37 = vld [vmem:[%s2546_s7 + $0xb4] sm:$0xf] }
  0x4a   :  { %776 = vmatpush.bf16.msra.mxu3 %v1439_v36  ;;  %v1324_v36 = vld [vmem:[%s2544_s6 + $0x8] sm:$0xf0]  ;;  %v1387_v47 = vor.u32 %v1657_v32, %v1386_v29  ;;  %v1697_v22 = vld [vmem:[%s2546_s7 + $0xc4] sm:$0xf0]  ;;  %v1487_v29 = vor.u32 %v1680_v23, %v1484_v24  ;;  %v1538_v32 = vld [vmem:[%s2546_s7 + $0xb0] sm:$0xf] }
  0x4b   :  { %v1540_v38 = vld [vmem:[%s2546_s7 + $0xb8] sm:$0xf0]  ;;  %v1539_v40 = vor.u32 %v1695_v34, %v1538_v32  ;;  %v1692_v49 = vld [vmem:[%s2546_s7 + $0xa4] sm:$0xf]  ;;  %v1532_v50 = vld [vmem:[%s2546_s7 + $0xa8] sm:$0xf0] }
  0x4c   :  { %738 = vmatpush.bf16.msra.mxu0 %v1363_v42  ;;  %v1323_v42 = vor.u32 %v1641_v28, %v1322_v27  ;;  %v1483_v27 = vor.u32 %v1681_v19, %v1482_v18  ;;  %v1524_v62 = vld [vmem:[%s2546_s7 + $0x98] sm:$0xf0]  ;;  %v1516_v11 = vld [vmem:[%s2546_s7 + $0x88] sm:$0xf0] }
  0x4d   :  { %751 = vmatpush.bf16.msra.mxu1 %v1427_v43  ;;  %764 = vmatpush.bf16.msra.mxu2 %v1367_v44  ;;  %v1703_v43 = vld [vmem:[%s2546_s7 + $0xf4] sm:$0xf0]  ;;  %v1686_v44 = vld [vmem:[%s2546_s7 + $0x74] sm:$0xf] }
  0x4e   :  { %777 = vmatpush.bf16.msra.mxu3 %v1431_v48  ;;  %v1327_v48 = vor.u32 %v1640_v33, %v1324_v36  ;;  %v1476_v36 = vld [vmem:[%s2546_s7 + $0x38] sm:$0xf0] }
  0x50   :  { %739 = vmatpush.bf16.msra.mxu0 %v1355_v54  ;;  %v1571_v54 = vor.u32 %v1703_v43, %v1570_v41  ;;  %v1677_v43 = vld [vmem:[%s2546_s7 + $0x24] sm:$0xf0] }
  0x51   :  { %752 = vmatpush.bf16.msra.mxu1 %v1419_v55  ;;  %765 = vmatpush.bf16.msra.mxu2 %v1359_v56  ;;  %v1511_v55 = vor.u32 %v1686_v44, %v1508_v45  ;;  %v1498_v56 = vld [vmem:[%s2546_s7 + $0x60] sm:$0xf]  ;;  %v1543_v45 = vor.u32 %v1694_v37, %v1540_v38 }
  0x52   :  { %778 = vmatpush.bf16.msra.mxu3 %v1423_v60  ;;  %v572_v60 = vpack.c.b16 %v570_v46, %v570_v46  ;;  %v1530_v44 = vld [vmem:[%s2546_s7 + $0xa0] sm:$0xf]  ;;  %v1693_v46 = vld [vmem:[%s2546_s7 + $0xa4] sm:$0xf0] }
  0x54   :  { %740 = vmatpush.bf16.msra.mxu0 %v1347_v2  ;;  %v1564_v2 = vld [vmem:[%s2546_s7 + $0xe8] sm:$0xf0] }
  0x55   :  { %753 = vmatpush.bf16.msra.mxu1 %v1411_v3  ;;  %766 = vmatpush.bf16.msra.mxu2 %v1351_v4  ;;  %v1499_v3 = vor.u32 %v1685_v57, %v1498_v56  ;;  %v1563_v4 = vor.u32 %v1701_v61, %v1562_v58  ;;  %v1567_v9 = vor.u32 %v1700_v1, %v1564_v2  ;;  %v1522_v56 = vld [vmem:[%s2546_s7 + $0x90] sm:$0xf]  ;;  %v1691_v58 = vld [vmem:[%s2546_s7 + $0x94] sm:$0xf0]  ;;  %v1690_v61 = vld [vmem:[%s2546_s7 + $0x94] sm:$0xf] }
  0x56   :  { %779 = vmatpush.bf16.msra.mxu3 %v1415_v8  ;;  %v1554_v8 = vld [vmem:[%s2546_s7 + $0xd0] sm:$0xf]  ;;  %v1535_v57 = vor.u32 %v1692_v49, %v1532_v50  ;;  %v1523_v1 = vor.u32 %v1691_v58, %v1522_v56 }
  0x58   :  { %741 = vmatpush.bf16.msra.mxu0 %v1339_v14  ;;  %v1556_v14 = vld [vmem:[%s2546_s7 + $0xd8] sm:$0xf0] }
  0x59   :  { %754 = vmatpush.bf16.msra.mxu1 %v1403_v15  ;;  %767 = vmatpush.bf16.msra.mxu2 %v1343_v16  ;;  %v1491_v15 = vor.u32 %v1683_v7, %v1490_v6  ;;  %v1555_v16 = vor.u32 %v1699_v10, %v1554_v8  ;;  %v1559_v21 = vor.u32 %v1698_v13, %v1556_v14  ;;  %v1689_v7 = vld [vmem:[%s2546_s7 + $0x84] sm:$0xf0]  ;;  %v1672_v8 = vld [vmem:[%s2546_s7 + $0x4] sm:$0xf] }
  0x5a   :  { %780 = vmatpush.bf16.msra.mxu3 %v1407_v20  ;;  %v1546_v20 = vld [vmem:[%s2546_s7 + $0xc0] sm:$0xf]  ;;  %v1527_v6 = vor.u32 %v1690_v61, %v1524_v62  ;;  %v1688_v10 = vld [vmem:[%s2546_s7 + $0x84] sm:$0xf] }
  0x5b   :  { %v1547_v28 = vor.u32 %v1697_v22, %v1546_v20 }
  0x5c   :  { %742 = vmatpush.bf16.msra.mxu0 %v1331_v26  ;;  %v1548_v26 = vld [vmem:[%s2546_s7 + $0xc8] sm:$0xf0] }
  0x5d   :  { %755 = vmatpush.bf16.msra.mxu1 %v1395_v30  ;;  %768 = vmatpush.bf16.msra.mxu2 %v1335_v31  ;;  %v1474_v30 = vld [vmem:[%s2546_s7 + $0x30] sm:$0xf]  ;;  %v1679_v31 = vld [vmem:[%s2546_s7 + $0x34] sm:$0xf0]  ;;  %v1551_v33 = vor.u32 %v1696_v25, %v1548_v26 }
  0x5e   :  { %781 = vmatpush.bf16.msra.mxu3 %v1399_v35  ;;  %v1678_v35 = vld [vmem:[%s2546_s7 + $0x34] sm:$0xf]  ;;  %v1475_v39 = vor.u32 %v1679_v31, %v1474_v30 }
  0x5f   :  { %v1479_v41 = vor.u32 %v1678_v35, %v1476_v36 }
  0x60   :  { %743 = vmatpush.bf16.msra.mxu0 %v1323_v42  ;;  %v1466_v42 = vld [vmem:[%s2546_s7 + $0x20] sm:$0xf] }
  0x61   :  { %756 = vmatpush.bf16.msra.mxu1 %v1387_v47  ;;  %769 = vmatpush.bf16.msra.mxu2 %v1327_v48  ;;  %v1676_v47 = vld [vmem:[%s2546_s7 + $0x24] sm:$0xf]  ;;  %v1468_v48 = vld [vmem:[%s2546_s7 + $0x28] sm:$0xf0]  ;;  %v1467_v51 = vor.u32 %v1677_v43, %v1466_v42 }
  0x62   :  { %782 = vmatpush.bf16.msra.mxu3 %v1391_v52  ;;  %v1531_v52 = vor.u32 %v1693_v46, %v1530_v44 }
  0x63   :  { %744 = vmatmul.bf16.vlgmr.msra.gmra.mxu0 %v572_v60 }
  0x64   :  { %990 = vmatpush.bf16.msrb.mxu0 %v1507_v53  ;;  %757 = vmatmul.bf16.vlgmr.msra.gmra.mxu1 %v573_v0  ;;  %v1471_v53 = vor.u32 %v1676_v47, %v1468_v48 }
  0x65   :  { %1003 = vmatpush.bf16.msrb.mxu1 %v1571_v54  ;;  %1016 = vmatpush.bf16.msrb.mxu2 %v1511_v55  ;;  %v1458_v54 = vld [vmem:[%s2546_s7 + $0x10] sm:$0xf]  ;;  %v1675_v55 = vld [vmem:[%s2546_s7 + $0x14] sm:$0xf0] }
  0x66   :  { %1029 = vmatpush.bf16.msrb.mxu3 %v1575_v59  ;;  %770 = vmatmul.bf16.vlgmr.msra.gmra.mxu2 %v572_v60  ;;  %v1674_v59 = vld [vmem:[%s2546_s7 + $0x14] sm:$0xf]  ;;  %v1460_v60 = vld [vmem:[%s2546_s7 + $0x18] sm:$0xf0]  ;;  %v1459_v63 = vor.u32 %v1675_v55, %v1458_v54 }
  0x67   :  { %783 = vmatmul.bf16.vlgmr.msra.gmra.mxu3 %v573_v0  ;;  %v790_v0 = vld [vmem:[%s2547_s3] sm:$0xff]  ;;  %v1463_v2 = vor.u32 %v1674_v59, %v1460_v60 }
  0x68   :  { %991 = vmatpush.bf16.msrb.mxu0 %v1499_v3  ;;  %v1450_v3 = vld [vmem:[%s2546_s7] sm:$0xf]  ;;  %v824_v12 = vunpack.c.l.b16 %v790_v0  ;;  %v825_v14 = vunpack.c.h.b16 %v790_v0 }
  0x69   :  { %1004 = vmatpush.bf16.msrb.mxu1 %v1563_v4  ;;  %1017 = vmatpush.bf16.msrb.mxu2 %v1503_v5  ;;  %v1673_v4 = vld [vmem:[%s2546_s7 + $0x4] sm:$0xf0]  ;;  %v1514_v5 = vld [vmem:[%s2546_s7 + $0x80] sm:$0xf] }
  0x6a   :  { %1030 = vmatpush.bf16.msrb.mxu3 %v1567_v9  ;;  %v1452_v9 = vld [vmem:[%s2546_s7 + $0x8] sm:$0xf0]  ;;  %v1451_v13 = vor.u32 %v1673_v4, %v1450_v3  ;;  %v826_v18 = vpack.c.b16 %v824_v12, %v824_v12  ;;  %v827_v19 = vpack.c.b16 %v825_v14, %v825_v14 }
  0x6c   :  { %992 = vmatpush.bf16.msrb.mxu0 %v1491_v15  ;;  %v1515_v15 = vor.u32 %v1689_v7, %v1514_v5 }
  0x6d   :  { %1005 = vmatpush.bf16.msrb.mxu1 %v1555_v16  ;;  %1018 = vmatpush.bf16.msrb.mxu2 %v1495_v17  ;;  %v1455_v16 = vor.u32 %v1672_v8, %v1452_v9  ;;  %v1519_v17 = vor.u32 %v1688_v10, %v1516_v11 }
  0x6e   :  { %1031 = vmatpush.bf16.msrb.mxu3 %v1559_v21 }
  0x70   :  { %993 = vmatpush.bf16.msrb.mxu0 %v1483_v27 }
  0x71   :  { %1006 = vmatpush.bf16.msrb.mxu1 %v1547_v28  ;;  %1019 = vmatpush.bf16.msrb.mxu2 %v1487_v29 }
  0x72   :  { %1032 = vmatpush.bf16.msrb.mxu3 %v1551_v33 }
  0x74   :  { %994 = vmatpush.bf16.msrb.mxu0 %v1475_v39 }
  0x75   :  { %1007 = vmatpush.bf16.msrb.mxu1 %v1539_v40  ;;  %1020 = vmatpush.bf16.msrb.mxu2 %v1479_v41 }
  0x76   :  { %1033 = vmatpush.bf16.msrb.mxu3 %v1543_v45 }
  0x78   :  { %995 = vmatpush.bf16.msrb.mxu0 %v1467_v51 }
  0x79   :  { %1008 = vmatpush.bf16.msrb.mxu1 %v1531_v52  ;;  %1021 = vmatpush.bf16.msrb.mxu2 %v1471_v53  ;;  %v1044_v52 = vld [vmem:[%s2548_s8] sm:$0x3] }
  0x7a   :  { %1034 = vmatpush.bf16.msrb.mxu3 %v1535_v57  ;;  %v1046_v57 = vperm.slane %v1044_v52, 0 }
  0x7c   :  { %996 = vmatpush.bf16.msrb.mxu0 %v1459_v63 }
  0x7d   :  { %1009 = vmatpush.bf16.msrb.mxu1 %v1523_v1  ;;  %1022 = vmatpush.bf16.msrb.mxu2 %v1463_v2  ;;  %v1047_v1 = vperm.slane %v1044_v52, 1 }
  0x7e   :  { %1035 = vmatpush.bf16.msrb.mxu3 %v1527_v6 }
  0x80   :  { %997 = vmatpush.bf16.msrb.mxu0 %v1451_v13 }
  0x81   :  { %1010 = vmatpush.bf16.msrb.mxu1 %v1515_v15  ;;  %1023 = vmatpush.bf16.msrb.mxu2 %v1455_v16 }
  0x82   :  { %1036 = vmatpush.bf16.msrb.mxu3 %v1519_v17 }
  0x83   :  { %998 = vmatmul.bf16.vlgmr.msrb.gmra.mxu0 %v826_v18 }
  0x84   :  { %1011 = vmatmul.bf16.vlgmr.msrb.gmra.mxu1 %v827_v19  ;;  %1024 = vmatmul.bf16.vlgmr.msrb.gmra.mxu2 %v826_v18 }
  0x85   :  { %1037 = vmatmul.bf16.vlgmr.msrb.gmra.mxu3 %v827_v19 }
  0xa0   :  { %v274_v20 = vpop.f32.mrf.mxu0 }
  0xa3   :  { %v287_v21 = vpop.f32.mrf.mxu1 }
  0xa4   :  { %v288_v22 = vadd.f32 %v287_v21, %v274_v20 }
  0xa7   :  { %v300_v23 = vpop.f32.mrf.mxu2 }
  0xa8   :  { %v276_v26 = vpop.f32.mrf.mxu0 }
  0xaa   :  { %v313_v24 = vpop.f32.mrf.mxu3 }
  0xab   :  { %v314_v25 = vadd.f32 %v313_v24, %v300_v23  ;;  %v289_v27 = vpop.f32.mrf.mxu1 }
  0xaf   :  { %v302_v28 = vpop.f32.mrf.mxu2 }
  0xb2   :  { %v315_v29 = vpop.f32.mrf.mxu3 }
  0xc0   :  { %v493_v30 = vpop.f32.mrf.mxu0 }
  0xc1   :  { %v494_v46 = vadd.f32 %v493_v30, %v288_v22 }
  0xc3   :  { %v506_v31 = vpop.f32.mrf.mxu1 }
  0xc4   :  { %v507_v49 = vadd.f32 %v506_v31, %v494_v46 }
  0xc7   :  { %v519_v32 = vpop.f32.mrf.mxu2 }
  0xc8   :  { %v495_v34 = vpop.f32.mrf.mxu0  ;;  %v520_v53 = vadd.f32 %v519_v32, %v314_v25 }
  0xca   :  { %v532_v33 = vpop.f32.mrf.mxu3 }
  0xcb   :  { %v508_v35 = vpop.f32.mrf.mxu1  ;;  %v533_v58 = vadd.f32 %v532_v33, %v520_v53 }
  0xcf   :  { %v521_v36 = vpop.f32.mrf.mxu2 }
  0xd2   :  { %v534_v37 = vpop.f32.mrf.mxu3 }
  0xe0   :  { %v745_v38 = vpop.f32.mrf.mxu0 }
  0xe1   :  { %v758_v39 = vpop.f32.mrf.mxu1 }
  0xe2   :  { %v759_v47 = vadd.f32 %v758_v39, %v745_v38 }
  0xe4   :  { %v788_v54 = vadd.f32 %v759_v47, %v507_v49 }
  0xe8   :  { %v747_v42 = vpop.f32.mrf.mxu0 }
  0xe9   :  { %v771_v40 = vpop.f32.mrf.mxu2  ;;  %v760_v43 = vpop.f32.mrf.mxu1 }
  0xea   :  { %v784_v41 = vpop.f32.mrf.mxu3 }
  0xeb   :  { %v785_v55 = vadd.f32 %v784_v41, %v771_v40 }
  0xed   :  { %v789_v62 = vadd.f32 %v785_v55, %v533_v58 }
  0xf1   :  { %v773_v44 = vpop.f32.mrf.mxu2 }
  0xf2   :  { %v786_v45 = vpop.f32.mrf.mxu3 }
 0x100   :  { %v999_v48 = vpop.f32.mrf.mxu0 }
 0x101   :  { %v1012_v50 = vpop.f32.mrf.mxu1 }
 0x102   :  { %v1013_v51 = vadd.f32 %v1012_v50, %v999_v48 }
 0x104   :  { %v1042_v56 = vadd.f32 %v1013_v51, %v788_v54 }
 0x106   :  { %v1050_v63 = vadd.f32 %v1046_v57, %v1042_v56 }
 0x107   :  { %v1025_v59 = vpop.f32.mrf.mxu2 }
 0x108   :  { %v1038_v60 = vpop.f32.mrf.mxu3  ;;  %v1001_v61 = vpop.f32.mrf.mxu0  ;;  %v1054_v4 = vmul.f32 0.1, %v1050_v63  ;;  %vm1052_vm0 = vcmp.gt.f32.partialorder %v1050_v63, 0.0 }
 0x109   :  { %v1039_v0 = vadd.f32 %v1038_v60, %v1025_v59  ;;  %v1014_v2 = vpop.f32.mrf.mxu1 }
 0x10a   :  { %v1056_v9 = vsel %vm1052_vm0, %v1050_v63, %v1054_v4 }
 0x10b   :  { %v1043_v3 = vadd.f32 %v1039_v0, %v789_v62 }
 0x10d   :  { %v1051_v5 = vadd.f32 %v1047_v1, %v1043_v3 }
 0x10f   :  { %vm1053_vm1 = vcmp.gt.f32.partialorder %v1051_v5, 0.0  ;;  %v1055_v6 = vmul.f32 0.1, %v1051_v5  ;;  %v1027_v7 = vpop.f32.mrf.mxu2 }
 0x110   :  { %v1040_v8 = vpop.f32.mrf.mxu3 }
 0x111   :  { %v1057_v10 = vsel %vm1053_vm1, %v1051_v5, %v1055_v6 }
 0x112   :  { %v1058_v11 = vpack.c.bf16 %v1057_v10, %v1056_v9 }
 0x114   :  { %1059 = vst [vmem:[%s2549_s9] sm:$0xff] %v1058_v11 }

// kernel: build_model_forward.24
= control target key start
LH: loop header
LB: loop body
LE: loop exit
PB: predicated region body
PF: predicated region fallthrough
CT: control target
= control target key end

     0   :  { %s305_s1 = inlined_call_operand.vmem [shape: bf16[128,128], index: 1, kind: input, shape index: {}]   ;;  %s306_s2 = inlined_call_operand.vmem [shape: f32[1,128], index: 2, kind: input, shape index: {}]   ;;  %s307_s0 = inlined_call_operand.vmem [shape: bf16[32,128], index: 0, kind: input, shape index: {}]   ;;  %s308_s3 = inlined_call_operand.vmem [shape: bf16[32,128], index: 3, kind: input, shape index: {}]   ;;  %s309_s4 = inlined_call_operand.vmem [shape: bf16[32,128], index: 4, kind: output, shape index: {}]  }
   0x1   :  { %v205_v0 = vld [vmem:[%s305_s1 + $0x38] sm:$0xff]  ;;  %v204_v1 = vld [vmem:[%s305_s1 + $0x30] sm:$0xff]  ;;  %v203_v2 = vld [vmem:[%s305_s1 + $0x28] sm:$0xff] }
   0x2   :  { %101 = vmatpush.bf16.msra.mxu0 %v205_v0  ;;  %226 = vmatpush.bf16.msra.mxu1 %v205_v0  ;;  %v202_v3 = vld [vmem:[%s305_s1 + $0x20] sm:$0xff]  ;;  %v201_v4 = vld [vmem:[%s305_s1 + $0x18] sm:$0xff]  ;;  %v200_v5 = vld [vmem:[%s305_s1 + $0x10] sm:$0xff] }
   0x3   :  { %v199_v6 = vld [vmem:[%s305_s1 + $0x8] sm:$0xff]  ;;  %v198_v7 = vld [vmem:[%s305_s1] sm:$0xff] }
   0x4   :  { %v196_v8 = vld [vmem:[%s307_s0] sm:$0xff]  ;;  %v197_v9 = vld [vmem:[%s307_s0 + $0x8] sm:$0xff] }
   0x5   :  { %v234_v10 = vld [vmem:[%s306_s2] ss:$0 sm:$0xff]  ;;  %v224_v14 = vld [vmem:[%s308_s3 + $0x8] sm:$0xff]  }
   0x6   :  { %102 = vmatpush.bf16.msra.mxu0 %v204_v1  ;;  %227 = vmatpush.bf16.msra.mxu1 %v204_v1  ;;  %v207_v12 = vld [vmem:[%s308_s3] sm:$0xff]   ;;  %v212_v18 = vunpack.c.l.bf16 %v224_v14  ;;  %v213_v22 = vunpack.c.h.bf16 %v224_v14 }
   0x7   :  { %v208_v16 = vunpack.c.l.bf16 %v207_v12  ;;  %v209_v21 = vunpack.c.h.bf16 %v207_v12 }
   0xa   :  { %103 = vmatpush.bf16.msra.mxu0 %v203_v2  ;;  %228 = vmatpush.bf16.msra.mxu1 %v203_v2 }
   0xe   :  { %104 = vmatpush.bf16.msra.mxu0 %v202_v3  ;;  %229 = vmatpush.bf16.msra.mxu1 %v202_v3 }
  0x12   :  { %105 = vmatpush.bf16.msra.mxu0 %v201_v4  ;;  %230 = vmatpush.bf16.msra.mxu1 %v201_v4 }
  0x16   :  { %106 = vmatpush.bf16.msra.mxu0 %v200_v5  ;;  %231 = vmatpush.bf16.msra.mxu1 %v200_v5 }
  0x1a   :  { %107 = vmatpush.bf16.msra.mxu0 %v199_v6  ;;  %232 = vmatpush.bf16.msra.mxu1 %v199_v6 }
  0x1e   :  { %108 = vmatpush.bf16.msra.mxu0 %v198_v7  ;;  %233 = vmatpush.bf16.msra.mxu1 %v198_v7 }
  0x21   :  { %109 = vmatmul.bf16.vlgmr.msra.gmra.mxu0 %v196_v8  ;;  %114 = vmatmul.bf16.vlgmr.msra.gmra.mxu1 %v197_v9 }
  0x9e   :  { %v110_v11 = vpop.f32.mrf.mxu0  ;;  %v115_v13 = vpop.f32.mrf.mxu1 }
  0x9f   :  { %v111_v15 = vadd.f32 %v234_v10, %v110_v11  ;;  %v116_v17 = vadd.f32 %v234_v10, %v115_v13 }
  0xa1   :  { %v128_v19 = vadd.f32 %v208_v16, %v111_v15  ;;  %v130_v20 = vadd.f32 %v212_v18, %v116_v17 }
  0xa3   :  { %v136_v27 = vmul.f32 0.1, %v128_v19  ;;  %v138_v28 = vmul.f32 0.1, %v130_v20  ;;  %vm132_vm0 = vcmp.gt.f32.partialorder %v128_v19, 0.0  ;;  %vm134_vm1 = vcmp.gt.f32.partialorder %v130_v20, 0.0 }
  0xa5   :  { %v140_v33 = vsel %vm132_vm0, %v128_v19, %v136_v27  ;;  %v142_v34 = vsel %vm134_vm1, %v130_v20, %v138_v28 }
  0xa6   :  { %v112_v23 = vpop.f32.mrf.mxu0  ;;  %v117_v24 = vpop.f32.mrf.mxu1 }
  0xa7   :  { %v113_v25 = vadd.f32 %v234_v10, %v112_v23  ;;  %v118_v26 = vadd.f32 %v234_v10, %v117_v24 }
  0xa9   :  { %v129_v29 = vadd.f32 %v209_v21, %v113_v25  ;;  %v131_v30 = vadd.f32 %v213_v22, %v118_v26 }
  0xab   :  { %vm133_vm2 = vcmp.gt.f32.partialorder %v129_v29, 0.0  ;;  %v137_v31 = vmul.f32 0.1, %v129_v29  ;;  %vm135_vm3 = vcmp.gt.f32.partialorder %v131_v30, 0.0  ;;  %v139_v32 = vmul.f32 0.1, %v131_v30 }
  0xad   :  { %v141_v35 = vsel %vm133_vm2, %v129_v29, %v137_v31  ;;  %v143_v36 = vsel %vm135_vm3, %v131_v30, %v139_v32 }
  0xae   :  { %v217_v37 = vpack.c.bf16 %v141_v35, %v140_v33  ;;  %v222_v38 = vpack.c.bf16 %v143_v36, %v142_v34 }
  0xb0   :  { %218 = vst [vmem:[%s309_s4] sm:$0xff] %v217_v37  }
  0xb1   :  { %225 = vst [vmem:[%s309_s4 + $0x8] sm:$0xff] %v222_v38  }

// kernel: build_model_forward.25
= control target key start
LH: loop header
LB: loop body
LE: loop exit
PB: predicated region body
PF: predicated region fallthrough
CT: control target
= control target key end

     0   :  { %vm167_vm2 = vcmask 523264   ;;  %vm197_vm5 = vcmask 519168   ;;  %s369_s1 = inlined_call_operand.vmem [shape: bf16[128,64], index: 1, kind: input, shape index: {}]   ;;  %s370_s2 = inlined_call_operand.vmem [shape: f32[1,64], index: 2, kind: input, shape index: {}]   ;;  %s371_s0 = inlined_call_operand.vmem [shape: bf16[32,128], index: 0, kind: input, shape index: {}]   ;;  %s372_s3 = inlined_call_operand.vmem [shape: bf16[64,64], index: 3, kind: input, shape index: {}]   ;;  %s373_s4 = inlined_call_operand.vmem [shape: bf16[32,64], index: 4, kind: output, shape index: {}]  }
   0x1   :  { %v273_v0 = vld [vmem:[%s369_s1 + $0x38] sm:$0xff]  ;;  %v272_v1 = vld [vmem:[%s369_s1 + $0x30] sm:$0xff]  ;;  %v271_v2 = vld [vmem:[%s369_s1 + $0x28] sm:$0xff] }
   0x2   :  { %102 = vmatpush.bf16.msra.mxu0 %v273_v0  ;;  %278 = vmatpush.bf16.msra.mxu2 %v273_v0  ;;  %v270_v3 = vld [vmem:[%s369_s1 + $0x20] sm:$0xff]  ;;  %v269_v4 = vld [vmem:[%s369_s1 + $0x18] sm:$0xff]  ;;  %v268_v5 = vld [vmem:[%s369_s1 + $0x10] sm:$0xff] }
   0x3   :  { %v267_v6 = vld [vmem:[%s369_s1 + $0x8] sm:$0xff]  ;;  %v266_v7 = vld [vmem:[%s369_s1] sm:$0xff]  ;;  %v277_v10 = vld [vmem:[%s372_s3 + $0x18] sm:$0xff] }
   0x4   :  { %v264_v8 = vld [vmem:[%s371_s0] sm:$0xff]  ;;  %v265_v9 = vld [vmem:[%s371_s0 + $0x8] sm:$0xff]  ;;  %178 = vmatpush.bf16.msra.mxu1 %v277_v10  ;;  %v276_v11 = vld [vmem:[%s372_s3 + $0x10] sm:$0xff] }
   0x5   :  { %v275_v12 = vld [vmem:[%s372_s3 + $0x8] sm:$0xff]  ;;  %v274_v13 = vld [vmem:[%s372_s3] sm:$0xff] }
   0x6   :  { %103 = vmatpush.bf16.msra.mxu0 %v272_v1  ;;  %279 = vmatpush.bf16.msra.mxu2 %v272_v1  ;;  %v286_v15 = vld [vmem:[%s370_s2] ss:$0 sm:$0xff] }
   0x8   :  { %179 = vmatpush.bf16.msra.mxu1 %v276_v11 }
   0xa   :  { %104 = vmatpush.bf16.msra.mxu0 %v271_v2  ;;  %280 = vmatpush.bf16.msra.mxu2 %v271_v2 }
   0xc   :  { %180 = vmatpush.bf16.msra.mxu1 %v275_v12 }
   0xe   :  { %105 = vmatpush.bf16.msra.mxu0 %v270_v3  ;;  %281 = vmatpush.bf16.msra.mxu2 %v270_v3 }
  0x10   :  { %181 = vmatpush.bf16.msra.mxu1 %v274_v13 }
  0x12   :  { %106 = vmatpush.bf16.msra.mxu0 %v269_v4  ;;  %282 = vmatpush.bf16.msra.mxu2 %v269_v4 }
  0x16   :  { %107 = vmatpush.bf16.msra.mxu0 %v268_v5  ;;  %283 = vmatpush.bf16.msra.mxu2 %v268_v5 }
  0x1a   :  { %108 = vmatpush.bf16.msra.mxu0 %v267_v6  ;;  %284 = vmatpush.bf16.msra.mxu2 %v267_v6 }
  0x1e   :  { %109 = vmatpush.bf16.msra.mxu0 %v266_v7  ;;  %285 = vmatpush.bf16.msra.mxu2 %v266_v7 }
  0x21   :  { %110 = vmatmul.bf16.vlgmr.msra.gmra.mxu0 %v264_v8  ;;  %115 = vmatmul.bf16.vlgmr.msra.gmra.mxu2 %v265_v9 }
  0x9e   :  { %v111_v14 = vpop.f32.mrf.mxu0 }
  0x9f   :  { %v112_v16 = vadd.f32 %v286_v15, %v111_v14 }
  0xa1   :  { %v125_v19 = vmul.f32 0.1, %v112_v16  ;;  %vm121_vm0 = vcmp.gt.f32.partialorder %v112_v16, 0.0 }
  0xa3   :  { %v129_v22 = vsel %vm121_vm0, %v112_v16, %v125_v19 }
  0xa4   :  { %v116_v17 = vpop.f32.mrf.mxu2 }
  0xa5   :  { %v117_v26 = vadd.f32 %v286_v15, %v116_v17 }
  0xa6   :  { %v113_v18 = vpop.f32.mrf.mxu0 }
  0xa7   :  { %v114_v20 = vadd.f32 %v286_v15, %v113_v18  ;;  %v127_v28 = vmul.f32 0.1, %v117_v26  ;;  %vm123_vm3 = vcmp.gt.f32.partialorder %v117_v26, 0.0 }
  0xa9   :  { %vm122_vm1 = vcmp.gt.f32.partialorder %v114_v20, 0.0  ;;  %v126_v21 = vmul.f32 0.1, %v114_v20  ;;  %v131_v30 = vsel %vm123_vm3, %v117_v26, %v127_v28 }
  0xab   :  { %v130_v23 = vsel %vm122_vm1, %v114_v20, %v126_v21 }
  0xac   :  { %v133_v24 = vpack.c.bf16 %v130_v23, %v129_v22  ;;  %v118_v25 = vpop.f32.mrf.mxu2 }
  0xad   :  { %v119_v27 = vadd.f32 %v286_v15, %v118_v25 }
  0xae   :  { %262 = vmatmul.msk.bf16.vlgmr.msra.gmra.mxu1 %vm167_vm2, %v133_v24 }
  0xaf   :  { %v128_v29 = vmul.f32 0.1, %v119_v27  ;;  %vm124_vm4 = vcmp.gt.f32.partialorder %v119_v27, 0.0 }
  0xb1   :  { %v132_v31 = vsel %vm124_vm4, %v119_v27, %v128_v29 }
  0xb2   :  { %v134_v32 = vpack.c.bf16 %v132_v31, %v131_v30 }
  0xbe   :  { %263 = vmatmul.msk.bf16.gmra.mxu1 %vm167_vm2, %v134_v32 }
 0x12b   :  { %v183_v33 = vpop.f32.mrf.mxu1 }
 0x12c   :  { %v193_v34 = vpack.c.bf16 %v183_v33, %v183_v33 }
 0x12e   :  { %198 = vst.msk [vmem:[%s373_s4] sm:$0xf] %vm197_vm5, %v193_v34 }
 0x133   :  { %v185_v35 = vpop.f32.mrf.mxu1 }
 0x134   :  { %v194_v36 = vpack.c.bf16 %v185_v35, %v185_v35 }
 0x136   :  { %199 = vst.msk [vmem:[%s373_s4 + $0x4] sm:$0xf] %vm197_vm5, %v194_v36 }
 0x13b   :  { %v188_v37 = vpop.f32.mrf.mxu1 }
 0x13c   :  { %v195_v38 = vpack.c.bf16 %v188_v37, %v188_v37 }
 0x13e   :  { %200 = vst.msk [vmem:[%s373_s4 + $0x8] sm:$0xf] %vm197_vm5, %v195_v38 }
 0x143   :  { %v190_v39 = vpop.f32.mrf.mxu1 }
 0x144   :  { %v196_v40 = vpack.c.bf16 %v190_v39, %v190_v39 }
 0x146   :  { %201 = vst.msk [vmem:[%s373_s4 + $0xc] sm:$0xf] %vm197_vm5, %v196_v40 }

// kernel: build_model_forward.26
= control target key start
LH: loop header
LB: loop body
LE: loop exit
PB: predicated region body
PF: predicated region fallthrough
CT: control target
= control target key end

     0   :  { %9 = vsyncpa [#allocation3], 0  ;;  %s479_s18 = smov [#allocation2]   ;;  %s682_s0 = inlined_call_operand.vmem [shape: bf16[128,64], index: 0, kind: input, shape index: {}]   ;;  %s683_s1 = inlined_call_operand.vmem [shape: bf16[64,64], index: 1, kind: input, shape index: {}]   ;;  %s684_s2 = inlined_call_operand.hbm [shape: f32[1,64], index: 2, kind: input, shape index: {}]   ;;  %s685_s3 = inlined_call_operand.vmem [shape: bf16[128,64], index: 3, kind: input, shape index: {}]   ;;  %s686_s4 = inlined_call_operand.vmem [shape: bf16[128,64], index: 4, kind: output, shape index: {}]  }
   0x1   :  { %s19_s17 = sshll.u32 %s684_s2, 4  ;;  %s21_s19 = sshll.u32 %s479_s18, 4  ;;  %s20_s17 = int_to_ptr.hbm [resolvable:$true] %s19_s17  ;;  %s22_s19 = int_to_ptr.vmem [resolvable:$true] %s21_s19 }
   0x2   :  { %24 = dma.hbm_to_vmem [thread:$0]  %s20_s17, 16, %s22_s19, [#allocation3]  }
   0x3   :  { %477 = dma.done.wait [#allocation3], 16  }
   0x4   :  { %478 = vsyncadd [#allocation3], 4294967280  ;;  %v399_v0 = vld [vmem:[%s683_s1 + $0x18] sm:$0xff]  ;;  %v398_v1 = vld [vmem:[%s683_s1 + $0x10] sm:$0xff]  ;;  %vm124_vm0 = vcmask 523264   ;;  %vm310_vm3 = vcmask 519168  }
   0x5   :  { %153 = vmatpush.bf16.msra.mxu0 %v399_v0  ;;  %439 = vmatpush.bf16.msra.mxu1 %v399_v0  ;;  %v397_v2 = vld [vmem:[%s683_s1 + $0x8] sm:$0xff]  ;;  %v396_v3 = vld [vmem:[%s683_s1] sm:$0xff]  ;;  %v390_v5 = vld [vmem:[%s682_s0 + $0x10] sm:$0xff] }
   0x6   :  { %440 = vmatpush.bf16.msra.mxu2 %v399_v0  ;;  %441 = vmatpush.bf16.msra.mxu3 %v399_v0  ;;  %v388_v4 = vld [vmem:[%s682_s0] sm:$0xff]  ;;  %v394_v7 = vld [vmem:[%s682_s0 + $0x30] sm:$0xff]  ;;  %v389_v8 = vld [vmem:[%s682_s0 + $0x8] sm:$0xff] }
   0x7   :  { %v392_v6 = vld [vmem:[%s682_s0 + $0x20] sm:$0xff]  ;;  %v391_v9 = vld [vmem:[%s682_s0 + $0x18] sm:$0xff]  ;;  %v393_v10 = vld [vmem:[%s682_s0 + $0x28] sm:$0xff] }
   0x8   :  { %v395_v11 = vld [vmem:[%s682_s0 + $0x38] sm:$0xff]  ;;  %v401_v12 = vld [vmem:[%s685_s3] sm:$0xff]   ;;  %v433_v13 = vld [vmem:[%s685_s3 + $0x10] sm:$0xff]  }
   0x9   :  { %154 = vmatpush.bf16.msra.mxu0 %v398_v1  ;;  %442 = vmatpush.bf16.msra.mxu1 %v398_v1  ;;  %v558_v14 = vld [vmem:[#allocation2] ss:$0 sm:$0xff]  ;;  %v402_v15 = vunpack.c.l.bf16 %v401_v12  ;;  %v410_v16 = vunpack.c.l.bf16 %v433_v13  ;;  %v570_v24 = vld [vmem:[%s685_s3 + $0x30] sm:$0xff]   ;;  %v403_v33 = vunpack.c.h.bf16 %v401_v12  ;;  %v411_v34 = vunpack.c.h.bf16 %v433_v13  ;;  %v591_v49 = vld [vmem:[%s685_s3 + $0x8] sm:$0xff]  }
   0xa   :  { %443 = vmatpush.bf16.msra.mxu2 %v398_v1  ;;  %444 = vmatpush.bf16.msra.mxu3 %v398_v1  ;;  %v565_v23 = vld [vmem:[%s685_s3 + $0x20] sm:$0xff]   ;;  %v426_v28 = vunpack.c.l.bf16 %v570_v24  ;;  %v427_v48 = vunpack.c.h.bf16 %v570_v24  ;;  %v596_v50 = vld [vmem:[%s685_s3 + $0x18] sm:$0xff]   ;;  %v406_v57 = vunpack.c.l.bf16 %v591_v49 }
   0xb   :  { %v418_v27 = vunpack.c.l.bf16 %v565_v23  ;;  %v419_v47 = vunpack.c.h.bf16 %v565_v23  ;;  %v414_v58 = vunpack.c.l.bf16 %v596_v50  ;;  %v407_v23 = vunpack.c.h.bf16 %v591_v49 }
   0xd   :  { %155 = vmatpush.bf16.msra.mxu0 %v397_v2  ;;  %445 = vmatpush.bf16.msra.mxu1 %v397_v2 }
   0xe   :  { %446 = vmatpush.bf16.msra.mxu2 %v397_v2  ;;  %447 = vmatpush.bf16.msra.mxu3 %v397_v2 }
  0x11   :  { %156 = vmatpush.bf16.msra.mxu0 %v396_v3  ;;  %448 = vmatpush.bf16.msra.mxu1 %v396_v3 }
  0x12   :  { %449 = vmatpush.bf16.msra.mxu2 %v396_v3  ;;  %450 = vmatpush.bf16.msra.mxu3 %v396_v3 }
  0x14   :  { %380 = vmatmul.msk.bf16.vlgmr.msra.gmra.mxu0 %vm124_vm0, %v388_v4  ;;  %382 = vmatmul.msk.bf16.vlgmr.msra.gmra.mxu1 %vm124_vm0, %v390_v5 }
  0x15   :  { %384 = vmatmul.msk.bf16.vlgmr.msra.gmra.mxu2 %vm124_vm0, %v392_v6  ;;  %386 = vmatmul.msk.bf16.vlgmr.msra.gmra.mxu3 %vm124_vm0, %v394_v7 }
  0x24   :  { %381 = vmatmul.msk.bf16.gmra.mxu0 %vm124_vm0, %v389_v8  ;;  %383 = vmatmul.msk.bf16.gmra.mxu1 %vm124_vm0, %v391_v9  ;;  %v611_v9 = vld [vmem:[%s685_s3 + $0x28] sm:$0xff]  }
  0x25   :  { %385 = vmatmul.msk.bf16.gmra.mxu2 %vm124_vm0, %v393_v10  ;;  %387 = vmatmul.msk.bf16.gmra.mxu3 %vm124_vm0, %v395_v11  ;;  %v423_v49 = vunpack.c.h.bf16 %v611_v9 }
  0x91   :  { %v158_v17 = vpop.f32.mrf.mxu0  ;;  %v168_v18 = vpop.f32.mrf.mxu1 }
  0x92   :  { %v159_v19 = vadd.f32 %v558_v14, %v158_v17  ;;  %v169_v20 = vadd.f32 %v558_v14, %v168_v18  ;;  %v422_v17 = vunpack.c.l.bf16 %v611_v9 }
  0x94   :  { %v230_v21 = vadd.f32 %v402_v15, %v159_v19  ;;  %v234_v22 = vadd.f32 %v410_v16, %v169_v20  ;;  %v624_v15 = vld [vmem:[%s685_s3 + $0x38] sm:$0xff]  }
  0x96   :  { %vm246_vm1 = vcmp.gt.f32.partialorder %v230_v21, 0.0  ;;  %v262_v25 = vmul.f32 0.1, %v230_v21  ;;  %vm250_vm2 = vcmp.gt.f32.partialorder %v234_v22, 0.0  ;;  %v266_v26 = vmul.f32 0.1, %v234_v22 }
  0x98   :  { %v278_v29 = vsel %vm246_vm1, %v230_v21, %v262_v25  ;;  %v282_v30 = vsel %vm250_vm2, %v234_v22, %v266_v26  ;;  %v178_v31 = vpop.f32.mrf.mxu2  ;;  %v188_v32 = vpop.f32.mrf.mxu3  ;;  %v430_v22 = vunpack.c.l.bf16 %v624_v15 }
  0x99   :  { %v294_v35 = vpack.c.bf16 %v278_v29, %v278_v29  ;;  %v298_v36 = vpack.c.bf16 %v282_v30, %v282_v30  ;;  %v179_v37 = vadd.f32 %v558_v14, %v178_v31  ;;  %v189_v38 = vadd.f32 %v558_v14, %v188_v32  ;;  %v160_v39 = vpop.f32.mrf.mxu0  ;;  %v170_v40 = vpop.f32.mrf.mxu1 }
  0x9a   :  { %v161_v41 = vadd.f32 %v558_v14, %v160_v39  ;;  %v171_v42 = vadd.f32 %v558_v14, %v170_v40  ;;  %v415_v29 = vunpack.c.h.bf16 %v596_v50 }
  0x9b   :  { %311 = vst.msk [vmem:[%s686_s4] sm:$0xf] %vm310_vm3, %v294_v35  ;;  %v238_v43 = vadd.f32 %v418_v27, %v179_v37  ;;  %v242_v44 = vadd.f32 %v426_v28, %v189_v38 }
  0x9c   :  { %315 = vst.msk [vmem:[%s686_s4 + $0x10] sm:$0xf] %vm310_vm3, %v298_v36  ;;  %v231_v45 = vadd.f32 %v403_v33, %v161_v41  ;;  %v235_v46 = vadd.f32 %v411_v34, %v171_v42 }
  0x9d   :  { %vm254_vm4 = vcmp.gt.f32.partialorder %v238_v43, 0.0  ;;  %v270_v51 = vmul.f32 0.1, %v238_v43  ;;  %vm258_vm5 = vcmp.gt.f32.partialorder %v242_v44, 0.0  ;;  %v274_v52 = vmul.f32 0.1, %v242_v44 }
  0x9e   :  { %vm247_vm6 = vcmp.gt.f32.partialorder %v231_v45, 0.0  ;;  %v263_v53 = vmul.f32 0.1, %v231_v45  ;;  %vm251_vm7 = vcmp.gt.f32.partialorder %v235_v46, 0.0  ;;  %v267_v54 = vmul.f32 0.1, %v235_v46 }
  0x9f   :  { %v286_v55 = vsel %vm254_vm4, %v238_v43, %v270_v51  ;;  %v290_v56 = vsel %vm258_vm5, %v242_v44, %v274_v52 }
  0xa0   :  { %v302_v59 = vpack.c.bf16 %v286_v55, %v286_v55  ;;  %v306_v60 = vpack.c.bf16 %v290_v56, %v290_v56  ;;  %v279_v61 = vsel %vm247_vm6, %v231_v45, %v263_v53  ;;  %v283_v62 = vsel %vm251_vm7, %v235_v46, %v267_v54  ;;  %v180_v63 = vpop.f32.mrf.mxu2  ;;  %v190_v0 = vpop.f32.mrf.mxu3 }
  0xa1   :  { %v295_v1 = vpack.c.bf16 %v279_v61, %v279_v61  ;;  %v299_v2 = vpack.c.bf16 %v283_v62, %v283_v62  ;;  %v181_v3 = vadd.f32 %v558_v14, %v180_v63  ;;  %v191_v4 = vadd.f32 %v558_v14, %v190_v0  ;;  %v163_v5 = vpop.f32.mrf.mxu0  ;;  %v173_v6 = vpop.f32.mrf.mxu1 }
  0xa2   :  { %319 = vst.msk [vmem:[%s686_s4 + $0x20] sm:$0xf] %vm310_vm3, %v302_v59  ;;  %v164_v7 = vadd.f32 %v558_v14, %v163_v5  ;;  %v174_v8 = vadd.f32 %v558_v14, %v173_v6  ;;  %v431_v55 = vunpack.c.h.bf16 %v624_v15 }
  0xa3   :  { %323 = vst.msk [vmem:[%s686_s4 + $0x30] sm:$0xf] %vm310_vm3, %v306_v60  ;;  %v239_v10 = vadd.f32 %v419_v47, %v181_v3  ;;  %v243_v11 = vadd.f32 %v427_v48, %v191_v4 }
  0xa4   :  { %312 = vst.msk [vmem:[%s686_s4 + $0x4] sm:$0xf] %vm310_vm3, %v295_v1  ;;  %v232_v12 = vadd.f32 %v406_v57, %v164_v7  ;;  %v236_v13 = vadd.f32 %v414_v58, %v174_v8 }
  0xa5   :  { %316 = vst.msk [vmem:[%s686_s4 + $0x14] sm:$0xf] %vm310_vm3, %v299_v2  ;;  %vm255_vm8 = vcmp.gt.f32.partialorder %v239_v10, 0.0  ;;  %v271_v16 = vmul.f32 0.1, %v239_v10  ;;  %vm259_vm9 = vcmp.gt.f32.partialorder %v243_v11, 0.0 }
  0xa6   :  { %v275_v18 = vmul.f32 0.1, %v243_v11  ;;  %vm248_vm10 = vcmp.gt.f32.partialorder %v232_v12, 0.0  ;;  %v264_v19 = vmul.f32 0.1, %v232_v12  ;;  %vm252_vm11 = vcmp.gt.f32.partialorder %v236_v13, 0.0 }
  0xa7   :  { %v287_v20 = vsel %vm255_vm8, %v239_v10, %v271_v16  ;;  %v268_v21 = vmul.f32 0.1, %v236_v13 }
  0xa8   :  { %v303_v24 = vpack.c.bf16 %v287_v20, %v287_v20  ;;  %v291_v25 = vsel %vm259_vm9, %v243_v11, %v275_v18  ;;  %v280_v26 = vsel %vm248_vm10, %v232_v12, %v264_v19  ;;  %v183_v27 = vpop.f32.mrf.mxu2  ;;  %v193_v28 = vpop.f32.mrf.mxu3 }
  0xa9   :  { %v307_v30 = vpack.c.bf16 %v291_v25, %v291_v25  ;;  %v296_v31 = vpack.c.bf16 %v280_v26, %v280_v26  ;;  %v284_v32 = vsel %vm252_vm11, %v236_v13, %v268_v21  ;;  %v184_v33 = vadd.f32 %v558_v14, %v183_v27  ;;  %v165_v34 = vpop.f32.mrf.mxu0  ;;  %v175_v35 = vpop.f32.mrf.mxu1 }
  0xaa   :  { %320 = vst.msk [vmem:[%s686_s4 + $0x24] sm:$0xf] %vm310_vm3, %v303_v24  ;;  %v300_v36 = vpack.c.bf16 %v284_v32, %v284_v32  ;;  %v194_v37 = vadd.f32 %v558_v14, %v193_v28  ;;  %v166_v38 = vadd.f32 %v558_v14, %v165_v34  ;;  %v176_v39 = vadd.f32 %v558_v14, %v175_v35 }
  0xab   :  { %324 = vst.msk [vmem:[%s686_s4 + $0x34] sm:$0xf] %vm310_vm3, %v307_v30  ;;  %v240_v40 = vadd.f32 %v422_v17, %v184_v33 }
  0xac   :  { %313 = vst.msk [vmem:[%s686_s4 + $0x8] sm:$0xf] %vm310_vm3, %v296_v31  ;;  %v244_v41 = vadd.f32 %v430_v22, %v194_v37  ;;  %v233_v42 = vadd.f32 %v407_v23, %v166_v38  ;;  %v237_v43 = vadd.f32 %v415_v29, %v176_v39 }
  0xad   :  { %317 = vst.msk [vmem:[%s686_s4 + $0x18] sm:$0xf] %vm310_vm3, %v300_v36  ;;  %vm256_vm12 = vcmp.gt.f32.partialorder %v240_v40, 0.0  ;;  %v272_v44 = vmul.f32 0.1, %v240_v40 }
  0xae   :  { %vm260_vm13 = vcmp.gt.f32.partialorder %v244_v41, 0.0  ;;  %v276_v45 = vmul.f32 0.1, %v244_v41  ;;  %vm249_vm14 = vcmp.gt.f32.partialorder %v233_v42, 0.0  ;;  %v265_v46 = vmul.f32 0.1, %v233_v42 }
  0xaf   :  { %v288_v47 = vsel %vm256_vm12, %v240_v40, %v272_v44  ;;  %vm253_vm15 = vcmp.gt.f32.partialorder %v237_v43, 0.0  ;;  %v269_v48 = vmul.f32 0.1, %v237_v43 }
  0xb0   :  { %v304_v50 = vpack.c.bf16 %v288_v47, %v288_v47  ;;  %v292_v51 = vsel %vm260_vm13, %v244_v41, %v276_v45  ;;  %v281_v52 = vsel %vm249_vm14, %v233_v42, %v265_v46  ;;  %v185_v53 = vpop.f32.mrf.mxu2  ;;  %v195_v54 = vpop.f32.mrf.mxu3 }
  0xb1   :  { %v308_v56 = vpack.c.bf16 %v292_v51, %v292_v51  ;;  %v297_v57 = vpack.c.bf16 %v281_v52, %v281_v52  ;;  %v285_v58 = vsel %vm253_vm15, %v237_v43, %v269_v48  ;;  %v186_v59 = vadd.f32 %v558_v14, %v185_v53 }
  0xb2   :  { %321 = vst.msk [vmem:[%s686_s4 + $0x28] sm:$0xf] %vm310_vm3, %v304_v50  ;;  %v301_v60 = vpack.c.bf16 %v285_v58, %v285_v58  ;;  %v196_v61 = vadd.f32 %v558_v14, %v195_v54 }
  0xb3   :  { %325 = vst.msk [vmem:[%s686_s4 + $0x38] sm:$0xf] %vm310_vm3, %v308_v56  ;;  %v241_v62 = vadd.f32 %v423_v49, %v186_v59 }
  0xb4   :  { %314 = vst.msk [vmem:[%s686_s4 + $0xc] sm:$0xf] %vm310_vm3, %v297_v57  ;;  %v245_v63 = vadd.f32 %v431_v55, %v196_v61 }
  0xb5   :  { %318 = vst.msk [vmem:[%s686_s4 + $0x1c] sm:$0xf] %vm310_vm3, %v301_v60  ;;  %vm257_vm0 = vcmp.gt.f32.partialorder %v241_v62, 0.0  ;;  %v273_v0 = vmul.f32 0.1, %v241_v62 }
  0xb6   :  { %vm261_vm1 = vcmp.gt.f32.partialorder %v245_v63, 0.0  ;;  %v277_v14 = vmul.f32 0.1, %v245_v63 }
  0xb7   :  { %v289_v1 = vsel %vm257_vm0, %v241_v62, %v273_v0 }
  0xb8   :  { %v305_v2 = vpack.c.bf16 %v289_v1, %v289_v1  ;;  %v293_v3 = vsel %vm261_vm1, %v245_v63, %v277_v14 }
  0xb9   :  { %v309_v4 = vpack.c.bf16 %v293_v3, %v293_v3 }
  0xba   :  { %322 = vst.msk [vmem:[%s686_s4 + $0x2c] sm:$0xf] %vm310_vm3, %v305_v2 }
  0xbb   :  { %326 = vst.msk [vmem:[%s686_s4 + $0x3c] sm:$0xf] %vm310_vm3, %v309_v4 }
  0xbc   :  { %331 = vsyncpa [#allocation3], 1 }

// kernel: build_model_forward.28
= control target key start
LH: loop header
LB: loop body
LE: loop exit
PB: predicated region body
PF: predicated region fallthrough
CT: control target
= control target key end

     0   :  { %10 = vsyncpa [#allocation3], 0  ;;  %s420_s21 = smov [#allocation2]   ;;  %s520_s0 = inlined_call_operand.vmem [shape: bf16[32,128], index: 0, kind: input, shape index: {}]   ;;  %s521_s1 = inlined_call_operand.vmem [shape: bf16[32,128], index: 1, kind: input, shape index: {}]   ;;  %s522_s2 = inlined_call_operand.vmem [shape: bf16[128,128], index: 2, kind: input, shape index: {}]   ;;  %s523_s3 = inlined_call_operand.vmem [shape: bf16[128,128], index: 3, kind: input, shape index: {}]   ;;  %s524_s4 = inlined_call_operand.hbm [shape: f32[1,128], index: 4, kind: input, shape index: {}]   ;;  %s525_s5 = inlined_call_operand.vmem [shape: bf16[32,128], index: 5, kind: output, shape index: {}]  }
   0x1   :  { %s24_s20 = sshll.u32 %s524_s4, 4  ;;  %s26_s22 = sshll.u32 %s420_s21, 4  ;;  %s25_s20 = int_to_ptr.hbm [resolvable:$true] %s24_s20  ;;  %s27_s22 = int_to_ptr.vmem [resolvable:$true] %s26_s22 }
   0x2   :  { %29 = dma.hbm_to_vmem [thread:$0]  %s25_s20, 16, %s27_s22, [#allocation3]  }
   0x3   :  { %418 = dma.done.wait [#allocation3], 16  }
   0x4   :  { %419 = vsyncadd [#allocation3], 4294967280  ;;  %v364_v0 = vld [vmem:[%s523_s3 + $0x38] sm:$0xff]  ;;  %v363_v2 = vld [vmem:[%s523_s3 + $0x30] sm:$0xff] }
   0x5   :  { %v354_v1 = vld [vmem:[%s522_s2 + $0x38] sm:$0xff]  ;;  %134 = vmatpush.bf16.msra.mxu0 %v364_v0  ;;  %376 = vmatpush.bf16.msra.mxu2 %v364_v0  ;;  %v353_v3 = vld [vmem:[%s522_s2 + $0x30] sm:$0xff]  ;;  %v362_v4 = vld [vmem:[%s523_s3 + $0x28] sm:$0xff] }
   0x6   :  { %213 = vmatpush.bf16.msra.mxu1 %v354_v1  ;;  %384 = vmatpush.bf16.msra.mxu3 %v354_v1  ;;  %v352_v5 = vld [vmem:[%s522_s2 + $0x28] sm:$0xff]  ;;  %v361_v6 = vld [vmem:[%s523_s3 + $0x20] sm:$0xff]  ;;  %v360_v8 = vld [vmem:[%s523_s3 + $0x18] sm:$0xff] }
   0x7   :  { %v351_v7 = vld [vmem:[%s522_s2 + $0x20] sm:$0xff]  ;;  %v350_v9 = vld [vmem:[%s522_s2 + $0x18] sm:$0xff]  ;;  %v359_v10 = vld [vmem:[%s523_s3 + $0x10] sm:$0xff] }
   0x8   :  { %v349_v11 = vld [vmem:[%s522_s2 + $0x10] sm:$0xff]  ;;  %v358_v12 = vld [vmem:[%s523_s3 + $0x8] sm:$0xff]  ;;  %v357_v14 = vld [vmem:[%s523_s3] sm:$0xff] }
   0x9   :  { %135 = vmatpush.bf16.msra.mxu0 %v363_v2  ;;  %377 = vmatpush.bf16.msra.mxu2 %v363_v2  ;;  %v348_v13 = vld [vmem:[%s522_s2 + $0x8] sm:$0xff]  ;;  %v347_v15 = vld [vmem:[%s522_s2] sm:$0xff] }
   0xa   :  { %214 = vmatpush.bf16.msra.mxu1 %v353_v3  ;;  %385 = vmatpush.bf16.msra.mxu3 %v353_v3  ;;  %v355_v16 = vld [vmem:[%s521_s1] sm:$0xff]  ;;  %v356_v17 = vld [vmem:[%s521_s1 + $0x8] sm:$0xff] }
   0xb   :  { %v345_v18 = vld [vmem:[%s520_s0] sm:$0xff]  ;;  %v346_v19 = vld [vmem:[%s520_s0 + $0x8] sm:$0xff] }
   0xc   :  { %v393_v23 = vld [vmem:[#allocation2] ss:$0 sm:$0xff] }
   0xd   :  { %136 = vmatpush.bf16.msra.mxu0 %v362_v4  ;;  %378 = vmatpush.bf16.msra.mxu2 %v362_v4 }
   0xe   :  { %215 = vmatpush.bf16.msra.mxu1 %v352_v5  ;;  %386 = vmatpush.bf16.msra.mxu3 %v352_v5 }
  0x11   :  { %137 = vmatpush.bf16.msra.mxu0 %v361_v6  ;;  %379 = vmatpush.bf16.msra.mxu2 %v361_v6 }
  0x12   :  { %216 = vmatpush.bf16.msra.mxu1 %v351_v7  ;;  %387 = vmatpush.bf16.msra.mxu3 %v351_v7 }
  0x15   :  { %138 = vmatpush.bf16.msra.mxu0 %v360_v8  ;;  %380 = vmatpush.bf16.msra.mxu2 %v360_v8 }
  0x16   :  { %217 = vmatpush.bf16.msra.mxu1 %v350_v9  ;;  %388 = vmatpush.bf16.msra.mxu3 %v350_v9 }
  0x19   :  { %139 = vmatpush.bf16.msra.mxu0 %v359_v10  ;;  %381 = vmatpush.bf16.msra.mxu2 %v359_v10 }
  0x1a   :  { %218 = vmatpush.bf16.msra.mxu1 %v349_v11  ;;  %389 = vmatpush.bf16.msra.mxu3 %v349_v11 }
  0x1d   :  { %140 = vmatpush.bf16.msra.mxu0 %v358_v12  ;;  %382 = vmatpush.bf16.msra.mxu2 %v358_v12 }
  0x1e   :  { %219 = vmatpush.bf16.msra.mxu1 %v348_v13  ;;  %390 = vmatpush.bf16.msra.mxu3 %v348_v13 }
  0x21   :  { %141 = vmatpush.bf16.msra.mxu0 %v357_v14  ;;  %383 = vmatpush.bf16.msra.mxu2 %v357_v14 }
  0x22   :  { %220 = vmatpush.bf16.msra.mxu1 %v347_v15  ;;  %391 = vmatpush.bf16.msra.mxu3 %v347_v15 }
  0x24   :  { %142 = vmatmul.bf16.vlgmr.msra.gmra.mxu0 %v355_v16  ;;  %147 = vmatmul.bf16.vlgmr.msra.gmra.mxu2 %v356_v17 }
  0x25   :  { %221 = vmatmul.bf16.vlgmr.msra.gmra.mxu1 %v345_v18  ;;  %226 = vmatmul.bf16.vlgmr.msra.gmra.mxu3 %v346_v19 }
  0xa1   :  { %v143_v20 = vpop.f32.mrf.mxu0 }
  0xa2   :  { %v222_v21 = vpop.f32.mrf.mxu1 }
  0xa3   :  { %v223_v22 = vadd.f32 %v222_v21, %v143_v20 }
  0xa5   :  { %v236_v26 = vadd.f32 %v393_v23, %v223_v22 }
  0xa7   :  { %v148_v24 = vpop.f32.mrf.mxu2  ;;  %v244_v31 = vmul.f32 0.1, %v236_v26  ;;  %vm240_vm0 = vcmp.gt.f32.partialorder %v236_v26, 0.0 }
  0xa8   :  { %v227_v25 = vpop.f32.mrf.mxu3 }
  0xa9   :  { %v145_v27 = vpop.f32.mrf.mxu0  ;;  %v228_v29 = vadd.f32 %v227_v25, %v148_v24  ;;  %v248_v37 = vsel %vm240_vm0, %v236_v26, %v244_v31 }
  0xaa   :  { %v224_v28 = vpop.f32.mrf.mxu1 }
  0xab   :  { %v225_v30 = vadd.f32 %v224_v28, %v145_v27  ;;  %v238_v33 = vadd.f32 %v393_v23, %v228_v29 }
  0xad   :  { %v237_v32 = vadd.f32 %v393_v23, %v225_v30  ;;  %v246_v41 = vmul.f32 0.1, %v238_v33  ;;  %vm242_vm2 = vcmp.gt.f32.partialorder %v238_v33, 0.0 }
  0xaf   :  { %vm241_vm1 = vcmp.gt.f32.partialorder %v237_v32, 0.0  ;;  %v245_v34 = vmul.f32 0.1, %v237_v32  ;;  %v150_v35 = vpop.f32.mrf.mxu2  ;;  %v250_v44 = vsel %vm242_vm2, %v238_v33, %v246_v41 }
  0xb0   :  { %v229_v36 = vpop.f32.mrf.mxu3 }
  0xb1   :  { %v249_v38 = vsel %vm241_vm1, %v237_v32, %v245_v34  ;;  %v230_v39 = vadd.f32 %v229_v36, %v150_v35 }
  0xb2   :  { %v368_v40 = vpack.c.bf16 %v249_v38, %v248_v37 }
  0xb3   :  { %v239_v42 = vadd.f32 %v393_v23, %v230_v39 }
  0xb4   :  { %369 = vst [vmem:[%s525_s5] sm:$0xff] %v368_v40  }
  0xb5   :  { %vm243_vm3 = vcmp.gt.f32.partialorder %v239_v42, 0.0  ;;  %v247_v43 = vmul.f32 0.1, %v239_v42 }
  0xb7   :  { %v251_v45 = vsel %vm243_vm3, %v239_v42, %v247_v43 }
  0xb8   :  { %v373_v46 = vpack.c.bf16 %v251_v45, %v250_v44 }
  0xba   :  { %375 = vst [vmem:[%s525_s5 + $0x8] sm:$0xff] %v373_v46  }
  0xbb   :  { %264 = vsyncpa [#allocation3], 1 }

// kernel: build_model_forward.27
= control target key start
LH: loop header
LB: loop body
LE: loop exit
PB: predicated region body
PF: predicated region fallthrough
CT: control target
= control target key end

     0   :  { %8 = vsyncpa [#allocation3], 0  ;;  %s402_s15 = smov [#allocation2]   ;;  %s504_s0 = inlined_call_operand.vmem [shape: bf16[32,256], index: 0, kind: input, shape index: {}]   ;;  %s505_s1 = inlined_call_operand.vmem [shape: bf16[256,128], index: 1, kind: input, shape index: {}]   ;;  %s506_s2 = inlined_call_operand.hbm [shape: f32[1,128], index: 2, kind: input, shape index: {}]   ;;  %s507_s3 = inlined_call_operand.vmem [shape: bf16[32,128], index: 3, kind: output, shape index: {}]  }
   0x1   :  { %s18_s14 = sshll.u32 %s506_s2, 4  ;;  %s20_s16 = sshll.u32 %s402_s15, 4  ;;  %s19_s14 = int_to_ptr.hbm [resolvable:$true] %s18_s14  ;;  %s21_s16 = int_to_ptr.vmem [resolvable:$true] %s20_s16 }
   0x2   :  { %23 = dma.hbm_to_vmem [thread:$0]  %s19_s14, 16, %s21_s16, [#allocation3]  }
   0x3   :  { %400 = dma.done.wait [#allocation3], 16  }
   0x4   :  { %401 = vsyncadd [#allocation3], 4294967280  ;;  %v338_v0 = vld [vmem:[%s505_s1 + $0x38] sm:$0xff]  ;;  %v337_v2 = vld [vmem:[%s505_s1 + $0x30] sm:$0xff] }
   0x5   :  { %v346_v1 = vld [vmem:[%s505_s1 + $0x78] sm:$0xff]  ;;  %184 = vmatpush.bf16.msra.mxu0 %v338_v0  ;;  %358 = vmatpush.bf16.msra.mxu2 %v338_v0  ;;  %v345_v3 = vld [vmem:[%s505_s1 + $0x70] sm:$0xff]  ;;  %v336_v4 = vld [vmem:[%s505_s1 + $0x28] sm:$0xff] }
   0x6   :  { %203 = vmatpush.bf16.msra.mxu1 %v346_v1  ;;  %366 = vmatpush.bf16.msra.mxu3 %v346_v1  ;;  %v344_v5 = vld [vmem:[%s505_s1 + $0x68] sm:$0xff]  ;;  %v335_v6 = vld [vmem:[%s505_s1 + $0x20] sm:$0xff]  ;;  %v334_v8 = vld [vmem:[%s505_s1 + $0x18] sm:$0xff] }
   0x7   :  { %v343_v7 = vld [vmem:[%s505_s1 + $0x60] sm:$0xff]  ;;  %v342_v9 = vld [vmem:[%s505_s1 + $0x58] sm:$0xff]  ;;  %v333_v10 = vld [vmem:[%s505_s1 + $0x10] sm:$0xff] }
   0x8   :  { %v341_v11 = vld [vmem:[%s505_s1 + $0x50] sm:$0xff]  ;;  %v332_v12 = vld [vmem:[%s505_s1 + $0x8] sm:$0xff]  ;;  %v331_v14 = vld [vmem:[%s505_s1] sm:$0xff] }
   0x9   :  { %185 = vmatpush.bf16.msra.mxu0 %v337_v2  ;;  %359 = vmatpush.bf16.msra.mxu2 %v337_v2  ;;  %v340_v13 = vld [vmem:[%s505_s1 + $0x48] sm:$0xff]  ;;  %v339_v15 = vld [vmem:[%s505_s1 + $0x40] sm:$0xff]  ;;  %v257_v18 = vld [vmem:[%s504_s0 + $0x10] sm:$0xf] }
   0xa   :  { %204 = vmatpush.bf16.msra.mxu1 %v345_v3  ;;  %367 = vmatpush.bf16.msra.mxu3 %v345_v3  ;;  %v249_v16 = vld [vmem:[%s504_s0] sm:$0xf]  ;;  %v328_v17 = vld [vmem:[%s504_s0 + $0x4] sm:$0xf0]  ;;  %v330_v19 = vld [vmem:[%s504_s0 + $0x14] sm:$0xf0] }
   0xb   :  { %v327_v20 = vld [vmem:[%s504_s0 + $0x4] sm:$0xf]  ;;  %v251_v21 = vld [vmem:[%s504_s0 + $0x8] sm:$0xf0]  ;;  %v329_v22 = vld [vmem:[%s504_s0 + $0x14] sm:$0xf]  ;;  %v250_v24 = vor.u32 %v328_v17, %v249_v16  ;;  %v258_v25 = vor.u32 %v330_v19, %v257_v18 }
   0xc   :  { %v259_v23 = vld [vmem:[%s504_s0 + $0x18] sm:$0xf0]  ;;  %v254_v26 = vor.u32 %v327_v20, %v251_v21  ;;  %v375_v28 = vld [vmem:[#allocation2] ss:$0 sm:$0xff] }
   0xd   :  { %186 = vmatpush.bf16.msra.mxu0 %v336_v4  ;;  %360 = vmatpush.bf16.msra.mxu2 %v336_v4  ;;  %v262_v27 = vor.u32 %v329_v22, %v259_v23 }
   0xe   :  { %205 = vmatpush.bf16.msra.mxu1 %v344_v5  ;;  %368 = vmatpush.bf16.msra.mxu3 %v344_v5 }
  0x11   :  { %187 = vmatpush.bf16.msra.mxu0 %v335_v6  ;;  %361 = vmatpush.bf16.msra.mxu2 %v335_v6 }
  0x12   :  { %206 = vmatpush.bf16.msra.mxu1 %v343_v7  ;;  %369 = vmatpush.bf16.msra.mxu3 %v343_v7 }
  0x15   :  { %188 = vmatpush.bf16.msra.mxu0 %v334_v8  ;;  %362 = vmatpush.bf16.msra.mxu2 %v334_v8 }
  0x16   :  { %207 = vmatpush.bf16.msra.mxu1 %v342_v9  ;;  %370 = vmatpush.bf16.msra.mxu3 %v342_v9 }
  0x19   :  { %189 = vmatpush.bf16.msra.mxu0 %v333_v10  ;;  %363 = vmatpush.bf16.msra.mxu2 %v333_v10 }
  0x1a   :  { %208 = vmatpush.bf16.msra.mxu1 %v341_v11  ;;  %371 = vmatpush.bf16.msra.mxu3 %v341_v11 }
  0x1d   :  { %190 = vmatpush.bf16.msra.mxu0 %v332_v12  ;;  %364 = vmatpush.bf16.msra.mxu2 %v332_v12 }
  0x1e   :  { %209 = vmatpush.bf16.msra.mxu1 %v340_v13  ;;  %372 = vmatpush.bf16.msra.mxu3 %v340_v13 }
  0x21   :  { %191 = vmatpush.bf16.msra.mxu0 %v331_v14  ;;  %365 = vmatpush.bf16.msra.mxu2 %v331_v14 }
  0x22   :  { %210 = vmatpush.bf16.msra.mxu1 %v339_v15  ;;  %373 = vmatpush.bf16.msra.mxu3 %v339_v15 }
  0x24   :  { %192 = vmatmul.bf16.vlgmr.msra.gmra.mxu0 %v250_v24  ;;  %197 = vmatmul.bf16.vlgmr.msra.gmra.mxu2 %v258_v25 }
  0x25   :  { %211 = vmatmul.bf16.vlgmr.msra.gmra.mxu1 %v254_v26  ;;  %216 = vmatmul.bf16.vlgmr.msra.gmra.mxu3 %v262_v27 }
  0xa1   :  { %v193_v29 = vpop.f32.mrf.mxu0 }
  0xa2   :  { %v212_v30 = vpop.f32.mrf.mxu1  ;;  %v194_v31 = vadd.f32 %v375_v28, %v193_v29 }
  0xa4   :  { %v213_v33 = vadd.f32 %v212_v30, %v194_v31 }
  0xa6   :  { %v226_v39 = vmul.f32 0.1, %v213_v33  ;;  %vm222_vm0 = vcmp.gt.f32.partialorder %v213_v33, 0.0 }
  0xa7   :  { %v198_v32 = vpop.f32.mrf.mxu2 }
  0xa8   :  { %v217_v34 = vpop.f32.mrf.mxu3  ;;  %v199_v36 = vadd.f32 %v375_v28, %v198_v32  ;;  %v230_v44 = vsel %vm222_vm0, %v213_v33, %v226_v39 }
  0xa9   :  { %v195_v35 = vpop.f32.mrf.mxu0 }
  0xaa   :  { %v196_v37 = vadd.f32 %v375_v28, %v195_v35  ;;  %v214_v38 = vpop.f32.mrf.mxu1  ;;  %v218_v41 = vadd.f32 %v217_v34, %v199_v36 }
  0xac   :  { %v215_v40 = vadd.f32 %v214_v38, %v196_v37  ;;  %v228_v49 = vmul.f32 0.1, %v218_v41  ;;  %vm224_vm2 = vcmp.gt.f32.partialorder %v218_v41, 0.0 }
  0xae   :  { %vm223_vm1 = vcmp.gt.f32.partialorder %v215_v40, 0.0  ;;  %v227_v42 = vmul.f32 0.1, %v215_v40  ;;  %v232_v52 = vsel %vm224_vm2, %v218_v41, %v228_v49 }
  0xaf   :  { %v200_v43 = vpop.f32.mrf.mxu2 }
  0xb0   :  { %v231_v45 = vsel %vm223_vm1, %v215_v40, %v227_v42  ;;  %v201_v46 = vadd.f32 %v375_v28, %v200_v43  ;;  %v219_v48 = vpop.f32.mrf.mxu3 }
  0xb1   :  { %v350_v47 = vpack.c.bf16 %v231_v45, %v230_v44 }
  0xb2   :  { %v220_v50 = vadd.f32 %v219_v48, %v201_v46 }
  0xb3   :  { %351 = vst [vmem:[%s507_s3] sm:$0xff] %v350_v47  }
  0xb4   :  { %vm225_vm3 = vcmp.gt.f32.partialorder %v220_v50, 0.0  ;;  %v229_v51 = vmul.f32 0.1, %v220_v50 }
  0xb6   :  { %v233_v53 = vsel %vm225_vm3, %v220_v50, %v229_v51 }
  0xb7   :  { %v355_v54 = vpack.c.bf16 %v233_v53, %v232_v52 }
  0xb9   :  { %357 = vst [vmem:[%s507_s3 + $0x8] sm:$0xff] %v355_v54  }
  0xba   :  { %246 = vsyncpa [#allocation3], 1 }

// kernel: build_model_forward.30
= control target key start
LH: loop header
LB: loop body
LE: loop exit
PB: predicated region body
PF: predicated region fallthrough
CT: control target
= control target key end

     0   :  { %s1290_s3 = inlined_call_operand.vmem [shape: bf16[256,256], index: 3, kind: input, shape index: {}]   ;;  %s1291_s2 = inlined_call_operand.vmem [shape: bf16[256,256], index: 2, kind: input, shape index: {}]   ;;  %s1292_s1 = inlined_call_operand.vmem [shape: bf16[8,256], index: 1, kind: input, shape index: {}]   ;;  %s1293_s0 = inlined_call_operand.vmem [shape: bf16[8,256], index: 0, kind: input, shape index: {}]   ;;  %s1294_s4 = inlined_call_operand.vmem [shape: f32[1,256], index: 4, kind: input, shape index: {}]   ;;  %s1295_s5 = inlined_call_operand.vmem [shape: bf16[8,256], index: 5, kind: output, shape index: {}]  }
   0x1   :  { %v602_v0 = vld [vmem:[%s1290_s3 + $0x70] sm:$0xf]  ;;  %v847_v1 = vld [vmem:[%s1290_s3 + $0x74] sm:$0xf0]  ;;  %v846_v5 = vld [vmem:[%s1290_s3 + $0x74] sm:$0xf] }
   0x2   :  { %v666_v2 = vld [vmem:[%s1290_s3 + $0xf0] sm:$0xf]  ;;  %v603_v3 = vor.u32 %v847_v1, %v602_v0  ;;  %v863_v4 = vld [vmem:[%s1290_s3 + $0xf4] sm:$0xf0]  ;;  %v604_v6 = vld [vmem:[%s1290_s3 + $0x78] sm:$0xf0] }
   0x3   :  { %v667_v7 = vor.u32 %v863_v4, %v666_v2  ;;  %v607_v8 = vor.u32 %v846_v5, %v604_v6  ;;  %v862_v9 = vld [vmem:[%s1290_s3 + $0xf4] sm:$0xf]  ;;  %v668_v10 = vld [vmem:[%s1290_s3 + $0xf8] sm:$0xf0]  ;;  %v594_v11 = vld [vmem:[%s1290_s3 + $0x60] sm:$0xf] }
   0x4   :  { %253 = vmatpush.bf16.msra.mxu0 %v603_v3  ;;  %v671_v12 = vor.u32 %v862_v9, %v668_v10  ;;  %v845_v13 = vld [vmem:[%s1290_s3 + $0x64] sm:$0xf0]  ;;  %v658_v14 = vld [vmem:[%s1290_s3 + $0xe0] sm:$0xf]  ;;  %v844_v18 = vld [vmem:[%s1290_s3 + $0x64] sm:$0xf] }
   0x5   :  { %v861_v15 = vld [vmem:[%s1290_s3 + $0xe4] sm:$0xf0]  ;;  %266 = vmatpush.bf16.msra.mxu1 %v667_v7  ;;  %279 = vmatpush.bf16.msra.mxu2 %v607_v8  ;;  %v595_v16 = vor.u32 %v845_v13, %v594_v11  ;;  %v596_v19 = vld [vmem:[%s1290_s3 + $0x68] sm:$0xf0]  ;;  %v860_v20 = vld [vmem:[%s1290_s3 + $0xe4] sm:$0xf] }
   0x6   :  { %v659_v17 = vor.u32 %v861_v15, %v658_v14  ;;  %292 = vmatpush.bf16.msra.mxu3 %v671_v12  ;;  %v599_v21 = vor.u32 %v844_v18, %v596_v19  ;;  %v660_v22 = vld [vmem:[%s1290_s3 + $0xe8] sm:$0xf0]  ;;  %v586_v23 = vld [vmem:[%s1290_s3 + $0x50] sm:$0xf]  ;;  %v843_v24 = vld [vmem:[%s1290_s3 + $0x54] sm:$0xf0] }
   0x7   :  { %v663_v25 = vor.u32 %v860_v20, %v660_v22  ;;  %v650_v26 = vld [vmem:[%s1290_s3 + $0xd0] sm:$0xf]  ;;  %v859_v27 = vld [vmem:[%s1290_s3 + $0xd4] sm:$0xf0]  ;;  %v842_v28 = vld [vmem:[%s1290_s3 + $0x54] sm:$0xf]  ;;  %v587_v29 = vor.u32 %v843_v24, %v586_v23 }
   0x8   :  { %254 = vmatpush.bf16.msra.mxu0 %v595_v16  ;;  %v588_v30 = vld [vmem:[%s1290_s3 + $0x58] sm:$0xf0]  ;;  %v858_v31 = vld [vmem:[%s1290_s3 + $0xd4] sm:$0xf]  ;;  %v651_v33 = vor.u32 %v859_v27, %v650_v26  ;;  %v578_v35 = vld [vmem:[%s1290_s3 + $0x40] sm:$0xf] }
   0x9   :  { %v652_v32 = vld [vmem:[%s1290_s3 + $0xd8] sm:$0xf0]  ;;  %267 = vmatpush.bf16.msra.mxu1 %v659_v17  ;;  %280 = vmatpush.bf16.msra.mxu2 %v599_v21  ;;  %v591_v34 = vor.u32 %v842_v28, %v588_v30  ;;  %v841_v36 = vld [vmem:[%s1290_s3 + $0x44] sm:$0xf0]  ;;  %v642_v37 = vld [vmem:[%s1290_s3 + $0xc0] sm:$0xf] }
   0xa   :  { %293 = vmatpush.bf16.msra.mxu3 %v663_v25  ;;  %v655_v38 = vor.u32 %v858_v31, %v652_v32  ;;  %v857_v39 = vld [vmem:[%s1290_s3 + $0xc4] sm:$0xf0]  ;;  %v840_v40 = vld [vmem:[%s1290_s3 + $0x44] sm:$0xf]  ;;  %v580_v41 = vld [vmem:[%s1290_s3 + $0x48] sm:$0xf0]  ;;  %v579_v44 = vor.u32 %v841_v36, %v578_v35 }
   0xb   :  { %v856_v42 = vld [vmem:[%s1290_s3 + $0xc4] sm:$0xf]  ;;  %v644_v43 = vld [vmem:[%s1290_s3 + $0xc8] sm:$0xf0]  ;;  %v643_v45 = vor.u32 %v857_v39, %v642_v37  ;;  %v583_v46 = vor.u32 %v840_v40, %v580_v41  ;;  %v570_v47 = vld [vmem:[%s1290_s3 + $0x30] sm:$0xf] }
   0xc   :  { %255 = vmatpush.bf16.msra.mxu0 %v587_v29  ;;  %v839_v48 = vld [vmem:[%s1290_s3 + $0x34] sm:$0xf0]  ;;  %v634_v49 = vld [vmem:[%s1290_s3 + $0xb0] sm:$0xf]  ;;  %v647_v50 = vor.u32 %v856_v42, %v644_v43  ;;  %v838_v52 = vld [vmem:[%s1290_s3 + $0x34] sm:$0xf] }
   0xd   :  { %268 = vmatpush.bf16.msra.mxu1 %v651_v33  ;;  %281 = vmatpush.bf16.msra.mxu2 %v591_v34  ;;  %v855_v51 = vld [vmem:[%s1290_s3 + $0xb4] sm:$0xf0]  ;;  %v572_v53 = vld [vmem:[%s1290_s3 + $0x38] sm:$0xf0]  ;;  %v854_v54 = vld [vmem:[%s1290_s3 + $0xb4] sm:$0xf]  ;;  %v571_v56 = vor.u32 %v839_v48, %v570_v47 }
   0xe   :  { %294 = vmatpush.bf16.msra.mxu3 %v655_v38  ;;  %v636_v55 = vld [vmem:[%s1290_s3 + $0xb8] sm:$0xf0]  ;;  %v635_v57 = vor.u32 %v855_v51, %v634_v49  ;;  %v575_v58 = vor.u32 %v838_v52, %v572_v53  ;;  %v562_v59 = vld [vmem:[%s1290_s3 + $0x20] sm:$0xf]  ;;  %v837_v60 = vld [vmem:[%s1290_s3 + $0x24] sm:$0xf0] }
   0xf   :  { %v626_v61 = vld [vmem:[%s1290_s3 + $0xa0] sm:$0xf]  ;;  %v639_v62 = vor.u32 %v854_v54, %v636_v55  ;;  %v853_v63 = vld [vmem:[%s1290_s3 + $0xa4] sm:$0xf0]  ;;  %v836_v0 = vld [vmem:[%s1290_s3 + $0x24] sm:$0xf]  ;;  %v563_v4 = vor.u32 %v837_v60, %v562_v59 }
  0x10   :  { %256 = vmatpush.bf16.msra.mxu0 %v579_v44  ;;  %v564_v1 = vld [vmem:[%s1290_s3 + $0x28] sm:$0xf0]  ;;  %v852_v2 = vld [vmem:[%s1290_s3 + $0xa4] sm:$0xf]  ;;  %v627_v5 = vor.u32 %v853_v63, %v626_v61  ;;  %v554_v7 = vld [vmem:[%s1290_s3 + $0x10] sm:$0xf] }
  0x11   :  { %269 = vmatpush.bf16.msra.mxu1 %v643_v45  ;;  %282 = vmatpush.bf16.msra.mxu2 %v583_v46  ;;  %v628_v3 = vld [vmem:[%s1290_s3 + $0xa8] sm:$0xf0]  ;;  %v567_v6 = vor.u32 %v836_v0, %v564_v1  ;;  %v835_v8 = vld [vmem:[%s1290_s3 + $0x14] sm:$0xf0]  ;;  %v618_v9 = vld [vmem:[%s1290_s3 + $0x90] sm:$0xf] }
  0x12   :  { %295 = vmatpush.bf16.msra.mxu3 %v647_v50  ;;  %v631_v10 = vor.u32 %v852_v2, %v628_v3  ;;  %v851_v11 = vld [vmem:[%s1290_s3 + $0x94] sm:$0xf0]  ;;  %v834_v12 = vld [vmem:[%s1290_s3 + $0x14] sm:$0xf]  ;;  %v556_v13 = vld [vmem:[%s1290_s3 + $0x18] sm:$0xf0]  ;;  %v555_v16 = vor.u32 %v835_v8, %v554_v7 }
  0x13   :  { %v850_v14 = vld [vmem:[%s1290_s3 + $0x94] sm:$0xf]  ;;  %v620_v15 = vld [vmem:[%s1290_s3 + $0x98] sm:$0xf0]  ;;  %v546_v17 = vld [vmem:[%s1290_s3] sm:$0xf]  ;;  %v619_v20 = vor.u32 %v851_v11, %v618_v9  ;;  %v559_v21 = vor.u32 %v834_v12, %v556_v13 }
  0x14   :  { %257 = vmatpush.bf16.msra.mxu0 %v571_v56  ;;  %v833_v18 = vld [vmem:[%s1290_s3 + $0x4] sm:$0xf0]  ;;  %v610_v19 = vld [vmem:[%s1290_s3 + $0x80] sm:$0xf]  ;;  %v832_v23 = vld [vmem:[%s1290_s3 + $0x4] sm:$0xf]  ;;  %v623_v25 = vor.u32 %v850_v14, %v620_v15 }
  0x15   :  { %270 = vmatpush.bf16.msra.mxu1 %v635_v57  ;;  %283 = vmatpush.bf16.msra.mxu2 %v575_v58  ;;  %v849_v22 = vld [vmem:[%s1290_s3 + $0x84] sm:$0xf0]  ;;  %v548_v24 = vld [vmem:[%s1290_s3 + $0x8] sm:$0xf0]  ;;  %v848_v26 = vld [vmem:[%s1290_s3 + $0x84] sm:$0xf]  ;;  %v547_v32 = vor.u32 %v833_v18, %v546_v17 }
  0x16   :  { %296 = vmatpush.bf16.msra.mxu3 %v639_v62  ;;  %v612_v27 = vld [vmem:[%s1290_s3 + $0x88] sm:$0xf0]  ;;  %v730_v28 = vld [vmem:[%s1291_s2 + $0x70] sm:$0xf]  ;;  %v815_v29 = vld [vmem:[%s1291_s2 + $0x74] sm:$0xf0]  ;;  %v611_v37 = vor.u32 %v849_v22, %v610_v19  ;;  %v551_v38 = vor.u32 %v832_v23, %v548_v24 }
  0x17   :  { %v794_v30 = vld [vmem:[%s1291_s2 + $0xf0] sm:$0xf]  ;;  %v53_v31 = vld [vmem:[%s1292_s1] sm:$0xff]  ;;  %v831_v33 = vld [vmem:[%s1291_s2 + $0xf4] sm:$0xf0]  ;;  %v615_v42 = vor.u32 %v848_v26, %v612_v27  ;;  %v731_v43 = vor.u32 %v815_v29, %v730_v28 }
  0x18   :  { %258 = vmatpush.bf16.msra.mxu0 %v563_v4  ;;  %v814_v34 = vld [vmem:[%s1291_s2 + $0x74] sm:$0xf]  ;;  %v732_v35 = vld [vmem:[%s1291_s2 + $0x78] sm:$0xf0]  ;;  %v87_v36 = vunpack.c.l.b16 %v53_v31  ;;  %v88_v41 = vunpack.c.h.b16 %v53_v31  ;;  %v795_v44 = vor.u32 %v831_v33, %v794_v30  ;;  %v722_v46 = vld [vmem:[%s1291_s2 + $0x60] sm:$0xf] }
  0x19   :  { %271 = vmatpush.bf16.msra.mxu1 %v627_v5  ;;  %284 = vmatpush.bf16.msra.mxu2 %v567_v6  ;;  %v830_v39 = vld [vmem:[%s1291_s2 + $0xf4] sm:$0xf]  ;;  %v796_v40 = vld [vmem:[%s1291_s2 + $0xf8] sm:$0xf0]  ;;  %v735_v45 = vor.u32 %v814_v34, %v732_v35  ;;  %v813_v47 = vld [vmem:[%s1291_s2 + $0x64] sm:$0xf0] }
  0x1a   :  { %297 = vmatpush.bf16.msra.mxu3 %v631_v10  ;;  %v786_v48 = vld [vmem:[%s1291_s2 + $0xe0] sm:$0xf]  ;;  %v799_v49 = vor.u32 %v830_v39, %v796_v40  ;;  %v829_v50 = vld [vmem:[%s1291_s2 + $0xe4] sm:$0xf0]  ;;  %v812_v51 = vld [vmem:[%s1291_s2 + $0x64] sm:$0xf]  ;;  %v89_v53 = vpack.c.b16 %v87_v36, %v87_v36  ;;  %v90_v56 = vpack.c.b16 %v88_v41, %v88_v41  ;;  %v723_v57 = vor.u32 %v813_v47, %v722_v46 }
  0x1b   :  { %v724_v52 = vld [vmem:[%s1291_s2 + $0x68] sm:$0xf0]  ;;  %v828_v54 = vld [vmem:[%s1291_s2 + $0xe4] sm:$0xf]  ;;  %v787_v58 = vor.u32 %v829_v50, %v786_v48  ;;  %v714_v60 = vld [vmem:[%s1291_s2 + $0x50] sm:$0xf] }
  0x1c   :  { %259 = vmatpush.bf16.msra.mxu0 %v555_v16  ;;  %v788_v55 = vld [vmem:[%s1291_s2 + $0xe8] sm:$0xf0]  ;;  %v727_v59 = vor.u32 %v812_v51, %v724_v52  ;;  %v811_v61 = vld [vmem:[%s1291_s2 + $0x54] sm:$0xf0]  ;;  %v778_v62 = vld [vmem:[%s1291_s2 + $0xd0] sm:$0xf] }
  0x1d   :  { %272 = vmatpush.bf16.msra.mxu1 %v619_v20  ;;  %285 = vmatpush.bf16.msra.mxu2 %v559_v21  ;;  %v791_v63 = vor.u32 %v828_v54, %v788_v55  ;;  %v827_v0 = vld [vmem:[%s1291_s2 + $0xd4] sm:$0xf0]  ;;  %v810_v1 = vld [vmem:[%s1291_s2 + $0x54] sm:$0xf]  ;;  %v716_v2 = vld [vmem:[%s1291_s2 + $0x58] sm:$0xf0]  ;;  %v715_v5 = vor.u32 %v811_v61, %v714_v60 }
  0x1e   :  { %298 = vmatpush.bf16.msra.mxu3 %v623_v25  ;;  %v826_v3 = vld [vmem:[%s1291_s2 + $0xd4] sm:$0xf]  ;;  %v780_v4 = vld [vmem:[%s1291_s2 + $0xd8] sm:$0xf0]  ;;  %v779_v6 = vor.u32 %v827_v0, %v778_v62  ;;  %v719_v7 = vor.u32 %v810_v1, %v716_v2  ;;  %v706_v8 = vld [vmem:[%s1291_s2 + $0x40] sm:$0xf] }
  0x1f   :  { %v809_v9 = vld [vmem:[%s1291_s2 + $0x44] sm:$0xf0]  ;;  %v770_v10 = vld [vmem:[%s1291_s2 + $0xc0] sm:$0xf]  ;;  %v783_v11 = vor.u32 %v826_v3, %v780_v4  ;;  %v808_v13 = vld [vmem:[%s1291_s2 + $0x44] sm:$0xf] }
  0x20   :  { %260 = vmatpush.bf16.msra.mxu0 %v547_v32  ;;  %v825_v12 = vld [vmem:[%s1291_s2 + $0xc4] sm:$0xf0]  ;;  %v708_v14 = vld [vmem:[%s1291_s2 + $0x48] sm:$0xf0]  ;;  %v824_v15 = vld [vmem:[%s1291_s2 + $0xc4] sm:$0xf]  ;;  %v707_v17 = vor.u32 %v809_v9, %v706_v8 }
  0x21   :  { %273 = vmatpush.bf16.msra.mxu1 %v611_v37  ;;  %286 = vmatpush.bf16.msra.mxu2 %v551_v38  ;;  %v772_v16 = vld [vmem:[%s1291_s2 + $0xc8] sm:$0xf0]  ;;  %v771_v18 = vor.u32 %v825_v12, %v770_v10  ;;  %v711_v19 = vor.u32 %v808_v13, %v708_v14  ;;  %v698_v20 = vld [vmem:[%s1291_s2 + $0x30] sm:$0xf]  ;;  %v807_v21 = vld [vmem:[%s1291_s2 + $0x34] sm:$0xf0] }
  0x22   :  { %299 = vmatpush.bf16.msra.mxu3 %v615_v42  ;;  %v762_v22 = vld [vmem:[%s1291_s2 + $0xb0] sm:$0xf]  ;;  %v775_v23 = vor.u32 %v824_v15, %v772_v16  ;;  %v823_v24 = vld [vmem:[%s1291_s2 + $0xb4] sm:$0xf0]  ;;  %v806_v25 = vld [vmem:[%s1291_s2 + $0x34] sm:$0xf]  ;;  %v699_v29 = vor.u32 %v807_v21, %v698_v20 }
  0x23   :  { %261 = vmatmul.bf16.vlgmr.msra.gmra.mxu0 %v89_v53  ;;  %v700_v26 = vld [vmem:[%s1291_s2 + $0x38] sm:$0xf0]  ;;  %v822_v27 = vld [vmem:[%s1291_s2 + $0xb4] sm:$0xf]  ;;  %v763_v30 = vor.u32 %v823_v24, %v762_v22  ;;  %v690_v32 = vld [vmem:[%s1291_s2 + $0x20] sm:$0xf] }
  0x24   :  { %472 = vmatpush.bf16.msrb.mxu0 %v731_v43  ;;  %287 = vmatmul.bf16.vlgmr.msra.gmra.mxu2 %v89_v53  ;;  %v764_v28 = vld [vmem:[%s1291_s2 + $0xb8] sm:$0xf0]  ;;  %v703_v31 = vor.u32 %v806_v25, %v700_v26  ;;  %v805_v33 = vld [vmem:[%s1291_s2 + $0x24] sm:$0xf0]  ;;  %v754_v34 = vld [vmem:[%s1291_s2 + $0xa0] sm:$0xf] }
  0x25   :  { %485 = vmatpush.bf16.msrb.mxu1 %v795_v44  ;;  %498 = vmatpush.bf16.msrb.mxu2 %v735_v45  ;;  %v767_v35 = vor.u32 %v822_v27, %v764_v28  ;;  %v821_v36 = vld [vmem:[%s1291_s2 + $0xa4] sm:$0xf0]  ;;  %v804_v37 = vld [vmem:[%s1291_s2 + $0x24] sm:$0xf]  ;;  %v692_v38 = vld [vmem:[%s1291_s2 + $0x28] sm:$0xf0]  ;;  %v691_v41 = vor.u32 %v805_v33, %v690_v32 }
  0x26   :  { %511 = vmatpush.bf16.msrb.mxu3 %v799_v49  ;;  %274 = vmatmul.bf16.vlgmr.msra.gmra.mxu1 %v90_v56  ;;  %v820_v39 = vld [vmem:[%s1291_s2 + $0xa4] sm:$0xf]  ;;  %v756_v40 = vld [vmem:[%s1291_s2 + $0xa8] sm:$0xf0]  ;;  %v755_v42 = vor.u32 %v821_v36, %v754_v34  ;;  %v695_v43 = vor.u32 %v804_v37, %v692_v38  ;;  %v682_v44 = vld [vmem:[%s1291_s2 + $0x10] sm:$0xf] }
  0x27   :  { %300 = vmatmul.bf16.vlgmr.msra.gmra.mxu3 %v90_v56  ;;  %v803_v45 = vld [vmem:[%s1291_s2 + $0x14] sm:$0xf0]  ;;  %v746_v46 = vld [vmem:[%s1291_s2 + $0x90] sm:$0xf]  ;;  %v759_v47 = vor.u32 %v820_v39, %v756_v40  ;;  %v802_v49 = vld [vmem:[%s1291_s2 + $0x14] sm:$0xf] }
  0x28   :  { %473 = vmatpush.bf16.msrb.mxu0 %v723_v57  ;;  %v819_v48 = vld [vmem:[%s1291_s2 + $0x94] sm:$0xf0]  ;;  %v684_v50 = vld [vmem:[%s1291_s2 + $0x18] sm:$0xf0]  ;;  %v818_v51 = vld [vmem:[%s1291_s2 + $0x94] sm:$0xf]  ;;  %v683_v53 = vor.u32 %v803_v45, %v682_v44 }
  0x29   :  { %486 = vmatpush.bf16.msrb.mxu1 %v787_v58  ;;  %499 = vmatpush.bf16.msrb.mxu2 %v727_v59  ;;  %v748_v52 = vld [vmem:[%s1291_s2 + $0x98] sm:$0xf0]  ;;  %v20_v54 = vld [vmem:[%s1293_s0] sm:$0xff]  ;;  %v747_v55 = vor.u32 %v819_v48, %v746_v46  ;;  %v687_v56 = vor.u32 %v802_v49, %v684_v50  ;;  %v801_v58 = vld [vmem:[%s1291_s2 + $0x4] sm:$0xf0] }
  0x2a   :  { %512 = vmatpush.bf16.msrb.mxu3 %v791_v63  ;;  %v674_v57 = vld [vmem:[%s1291_s2] sm:$0xf]  ;;  %v751_v60 = vor.u32 %v818_v51, %v748_v52  ;;  %v817_v61 = vld [vmem:[%s1291_s2 + $0x84] sm:$0xf0]  ;;  %v800_v62 = vld [vmem:[%s1291_s2 + $0x4] sm:$0xf]  ;;  %v306_v2 = vunpack.c.l.b16 %v20_v54  ;;  %v307_v4 = vunpack.c.h.b16 %v20_v54 }
  0x2b   :  { %v738_v59 = vld [vmem:[%s1291_s2 + $0x80] sm:$0xf]  ;;  %v676_v63 = vld [vmem:[%s1291_s2 + $0x8] sm:$0xf0]  ;;  %v816_v0 = vld [vmem:[%s1291_s2 + $0x84] sm:$0xf]  ;;  %v675_v3 = vor.u32 %v801_v58, %v674_v57 }
  0x2c   :  { %474 = vmatpush.bf16.msrb.mxu0 %v715_v5  ;;  %v740_v1 = vld [vmem:[%s1291_s2 + $0x88] sm:$0xf0]  ;;  %v739_v5 = vor.u32 %v817_v61, %v738_v59  ;;  %v308_v8 = vpack.c.b16 %v306_v2, %v306_v2  ;;  %v309_v9 = vpack.c.b16 %v307_v4, %v307_v4  ;;  %v524_v22 = vld [vmem:[%s1294_s4] sm:$0x3] }
  0x2d   :  { %487 = vmatpush.bf16.msrb.mxu1 %v779_v6  ;;  %500 = vmatpush.bf16.msrb.mxu2 %v719_v7  ;;  %v679_v6 = vor.u32 %v800_v62, %v676_v63  ;;  %v743_v7 = vor.u32 %v816_v0, %v740_v1  ;;  %v526_v24 = vperm.slane %v524_v22, 0 }
  0x2e   :  { %513 = vmatpush.bf16.msrb.mxu3 %v783_v11 }
  0x30   :  { %475 = vmatpush.bf16.msrb.mxu0 %v707_v17 }
  0x31   :  { %488 = vmatpush.bf16.msrb.mxu1 %v771_v18  ;;  %501 = vmatpush.bf16.msrb.mxu2 %v711_v19 }
  0x32   :  { %514 = vmatpush.bf16.msrb.mxu3 %v775_v23 }
  0x34   :  { %476 = vmatpush.bf16.msrb.mxu0 %v699_v29 }
  0x35   :  { %489 = vmatpush.bf16.msrb.mxu1 %v763_v30  ;;  %502 = vmatpush.bf16.msrb.mxu2 %v703_v31  ;;  %v527_v30 = vperm.slane %v524_v22, 1 }
  0x36   :  { %515 = vmatpush.bf16.msrb.mxu3 %v767_v35 }
  0x38   :  { %477 = vmatpush.bf16.msrb.mxu0 %v691_v41 }
  0x39   :  { %490 = vmatpush.bf16.msrb.mxu1 %v755_v42  ;;  %503 = vmatpush.bf16.msrb.mxu2 %v695_v43 }
  0x3a   :  { %516 = vmatpush.bf16.msrb.mxu3 %v759_v47 }
  0x3c   :  { %478 = vmatpush.bf16.msrb.mxu0 %v683_v53 }
  0x3d   :  { %491 = vmatpush.bf16.msrb.mxu1 %v747_v55  ;;  %504 = vmatpush.bf16.msrb.mxu2 %v687_v56 }
  0x3e   :  { %517 = vmatpush.bf16.msrb.mxu3 %v751_v60 }
  0x40   :  { %479 = vmatpush.bf16.msrb.mxu0 %v675_v3 }
  0x41   :  { %492 = vmatpush.bf16.msrb.mxu1 %v739_v5  ;;  %505 = vmatpush.bf16.msrb.mxu2 %v679_v6 }
  0x42   :  { %518 = vmatpush.bf16.msrb.mxu3 %v743_v7 }
  0x43   :  { %480 = vmatmul.bf16.vlgmr.msrb.gmra.mxu0 %v308_v8 }
  0x44   :  { %493 = vmatmul.bf16.vlgmr.msrb.gmra.mxu1 %v309_v9  ;;  %506 = vmatmul.bf16.vlgmr.msrb.gmra.mxu2 %v308_v8 }
  0x45   :  { %519 = vmatmul.bf16.vlgmr.msrb.gmra.mxu3 %v309_v9 }
  0xa0   :  { %v262_v10 = vpop.f32.mrf.mxu0 }
  0xa3   :  { %v275_v11 = vpop.f32.mrf.mxu1 }
  0xa4   :  { %v276_v18 = vadd.f32 %v275_v11, %v262_v10 }
  0xa7   :  { %v288_v12 = vpop.f32.mrf.mxu2 }
  0xa8   :  { %v264_v14 = vpop.f32.mrf.mxu0 }
  0xaa   :  { %v301_v13 = vpop.f32.mrf.mxu3 }
  0xab   :  { %v277_v15 = vpop.f32.mrf.mxu1  ;;  %v302_v25 = vadd.f32 %v301_v13, %v288_v12 }
  0xaf   :  { %v290_v16 = vpop.f32.mrf.mxu2 }
  0xb2   :  { %v303_v17 = vpop.f32.mrf.mxu3 }
  0xc0   :  { %v481_v19 = vpop.f32.mrf.mxu0 }
  0xc1   :  { %v482_v20 = vadd.f32 %v481_v19, %v276_v18  ;;  %v494_v21 = vpop.f32.mrf.mxu1 }
  0xc3   :  { %v495_v23 = vadd.f32 %v494_v21, %v482_v20 }
  0xc5   :  { %v530_v27 = vadd.f32 %v526_v24, %v495_v23 }
  0xc7   :  { %v507_v26 = vpop.f32.mrf.mxu2  ;;  %v534_v34 = vmul.f32 0.1, %v530_v27  ;;  %vm532_vm0 = vcmp.gt.f32.partialorder %v530_v27, 0.0 }
  0xc8   :  { %v508_v28 = vadd.f32 %v507_v26, %v302_v25  ;;  %v520_v29 = vpop.f32.mrf.mxu3  ;;  %v483_v31 = vpop.f32.mrf.mxu0 }
  0xc9   :  { %v496_v32 = vpop.f32.mrf.mxu1  ;;  %v536_v38 = vsel %vm532_vm0, %v530_v27, %v534_v34 }
  0xca   :  { %v521_v33 = vadd.f32 %v520_v29, %v508_v28 }
  0xcc   :  { %v531_v35 = vadd.f32 %v527_v30, %v521_v33 }
  0xce   :  { %vm533_vm1 = vcmp.gt.f32.partialorder %v531_v35, 0.0  ;;  %v535_v36 = vmul.f32 0.1, %v531_v35 }
  0xcf   :  { %v509_v37 = vpop.f32.mrf.mxu2 }
  0xd0   :  { %v537_v39 = vsel %vm533_vm1, %v531_v35, %v535_v36  ;;  %v522_v40 = vpop.f32.mrf.mxu3 }
  0xd1   :  { %v538_v41 = vpack.c.bf16 %v537_v39, %v536_v38 }
  0xd3   :  { %539 = vst [vmem:[%s1295_s5] sm:$0xff] %v538_v41 }

// kernel: build_model_forward.32
= control target key start
LH: loop header
LB: loop body
LE: loop exit
PB: predicated region body
PF: predicated region fallthrough
CT: control target
= control target key end

     0   :  { %16 = vsyncpa [#allocation3], 0  ;;  %s1095_s0 = inlined_call_operand.vmem [shape: bf16[32,128], index: 0, kind: input, shape index: {}]   ;;  %s1096_s1 = inlined_call_operand.vmem [shape: bf16[128,256], index: 1, kind: input, shape index: {}]   ;;  %s1097_s2 = inlined_call_operand.vmem [shape: f32[1,256], index: 2, kind: input, shape index: {}]   ;;  %s1098_s3 = inlined_call_operand.vmem [shape: bf16[256,24], index: 3, kind: input, shape index: {}]   ;;  %s1099_s4 = inlined_call_operand.hbm [shape: f32[1,24], index: 4, kind: input, shape index: {}]   ;;  %s1100_s5 = inlined_call_operand.vmem [shape: f32[32,24], index: 5, kind: input, shape index: {}]   ;;  %s1101_s6 = inlined_call_operand.vmem [shape: f32[1,24], index: 6, kind: input, shape index: {}]   ;;  %s1102_s7 = inlined_call_operand.hbm [shape: f32[1,24], index: 7, kind: input, shape index: {}]   ;;  %s1103_s8 = inlined_call_operand.vmem [shape: f32[1,24], index: 8, kind: input, shape index: {}]   ;;  %s1104_s9 = inlined_call_operand.vmem [shape: f32[32,24], index: 9, kind: output, shape index: {0}]   ;;  %s1105_s10 = inlined_call_operand.vmem [shape: f32[32,24], index: 10, kind: output, shape index: {1}]  }
   0x1   :  { %s31_s15 = sshll.u32 %s1099_s4, 4  ;;  %s32_s15 = int_to_ptr.hbm [resolvable:$true] %s31_s15 }
   0x2   :  { %17 = vsyncpa [#allocation5], 0  ;;  %s811_s16 = smov [#allocation2]   ;;  %s46_s20 = sshll.u32 %s1102_s7, 4  ;;  %s47_s20 = int_to_ptr.hbm [resolvable:$true] %s46_s20 }
   0x3   :  { %s33_s17 = sshll.u32 %s811_s16, 4  ;;  %s812_s21 = smov [#allocation4]   ;;  %s34_s17 = int_to_ptr.vmem [resolvable:$true] %s33_s17 }
   0x4   :  { %36 = dma.hbm_to_vmem [thread:$0]  %s32_s15, 16, %s34_s17, [#allocation3]  }
   0x5   :  { %s48_s22 = sshll.u32 %s812_s21, 4  ;;  %s49_s22 = int_to_ptr.vmem [resolvable:$true] %s48_s22 }
   0x6   :  { %51 = dma.hbm_to_vmem [thread:$0]  %s47_s20, 16, %s49_s22, [#allocation5]  }
   0x7   :  { %807 = dma.done.wait [#allocation3], 16  }
   0x8   :  { %808 = vsyncadd [#allocation3], 4294967280 }
   0x9   :  { %809 = dma.done.wait [#allocation5], 16  }
   0xa   :  { %810 = vsyncadd [#allocation5], 4294967280  ;;  %v621_v0 = vld [vmem:[%s1096_s1 + $0x70] sm:$0xf]  ;;  %v712_v1 = vld [vmem:[%s1096_s1 + $0x74] sm:$0xf0] }
   0xb   :  { %v711_v2 = vld [vmem:[%s1096_s1 + $0x74] sm:$0xf]  ;;  %v622_v3 = vor.u32 %v712_v1, %v621_v0  ;;  %v623_v4 = vld [vmem:[%s1096_s1 + $0x78] sm:$0xf0]  ;;  %v613_v5 = vld [vmem:[%s1096_s1 + $0x60] sm:$0xf] }
   0xc   :  { %v710_v6 = vld [vmem:[%s1096_s1 + $0x64] sm:$0xf0]  ;;  %v626_v7 = vor.u32 %v711_v2, %v623_v4  ;;  %v709_v8 = vld [vmem:[%s1096_s1 + $0x64] sm:$0xf]  ;;  %v615_v9 = vld [vmem:[%s1096_s1 + $0x68] sm:$0xf0] }
   0xd   :  { %180 = vmatpush.bf16.msra.mxu0 %v622_v3  ;;  %v614_v10 = vor.u32 %v710_v6, %v613_v5  ;;  %v618_v11 = vor.u32 %v709_v8, %v615_v9  ;;  %v605_v12 = vld [vmem:[%s1096_s1 + $0x50] sm:$0xf]  ;;  %v708_v13 = vld [vmem:[%s1096_s1 + $0x54] sm:$0xf0]  ;;  %v707_v14 = vld [vmem:[%s1096_s1 + $0x54] sm:$0xf] }
   0xe   :  { %199 = vmatpush.bf16.msra.mxu1 %v626_v7  ;;  %v607_v15 = vld [vmem:[%s1096_s1 + $0x58] sm:$0xf0]  ;;  %v606_v16 = vor.u32 %v708_v13, %v605_v12  ;;  %v597_v18 = vld [vmem:[%s1096_s1 + $0x40] sm:$0xf]  ;;  %v706_v19 = vld [vmem:[%s1096_s1 + $0x44] sm:$0xf0] }
   0xf   :  { %v610_v17 = vor.u32 %v707_v14, %v607_v15  ;;  %v705_v20 = vld [vmem:[%s1096_s1 + $0x44] sm:$0xf]  ;;  %v599_v21 = vld [vmem:[%s1096_s1 + $0x48] sm:$0xf0]  ;;  %v598_v22 = vor.u32 %v706_v19, %v597_v18  ;;  %v589_v23 = vld [vmem:[%s1096_s1 + $0x30] sm:$0xf] }
  0x10   :  { %v602_v24 = vor.u32 %v705_v20, %v599_v21  ;;  %v704_v25 = vld [vmem:[%s1096_s1 + $0x34] sm:$0xf0]  ;;  %v703_v26 = vld [vmem:[%s1096_s1 + $0x34] sm:$0xf]  ;;  %v591_v27 = vld [vmem:[%s1096_s1 + $0x38] sm:$0xf0] }
  0x11   :  { %181 = vmatpush.bf16.msra.mxu0 %v614_v10  ;;  %v590_v28 = vor.u32 %v704_v25, %v589_v23  ;;  %v594_v29 = vor.u32 %v703_v26, %v591_v27  ;;  %v581_v30 = vld [vmem:[%s1096_s1 + $0x20] sm:$0xf]  ;;  %v702_v31 = vld [vmem:[%s1096_s1 + $0x24] sm:$0xf0]  ;;  %v701_v32 = vld [vmem:[%s1096_s1 + $0x24] sm:$0xf] }
  0x12   :  { %200 = vmatpush.bf16.msra.mxu1 %v618_v11  ;;  %v583_v33 = vld [vmem:[%s1096_s1 + $0x28] sm:$0xf0]  ;;  %v582_v34 = vor.u32 %v702_v31, %v581_v30  ;;  %v720_v35 = vld [vmem:[%s1098_s3 + $0x38] sm:$0xff]  ;;  %v573_v38 = vld [vmem:[%s1096_s1 + $0x10] sm:$0xf]  ;;  %vm416_vm8 = vcmask 195584  }
  0x13   :  { %v728_v36 = vld [vmem:[%s1098_s3 + $0x78] sm:$0xff]  ;;  %v586_v37 = vor.u32 %v701_v32, %v583_v33  ;;  %v699_v40 = vld [vmem:[%s1096_s1 + $0x14] sm:$0xf]  ;;  %378 = vmatpush.bf16.msra.mxu2 %v720_v35  ;;  %v565_v46 = vld [vmem:[%s1096_s1] sm:$0xf] }
  0x14   :  { %v700_v39 = vld [vmem:[%s1096_s1 + $0x14] sm:$0xf0]  ;;  %v575_v41 = vld [vmem:[%s1096_s1 + $0x18] sm:$0xf0]  ;;  %397 = vmatpush.bf16.msra.mxu3 %v728_v36  ;;  %v719_v42 = vld [vmem:[%s1098_s3 + $0x30] sm:$0xff] }
  0x15   :  { %182 = vmatpush.bf16.msra.mxu0 %v606_v16  ;;  %v727_v43 = vld [vmem:[%s1098_s3 + $0x70] sm:$0xff]  ;;  %v574_v44 = vor.u32 %v700_v39, %v573_v38  ;;  %v578_v45 = vor.u32 %v699_v40, %v575_v41  ;;  %v698_v47 = vld [vmem:[%s1096_s1 + $0x4] sm:$0xf0]  ;;  %v697_v48 = vld [vmem:[%s1096_s1 + $0x4] sm:$0xf] }
  0x16   :  { %201 = vmatpush.bf16.msra.mxu1 %v610_v17  ;;  %v567_v49 = vld [vmem:[%s1096_s1 + $0x8] sm:$0xf0]  ;;  %v566_v52 = vor.u32 %v698_v47, %v565_v46  ;;  %v717_v54 = vld [vmem:[%s1098_s3 + $0x20] sm:$0xff]  ;;  %v716_v58 = vld [vmem:[%s1098_s3 + $0x18] sm:$0xff] }
  0x17   :  { %379 = vmatpush.bf16.msra.mxu2 %v719_v42  ;;  %v718_v50 = vld [vmem:[%s1098_s3 + $0x28] sm:$0xff]  ;;  %v570_v53 = vor.u32 %v697_v48, %v567_v49  ;;  %v725_v55 = vld [vmem:[%s1098_s3 + $0x60] sm:$0xff]  ;;  %v724_v59 = vld [vmem:[%s1098_s3 + $0x58] sm:$0xff] }
  0x18   :  { %398 = vmatpush.bf16.msra.mxu3 %v727_v43  ;;  %v726_v51 = vld [vmem:[%s1098_s3 + $0x68] sm:$0xff]  ;;  %v695_v56 = vld [vmem:[%s1095_s0] sm:$0xff]  ;;  %v715_v60 = vld [vmem:[%s1098_s3 + $0x10] sm:$0xff] }
  0x19   :  { %183 = vmatpush.bf16.msra.mxu0 %v598_v22  ;;  %v696_v57 = vld [vmem:[%s1095_s0 + $0x8] sm:$0xff]  ;;  %v723_v61 = vld [vmem:[%s1098_s3 + $0x50] sm:$0xff]  ;;  %v713_v0 = vld [vmem:[%s1098_s3] sm:$0xff] }
  0x1a   :  { %202 = vmatpush.bf16.msra.mxu1 %v602_v24  ;;  %v714_v62 = vld [vmem:[%s1098_s3 + $0x8] sm:$0xff]  ;;  %v721_v1 = vld [vmem:[%s1098_s3 + $0x40] sm:$0xff] }
  0x1b   :  { %380 = vmatpush.bf16.msra.mxu2 %v718_v50  ;;  %v722_v63 = vld [vmem:[%s1098_s3 + $0x48] sm:$0xff]  ;;  %v82_v2 = vld [vmem:[%s1097_s2] sm:$0x3] }
  0x1c   :  { %399 = vmatpush.bf16.msra.mxu3 %v726_v51  ;;  %v84_v4 = vperm.slane %v82_v2, 0  ;;  %v85_v6 = vperm.slane %v82_v2, 1  ;;  %v731_v41 = vld [vmem:[#allocation2] ss:$0 sm:$0xff] }
  0x1d   :  { %184 = vmatpush.bf16.msra.mxu0 %v590_v28 }
  0x1e   :  { %203 = vmatpush.bf16.msra.mxu1 %v594_v29 }
  0x1f   :  { %381 = vmatpush.bf16.msra.mxu2 %v717_v54 }
  0x20   :  { %400 = vmatpush.bf16.msra.mxu3 %v725_v55 }
  0x21   :  { %185 = vmatpush.bf16.msra.mxu0 %v582_v34 }
  0x22   :  { %204 = vmatpush.bf16.msra.mxu1 %v586_v37 }
  0x23   :  { %382 = vmatpush.bf16.msra.mxu2 %v716_v58 }
  0x24   :  { %401 = vmatpush.bf16.msra.mxu3 %v724_v59 }
  0x25   :  { %186 = vmatpush.bf16.msra.mxu0 %v574_v44 }
  0x26   :  { %205 = vmatpush.bf16.msra.mxu1 %v578_v45 }
  0x27   :  { %383 = vmatpush.bf16.msra.mxu2 %v715_v60 }
  0x28   :  { %402 = vmatpush.bf16.msra.mxu3 %v723_v61 }
  0x29   :  { %187 = vmatpush.bf16.msra.mxu0 %v566_v52  ;;  %v1034_v52 = vld [vmem:[%s1103_s8] ss:$0 sm:$0xff] }
  0x2a   :  { %206 = vmatpush.bf16.msra.mxu1 %v570_v53 }
  0x2b   :  { %384 = vmatpush.bf16.msra.mxu2 %v714_v62 }
  0x2c   :  { %188 = vmatmul.bf16.vlgmr.msra.gmra.mxu0 %v695_v56  ;;  %403 = vmatpush.bf16.msra.mxu3 %v722_v63 }
  0x2d   :  { %207 = vmatmul.bf16.vlgmr.msra.gmra.mxu1 %v695_v56 }
  0x2f   :  { %385 = vmatpush.bf16.msra.mxu2 %v713_v0 }
  0x30   :  { %404 = vmatpush.bf16.msra.mxu3 %v721_v1 }
  0x3c   :  { %193 = vmatmul.bf16.gmra.mxu0 %v696_v57 }
  0x3d   :  { %212 = vmatmul.bf16.gmra.mxu1 %v696_v57 }
  0xa9   :  { %v189_v3 = vpop.f32.mrf.mxu0 }
  0xaa   :  { %v208_v5 = vpop.f32.mrf.mxu1  ;;  %v190_v7 = vadd.f32 %v189_v3, %v84_v4 }
  0xab   :  { %v209_v8 = vadd.f32 %v208_v5, %v85_v6 }
  0xac   :  { %v226_v10 = vmul.f32 0.1, %v190_v7  ;;  %vm218_vm0 = vcmp.gt.f32.partialorder %v190_v7, 0.0 }
  0xad   :  { %v227_v13 = vmul.f32 0.1, %v209_v8  ;;  %vm219_vm2 = vcmp.gt.f32.partialorder %v209_v8, 0.0 }
  0xae   :  { %v234_v17 = vsel %vm218_vm0, %v190_v7, %v226_v10 }
  0xaf   :  { %v235_v20 = vsel %vm219_vm2, %v209_v8, %v227_v13 }
  0xb1   :  { %v191_v9 = vpop.f32.mrf.mxu0 }
  0xb2   :  { %v192_v11 = vadd.f32 %v191_v9, %v84_v4  ;;  %v210_v12 = vpop.f32.mrf.mxu1 }
  0xb3   :  { %v211_v14 = vadd.f32 %v210_v12, %v85_v6 }
  0xb4   :  { %v228_v15 = vmul.f32 0.1, %v192_v11  ;;  %vm220_vm1 = vcmp.gt.f32.partialorder %v192_v11, 0.0 }
  0xb5   :  { %v229_v16 = vmul.f32 0.1, %v211_v14  ;;  %vm221_vm3 = vcmp.gt.f32.partialorder %v211_v14, 0.0 }
  0xb6   :  { %v236_v18 = vsel %vm220_vm1, %v192_v11, %v228_v15 }
  0xb7   :  { %v242_v19 = vpack.c.bf16 %v236_v18, %v234_v17  ;;  %v237_v21 = vsel %vm221_vm3, %v211_v14, %v229_v16  ;;  %v497_v17 = vld [vmem:[%s1100_s5] sm:$0xff] }
  0xb8   :  { %v243_v22 = vpack.c.bf16 %v237_v21, %v235_v20  ;;  %v1053_v18 = vld [vmem:[#allocation4] ss:$0 sm:$0xff] }
  0xb9   :  { %v194_v23 = vpop.f32.mrf.mxu0  ;;  %386 = vmatmul.bf16.vlgmr.msra.gmra.mxu2 %v242_v19 }
  0xba   :  { %v213_v24 = vpop.f32.mrf.mxu1  ;;  %405 = vmatmul.bf16.vlgmr.msra.gmra.mxu3 %v243_v22  ;;  %v195_v25 = vadd.f32 %v194_v23, %v84_v4  ;;  %v1058_v22 = vld [vmem:[%s1101_s6] ss:$0 sm:$0xff] }
  0xbb   :  { %v214_v26 = vadd.f32 %v213_v24, %v85_v6 }
  0xbc   :  { %v230_v28 = vmul.f32 0.1, %v195_v25  ;;  %vm222_vm4 = vcmp.gt.f32.partialorder %v195_v25, 0.0 }
  0xbd   :  { %v231_v31 = vmul.f32 0.1, %v214_v26  ;;  %vm223_vm6 = vcmp.gt.f32.partialorder %v214_v26, 0.0 }
  0xbe   :  { %v238_v35 = vsel %vm222_vm4, %v195_v25, %v230_v28 }
  0xbf   :  { %v239_v38 = vsel %vm223_vm6, %v214_v26, %v231_v31 }
  0xc1   :  { %v196_v27 = vpop.f32.mrf.mxu0 }
  0xc2   :  { %v197_v29 = vadd.f32 %v196_v27, %v84_v4  ;;  %v215_v30 = vpop.f32.mrf.mxu1 }
  0xc3   :  { %v216_v32 = vadd.f32 %v215_v30, %v85_v6 }
  0xc4   :  { %v232_v33 = vmul.f32 0.1, %v197_v29  ;;  %vm224_vm5 = vcmp.gt.f32.partialorder %v197_v29, 0.0 }
  0xc5   :  { %v233_v34 = vmul.f32 0.1, %v216_v32  ;;  %vm225_vm7 = vcmp.gt.f32.partialorder %v216_v32, 0.0 }
  0xc6   :  { %v240_v36 = vsel %vm224_vm5, %v197_v29, %v232_v33 }
  0xc7   :  { %v244_v37 = vpack.c.bf16 %v240_v36, %v238_v35  ;;  %v241_v39 = vsel %vm225_vm7, %v216_v32, %v233_v34 }
  0xc8   :  { %v245_v40 = vpack.c.bf16 %v241_v39, %v239_v38  ;;  %v498_v39 = vld [vmem:[%s1100_s5 + $0x8] sm:$0xff] }
  0xc9   :  { %391 = vmatmul.bf16.gmra.mxu2 %v244_v37 }
  0xca   :  { %410 = vmatmul.bf16.gmra.mxu3 %v245_v40 }
 0x13c   :  { %v387_v42 = vpop.f32.mrf.mxu2 }
 0x13d   :  { %v388_v43 = vadd.f32 %v731_v41, %v387_v42  ;;  %v406_v44 = vpop.f32.mrf.mxu3 }
 0x13f   :  { %v407_v45 = vadd.f32 %v406_v44, %v388_v43 }
 0x141   :  { %417 = vst.msk [vmem:[%s1104_s9] sm:$0xff] %vm416_vm8, %v407_v45  ;;  %v691_v46 = vmul.f32 -1.442695, %v407_v45  ;;  %v517_v56 = vmul.f32 %v1034_v52, %v407_v45 }
 0x143   :  { %735 = vpow2.f32 %v691_v46  ;;  %v521_v61 = vmul.f32 1.442695, %v517_v56 }
 0x144   :  { %v389_v47 = vpop.f32.mrf.mxu2 }
 0x145   :  { %v390_v48 = vadd.f32 %v731_v41, %v389_v47  ;;  %v408_v49 = vpop.f32.mrf.mxu3 }
 0x147   :  { %v409_v50 = vadd.f32 %v408_v49, %v390_v48 }
 0x149   :  { %v736_v51 = vpop.eup %735  ;;  %418 = vst.msk [vmem:[%s1104_s9 + $0x8] sm:$0xff] %vm416_vm8, %v409_v50  ;;  %v692_v53 = vmul.f32 -1.442695, %v409_v50  ;;  %v518_v4 = vmul.f32 %v1034_v52, %v409_v50 }
 0x14a   :  { %v433_v54 = vadd.f32 1.0, %v736_v51 }
 0x14b   :  { %737 = vpow2.f32 %v692_v53  ;;  %v523_v13 = vmul.f32 1.442695, %v518_v4 }
 0x14c   :  { %739 = vrcp.f32 %v433_v54  ;;  %v392_v55 = vpop.f32.mrf.mxu2  ;;  %v448_v6 = vand.u32 2147483648, %v433_v54  ;;  %v446_v9 = vand.u32 2147483647, %v433_v54  ;;  %vm442_vm10 = vweird.f32 %v433_v54 }
 0x14d   :  { %v393_v57 = vadd.f32 %v731_v41, %v392_v55  ;;  %v411_v58 = vpop.f32.mrf.mxu3 }
 0x14e   :  { %v449_v16 = vor.u32 1.1754944e-38, %v448_v6  ;;  %vm447_vm12 = vcmp.eq.f32.partialorder %v446_v9, 8.507059e+37  ;;  %v500_v9 = vld [vmem:[%s1100_s5 + $0x18] sm:$0xff] }
 0x14f   :  { %v412_v59 = vadd.f32 %v411_v58, %v393_v57  ;;  %v499_v58 = vld [vmem:[%s1100_s5 + $0x10] sm:$0xff] }
 0x151   :  { %v738_v60 = vpop.eup %737  ;;  %419 = vst.msk [vmem:[%s1104_s9 + $0x10] sm:$0xff] %vm416_vm8, %v412_v59  ;;  %v693_v62 = vmul.f32 -1.442695, %v412_v59  ;;  %v519_v27 = vmul.f32 %v1034_v52, %v412_v59 }
 0x152   :  { %v740_v63 = vpop.eup %739  ;;  %v434_v0 = vadd.f32 1.0, %v738_v60 }
 0x153   :  { %v438_v1 = vmul.f32 %v740_v63, %v433_v54  ;;  %741 = vpow2.f32 %v693_v62  ;;  %vm443_vm9 = vweird.f32 %v740_v63  ;;  %v525_v36 = vmul.f32 1.442695, %v519_v27 }
 0x154   :  { %743 = vrcp.f32 %v434_v0  ;;  %v394_v2 = vpop.f32.mrf.mxu2  ;;  %vm444_vm11 = vmor %vm442_vm10, %vm443_vm9  ;;  %v463_v29 = vand.u32 2147483648, %v434_v0  ;;  %v461_v32 = vand.u32 2147483647, %v434_v0  ;;  %vm457_vm14 = vweird.f32 %v434_v0 }
 0x155   :  { %v439_v3 = vsub.f32 1.0, %v438_v1  ;;  %745 = vpow2.f32 %v521_v61  ;;  %v395_v5 = vadd.f32 %v731_v41, %v394_v2  ;;  %v413_v7 = vpop.f32.mrf.mxu3 }
 0x156   :  { %v464_v38 = vor.u32 1.1754944e-38, %v463_v29  ;;  %vm462_vm0 = vcmp.eq.f32.partialorder %v461_v32, 8.507059e+37 }
 0x157   :  { %v440_v8 = vmul.f32 %v740_v63, %v439_v3  ;;  %v414_v10 = vadd.f32 %v413_v7, %v395_v5 }
 0x159   :  { %v742_v11 = vpop.eup %741  ;;  %v441_v12 = vadd.f32 %v740_v63, %v440_v8  ;;  %420 = vst.msk [vmem:[%s1104_s9 + $0x18] sm:$0xff] %vm416_vm8, %v414_v10  ;;  %v694_v14 = vmul.f32 -1.442695, %v414_v10  ;;  %v520_v49 = vmul.f32 %v1034_v52, %v414_v10 }
 0x15a   :  { %v744_v15 = vpop.eup %743  ;;  %v435_v19 = vadd.f32 1.0, %v742_v11 }
 0x15b   :  { %v746_v20 = vpop.eup %745  ;;  %v445_v21 = vsel %vm444_vm11, %v740_v63, %v441_v12  ;;  %v453_v23 = vmul.f32 %v744_v15, %v434_v0  ;;  %747 = vpow2.f32 %v694_v14  ;;  %vm458_vm13 = vweird.f32 %v744_v15 }
 0x15c   :  { %v450_v24 = vsel %vm447_vm12, %v449_v16, %v445_v21  ;;  %749 = vrcp.f32 %v435_v19  ;;  %v533_v28 = vmul.f32 %v746_v20, %v1053_v18  ;;  %vm459_vm15 = vmor %vm457_vm14, %vm458_vm13  ;;  %v478_v48 = vand.u32 2147483648, %v435_v19 }
 0x15d   :  { %v501_v25 = vadd.f32 %v497_v17, %v450_v24  ;;  %v454_v26 = vsub.f32 1.0, %v453_v23  ;;  %751 = vpow2.f32 %v523_v13  ;;  %v476_v53 = vand.u32 2147483647, %v435_v19 }
 0x15e   :  { %vm472_vm2 = vweird.f32 %v435_v19  ;;  %v479_v57 = vor.u32 1.1754944e-38, %v478_v48  ;;  %v527_v59 = vmul.f32 1.442695, %v520_v49 }
 0x15f   :  { %v509_v30 = vmul.f32 %v1058_v22, %v501_v25  ;;  %v455_v31 = vmul.f32 %v744_v15, %v454_v26  ;;  %vm477_vm4 = vcmp.eq.f32.partialorder %v476_v53, 8.507059e+37 }
 0x161   :  { %v748_v33 = vpop.eup %747  ;;  %v537_v34 = vadd.f32 %v533_v28, %v509_v30  ;;  %v456_v35 = vadd.f32 %v744_v15, %v455_v31 }
 0x162   :  { %v750_v37 = vpop.eup %749  ;;  %v436_v40 = vadd.f32 1.0, %v748_v33 }
 0x163   :  { %v752_v41 = vpop.eup %751  ;;  %541 = vst.msk [vmem:[%s1105_s10] sm:$0xff] %vm416_vm8, %v537_v34  ;;  %v460_v42 = vsel %vm459_vm15, %v744_v15, %v456_v35  ;;  %v468_v43 = vmul.f32 %v750_v37, %v435_v19  ;;  %vm473_vm1 = vweird.f32 %v750_v37 }
 0x164   :  { %v465_v44 = vsel %vm462_vm0, %v464_v38, %v460_v42  ;;  %753 = vrcp.f32 %v436_v40  ;;  %v534_v47 = vmul.f32 %v752_v41, %v1053_v18  ;;  %vm474_vm3 = vmor %vm472_vm2, %vm473_vm1  ;;  %v493_v2 = vand.u32 2147483648, %v436_v40 }
 0x165   :  { %v502_v45 = vadd.f32 %v498_v39, %v465_v44  ;;  %v469_v46 = vsub.f32 1.0, %v468_v43  ;;  %755 = vpow2.f32 %v525_v36  ;;  %v491_v5 = vand.u32 2147483647, %v436_v40 }
 0x166   :  { %757 = vpow2.f32 %v527_v59  ;;  %vm487_vm6 = vweird.f32 %v436_v40  ;;  %v494_v8 = vor.u32 1.1754944e-38, %v493_v2 }
 0x167   :  { %v510_v50 = vmul.f32 %v1058_v22, %v502_v45  ;;  %v470_v51 = vmul.f32 %v750_v37, %v469_v46  ;;  %vm492_vm9 = vcmp.eq.f32.partialorder %v491_v5, 8.507059e+37 }
 0x169   :  { %v538_v54 = vadd.f32 %v534_v47, %v510_v50  ;;  %v471_v55 = vadd.f32 %v750_v37, %v470_v51 }
 0x16a   :  { %v754_v56 = vpop.eup %753 }
 0x16b   :  { %v756_v60 = vpop.eup %755  ;;  %542 = vst.msk [vmem:[%s1105_s10 + $0x8] sm:$0xff] %vm416_vm8, %v538_v54  ;;  %v475_v52 = vsel %vm474_vm3, %v750_v37, %v471_v55  ;;  %v483_v61 = vmul.f32 %v754_v56, %v436_v40  ;;  %vm488_vm5 = vweird.f32 %v754_v56 }
 0x16c   :  { %v480_v62 = vsel %vm477_vm4, %v479_v57, %v475_v52  ;;  %v535_v1 = vmul.f32 %v756_v60, %v1053_v18  ;;  %vm489_vm7 = vmor %vm487_vm6, %vm488_vm5  ;;  %v758_v11 = vpop.eup %757 }
 0x16d   :  { %v503_v63 = vadd.f32 %v499_v58, %v480_v62  ;;  %v484_v0 = vsub.f32 1.0, %v483_v61  ;;  %v536_v15 = vmul.f32 %v758_v11, %v1053_v18 }
 0x16f   :  { %v511_v3 = vmul.f32 %v1058_v22, %v503_v63  ;;  %v485_v4 = vmul.f32 %v754_v56, %v484_v0 }
 0x171   :  { %v539_v6 = vadd.f32 %v535_v1, %v511_v3  ;;  %v486_v7 = vadd.f32 %v754_v56, %v485_v4 }
 0x173   :  { %543 = vst.msk [vmem:[%s1105_s10 + $0x10] sm:$0xff] %vm416_vm8, %v539_v6  ;;  %v490_v10 = vsel %vm489_vm7, %v754_v56, %v486_v7 }
 0x174   :  { %v495_v12 = vsel %vm492_vm9, %v494_v8, %v490_v10 }
 0x175   :  { %v504_v13 = vadd.f32 %v500_v9, %v495_v12 }
 0x177   :  { %v512_v14 = vmul.f32 %v1058_v22, %v504_v13 }
 0x179   :  { %v540_v16 = vadd.f32 %v536_v15, %v512_v14 }
 0x17b   :  { %544 = vst.msk [vmem:[%s1105_s10 + $0x18] sm:$0xff] %vm416_vm8, %v540_v16 }
 0x17c   :  { %553 = vsyncpa [#allocation3], 1 }
 0x17d   :  { %554 = vsyncpa [#allocation5], 1 }

// kernel: build_model_forward.33
= control target key start
LH: loop header
LB: loop body
LE: loop exit
PB: predicated region body
PF: predicated region fallthrough
CT: control target
= control target key end

     0   :  { %16 = vsyncpa [#allocation3], 0  ;;  %s2071_s0 = inlined_call_operand.vmem [shape: bf16[8,256], index: 0, kind: input, shape index: {}]   ;;  %s2072_s1 = inlined_call_operand.vmem [shape: bf16[256,512], index: 1, kind: input, shape index: {}]   ;;  %s2073_s2 = inlined_call_operand.vmem [shape: f32[1,512], index: 2, kind: input, shape index: {}]   ;;  %s2074_s3 = inlined_call_operand.vmem [shape: bf16[512,24], index: 3, kind: input, shape index: {}]   ;;  %s2075_s4 = inlined_call_operand.hbm [shape: f32[1,24], index: 4, kind: input, shape index: {}]   ;;  %s2076_s5 = inlined_call_operand.vmem [shape: f32[8,24], index: 5, kind: input, shape index: {}]   ;;  %s2077_s6 = inlined_call_operand.vmem [shape: f32[1,24], index: 6, kind: input, shape index: {}]   ;;  %s2078_s7 = inlined_call_operand.hbm [shape: f32[1,24], index: 7, kind: input, shape index: {}]   ;;  %s2079_s8 = inlined_call_operand.vmem [shape: f32[1,24], index: 8, kind: input, shape index: {}]   ;;  %s2080_s9 = inlined_call_operand.vmem [shape: f32[8,24], index: 9, kind: output, shape index: {0}]   ;;  %s2081_s10 = inlined_call_operand.vmem [shape: f32[8,24], index: 10, kind: output, shape index: {1}]  }
   0x1   :  { %s31_s15 = sshll.u32 %s2075_s4, 4  ;;  %s32_s15 = int_to_ptr.hbm [resolvable:$true] %s31_s15 }
   0x2   :  { %17 = vsyncpa [#allocation5], 0  ;;  %s1493_s16 = smov [#allocation2]   ;;  %s46_s20 = sshll.u32 %s2078_s7, 4  ;;  %s47_s20 = int_to_ptr.hbm [resolvable:$true] %s46_s20 }
   0x3   :  { %s33_s17 = sshll.u32 %s1493_s16, 4  ;;  %s1494_s21 = smov [#allocation4]   ;;  %s34_s17 = int_to_ptr.vmem [resolvable:$true] %s33_s17 }
   0x4   :  { %36 = dma.hbm_to_vmem [thread:$0]  %s32_s15, 16, %s34_s17, [#allocation3]  }
   0x5   :  { %s48_s22 = sshll.u32 %s1494_s21, 4  ;;  %s49_s22 = int_to_ptr.vmem [resolvable:$true] %s48_s22 }
   0x6   :  { %51 = dma.hbm_to_vmem [thread:$0]  %s47_s20, 16, %s49_s22, [#allocation5]  }
   0x7   :  { %1489 = dma.done.wait [#allocation3], 16  }
   0x8   :  { %1490 = vsyncadd [#allocation3], 4294967280 }
   0x9   :  { %1491 = dma.done.wait [#allocation5], 16  }
   0xa   :  { %1492 = vsyncadd [#allocation5], 4294967280  ;;  %v1062_v0 = vld [vmem:[%s2072_s1 + $0xe0] sm:$0xf]  ;;  %v1363_v1 = vld [vmem:[%s2072_s1 + $0xec] sm:$0xf0] }
   0xb   :  { %v1190_v2 = vld [vmem:[%s2072_s1 + $0x1e0] sm:$0xf]  ;;  %v1063_v3 = vor.u32 %v1363_v1, %v1062_v0  ;;  %v1395_v4 = vld [vmem:[%s2072_s1 + $0x1ec] sm:$0xf0]  ;;  %v1361_v5 = vld [vmem:[%s2072_s1 + $0xe4] sm:$0xf] }
   0xc   :  { %v1064_v6 = vld [vmem:[%s2072_s1 + $0xf0] sm:$0xf0]  ;;  %v1191_v7 = vor.u32 %v1395_v4, %v1190_v2  ;;  %v1393_v9 = vld [vmem:[%s2072_s1 + $0x1e4] sm:$0xf]  ;;  %v1046_v11 = vld [vmem:[%s2072_s1 + $0xc0] sm:$0xf] }
   0xd   :  { %v1067_v8 = vor.u32 %v1361_v5, %v1064_v6  ;;  %v1192_v10 = vld [vmem:[%s2072_s1 + $0x1f0] sm:$0xf0]  ;;  %464 = vmatpush.bf16.msra.mxu0 %v1063_v3  ;;  %v1359_v13 = vld [vmem:[%s2072_s1 + $0xcc] sm:$0xf0]  ;;  %v1174_v14 = vld [vmem:[%s2072_s1 + $0x1c0] sm:$0xf] }
   0xe   :  { %v1195_v12 = vor.u32 %v1393_v9, %v1192_v10  ;;  %v1391_v15 = vld [vmem:[%s2072_s1 + $0x1cc] sm:$0xf0]  ;;  %477 = vmatpush.bf16.msra.mxu1 %v1191_v7  ;;  %v1047_v16 = vor.u32 %v1359_v13, %v1046_v11  ;;  %v1357_v18 = vld [vmem:[%s2072_s1 + $0xc4] sm:$0xf]  ;;  %v1048_v19 = vld [vmem:[%s2072_s1 + $0xd0] sm:$0xf0] }
   0xf   :  { %490 = vmatpush.bf16.msra.mxu2 %v1067_v8  ;;  %v1175_v17 = vor.u32 %v1391_v15, %v1174_v14  ;;  %v1389_v20 = vld [vmem:[%s2072_s1 + $0x1c4] sm:$0xf]  ;;  %v1051_v21 = vor.u32 %v1357_v18, %v1048_v19  ;;  %v1176_v22 = vld [vmem:[%s2072_s1 + $0x1d0] sm:$0xf0]  ;;  %v1030_v23 = vld [vmem:[%s2072_s1 + $0xa0] sm:$0xf] }
  0x10   :  { %503 = vmatpush.bf16.msra.mxu3 %v1195_v12  ;;  %v1355_v24 = vld [vmem:[%s2072_s1 + $0xac] sm:$0xf0]  ;;  %v1179_v25 = vor.u32 %v1389_v20, %v1176_v22  ;;  %v1158_v26 = vld [vmem:[%s2072_s1 + $0x1a0] sm:$0xf]  ;;  %v1353_v28 = vld [vmem:[%s2072_s1 + $0xa4] sm:$0xf] }
  0x11   :  { %v1387_v27 = vld [vmem:[%s2072_s1 + $0x1ac] sm:$0xf0]  ;;  %465 = vmatpush.bf16.msra.mxu0 %v1047_v16  ;;  %v1031_v29 = vor.u32 %v1355_v24, %v1030_v23  ;;  %v1032_v30 = vld [vmem:[%s2072_s1 + $0xb0] sm:$0xf0]  ;;  %v1385_v31 = vld [vmem:[%s2072_s1 + $0x1a4] sm:$0xf] }
  0x12   :  { %v1160_v32 = vld [vmem:[%s2072_s1 + $0x1b0] sm:$0xf0]  ;;  %478 = vmatpush.bf16.msra.mxu1 %v1175_v17  ;;  %v1159_v33 = vor.u32 %v1387_v27, %v1158_v26  ;;  %v1035_v34 = vor.u32 %v1353_v28, %v1032_v30  ;;  %v1014_v35 = vld [vmem:[%s2072_s1 + $0x80] sm:$0xf]  ;;  %v1351_v36 = vld [vmem:[%s2072_s1 + $0x8c] sm:$0xf0] }
  0x13   :  { %491 = vmatpush.bf16.msra.mxu2 %v1051_v21  ;;  %v1142_v37 = vld [vmem:[%s2072_s1 + $0x180] sm:$0xf]  ;;  %v1163_v38 = vor.u32 %v1385_v31, %v1160_v32  ;;  %v1383_v39 = vld [vmem:[%s2072_s1 + $0x18c] sm:$0xf0]  ;;  %v1349_v40 = vld [vmem:[%s2072_s1 + $0x84] sm:$0xf]  ;;  %v1015_v44 = vor.u32 %v1351_v36, %v1014_v35 }
  0x14   :  { %504 = vmatpush.bf16.msra.mxu3 %v1179_v25  ;;  %v1016_v41 = vld [vmem:[%s2072_s1 + $0x90] sm:$0xf0]  ;;  %v1381_v42 = vld [vmem:[%s2072_s1 + $0x184] sm:$0xf]  ;;  %v1143_v45 = vor.u32 %v1383_v39, %v1142_v37  ;;  %v998_v47 = vld [vmem:[%s2072_s1 + $0x60] sm:$0xf] }
  0x15   :  { %v1144_v43 = vld [vmem:[%s2072_s1 + $0x190] sm:$0xf0]  ;;  %466 = vmatpush.bf16.msra.mxu0 %v1031_v29  ;;  %v1019_v46 = vor.u32 %v1349_v40, %v1016_v41  ;;  %v1347_v48 = vld [vmem:[%s2072_s1 + $0x6c] sm:$0xf0]  ;;  %v1126_v49 = vld [vmem:[%s2072_s1 + $0x160] sm:$0xf] }
  0x16   :  { %479 = vmatpush.bf16.msra.mxu1 %v1159_v33  ;;  %v1147_v50 = vor.u32 %v1381_v42, %v1144_v43  ;;  %v1379_v51 = vld [vmem:[%s2072_s1 + $0x16c] sm:$0xf0]  ;;  %v1345_v52 = vld [vmem:[%s2072_s1 + $0x64] sm:$0xf]  ;;  %v1000_v53 = vld [vmem:[%s2072_s1 + $0x70] sm:$0xf0]  ;;  %v999_v56 = vor.u32 %v1347_v48, %v998_v47 }
  0x17   :  { %492 = vmatpush.bf16.msra.mxu2 %v1035_v34  ;;  %v1377_v54 = vld [vmem:[%s2072_s1 + $0x164] sm:$0xf]  ;;  %v1128_v55 = vld [vmem:[%s2072_s1 + $0x170] sm:$0xf0]  ;;  %v1127_v57 = vor.u32 %v1379_v51, %v1126_v49  ;;  %v1003_v58 = vor.u32 %v1345_v52, %v1000_v53  ;;  %v982_v59 = vld [vmem:[%s2072_s1 + $0x40] sm:$0xf] }
  0x18   :  { %505 = vmatpush.bf16.msra.mxu3 %v1163_v38  ;;  %v1343_v60 = vld [vmem:[%s2072_s1 + $0x4c] sm:$0xf0]  ;;  %v1110_v61 = vld [vmem:[%s2072_s1 + $0x140] sm:$0xf]  ;;  %v1131_v62 = vor.u32 %v1377_v54, %v1128_v55  ;;  %v1341_v0 = vld [vmem:[%s2072_s1 + $0x44] sm:$0xf] }
  0x19   :  { %467 = vmatpush.bf16.msra.mxu0 %v1015_v44  ;;  %v1375_v63 = vld [vmem:[%s2072_s1 + $0x14c] sm:$0xf0]  ;;  %v984_v1 = vld [vmem:[%s2072_s1 + $0x50] sm:$0xf0]  ;;  %v1373_v2 = vld [vmem:[%s2072_s1 + $0x144] sm:$0xf]  ;;  %v983_v4 = vor.u32 %v1343_v60, %v982_v59 }
  0x1a   :  { %480 = vmatpush.bf16.msra.mxu1 %v1143_v45  ;;  %v1112_v3 = vld [vmem:[%s2072_s1 + $0x150] sm:$0xf0]  ;;  %v1111_v5 = vor.u32 %v1375_v63, %v1110_v61  ;;  %v987_v6 = vor.u32 %v1341_v0, %v984_v1  ;;  %v966_v7 = vld [vmem:[%s2072_s1 + $0x20] sm:$0xf]  ;;  %v1339_v8 = vld [vmem:[%s2072_s1 + $0x2c] sm:$0xf0] }
  0x1b   :  { %493 = vmatpush.bf16.msra.mxu2 %v1019_v46  ;;  %v1094_v9 = vld [vmem:[%s2072_s1 + $0x120] sm:$0xf]  ;;  %v1115_v10 = vor.u32 %v1373_v2, %v1112_v3  ;;  %v1371_v11 = vld [vmem:[%s2072_s1 + $0x12c] sm:$0xf0]  ;;  %v1337_v12 = vld [vmem:[%s2072_s1 + $0x24] sm:$0xf]  ;;  %v967_v16 = vor.u32 %v1339_v8, %v966_v7 }
  0x1c   :  { %506 = vmatpush.bf16.msra.mxu3 %v1147_v50  ;;  %v968_v13 = vld [vmem:[%s2072_s1 + $0x30] sm:$0xf0]  ;;  %v1369_v14 = vld [vmem:[%s2072_s1 + $0x124] sm:$0xf]  ;;  %v950_v17 = vld [vmem:[%s2072_s1] sm:$0xf]  ;;  %v1095_v20 = vor.u32 %v1371_v11, %v1094_v9 }
  0x1d   :  { %468 = vmatpush.bf16.msra.mxu0 %v999_v56  ;;  %v1096_v15 = vld [vmem:[%s2072_s1 + $0x130] sm:$0xf0]  ;;  %v1335_v18 = vld [vmem:[%s2072_s1 + $0xc] sm:$0xf0]  ;;  %v1078_v19 = vld [vmem:[%s2072_s1 + $0x100] sm:$0xf]  ;;  %v971_v21 = vor.u32 %v1337_v12, %v968_v13 }
  0x1e   :  { %481 = vmatpush.bf16.msra.mxu1 %v1127_v57  ;;  %v1367_v22 = vld [vmem:[%s2072_s1 + $0x10c] sm:$0xf0]  ;;  %v1333_v23 = vld [vmem:[%s2072_s1 + $0x4] sm:$0xf]  ;;  %v952_v24 = vld [vmem:[%s2072_s1 + $0x10] sm:$0xf0]  ;;  %v1099_v25 = vor.u32 %v1369_v14, %v1096_v15  ;;  %v951_v32 = vor.u32 %v1335_v18, %v950_v17 }
  0x1f   :  { %494 = vmatpush.bf16.msra.mxu2 %v1003_v58  ;;  %v1365_v26 = vld [vmem:[%s2072_s1 + $0x104] sm:$0xf]  ;;  %v1080_v27 = vld [vmem:[%s2072_s1 + $0x110] sm:$0xf0]  ;;  %v1070_v28 = vld [vmem:[%s2072_s1 + $0xe8] sm:$0xf]  ;;  %v1079_v37 = vor.u32 %v1367_v22, %v1078_v19  ;;  %v955_v38 = vor.u32 %v1333_v23, %v952_v24 }
  0x20   :  { %507 = vmatpush.bf16.msra.mxu3 %v1131_v62  ;;  %v1364_v29 = vld [vmem:[%s2072_s1 + $0xf4] sm:$0xf0]  ;;  %v1198_v30 = vld [vmem:[%s2072_s1 + $0x1e8] sm:$0xf]  ;;  %v62_v31 = vld [vmem:[%s2071_s0] sm:$0xff]  ;;  %v1083_v42 = vor.u32 %v1365_v26, %v1080_v27  ;;  %vm896_vm4 = vcmask 195584  }
  0x21   :  { %469 = vmatpush.bf16.msra.mxu0 %v983_v4  ;;  %v1396_v33 = vld [vmem:[%s2072_s1 + $0x1f4] sm:$0xf0]  ;;  %v1362_v34 = vld [vmem:[%s2072_s1 + $0xec] sm:$0xf]  ;;  %v1072_v35 = vld [vmem:[%s2072_s1 + $0xf8] sm:$0xf0]  ;;  %v138_v36 = vunpack.c.l.b16 %v62_v31  ;;  %v139_v41 = vunpack.c.h.b16 %v62_v31  ;;  %v1071_v43 = vor.u32 %v1364_v29, %v1070_v28 }
  0x22   :  { %482 = vmatpush.bf16.msra.mxu1 %v1111_v5  ;;  %v1394_v39 = vld [vmem:[%s2072_s1 + $0x1ec] sm:$0xf]  ;;  %v1200_v40 = vld [vmem:[%s2072_s1 + $0x1f8] sm:$0xf0]  ;;  %v1199_v44 = vor.u32 %v1396_v33, %v1198_v30  ;;  %v1075_v45 = vor.u32 %v1362_v34, %v1072_v35  ;;  %v1054_v46 = vld [vmem:[%s2072_s1 + $0xc8] sm:$0xf] }
  0x23   :  { %495 = vmatpush.bf16.msra.mxu2 %v987_v6  ;;  %v1360_v47 = vld [vmem:[%s2072_s1 + $0xd4] sm:$0xf0]  ;;  %v1182_v48 = vld [vmem:[%s2072_s1 + $0x1c8] sm:$0xf]  ;;  %v1203_v49 = vor.u32 %v1394_v39, %v1200_v40  ;;  %v1358_v51 = vld [vmem:[%s2072_s1 + $0xcc] sm:$0xf]  ;;  %v1793_v53 = vpack.c.b16 %v138_v36, %v138_v36  ;;  %v1801_v56 = vpack.c.b16 %v139_v41, %v139_v41 }
  0x24   :  { %508 = vmatpush.bf16.msra.mxu3 %v1115_v10  ;;  %v1392_v50 = vld [vmem:[%s2072_s1 + $0x1d4] sm:$0xf0]  ;;  %v1056_v52 = vld [vmem:[%s2072_s1 + $0xd8] sm:$0xf0]  ;;  %v1390_v54 = vld [vmem:[%s2072_s1 + $0x1cc] sm:$0xf]  ;;  %v1055_v57 = vor.u32 %v1360_v47, %v1054_v46 }
  0x25   :  { %470 = vmatpush.bf16.msra.mxu0 %v967_v16  ;;  %v1184_v55 = vld [vmem:[%s2072_s1 + $0x1d8] sm:$0xf0]  ;;  %v1183_v58 = vor.u32 %v1392_v50, %v1182_v48  ;;  %v1059_v59 = vor.u32 %v1358_v51, %v1056_v52  ;;  %v1038_v60 = vld [vmem:[%s2072_s1 + $0xa8] sm:$0xf]  ;;  %v1356_v61 = vld [vmem:[%s2072_s1 + $0xb4] sm:$0xf0] }
  0x26   :  { %483 = vmatpush.bf16.msra.mxu1 %v1095_v20  ;;  %v1166_v62 = vld [vmem:[%s2072_s1 + $0x1a8] sm:$0xf]  ;;  %v1187_v63 = vor.u32 %v1390_v54, %v1184_v55  ;;  %v1388_v0 = vld [vmem:[%s2072_s1 + $0x1b4] sm:$0xf0]  ;;  %v1354_v1 = vld [vmem:[%s2072_s1 + $0xac] sm:$0xf]  ;;  %v1039_v5 = vor.u32 %v1356_v61, %v1038_v60 }
  0x27   :  { %496 = vmatpush.bf16.msra.mxu2 %v971_v21  ;;  %v1040_v2 = vld [vmem:[%s2072_s1 + $0xb8] sm:$0xf0]  ;;  %v1386_v3 = vld [vmem:[%s2072_s1 + $0x1ac] sm:$0xf]  ;;  %v1167_v6 = vor.u32 %v1388_v0, %v1166_v62  ;;  %v1022_v8 = vld [vmem:[%s2072_s1 + $0x88] sm:$0xf] }
  0x28   :  { %509 = vmatpush.bf16.msra.mxu3 %v1099_v25  ;;  %v1168_v4 = vld [vmem:[%s2072_s1 + $0x1b8] sm:$0xf0]  ;;  %v1043_v7 = vor.u32 %v1354_v1, %v1040_v2  ;;  %v1352_v9 = vld [vmem:[%s2072_s1 + $0x94] sm:$0xf0]  ;;  %v1150_v10 = vld [vmem:[%s2072_s1 + $0x188] sm:$0xf] }
  0x29   :  { %471 = vmatpush.bf16.msra.mxu0 %v951_v32  ;;  %v1171_v11 = vor.u32 %v1386_v3, %v1168_v4  ;;  %v1384_v12 = vld [vmem:[%s2072_s1 + $0x194] sm:$0xf0]  ;;  %v1350_v13 = vld [vmem:[%s2072_s1 + $0x8c] sm:$0xf]  ;;  %v1024_v14 = vld [vmem:[%s2072_s1 + $0x98] sm:$0xf0]  ;;  %v1023_v17 = vor.u32 %v1352_v9, %v1022_v8 }
  0x2a   :  { %484 = vmatpush.bf16.msra.mxu1 %v1079_v37  ;;  %v1382_v15 = vld [vmem:[%s2072_s1 + $0x18c] sm:$0xf]  ;;  %v1152_v16 = vld [vmem:[%s2072_s1 + $0x198] sm:$0xf0]  ;;  %v1151_v18 = vor.u32 %v1384_v12, %v1150_v10  ;;  %v1027_v19 = vor.u32 %v1350_v13, %v1024_v14  ;;  %v1006_v20 = vld [vmem:[%s2072_s1 + $0x68] sm:$0xf] }
  0x2b   :  { %497 = vmatpush.bf16.msra.mxu2 %v955_v38  ;;  %v1348_v21 = vld [vmem:[%s2072_s1 + $0x74] sm:$0xf0]  ;;  %v1134_v22 = vld [vmem:[%s2072_s1 + $0x168] sm:$0xf]  ;;  %v1155_v23 = vor.u32 %v1382_v15, %v1152_v16  ;;  %v1346_v25 = vld [vmem:[%s2072_s1 + $0x6c] sm:$0xf] }
  0x2c   :  { %510 = vmatpush.bf16.msra.mxu3 %v1083_v42  ;;  %472 = vmatmul.bf16.vlgmr.msra.gmra.mxu0 %v1793_v53  ;;  %v1380_v24 = vld [vmem:[%s2072_s1 + $0x174] sm:$0xf0]  ;;  %v1008_v26 = vld [vmem:[%s2072_s1 + $0x78] sm:$0xf0]  ;;  %v1378_v27 = vld [vmem:[%s2072_s1 + $0x16c] sm:$0xf]  ;;  %v1007_v30 = vor.u32 %v1348_v21, %v1006_v20 }
  0x2d   :  { %516 = vmatpush.bf16.msrb.mxu0 %v1071_v43  ;;  %485 = vmatmul.bf16.vlgmr.msra.gmra.mxu1 %v1801_v56  ;;  %v1136_v28 = vld [vmem:[%s2072_s1 + $0x178] sm:$0xf0]  ;;  %v990_v29 = vld [vmem:[%s2072_s1 + $0x48] sm:$0xf]  ;;  %v1344_v31 = vld [vmem:[%s2072_s1 + $0x54] sm:$0xf0]  ;;  %v1135_v34 = vor.u32 %v1380_v24, %v1134_v22  ;;  %v1011_v35 = vor.u32 %v1346_v25, %v1008_v26 }
  0x2e   :  { %529 = vmatpush.bf16.msrb.mxu1 %v1199_v44  ;;  %498 = vmatmul.bf16.vlgmr.msra.gmra.mxu2 %v1793_v53  ;;  %v1118_v32 = vld [vmem:[%s2072_s1 + $0x148] sm:$0xf]  ;;  %v1376_v33 = vld [vmem:[%s2072_s1 + $0x154] sm:$0xf0]  ;;  %v1139_v36 = vor.u32 %v1378_v27, %v1136_v28  ;;  %v1342_v37 = vld [vmem:[%s2072_s1 + $0x4c] sm:$0xf]  ;;  %v991_v41 = vor.u32 %v1344_v31, %v990_v29 }
  0x2f   :  { %542 = vmatpush.bf16.msrb.mxu2 %v1075_v45  ;;  %511 = vmatmul.bf16.vlgmr.msra.gmra.mxu3 %v1801_v56  ;;  %v992_v38 = vld [vmem:[%s2072_s1 + $0x58] sm:$0xf0]  ;;  %v1374_v39 = vld [vmem:[%s2072_s1 + $0x14c] sm:$0xf]  ;;  %v1119_v42 = vor.u32 %v1376_v33, %v1118_v32  ;;  %v974_v44 = vld [vmem:[%s2072_s1 + $0x28] sm:$0xf] }
  0x30   :  { %555 = vmatpush.bf16.msrb.mxu3 %v1203_v49  ;;  %v1120_v40 = vld [vmem:[%s2072_s1 + $0x158] sm:$0xf0]  ;;  %v995_v43 = vor.u32 %v1342_v37, %v992_v38  ;;  %v1340_v45 = vld [vmem:[%s2072_s1 + $0x34] sm:$0xf0]  ;;  %v1102_v46 = vld [vmem:[%s2072_s1 + $0x128] sm:$0xf] }
  0x31   :  { %517 = vmatpush.bf16.msrb.mxu0 %v1055_v57  ;;  %v1123_v47 = vor.u32 %v1374_v39, %v1120_v40  ;;  %v1372_v48 = vld [vmem:[%s2072_s1 + $0x134] sm:$0xf0]  ;;  %v1338_v49 = vld [vmem:[%s2072_s1 + $0x2c] sm:$0xf]  ;;  %v976_v50 = vld [vmem:[%s2072_s1 + $0x38] sm:$0xf0]  ;;  %v975_v54 = vor.u32 %v1340_v45, %v974_v44 }
  0x32   :  { %530 = vmatpush.bf16.msrb.mxu1 %v1183_v58  ;;  %v1370_v51 = vld [vmem:[%s2072_s1 + $0x12c] sm:$0xf]  ;;  %v1104_v52 = vld [vmem:[%s2072_s1 + $0x138] sm:$0xf0]  ;;  %v1103_v55 = vor.u32 %v1372_v48, %v1102_v46  ;;  %v979_v57 = vor.u32 %v1338_v49, %v976_v50  ;;  %v958_v58 = vld [vmem:[%s2072_s1 + $0x8] sm:$0xf] }
  0x33   :  { %543 = vmatpush.bf16.msrb.mxu2 %v1059_v59  ;;  %v1336_v59 = vld [vmem:[%s2072_s1 + $0x14] sm:$0xf0]  ;;  %v1086_v60 = vld [vmem:[%s2072_s1 + $0x108] sm:$0xf]  ;;  %v1107_v61 = vor.u32 %v1370_v51, %v1104_v52  ;;  %v960_v0 = vld [vmem:[%s2072_s1 + $0x18] sm:$0xf0] }
  0x34   :  { %556 = vmatpush.bf16.msrb.mxu3 %v1187_v63  ;;  %v1368_v62 = vld [vmem:[%s2072_s1 + $0x114] sm:$0xf0]  ;;  %v1334_v63 = vld [vmem:[%s2072_s1 + $0xc] sm:$0xf]  ;;  %v1088_v2 = vld [vmem:[%s2072_s1 + $0x118] sm:$0xf0]  ;;  %v959_v3 = vor.u32 %v1336_v59, %v958_v58 }
  0x35   :  { %518 = vmatpush.bf16.msrb.mxu0 %v1039_v5  ;;  %v1366_v1 = vld [vmem:[%s2072_s1 + $0x10c] sm:$0xf]  ;;  %v1087_v4 = vor.u32 %v1368_v62, %v1086_v60  ;;  %v963_v5 = vor.u32 %v1334_v63, %v960_v0  ;;  %v1412_v8 = vld [vmem:[%s2074_s3 + $0x78] sm:$0xff]  ;;  %v1403_v9 = vld [vmem:[%s2074_s3 + $0x30] sm:$0xff] }
  0x36   :  { %531 = vmatpush.bf16.msrb.mxu1 %v1167_v6  ;;  %v1091_v6 = vor.u32 %v1366_v1, %v1088_v2  ;;  %v1411_v10 = vld [vmem:[%s2074_s3 + $0x70] sm:$0xff]  ;;  %v1410_v12 = vld [vmem:[%s2074_s3 + $0x68] sm:$0xff]  ;;  %v1401_v13 = vld [vmem:[%s2074_s3 + $0x20] sm:$0xff] }
  0x37   :  { %544 = vmatpush.bf16.msrb.mxu2 %v1043_v7  ;;  %v1404_v7 = vld [vmem:[%s2074_s3 + $0x38] sm:$0xff]  ;;  %v1399_v15 = vld [vmem:[%s2074_s3 + $0x10] sm:$0xff]  ;;  %v1397_v21 = vld [vmem:[%s2074_s3] sm:$0xff] }
  0x38   :  { %557 = vmatpush.bf16.msrb.mxu3 %v1171_v11  ;;  %v1402_v11 = vld [vmem:[%s2074_s3 + $0x28] sm:$0xff]  ;;  %v1408_v14 = vld [vmem:[%s2074_s3 + $0x58] sm:$0xff]  ;;  %v1407_v16 = vld [vmem:[%s2074_s3 + $0x50] sm:$0xff] }
  0x39   :  { %519 = vmatpush.bf16.msrb.mxu0 %v1023_v17  ;;  %v1420_v17 = vld [vmem:[%s2074_s3 + $0xb8] sm:$0xff]  ;;  %v1419_v20 = vld [vmem:[%s2074_s3 + $0xb0] sm:$0xff]  ;;  %v1418_v24 = vld [vmem:[%s2074_s3 + $0xa8] sm:$0xff] }
  0x3a   :  { %532 = vmatpush.bf16.msrb.mxu1 %v1151_v18  ;;  %v1398_v18 = vld [vmem:[%s2074_s3 + $0x8] sm:$0xff]  ;;  %v1428_v22 = vld [vmem:[%s2074_s3 + $0xf8] sm:$0xff]  ;;  %v1427_v25 = vld [vmem:[%s2074_s3 + $0xf0] sm:$0xff] }
  0x3b   :  { %545 = vmatpush.bf16.msrb.mxu2 %v1027_v19  ;;  %v1406_v19 = vld [vmem:[%s2074_s3 + $0x48] sm:$0xff]  ;;  %v1417_v26 = vld [vmem:[%s2074_s3 + $0xa0] sm:$0xff]  ;;  %v1416_v28 = vld [vmem:[%s2074_s3 + $0x98] sm:$0xff] }
  0x3c   :  { %558 = vmatpush.bf16.msrb.mxu3 %v1155_v23  ;;  %v1405_v23 = vld [vmem:[%s2074_s3 + $0x40] sm:$0xff]  ;;  %v1426_v27 = vld [vmem:[%s2074_s3 + $0xe8] sm:$0xff]  ;;  %v1424_v33 = vld [vmem:[%s2074_s3 + $0xd8] sm:$0xff] }
  0x3d   :  { %520 = vmatpush.bf16.msrb.mxu0 %v1007_v30  ;;  %v1425_v29 = vld [vmem:[%s2074_s3 + $0xe0] sm:$0xff]  ;;  %v1415_v30 = vld [vmem:[%s2074_s3 + $0x90] sm:$0xff]  ;;  %v1422_v44 = vld [vmem:[%s2074_s3 + $0xc8] sm:$0xff] }
  0x3e   :  { %533 = vmatpush.bf16.msrb.mxu1 %v1135_v34  ;;  %v127_v31 = vld [vmem:[%s2073_s2] sm:$0xf]  ;;  %v1414_v34 = vld [vmem:[%s2074_s3 + $0x88] sm:$0xff]  ;;  %v1423_v38 = vld [vmem:[%s2074_s3 + $0xd0] sm:$0xff] }
  0x3f   :  { %546 = vmatpush.bf16.msrb.mxu2 %v1011_v35  ;;  %v129_v32 = vperm.slane %v127_v31, 0  ;;  %v130_v39 = vperm.slane %v127_v31, 1  ;;  %v1421_v52 = vld [vmem:[%s2074_s3 + $0xc0] sm:$0xff]  ;;  %v131_v60 = vperm.slane %v127_v31, 2  ;;  %v132_v1 = vperm.slane %v127_v31, 3 }
  0x40   :  { %559 = vmatpush.bf16.msrb.mxu3 %v1139_v36 }
  0x41   :  { %521 = vmatpush.bf16.msrb.mxu0 %v991_v41  ;;  %v1413_v41 = vld [vmem:[%s2074_s3 + $0x80] sm:$0xff] }
  0x42   :  { %534 = vmatpush.bf16.msrb.mxu1 %v1119_v42 }
  0x43   :  { %547 = vmatpush.bf16.msrb.mxu2 %v995_v43 }
  0x44   :  { %560 = vmatpush.bf16.msrb.mxu3 %v1123_v47 }
  0x45   :  { %522 = vmatpush.bf16.msrb.mxu0 %v975_v54 }
  0x46   :  { %535 = vmatpush.bf16.msrb.mxu1 %v1103_v55 }
  0x47   :  { %548 = vmatpush.bf16.msrb.mxu2 %v979_v57 }
  0x48   :  { %561 = vmatpush.bf16.msrb.mxu3 %v1107_v61 }
  0x49   :  { %523 = vmatpush.bf16.msrb.mxu0 %v959_v3 }
  0x4a   :  { %536 = vmatpush.bf16.msrb.mxu1 %v1087_v4 }
  0x4b   :  { %549 = vmatpush.bf16.msrb.mxu2 %v963_v5 }
  0x4c   :  { %562 = vmatpush.bf16.msrb.mxu3 %v1091_v6  ;;  %524 = vmatmul.bf16.vlgmr.msrb.gmra.mxu0 %v1793_v53 }
  0x4d   :  { %844 = vmatpush.bf16.msra.mxu0 %v1404_v7  ;;  %537 = vmatmul.bf16.vlgmr.msrb.gmra.mxu1 %v1801_v56 }
  0x4e   :  { %857 = vmatpush.bf16.msra.mxu1 %v1412_v8  ;;  %550 = vmatmul.bf16.vlgmr.msrb.gmra.mxu2 %v1793_v53  ;;  %v1409_v53 = vld [vmem:[%s2074_s3 + $0x60] sm:$0xff] }
  0x4f   :  { %563 = vmatmul.bf16.vlgmr.msrb.gmra.mxu3 %v1801_v56  ;;  %v1400_v56 = vld [vmem:[%s2074_s3 + $0x18] sm:$0xff]  ;;  %870 = vmatpush.bf16.msra.mxu2 %v1420_v17 }
  0x50   :  { %883 = vmatpush.bf16.msra.mxu3 %v1428_v22 }
  0x51   :  { %845 = vmatpush.bf16.msra.mxu0 %v1403_v9 }
  0x52   :  { %858 = vmatpush.bf16.msra.mxu1 %v1411_v10 }
  0x53   :  { %871 = vmatpush.bf16.msra.mxu2 %v1419_v20 }
  0x54   :  { %884 = vmatpush.bf16.msra.mxu3 %v1427_v25 }
  0x55   :  { %846 = vmatpush.bf16.msra.mxu0 %v1402_v11 }
  0x56   :  { %859 = vmatpush.bf16.msra.mxu1 %v1410_v12 }
  0x57   :  { %872 = vmatpush.bf16.msra.mxu2 %v1418_v24 }
  0x58   :  { %885 = vmatpush.bf16.msra.mxu3 %v1426_v27 }
  0x59   :  { %847 = vmatpush.bf16.msra.mxu0 %v1401_v13 }
  0x5a   :  { %860 = vmatpush.bf16.msra.mxu1 %v1409_v53 }
  0x5b   :  { %873 = vmatpush.bf16.msra.mxu2 %v1417_v26 }
  0x5c   :  { %886 = vmatpush.bf16.msra.mxu3 %v1425_v29 }
  0x5d   :  { %848 = vmatpush.bf16.msra.mxu0 %v1400_v56 }
  0x5e   :  { %861 = vmatpush.bf16.msra.mxu1 %v1408_v14 }
  0x5f   :  { %874 = vmatpush.bf16.msra.mxu2 %v1416_v28 }
  0x60   :  { %887 = vmatpush.bf16.msra.mxu3 %v1424_v33 }
  0x61   :  { %849 = vmatpush.bf16.msra.mxu0 %v1399_v15 }
  0x62   :  { %862 = vmatpush.bf16.msra.mxu1 %v1407_v16 }
  0x63   :  { %875 = vmatpush.bf16.msra.mxu2 %v1415_v30  ;;  %v1433_v30 = vld [vmem:[%s2079_s8] ss:$0 sm:$0xff] }
  0x64   :  { %888 = vmatpush.bf16.msra.mxu3 %v1423_v38 }
  0x65   :  { %850 = vmatpush.bf16.msra.mxu0 %v1398_v18  ;;  %v1431_v18 = vld [vmem:[#allocation2] ss:$0 sm:$0xff] }
  0x66   :  { %863 = vmatpush.bf16.msra.mxu1 %v1406_v19 }
  0x67   :  { %876 = vmatpush.bf16.msra.mxu2 %v1414_v34 }
  0x68   :  { %889 = vmatpush.bf16.msra.mxu3 %v1422_v44  ;;  %v1434_v44 = vld [vmem:[#allocation4] ss:$0 sm:$0xff] }
  0x69   :  { %851 = vmatpush.bf16.msra.mxu0 %v1397_v21 }
  0x6a   :  { %864 = vmatpush.bf16.msra.mxu1 %v1405_v23 }
  0x6b   :  { %877 = vmatpush.bf16.msra.mxu2 %v1413_v41  ;;  %v917_v41 = vld [vmem:[%s2076_s5] sm:$0xff] }
  0x6c   :  { %890 = vmatpush.bf16.msra.mxu3 %v1421_v52 }
  0xa9   :  { %v473_v35 = vpop.f32.mrf.mxu0 }
  0xaa   :  { %v474_v36 = vadd.f32 %v473_v35, %v129_v32  ;;  %v486_v37 = vpop.f32.mrf.mxu1 }
  0xac   :  { %v487_v40 = vadd.f32 %v486_v37, %v474_v36 }
  0xae   :  { %vm568_vm0 = vcmp.gt.f32.partialorder %v487_v40, 0.0  ;;  %v572_v42 = vmul.f32 0.1, %v487_v40 }
  0xb0   :  { %v576_v47 = vsel %vm568_vm0, %v487_v40, %v572_v42 }
  0xb1   :  { %v499_v43 = vpop.f32.mrf.mxu2  ;;  %v580_v48 = vpack.c.bf16 %v576_v47, %v576_v47  ;;  %v475_v50 = vpop.f32.mrf.mxu0 }
  0xb2   :  { %v500_v45 = vadd.f32 %v499_v43, %v130_v39  ;;  %v512_v46 = vpop.f32.mrf.mxu3  ;;  %v488_v51 = vpop.f32.mrf.mxu1  ;;  %v1432_v43 = vld [vmem:[%s2077_s6] ss:$0 sm:$0xff] }
  0xb3   :  { %852 = vmatmul.bf16.vlgmr.msra.gmra.mxu0 %v580_v48 }
  0xb4   :  { %v513_v49 = vadd.f32 %v512_v46, %v500_v45 }
  0xb6   :  { %vm569_vm1 = vcmp.gt.f32.partialorder %v513_v49, 0.0  ;;  %v573_v54 = vmul.f32 0.1, %v513_v49 }
  0xb8   :  { %v577_v55 = vsel %vm569_vm1, %v513_v49, %v573_v54 }
  0xb9   :  { %v581_v57 = vpack.c.bf16 %v577_v55, %v577_v55  ;;  %v501_v58 = vpop.f32.mrf.mxu2 }
  0xba   :  { %v514_v59 = vpop.f32.mrf.mxu3 }
  0xbb   :  { %865 = vmatmul.bf16.vlgmr.msra.gmra.mxu1 %v581_v57 }
  0xc9   :  { %v525_v61 = vpop.f32.mrf.mxu0 }
  0xca   :  { %v526_v62 = vadd.f32 %v525_v61, %v131_v60  ;;  %v538_v63 = vpop.f32.mrf.mxu1 }
  0xcc   :  { %v539_v0 = vadd.f32 %v538_v63, %v526_v62 }
  0xce   :  { %vm570_vm2 = vcmp.gt.f32.partialorder %v539_v0, 0.0  ;;  %v574_v2 = vmul.f32 0.1, %v539_v0 }
  0xd0   :  { %v578_v3 = vsel %vm570_vm2, %v539_v0, %v574_v2 }
  0xd1   :  { %v551_v4 = vpop.f32.mrf.mxu2  ;;  %v582_v5 = vpack.c.bf16 %v578_v3, %v578_v3  ;;  %v527_v8 = vpop.f32.mrf.mxu0 }
  0xd2   :  { %v552_v6 = vadd.f32 %v551_v4, %v132_v1  ;;  %v564_v7 = vpop.f32.mrf.mxu3  ;;  %v540_v9 = vpop.f32.mrf.mxu1 }
  0xd3   :  { %878 = vmatmul.bf16.vlgmr.msra.gmra.mxu2 %v582_v5 }
  0xd4   :  { %v565_v10 = vadd.f32 %v564_v7, %v552_v6 }
  0xd6   :  { %vm571_vm3 = vcmp.gt.f32.partialorder %v565_v10, 0.0  ;;  %v575_v11 = vmul.f32 0.1, %v565_v10 }
  0xd8   :  { %v579_v12 = vsel %vm571_vm3, %v565_v10, %v575_v11 }
  0xd9   :  { %v583_v13 = vpack.c.bf16 %v579_v12, %v579_v12  ;;  %v553_v53 = vpop.f32.mrf.mxu2 }
  0xda   :  { %v566_v56 = vpop.f32.mrf.mxu3 }
  0xdb   :  { %891 = vmatmul.bf16.vlgmr.msra.gmra.mxu3 %v583_v13 }
 0x130   :  { %v853_v14 = vpop.f32.mrf.mxu0 }
 0x131   :  { %v854_v19 = vadd.f32 %v1431_v18, %v853_v14 }
 0x138   :  { %v866_v15 = vpop.f32.mrf.mxu1  ;;  %v855_v16 = vpop.f32.mrf.mxu0 }
 0x139   :  { %v867_v21 = vadd.f32 %v866_v15, %v854_v19 }
 0x140   :  { %v868_v17 = vpop.f32.mrf.mxu1 }
 0x156   :  { %v879_v20 = vpop.f32.mrf.mxu2 }
 0x157   :  { %v880_v22 = vadd.f32 %v879_v20, %v867_v21 }
 0x15e   :  { %v892_v23 = vpop.f32.mrf.mxu3  ;;  %v881_v25 = vpop.f32.mrf.mxu2 }
 0x15f   :  { %v893_v24 = vadd.f32 %v892_v23, %v880_v22 }
 0x161   :  { %897 = vst.msk [vmem:[%s2080_s9] sm:$0xff] %vm896_vm4, %v893_v24  ;;  %v1332_v26 = vmul.f32 -1.442695, %v893_v24  ;;  %v928_v31 = vmul.f32 %v1433_v30, %v893_v24 }
 0x163   :  { %1435 = vpow2.f32 %v1332_v26  ;;  %v929_v33 = vmul.f32 1.442695, %v928_v31 }
 0x166   :  { %v894_v27 = vpop.f32.mrf.mxu3 }
 0x169   :  { %v1436_v28 = vpop.eup %1435 }
 0x16a   :  { %v901_v29 = vadd.f32 1.0, %v1436_v28 }
 0x16c   :  { %1437 = vrcp.f32 %v901_v29  ;;  %v913_v36 = vand.u32 2147483648, %v901_v29  ;;  %v911_v38 = vand.u32 2147483647, %v901_v29  ;;  %vm907_vm6 = vweird.f32 %v901_v29 }
 0x16d   :  { %1439 = vpow2.f32 %v929_v33 }
 0x16e   :  { %v914_v40 = vor.u32 1.1754944e-38, %v913_v36  ;;  %vm912_vm8 = vcmp.eq.f32.partialorder %v911_v38, 8.507059e+37 }
 0x172   :  { %v1438_v32 = vpop.eup %1437 }
 0x173   :  { %v903_v34 = vmul.f32 %v1438_v32, %v901_v29  ;;  %vm908_vm5 = vweird.f32 %v1438_v32  ;;  %v1440_v45 = vpop.eup %1439 }
 0x174   :  { %vm909_vm7 = vmor %vm907_vm6, %vm908_vm5  ;;  %v935_v49 = vmul.f32 %v1440_v45, %v1434_v44 }
 0x175   :  { %v904_v35 = vsub.f32 1.0, %v903_v34 }
 0x177   :  { %v905_v37 = vmul.f32 %v1438_v32, %v904_v35 }
 0x179   :  { %v906_v39 = vadd.f32 %v1438_v32, %v905_v37 }
 0x17b   :  { %v910_v42 = vsel %vm909_vm7, %v1438_v32, %v906_v39 }
 0x17c   :  { %v915_v46 = vsel %vm912_vm8, %v914_v40, %v910_v42 }
 0x17d   :  { %v918_v47 = vadd.f32 %v917_v41, %v915_v46 }
 0x17f   :  { %v923_v48 = vmul.f32 %v1432_v43, %v918_v47 }
 0x181   :  { %v936_v50 = vadd.f32 %v935_v49, %v923_v48 }
 0x183   :  { %937 = vst.msk [vmem:[%s2081_s10] sm:$0xff] %vm896_vm4, %v936_v50 }
 0x184   :  { %946 = vsyncpa [#allocation3], 1 }
 0x185   :  { %947 = vsyncpa [#allocation5], 1 }

// kernel: build_model_forward.31
= control target key start
LH: loop header
LB: loop body
LE: loop exit
PB: predicated region body
PF: predicated region fallthrough
CT: control target
= control target key end

     0   :  { %16 = vsyncpa [#allocation3], 0  ;;  %s1138_s16 = smov [#allocation2]   ;;  %s1604_s0 = inlined_call_operand.vmem [shape: bf16[128,64], index: 0, kind: input, shape index: {}]   ;;  %s1605_s1 = inlined_call_operand.vmem [shape: bf16[64,128], index: 1, kind: input, shape index: {}]   ;;  %s1606_s2 = inlined_call_operand.vmem [shape: f32[1,128], index: 2, kind: input, shape index: {}]   ;;  %s1607_s3 = inlined_call_operand.vmem [shape: bf16[128,24], index: 3, kind: input, shape index: {}]   ;;  %s1608_s4 = inlined_call_operand.vmem [shape: f32[1,24], index: 4, kind: input, shape index: {}]   ;;  %s1609_s5 = inlined_call_operand.vmem [shape: f32[128,24], index: 5, kind: input, shape index: {}]   ;;  %s1610_s6 = inlined_call_operand.vmem [shape: f32[1,24], index: 6, kind: input, shape index: {}]   ;;  %s1611_s7 = inlined_call_operand.hbm [shape: f32[1,24], index: 7, kind: input, shape index: {}]   ;;  %s1612_s8 = inlined_call_operand.vmem [shape: f32[1,24], index: 8, kind: input, shape index: {}]   ;;  %s1613_s9 = inlined_call_operand.vmem [shape: f32[128,24], index: 9, kind: output, shape index: {0}]   ;;  %s1614_s10 = inlined_call_operand.vmem [shape: f32[128,24], index: 10, kind: output, shape index: {1}]  }
   0x1   :  { %s36_s15 = sshll.u32 %s1611_s7, 4  ;;  %s38_s17 = sshll.u32 %s1138_s16, 4  ;;  %s37_s15 = int_to_ptr.hbm [resolvable:$true] %s36_s15  ;;  %s39_s17 = int_to_ptr.vmem [resolvable:$true] %s38_s17 }
   0x2   :  { %41 = dma.hbm_to_vmem [thread:$0]  %s37_s15, 16, %s39_s17, [#allocation3]  }
   0x3   :  { %1136 = dma.done.wait [#allocation3], 16  }
   0x4   :  { %1137 = vsyncadd [#allocation3], 4294967280  ;;  %v989_v0 = vld [vmem:[%s1605_s1 + $0x18] sm:$0xff]  ;;  %v988_v1 = vld [vmem:[%s1605_s1 + $0x10] sm:$0xff]  ;;  %vm141_vm0 = vcmask 523264  }
   0x5   :  { %170 = vmatpush.bf16.msra.mxu0 %v989_v0  ;;  %998 = vmatpush.bf16.msra.mxu3 %v989_v0  ;;  %v987_v2 = vld [vmem:[%s1605_s1 + $0x8] sm:$0xff]  ;;  %v986_v3 = vld [vmem:[%s1605_s1] sm:$0xff]  ;;  %v980_v6 = vld [vmem:[%s1604_s0 + $0x10] sm:$0xff] }
   0x6   :  { %v978_v4 = vld [vmem:[%s1604_s0] sm:$0xff]  ;;  %v979_v5 = vld [vmem:[%s1604_s0 + $0x8] sm:$0xff]  ;;  %v997_v8 = vld [vmem:[%s1607_s3 + $0x38] sm:$0xff] }
   0x7   :  { %v983_v7 = vld [vmem:[%s1604_s0 + $0x28] sm:$0xff]  ;;  %339 = vmatpush.bf16.msra.mxu1 %v997_v8  ;;  %v996_v9 = vld [vmem:[%s1607_s3 + $0x30] sm:$0xff]  ;;  %1002 = vmatpush.bf16.msra.mxu2 %v997_v8  ;;  %v994_v11 = vld [vmem:[%s1607_s3 + $0x20] sm:$0xff] }
   0x8   :  { %v995_v10 = vld [vmem:[%s1607_s3 + $0x28] sm:$0xff]  ;;  %v981_v12 = vld [vmem:[%s1604_s0 + $0x18] sm:$0xff]  ;;  %v984_v13 = vld [vmem:[%s1604_s0 + $0x30] sm:$0xff] }
   0x9   :  { %171 = vmatpush.bf16.msra.mxu0 %v988_v1  ;;  %999 = vmatpush.bf16.msra.mxu3 %v988_v1  ;;  %v982_v14 = vld [vmem:[%s1604_s0 + $0x20] sm:$0xff]  ;;  %v985_v15 = vld [vmem:[%s1604_s0 + $0x38] sm:$0xff]  ;;  %v992_v17 = vld [vmem:[%s1607_s3 + $0x10] sm:$0xff] }
   0xa   :  { %v993_v16 = vld [vmem:[%s1607_s3 + $0x18] sm:$0xff]  ;;  %v991_v18 = vld [vmem:[%s1607_s3 + $0x8] sm:$0xff]  ;;  %v990_v19 = vld [vmem:[%s1607_s3] sm:$0xff] }
   0xb   :  { %340 = vmatpush.bf16.msra.mxu1 %v996_v9  ;;  %1003 = vmatpush.bf16.msra.mxu2 %v996_v9  ;;  %v1268_v21 = vld [vmem:[%s1606_s2] ss:$0 sm:$0xff] }
   0xd   :  { %172 = vmatpush.bf16.msra.mxu0 %v987_v2  ;;  %1000 = vmatpush.bf16.msra.mxu3 %v987_v2 }
   0xf   :  { %341 = vmatpush.bf16.msra.mxu1 %v995_v10  ;;  %1004 = vmatpush.bf16.msra.mxu2 %v995_v10 }
  0x11   :  { %173 = vmatpush.bf16.msra.mxu0 %v986_v3  ;;  %1001 = vmatpush.bf16.msra.mxu3 %v986_v3 }
  0x13   :  { %342 = vmatpush.bf16.msra.mxu1 %v994_v11  ;;  %1005 = vmatpush.bf16.msra.mxu2 %v994_v11 }
  0x14   :  { %922 = vmatmul.msk.bf16.vlgmr.msra.gmra.mxu0 %vm141_vm0, %v978_v4  ;;  %927 = vmatmul.msk.bf16.vlgmr.msra.gmra.mxu3 %vm141_vm0, %v983_v7 }
  0x17   :  { %343 = vmatpush.bf16.msra.mxu1 %v993_v16  ;;  %1006 = vmatpush.bf16.msra.mxu2 %v993_v16 }
  0x1b   :  { %344 = vmatpush.bf16.msra.mxu1 %v992_v17  ;;  %1007 = vmatpush.bf16.msra.mxu2 %v992_v17 }
  0x1f   :  { %345 = vmatpush.bf16.msra.mxu1 %v991_v18  ;;  %1008 = vmatpush.bf16.msra.mxu2 %v991_v18 }
  0x23   :  { %346 = vmatpush.bf16.msra.mxu1 %v990_v19  ;;  %1009 = vmatpush.bf16.msra.mxu2 %v990_v19 }
  0x24   :  { %923 = vmatmul.msk.bf16.gmra.mxu0 %vm141_vm0, %v979_v5  ;;  %928 = vmatmul.msk.bf16.gmra.mxu3 %vm141_vm0, %v984_v13 }
  0x34   :  { %924 = vmatmul.msk.bf16.gmra.mxu0 %vm141_vm0, %v980_v6  ;;  %929 = vmatmul.msk.bf16.gmra.mxu3 %vm141_vm0, %v985_v15 }
  0x44   :  { %925 = vmatmul.msk.bf16.gmra.mxu0 %vm141_vm0, %v981_v12 }
  0x54   :  { %926 = vmatmul.msk.bf16.gmra.mxu0 %vm141_vm0, %v982_v14 }
  0x91   :  { %v175_v20 = vpop.f32.mrf.mxu0 }
  0x92   :  { %v176_v22 = vadd.f32 %v1268_v21, %v175_v20 }
  0x94   :  { %v231_v24 = vmul.f32 0.1, %v176_v22  ;;  %vm215_vm1 = vcmp.gt.f32.partialorder %v176_v22, 0.0 }
  0x96   :  { %v247_v27 = vsel %vm215_vm1, %v176_v22, %v231_v24  ;;  %vm388_vm1 = vcmask 195584  }
  0x97   :  { %v200_v57 = vpop.f32.mrf.mxu3 }
  0x98   :  { %v201_v5 = vadd.f32 %v1268_v21, %v200_v57 }
  0x99   :  { %v177_v23 = vpop.f32.mrf.mxu0 }
  0x9a   :  { %v178_v25 = vadd.f32 %v1268_v21, %v177_v23  ;;  %v241_v7 = vmul.f32 0.1, %v201_v5  ;;  %vm225_vm11 = vcmp.gt.f32.partialorder %v201_v5, 0.0 }
  0x9c   :  { %v232_v26 = vmul.f32 0.1, %v178_v25  ;;  %vm216_vm2 = vcmp.gt.f32.partialorder %v178_v25, 0.0  ;;  %v257_v9 = vsel %vm225_vm11, %v201_v5, %v241_v7 }
  0x9e   :  { %v248_v28 = vsel %vm216_vm2, %v178_v25, %v232_v26 }
  0x9f   :  { %v263_v29 = vpack.c.bf16 %v248_v28, %v247_v27  ;;  %v202_v61 = vpop.f32.mrf.mxu3 }
  0xa0   :  { %v203_v6 = vadd.f32 %v1268_v21, %v202_v61  ;;  %v709_v61 = vld [vmem:[%s1609_s5] sm:$0xff] }
  0xa1   :  { %v180_v30 = vpop.f32.mrf.mxu0  ;;  %347 = vmatmul.bf16.vlgmr.msra.gmra.mxu1 %v263_v29 }
  0xa2   :  { %v181_v31 = vadd.f32 %v1268_v21, %v180_v30  ;;  %v242_v8 = vmul.f32 0.1, %v203_v6  ;;  %vm226_vm12 = vcmp.gt.f32.partialorder %v203_v6, 0.0  ;;  %v1289_v30 = vld [vmem:[%s1608_s4] ss:$0 sm:$0xff] }
  0xa4   :  { %v233_v33 = vmul.f32 0.1, %v181_v31  ;;  %vm217_vm3 = vcmp.gt.f32.partialorder %v181_v31, 0.0  ;;  %v258_v10 = vsel %vm226_vm12, %v203_v6, %v242_v8 }
  0xa5   :  { %v268_v12 = vpack.c.bf16 %v258_v10, %v257_v9 }
  0xa6   :  { %v249_v36 = vsel %vm217_vm3, %v181_v31, %v233_v33 }
  0xa7   :  { %v205_v4 = vpop.f32.mrf.mxu3 }
  0xa8   :  { %v206_v13 = vadd.f32 %v1268_v21, %v205_v4 }
  0xa9   :  { %v182_v32 = vpop.f32.mrf.mxu0 }
  0xaa   :  { %v183_v34 = vadd.f32 %v1268_v21, %v182_v32  ;;  %v243_v16 = vmul.f32 0.1, %v206_v13  ;;  %vm227_vm13 = vcmp.gt.f32.partialorder %v206_v13, 0.0 }
  0xac   :  { %v234_v35 = vmul.f32 0.1, %v183_v34  ;;  %vm218_vm4 = vcmp.gt.f32.partialorder %v183_v34, 0.0  ;;  %v259_v18 = vsel %vm227_vm13, %v206_v13, %v243_v16 }
  0xae   :  { %v250_v37 = vsel %vm218_vm4, %v183_v34, %v234_v35 }
  0xaf   :  { %v264_v38 = vpack.c.bf16 %v250_v37, %v249_v36  ;;  %v207_v11 = vpop.f32.mrf.mxu3  ;;  %v1300_v36 = vld [vmem:[%s1612_s8] ss:$0 sm:$0xff] }
  0xb0   :  { %v208_v14 = vadd.f32 %v1268_v21, %v207_v11 }
  0xb1   :  { %v185_v39 = vpop.f32.mrf.mxu0  ;;  %352 = vmatmul.bf16.gmra.mxu1 %v264_v38 }
  0xb2   :  { %v186_v40 = vadd.f32 %v1268_v21, %v185_v39  ;;  %v244_v17 = vmul.f32 0.1, %v208_v14  ;;  %vm228_vm14 = vcmp.gt.f32.partialorder %v208_v14, 0.0 }
  0xb4   :  { %v235_v42 = vmul.f32 0.1, %v186_v40  ;;  %vm219_vm5 = vcmp.gt.f32.partialorder %v186_v40, 0.0  ;;  %v260_v19 = vsel %vm228_vm14, %v208_v14, %v244_v17 }
  0xb5   :  { %v269_v20 = vpack.c.bf16 %v260_v19, %v259_v18 }
  0xb6   :  { %v251_v45 = vsel %vm219_vm5, %v186_v40, %v235_v42 }
  0xb7   :  { %v210_v15 = vpop.f32.mrf.mxu3 }
  0xb8   :  { %v211_v23 = vadd.f32 %v1268_v21, %v210_v15 }
  0xb9   :  { %v187_v41 = vpop.f32.mrf.mxu0 }
  0xba   :  { %v188_v43 = vadd.f32 %v1268_v21, %v187_v41  ;;  %v245_v25 = vmul.f32 0.1, %v211_v23  ;;  %vm229_vm15 = vcmp.gt.f32.partialorder %v211_v23, 0.0 }
  0xbc   :  { %v236_v44 = vmul.f32 0.1, %v188_v43  ;;  %vm220_vm6 = vcmp.gt.f32.partialorder %v188_v43, 0.0  ;;  %v261_v27 = vsel %vm229_vm15, %v211_v23, %v245_v25  ;;  %v710_v23 = vld [vmem:[%s1609_s5 + $0x8] sm:$0xff] }
  0xbe   :  { %v252_v46 = vsel %vm220_vm6, %v188_v43, %v236_v44 }
  0xbf   :  { %v265_v47 = vpack.c.bf16 %v252_v46, %v251_v45  ;;  %v212_v22 = vpop.f32.mrf.mxu3 }
  0xc0   :  { %v213_v24 = vadd.f32 %v1268_v21, %v212_v22 }
  0xc1   :  { %v190_v48 = vpop.f32.mrf.mxu0  ;;  %357 = vmatmul.bf16.gmra.mxu1 %v265_v47 }
  0xc2   :  { %v191_v49 = vadd.f32 %v1268_v21, %v190_v48  ;;  %v246_v26 = vmul.f32 0.1, %v213_v24  ;;  %vm230_vm0 = vcmp.gt.f32.partialorder %v213_v24, 0.0 }
  0xc4   :  { %v237_v51 = vmul.f32 0.1, %v191_v49  ;;  %vm221_vm7 = vcmp.gt.f32.partialorder %v191_v49, 0.0  ;;  %v262_v28 = vsel %vm230_vm0, %v213_v24, %v246_v26 }
  0xc5   :  { %v270_v29 = vpack.c.bf16 %v262_v28, %v261_v27 }
  0xc6   :  { %v253_v54 = vsel %vm221_vm7, %v191_v49, %v237_v51 }
  0xc9   :  { %v192_v50 = vpop.f32.mrf.mxu0 }
  0xca   :  { %v193_v52 = vadd.f32 %v1268_v21, %v192_v50 }
  0xcc   :  { %v238_v53 = vmul.f32 0.1, %v193_v52  ;;  %vm222_vm8 = vcmp.gt.f32.partialorder %v193_v52, 0.0 }
  0xce   :  { %v254_v55 = vsel %vm222_vm8, %v193_v52, %v238_v53 }
  0xcf   :  { %v266_v56 = vpack.c.bf16 %v254_v55, %v253_v54 }
  0xd1   :  { %v195_v58 = vpop.f32.mrf.mxu0  ;;  %362 = vmatmul.bf16.gmra.mxu1 %v266_v56 }
  0xd2   :  { %v196_v59 = vadd.f32 %v1268_v21, %v195_v58 }
  0xd4   :  { %v239_v62 = vmul.f32 0.1, %v196_v59  ;;  %vm223_vm9 = vcmp.gt.f32.partialorder %v196_v59, 0.0 }
  0xd6   :  { %v255_v1 = vsel %vm223_vm9, %v196_v59, %v239_v62  ;;  %v1321_v62 = vld [vmem:[#allocation2] ss:$0 sm:$0xff] }
  0xd9   :  { %v197_v60 = vpop.f32.mrf.mxu0 }
  0xda   :  { %v198_v63 = vadd.f32 %v1268_v21, %v197_v60 }
  0xdc   :  { %v240_v0 = vmul.f32 0.1, %v198_v63  ;;  %vm224_vm10 = vcmp.gt.f32.partialorder %v198_v63, 0.0 }
  0xde   :  { %v256_v2 = vsel %vm224_vm10, %v198_v63, %v240_v0 }
  0xdf   :  { %v267_v3 = vpack.c.bf16 %v256_v2, %v255_v1  ;;  %v1328_v2 = vld [vmem:[%s1610_s6] ss:$0 sm:$0xff] }
  0xe1   :  { %367 = vmatmul.bf16.vlgmr.msra.gmra.mxu2 %v267_v3 }
  0xf1   :  { %372 = vmatmul.bf16.gmra.mxu2 %v268_v12 }
 0x101   :  { %377 = vmatmul.bf16.gmra.mxu2 %v269_v20 }
 0x111   :  { %382 = vmatmul.bf16.gmra.mxu2 %v270_v29 }
 0x11e   :  { %v348_v31 = vpop.f32.mrf.mxu1 }
 0x11f   :  { %v349_v32 = vadd.f32 %v1289_v30, %v348_v31 }
 0x121   :  { %389 = vst.msk [vmem:[%s1613_s9] sm:$0xff] %vm388_vm1, %v349_v32  ;;  %v962_v21 = vmul.f32 -1.442695, %v349_v32  ;;  %v765_v39 = vmul.f32 %v1300_v36, %v349_v32 }
 0x123   :  { %1016 = vpow2.f32 %v962_v21  ;;  %v781_v43 = vmul.f32 1.442695, %v765_v39 }
 0x126   :  { %v350_v33 = vpop.f32.mrf.mxu1 }
 0x127   :  { %v351_v34 = vadd.f32 %v1289_v30, %v350_v33 }
 0x129   :  { %v1017_v35 = vpop.eup %1016  ;;  %390 = vst.msk [vmem:[%s1613_s9 + $0x8] sm:$0xff] %vm388_vm1, %v351_v34  ;;  %v963_v37 = vmul.f32 -1.442695, %v351_v34  ;;  %v766_v49 = vmul.f32 %v1300_v36, %v351_v34 }
 0x12a   :  { %v453_v38 = vadd.f32 1.0, %v1017_v35 }
 0x12b   :  { %1018 = vpow2.f32 %v963_v37  ;;  %v783_v57 = vmul.f32 1.442695, %v766_v49 }
 0x12c   :  { %1020 = vrcp.f32 %v453_v38  ;;  %v480_v50 = vand.u32 2147483648, %v453_v38  ;;  %v478_v53 = vand.u32 2147483647, %v453_v38  ;;  %vm474_vm3 = vweird.f32 %v453_v38 }
 0x12e   :  { %v353_v40 = vpop.f32.mrf.mxu1  ;;  %v481_v60 = vor.u32 1.1754944e-38, %v480_v50  ;;  %vm479_vm5 = vcmp.eq.f32.partialorder %v478_v53, 8.507059e+37 }
 0x12f   :  { %v354_v41 = vadd.f32 %v1289_v30, %v353_v40 }
 0x131   :  { %v1019_v42 = vpop.eup %1018  ;;  %391 = vst.msk [vmem:[%s1613_s9 + $0x10] sm:$0xff] %vm388_vm1, %v354_v41  ;;  %v964_v44 = vmul.f32 -1.442695, %v354_v41  ;;  %v767_v5 = vmul.f32 %v1300_v36, %v354_v41 }
 0x132   :  { %v1021_v45 = vpop.eup %1020  ;;  %v454_v46 = vadd.f32 1.0, %v1019_v42 }
 0x133   :  { %v470_v47 = vmul.f32 %v1021_v45, %v453_v38  ;;  %1022 = vpow2.f32 %v964_v44  ;;  %vm475_vm2 = vweird.f32 %v1021_v45  ;;  %v785_v15 = vmul.f32 1.442695, %v767_v5 }
 0x134   :  { %1024 = vrcp.f32 %v454_v46  ;;  %vm476_vm4 = vmor %vm474_vm3, %vm475_vm2  ;;  %v493_v9 = vand.u32 2147483647, %v454_v46  ;;  %v495_v10 = vand.u32 2147483648, %v454_v46  ;;  %vm489_vm7 = vweird.f32 %v454_v46 }
 0x135   :  { %v471_v48 = vsub.f32 1.0, %v470_v47  ;;  %1026 = vpow2.f32 %v781_v43 }
 0x136   :  { %v355_v51 = vpop.f32.mrf.mxu1  ;;  %vm494_vm9 = vcmp.eq.f32.partialorder %v493_v9, 8.507059e+37  ;;  %v496_v22 = vor.u32 1.1754944e-38, %v495_v10 }
 0x137   :  { %v472_v52 = vmul.f32 %v1021_v45, %v471_v48  ;;  %v356_v54 = vadd.f32 %v1289_v30, %v355_v51 }
 0x139   :  { %v1023_v55 = vpop.eup %1022  ;;  %v473_v56 = vadd.f32 %v1021_v45, %v472_v52  ;;  %392 = vst.msk [vmem:[%s1613_s9 + $0x18] sm:$0xff] %vm388_vm1, %v356_v54  ;;  %v965_v58 = vmul.f32 -1.442695, %v356_v54  ;;  %v768_v28 = vmul.f32 %v1300_v36, %v356_v54 }
 0x13a   :  { %v1025_v59 = vpop.eup %1024  ;;  %v1323_v63 = vadd.f32 1.0, %v1023_v55 }
 0x13b   :  { %v1027_v0 = vpop.eup %1026  ;;  %v477_v1 = vsel %vm476_vm4, %v1021_v45, %v473_v56  ;;  %v485_v3 = vmul.f32 %v1025_v59, %v454_v46  ;;  %1028 = vpow2.f32 %v965_v58  ;;  %vm490_vm6 = vweird.f32 %v1025_v59  ;;  %v711_v46 = vld [vmem:[%s1609_s5 + $0x10] sm:$0xff] }
 0x13c   :  { %v482_v4 = vsel %vm479_vm5, %v481_v60, %v477_v1  ;;  %1030 = vrcp.f32 %v1323_v63  ;;  %v817_v8 = vmul.f32 %v1027_v0, %v1321_v62  ;;  %vm491_vm8 = vmor %vm489_vm7, %vm490_vm6  ;;  %v508_v33 = vand.u32 2147483647, %v1323_v63 }
 0x13d   :  { %v725_v6 = vadd.f32 %v709_v61, %v482_v4  ;;  %v486_v7 = vsub.f32 1.0, %v485_v3  ;;  %1032 = vpow2.f32 %v783_v57  ;;  %v510_v34 = vand.u32 2147483648, %v1323_v63 }
 0x13e   :  { %v358_v11 = vpop.f32.mrf.mxu1  ;;  %v787_v39 = vmul.f32 1.442695, %v768_v28  ;;  %vm504_vm11 = vweird.f32 %v1323_v63  ;;  %vm509_vm13 = vcmp.eq.f32.partialorder %v508_v33, 8.507059e+37 }
 0x13f   :  { %v745_v12 = vmul.f32 %v1328_v2, %v725_v6  ;;  %v487_v13 = vmul.f32 %v1025_v59, %v486_v7  ;;  %v359_v14 = vadd.f32 %v1289_v30, %v358_v11  ;;  %v511_v45 = vor.u32 1.1754944e-38, %v510_v34  ;;  %v712_v7 = vld [vmem:[%s1609_s5 + $0x18] sm:$0xff] }
 0x141   :  { %v1029_v16 = vpop.eup %1028  ;;  %v833_v17 = vadd.f32 %v817_v8, %v745_v12  ;;  %v488_v18 = vadd.f32 %v1025_v59, %v487_v13  ;;  %393 = vst.msk [vmem:[%s1613_s9 + $0x20] sm:$0xff] %vm388_vm1, %v359_v14  ;;  %v966_v19 = vmul.f32 -1.442695, %v359_v14  ;;  %v769_v55 = vmul.f32 %v1300_v36, %v359_v14 }
 0x142   :  { %v1031_v20 = vpop.eup %1030  ;;  %v1342_v24 = vadd.f32 1.0, %v1029_v16 }
 0x143   :  { %v1033_v25 = vpop.eup %1032  ;;  %849 = vst.msk [vmem:[%s1614_s10] sm:$0xff] %vm388_vm1, %v833_v17  ;;  %v492_v26 = vsel %vm491_vm8, %v1025_v59, %v488_v18  ;;  %v500_v27 = vmul.f32 %v1031_v20, %v1323_v63  ;;  %1034 = vpow2.f32 %v966_v19  ;;  %vm505_vm10 = vweird.f32 %v1031_v20 }
 0x144   :  { %v497_v29 = vsel %vm494_vm9, %v496_v22, %v492_v26  ;;  %1036 = vrcp.f32 %v1342_v24  ;;  %v818_v21 = vmul.f32 %v1033_v25, %v1321_v62  ;;  %vm506_vm12 = vmor %vm504_vm11, %vm505_vm10  ;;  %v525_v57 = vand.u32 2147483648, %v1342_v24 }
 0x145   :  { %v726_v31 = vadd.f32 %v710_v23, %v497_v29  ;;  %v501_v32 = vsub.f32 1.0, %v500_v27  ;;  %1038 = vpow2.f32 %v785_v15  ;;  %v523_v61 = vand.u32 2147483647, %v1342_v24  ;;  %v713_v29 = vld [vmem:[%s1609_s5 + $0x20] sm:$0xff] }
 0x146   :  { %v360_v35 = vpop.f32.mrf.mxu1  ;;  %1040 = vpow2.f32 %v787_v39  ;;  %vm519_vm15 = vweird.f32 %v1342_v24  ;;  %v789_v4 = vmul.f32 1.442695, %v769_v55  ;;  %v526_v6 = vor.u32 1.1754944e-38, %v525_v57 }
 0x147   :  { %v746_v37 = vmul.f32 %v1328_v2, %v726_v31  ;;  %v502_v38 = vmul.f32 %v1031_v20, %v501_v32  ;;  %v361_v40 = vadd.f32 %v1289_v30, %v360_v35  ;;  %vm524_vm2 = vcmp.eq.f32.partialorder %v523_v61, 8.507059e+37 }
 0x149   :  { %v1035_v41 = vpop.eup %1034  ;;  %v834_v42 = vadd.f32 %v818_v21, %v746_v37  ;;  %v503_v43 = vadd.f32 %v1031_v20, %v502_v38  ;;  %394 = vst.msk [vmem:[%s1613_s9 + $0x28] sm:$0xff] %vm388_vm1, %v361_v40  ;;  %v967_v48 = vmul.f32 -1.442695, %v361_v40  ;;  %v770_v23 = vmul.f32 %v1300_v36, %v361_v40 }
 0x14a   :  { %v1037_v44 = vpop.eup %1036  ;;  %v1360_v47 = vadd.f32 1.0, %v1035_v41 }
 0x14b   :  { %v1039_v49 = vpop.eup %1038  ;;  %850 = vst.msk [vmem:[%s1614_s10 + $0x8] sm:$0xff] %vm388_vm1, %v834_v42  ;;  %v507_v50 = vsel %vm506_vm12, %v1031_v20, %v503_v43  ;;  %v515_v51 = vmul.f32 %v1037_v44, %v1342_v24  ;;  %vm520_vm14 = vweird.f32 %v1037_v44  ;;  %v791_v37 = vmul.f32 1.442695, %v770_v23 }
 0x14c   :  { %v512_v52 = vsel %vm509_vm13, %v511_v45, %v507_v50  ;;  %1042 = vrcp.f32 %v1360_v47  ;;  %v819_v56 = vmul.f32 %v1039_v49, %v1321_v62  ;;  %v1041_v0 = vpop.eup %1040  ;;  %vm521_vm0 = vmor %vm519_vm15, %vm520_vm14  ;;  %v540_v17 = vand.u32 2147483648, %v1360_v47 }
 0x14d   :  { %v727_v53 = vadd.f32 %v711_v46, %v512_v52  ;;  %v516_v54 = vsub.f32 1.0, %v515_v51  ;;  %1044 = vpow2.f32 %v967_v48  ;;  %v820_v16 = vmul.f32 %v1041_v0, %v1321_v62 }
 0x14e   :  { %v363_v58 = vpop.f32.mrf.mxu1  ;;  %v538_v22 = vand.u32 2147483647, %v1360_v47  ;;  %vm534_vm4 = vweird.f32 %v1360_v47  ;;  %v541_v28 = vor.u32 1.1754944e-38, %v540_v17 }
 0x14f   :  { %v747_v59 = vmul.f32 %v1328_v2, %v727_v53  ;;  %v517_v60 = vmul.f32 %v1037_v44, %v516_v54  ;;  %v364_v63 = vadd.f32 %v1289_v30, %v363_v58  ;;  %v714_v54 = vld [vmem:[%s1609_s5 + $0x28] sm:$0xff] }
 0x150   :  { %vm539_vm6 = vcmp.eq.f32.partialorder %v538_v22, 8.507059e+37 }
 0x151   :  { %v835_v1 = vadd.f32 %v819_v56, %v747_v59  ;;  %v518_v3 = vadd.f32 %v1037_v44, %v517_v60  ;;  %395 = vst.msk [vmem:[%s1613_s9 + $0x30] sm:$0xff] %vm388_vm1, %v364_v63  ;;  %v968_v8 = vmul.f32 -1.442695, %v364_v63  ;;  %v771_v40 = vmul.f32 %v1300_v36, %v364_v63 }
 0x152   :  { %v1043_v5 = vpop.eup %1042 }
 0x153   :  { %v1045_v9 = vpop.eup %1044  ;;  %851 = vst.msk [vmem:[%s1614_s10 + $0x10] sm:$0xff] %vm388_vm1, %v835_v1  ;;  %v522_v10 = vsel %vm521_vm0, %v1037_v44, %v518_v3  ;;  %v530_v11 = vmul.f32 %v1043_v5, %v1360_v47  ;;  %1046 = vpow2.f32 %v968_v8  ;;  %vm535_vm3 = vweird.f32 %v1043_v5 }
 0x154   :  { %v527_v12 = vsel %vm524_vm2, %v526_v6, %v522_v10  ;;  %v458_v13 = vadd.f32 1.0, %v1045_v9  ;;  %1048 = vpow2.f32 %v789_v4  ;;  %vm536_vm5 = vmor %vm534_vm4, %vm535_vm3  ;;  %v793_v49 = vmul.f32 1.442695, %v771_v40 }
 0x155   :  { %v728_v14 = vadd.f32 %v712_v7, %v527_v12  ;;  %v531_v15 = vsub.f32 1.0, %v530_v11  ;;  %v715_v12 = vld [vmem:[%s1609_s5 + $0x30] sm:$0xff] }
 0x156   :  { %1050 = vrcp.f32 %v458_v13  ;;  %v365_v18 = vpop.f32.mrf.mxu1  ;;  %v555_v44 = vand.u32 2147483648, %v458_v13  ;;  %v553_v47 = vand.u32 2147483647, %v458_v13  ;;  %vm549_vm8 = vweird.f32 %v458_v13 }
 0x157   :  { %v748_v19 = vmul.f32 %v1328_v2, %v728_v14  ;;  %v532_v20 = vmul.f32 %v1043_v5, %v531_v15  ;;  %v366_v24 = vadd.f32 %v1289_v30, %v365_v18 }
 0x158   :  { %v556_v53 = vor.u32 1.1754944e-38, %v555_v44  ;;  %vm554_vm10 = vcmp.eq.f32.partialorder %v553_v47, 8.507059e+37 }
 0x159   :  { %v836_v25 = vadd.f32 %v820_v16, %v748_v19  ;;  %v533_v26 = vadd.f32 %v1043_v5, %v532_v20  ;;  %v1047_v27 = vpop.eup %1046  ;;  %396 = vst.msk [vmem:[%s1613_s9 + $0x38] sm:$0xff] %vm388_vm1, %v366_v24  ;;  %v969_v31 = vmul.f32 -1.442695, %v366_v24  ;;  %v772_v0 = vmul.f32 %v1300_v36, %v366_v24 }
 0x15a   :  { %v1049_v32 = vpop.eup %1048  ;;  %v459_v33 = vadd.f32 1.0, %v1047_v27 }
 0x15b   :  { %852 = vst.msk [vmem:[%s1614_s10 + $0x18] sm:$0xff] %vm388_vm1, %v836_v25  ;;  %v537_v21 = vsel %vm536_vm5, %v1043_v5, %v533_v26  ;;  %1052 = vpow2.f32 %v969_v31  ;;  %v821_v42 = vmul.f32 %v1049_v32, %v1321_v62 }
 0x15c   :  { %v1051_v34 = vpop.eup %1050  ;;  %v542_v35 = vsel %vm539_vm6, %v541_v28, %v537_v21  ;;  %1054 = vrcp.f32 %v459_v33  ;;  %v570_v63 = vand.u32 2147483648, %v459_v33  ;;  %v568_v4 = vand.u32 2147483647, %v459_v33 }
 0x15d   :  { %v729_v38 = vadd.f32 %v713_v29, %v542_v35  ;;  %v545_v39 = vmul.f32 %v1051_v34, %v458_v13  ;;  %1056 = vpow2.f32 %v791_v37  ;;  %vm550_vm7 = vweird.f32 %v1051_v34 }
 0x15e   :  { %vm551_vm9 = vmor %vm549_vm8, %vm550_vm7  ;;  %vm564_vm12 = vweird.f32 %v459_v33  ;;  %v571_v11 = vor.u32 1.1754944e-38, %v570_v63  ;;  %v795_v13 = vmul.f32 1.442695, %v772_v0  ;;  %vm569_vm14 = vcmp.eq.f32.partialorder %v568_v4, 8.507059e+37 }
 0x15f   :  { %v749_v41 = vmul.f32 %v1328_v2, %v729_v38  ;;  %v546_v43 = vsub.f32 1.0, %v545_v39 }
 0x161   :  { %v837_v45 = vadd.f32 %v821_v42, %v749_v41  ;;  %v547_v46 = vmul.f32 %v1051_v34, %v546_v43  ;;  %v1053_v48 = vpop.eup %1052 }
 0x162   :  { %v1055_v50 = vpop.eup %1054  ;;  %v1416_v52 = vadd.f32 1.0, %v1053_v48 }
 0x163   :  { %853 = vst.msk [vmem:[%s1614_s10 + $0x20] sm:$0xff] %vm388_vm1, %v837_v45  ;;  %v548_v51 = vadd.f32 %v1051_v34, %v547_v46  ;;  %v560_v55 = vmul.f32 %v1055_v50, %v459_v33  ;;  %v1057_v58 = vpop.eup %1056  ;;  %vm565_vm11 = vweird.f32 %v1055_v50 }
 0x164   :  { %v368_v56 = vpop.f32.mrf.mxu2  ;;  %1058 = vrcp.f32 %v1416_v52  ;;  %v822_v6 = vmul.f32 %v1057_v58, %v1321_v62  ;;  %vm566_vm13 = vmor %vm564_vm12, %vm565_vm11  ;;  %v585_v24 = vand.u32 2147483648, %v1416_v52  ;;  %v583_v28 = vand.u32 2147483647, %v1416_v52 }
 0x165   :  { %v552_v57 = vsel %vm551_vm9, %v1051_v34, %v548_v51  ;;  %v561_v60 = vsub.f32 1.0, %v560_v55  ;;  %1060 = vpow2.f32 %v793_v49  ;;  %v369_v1 = vadd.f32 %v1289_v30, %v368_v56  ;;  %v716_v34 = vld [vmem:[%s1609_s5 + $0x38] sm:$0xff] }
 0x166   :  { %v557_v59 = vsel %vm554_vm10, %v556_v53, %v552_v57  ;;  %vm579_vm0 = vweird.f32 %v1416_v52  ;;  %v586_v33 = vor.u32 1.1754944e-38, %v585_v24  ;;  %vm584_vm3 = vcmp.eq.f32.partialorder %v583_v28, 8.507059e+37 }
 0x167   :  { %v730_v61 = vadd.f32 %v714_v54, %v557_v59  ;;  %v562_v3 = vmul.f32 %v1055_v50, %v561_v60  ;;  %397 = vst.msk [vmem:[%s1613_s9 + $0x40] sm:$0xff] %vm388_vm1, %v369_v1  ;;  %v970_v7 = vmul.f32 -1.442695, %v369_v1  ;;  %v773_v40 = vmul.f32 %v1300_v36, %v369_v1 }
 0x169   :  { %v750_v5 = vmul.f32 %v1328_v2, %v730_v61  ;;  %v563_v8 = vadd.f32 %v1055_v50, %v562_v3  ;;  %1062 = vpow2.f32 %v970_v7  ;;  %v797_v48 = vmul.f32 1.442695, %v773_v40 }
 0x16a   :  { %v1059_v9 = vpop.eup %1058  ;;  %1064 = vpow2.f32 %v795_v13 }
 0x16b   :  { %v838_v10 = vadd.f32 %v822_v6, %v750_v5  ;;  %v1061_v14 = vpop.eup %1060  ;;  %v567_v15 = vsel %vm566_vm13, %v1055_v50, %v563_v8  ;;  %v575_v16 = vmul.f32 %v1059_v9, %v1416_v52  ;;  %vm580_vm15 = vweird.f32 %v1059_v9  ;;  %v717_v6 = vld [vmem:[%s1609_s5 + $0x40] sm:$0xff] }
 0x16c   :  { %v370_v17 = vpop.f32.mrf.mxu2  ;;  %v572_v18 = vsel %vm569_vm14, %v571_v11, %v567_v15  ;;  %v823_v23 = vmul.f32 %v1061_v14, %v1321_v62  ;;  %vm581_vm2 = vmor %vm579_vm0, %vm580_vm15 }
 0x16d   :  { %854 = vst.msk [vmem:[%s1614_s10 + $0x28] sm:$0xff] %vm388_vm1, %v838_v10  ;;  %v371_v19 = vadd.f32 %v1289_v30, %v370_v17  ;;  %v731_v20 = vadd.f32 %v715_v12, %v572_v18  ;;  %v576_v22 = vsub.f32 1.0, %v575_v16 }
 0x16f   :  { %398 = vst.msk [vmem:[%s1613_s9 + $0x48] sm:$0xff] %vm388_vm1, %v371_v19  ;;  %v971_v25 = vmul.f32 -1.442695, %v371_v19  ;;  %v751_v26 = vmul.f32 %v1328_v2, %v731_v20  ;;  %v577_v27 = vmul.f32 %v1059_v9, %v576_v22  ;;  %v1063_v29 = vpop.eup %1062  ;;  %v774_v51 = vmul.f32 %v1300_v36, %v371_v19 }
 0x170   :  { %v461_v21 = vadd.f32 1.0, %v1063_v29  ;;  %v1065_v38 = vpop.eup %1064 }
 0x171   :  { %1066 = vpow2.f32 %v971_v25  ;;  %v839_v31 = vadd.f32 %v823_v23, %v751_v26  ;;  %v578_v32 = vadd.f32 %v1059_v9, %v577_v27  ;;  %v824_v46 = vmul.f32 %v1065_v38, %v1321_v62  ;;  %v718_v26 = vld [vmem:[%s1609_s5 + $0x48] sm:$0xff] }
 0x172   :  { %1068 = vrcp.f32 %v461_v21  ;;  %v600_v56 = vand.u32 2147483648, %v461_v21  ;;  %v799_v57 = vmul.f32 1.442695, %v774_v51  ;;  %v598_v60 = vand.u32 2147483647, %v461_v21  ;;  %v719_v51 = vld [vmem:[%s1609_s5 + $0x50] sm:$0xff] }
 0x173   :  { %855 = vst.msk [vmem:[%s1614_s10 + $0x30] sm:$0xff] %vm388_vm1, %v839_v31  ;;  %v582_v35 = vsel %vm581_vm2, %v1059_v9, %v578_v32  ;;  %vm594_vm5 = vweird.f32 %v461_v21 }
 0x174   :  { %v373_v37 = vpop.f32.mrf.mxu2  ;;  %v587_v39 = vsel %vm584_vm3, %v586_v33, %v582_v35  ;;  %v601_v5 = vor.u32 1.1754944e-38, %v600_v56  ;;  %vm599_vm7 = vcmp.eq.f32.partialorder %v598_v60, 8.507059e+37 }
 0x175   :  { %v374_v41 = vadd.f32 %v1289_v30, %v373_v37  ;;  %v732_v42 = vadd.f32 %v716_v34, %v587_v39 }
 0x177   :  { %v1067_v43 = vpop.eup %1066  ;;  %399 = vst.msk [vmem:[%s1613_s9 + $0x50] sm:$0xff] %vm388_vm1, %v374_v41  ;;  %v972_v44 = vmul.f32 -1.442695, %v374_v41  ;;  %v752_v45 = vmul.f32 %v1328_v2, %v732_v42  ;;  %v775_v1 = vmul.f32 %v1300_v36, %v374_v41 }
 0x178   :  { %v462_v47 = vadd.f32 1.0, %v1067_v43  ;;  %v1069_v49 = vpop.eup %1068 }
 0x179   :  { %1070 = vpow2.f32 %v972_v44  ;;  %v840_v50 = vadd.f32 %v824_v46, %v752_v45  ;;  %v590_v52 = vmul.f32 %v1069_v49, %v461_v21  ;;  %vm595_vm4 = vweird.f32 %v1069_v49 }
 0x17a   :  { %1072 = vrcp.f32 %v462_v47  ;;  %vm596_vm6 = vmor %vm594_vm5, %vm595_vm4  ;;  %v613_v11 = vand.u32 2147483647, %v462_v47  ;;  %v615_v12 = vand.u32 2147483648, %v462_v47  ;;  %v801_v13 = vmul.f32 1.442695, %v775_v1 }
 0x17b   :  { %856 = vst.msk [vmem:[%s1614_s10 + $0x38] sm:$0xff] %vm388_vm1, %v840_v50  ;;  %v591_v54 = vsub.f32 1.0, %v590_v52  ;;  %1074 = vpow2.f32 %v797_v48  ;;  %vm609_vm9 = vweird.f32 %v462_v47 }
 0x17c   :  { %v375_v53 = vpop.f32.mrf.mxu2  ;;  %vm614_vm11 = vcmp.eq.f32.partialorder %v613_v11, 8.507059e+37  ;;  %v616_v25 = vor.u32 1.1754944e-38, %v615_v12 }
 0x17d   :  { %v376_v55 = vadd.f32 %v1289_v30, %v375_v53  ;;  %v592_v59 = vmul.f32 %v1069_v49, %v591_v54 }
 0x17f   :  { %v1071_v58 = vpop.eup %1070  ;;  %400 = vst.msk [vmem:[%s1613_s9 + $0x58] sm:$0xff] %vm388_vm1, %v376_v55  ;;  %v973_v61 = vmul.f32 -1.442695, %v376_v55  ;;  %v593_v3 = vadd.f32 %v1069_v49, %v592_v59  ;;  %v776_v35 = vmul.f32 %v1300_v36, %v376_v55 }
 0x180   :  { %v1073_v63 = vpop.eup %1072  ;;  %v1473_v0 = vadd.f32 1.0, %v1071_v58 }
 0x181   :  { %v605_v4 = vmul.f32 %v1073_v63, %v462_v47  ;;  %1076 = vpow2.f32 %v973_v61  ;;  %v1075_v7 = vpop.eup %1074  ;;  %v597_v8 = vsel %vm596_vm6, %v1069_v49, %v593_v3  ;;  %vm610_vm8 = vweird.f32 %v1073_v63 }
 0x182   :  { %1078 = vrcp.f32 %v1473_v0  ;;  %v602_v10 = vsel %vm599_vm7, %v601_v5, %v597_v8  ;;  %v825_v18 = vmul.f32 %v1075_v7, %v1321_v62  ;;  %vm611_vm10 = vmor %vm609_vm9, %vm610_vm8  ;;  %v628_v38 = vand.u32 2147483647, %v1473_v0 }
 0x183   :  { %v606_v9 = vsub.f32 1.0, %v605_v4  ;;  %1080 = vpow2.f32 %v799_v57  ;;  %v733_v15 = vadd.f32 %v717_v6, %v602_v10  ;;  %v630_v39 = vand.u32 2147483648, %v1473_v0 }
 0x184   :  { %v378_v14 = vpop.f32.mrf.mxu2  ;;  %1082 = vpow2.f32 %v801_v13  ;;  %vm624_vm13 = vweird.f32 %v1473_v0  ;;  %v803_v47 = vmul.f32 1.442695, %v776_v35  ;;  %vm629_vm15 = vcmp.eq.f32.partialorder %v628_v38, 8.507059e+37 }
 0x185   :  { %v607_v16 = vmul.f32 %v1073_v63, %v606_v9  ;;  %v379_v17 = vadd.f32 %v1289_v30, %v378_v14  ;;  %v753_v20 = vmul.f32 %v1328_v2, %v733_v15  ;;  %v631_v50 = vor.u32 1.1754944e-38, %v630_v39  ;;  %v720_v9 = vld [vmem:[%s1609_s5 + $0x58] sm:$0xff] }
 0x187   :  { %v1077_v19 = vpop.eup %1076  ;;  %v608_v22 = vadd.f32 %v1073_v63, %v607_v16  ;;  %401 = vst.msk [vmem:[%s1613_s9 + $0x60] sm:$0xff] %vm388_vm1, %v379_v17  ;;  %v974_v23 = vmul.f32 -1.442695, %v379_v17  ;;  %v841_v29 = vadd.f32 %v825_v18, %v753_v20  ;;  %v777_v61 = vmul.f32 %v1300_v36, %v379_v17 }
 0x188   :  { %v1079_v24 = vpop.eup %1078  ;;  %v1490_v27 = vadd.f32 1.0, %v1077_v19 }
 0x189   :  { %v1081_v28 = vpop.eup %1080  ;;  %v612_v31 = vsel %vm611_vm10, %v1073_v63, %v608_v22  ;;  %v620_v32 = vmul.f32 %v1079_v24, %v1473_v0  ;;  %857 = vst.msk [vmem:[%s1614_s10 + $0x40] sm:$0xff] %vm388_vm1, %v841_v29  ;;  %vm625_vm12 = vweird.f32 %v1079_v24  ;;  %v805_v14 = vmul.f32 1.442695, %v777_v61 }
 0x18a   :  { %v617_v21 = vsel %vm614_vm11, %v616_v25, %v612_v31  ;;  %1084 = vrcp.f32 %v1490_v27  ;;  %v826_v37 = vmul.f32 %v1081_v28, %v1321_v62  ;;  %v1083_v44 = vpop.eup %1082  ;;  %vm626_vm14 = vmor %vm624_vm13, %vm625_vm12  ;;  %v645_v60 = vand.u32 2147483648, %v1490_v27 }
 0x18b   :  { %v734_v33 = vadd.f32 %v718_v26, %v617_v21  ;;  %v621_v34 = vsub.f32 1.0, %v620_v32  ;;  %1086 = vpow2.f32 %v974_v23  ;;  %v827_v59 = vmul.f32 %v1083_v44, %v1321_v62 }
 0x18c   :  { %v380_v40 = vpop.f32.mrf.mxu2  ;;  %v643_v3 = vand.u32 2147483647, %v1490_v27  ;;  %vm639_vm2 = vweird.f32 %v1490_v27  ;;  %v646_v8 = vor.u32 1.1754944e-38, %v645_v60 }
 0x18d   :  { %v754_v41 = vmul.f32 %v1328_v2, %v734_v33  ;;  %v622_v42 = vmul.f32 %v1079_v24, %v621_v34  ;;  %v381_v43 = vadd.f32 %v1289_v30, %v380_v40 }
 0x18e   :  { %vm644_vm4 = vcmp.eq.f32.partialorder %v643_v3, 8.507059e+37 }
 0x18f   :  { %v842_v45 = vadd.f32 %v826_v37, %v754_v41  ;;  %v623_v46 = vadd.f32 %v1079_v24, %v622_v42  ;;  %402 = vst.msk [vmem:[%s1613_s9 + $0x68] sm:$0xff] %vm388_vm1, %v381_v43  ;;  %v975_v48 = vmul.f32 -1.442695, %v381_v43  ;;  %v778_v20 = vmul.f32 %v1300_v36, %v381_v43  ;;  %v721_v37 = vld [vmem:[%s1609_s5 + $0x60] sm:$0xff] }
 0x190   :  { %v1085_v49 = vpop.eup %1084 }
 0x191   :  { %v1087_v52 = vpop.eup %1086  ;;  %858 = vst.msk [vmem:[%s1614_s10 + $0x48] sm:$0xff] %vm388_vm1, %v842_v45  ;;  %v627_v53 = vsel %vm626_vm14, %v1079_v24, %v623_v46  ;;  %v635_v54 = vmul.f32 %v1085_v49, %v1490_v27  ;;  %1088 = vpow2.f32 %v975_v48  ;;  %vm640_vm0 = vweird.f32 %v1085_v49 }
 0x192   :  { %v632_v55 = vsel %vm629_vm15, %v631_v50, %v627_v53  ;;  %v1517_v56 = vadd.f32 1.0, %v1087_v52  ;;  %1090 = vpow2.f32 %v803_v47  ;;  %vm641_vm3 = vmor %vm639_vm2, %vm640_vm0  ;;  %v807_v21 = vmul.f32 1.442695, %v778_v20  ;;  %v722_v53 = vld [vmem:[%s1609_s5 + $0x68] sm:$0xff] }
 0x193   :  { %v735_v57 = vadd.f32 %v719_v51, %v632_v55  ;;  %v636_v58 = vsub.f32 1.0, %v635_v54 }
 0x194   :  { %1092 = vrcp.f32 %v1517_v56  ;;  %v383_v63 = vpop.f32.mrf.mxu2  ;;  %v658_v26 = vand.u32 2147483647, %v1517_v56  ;;  %v660_v27 = vand.u32 2147483648, %v1517_v56  ;;  %vm654_vm6 = vweird.f32 %v1517_v56 }
 0x195   :  { %v755_v0 = vmul.f32 %v1328_v2, %v735_v57  ;;  %v637_v1 = vmul.f32 %v1085_v49, %v636_v58  ;;  %v1526_v4 = vadd.f32 %v1289_v30, %v383_v63 }
 0x196   :  { %v661_v35 = vor.u32 1.1754944e-38, %v660_v27  ;;  %vm659_vm8 = vcmp.eq.f32.partialorder %v658_v26, 8.507059e+37  ;;  %v724_v27 = vld [vmem:[%s1609_s5 + $0x78] sm:$0xff] }
 0x197   :  { %v1089_v5 = vpop.eup %1088  ;;  %v843_v6 = vadd.f32 %v827_v59, %v755_v0  ;;  %v638_v7 = vadd.f32 %v1085_v49, %v637_v1  ;;  %403 = vst.msk [vmem:[%s1613_s9 + $0x70] sm:$0xff] %vm388_vm1, %v1526_v4  ;;  %v976_v11 = vmul.f32 -1.442695, %v1526_v4  ;;  %v779_v51 = vmul.f32 %v1300_v36, %v1526_v4 }
 0x198   :  { %v1532_v10 = vadd.f32 1.0, %v1089_v5  ;;  %v1091_v12 = vpop.eup %1090 }
 0x199   :  { %859 = vst.msk [vmem:[%s1614_s10 + $0x50] sm:$0xff] %vm388_vm1, %v843_v6  ;;  %v642_v13 = vsel %vm641_vm3, %v1085_v49, %v638_v7  ;;  %v828_v19 = vmul.f32 %v1091_v12, %v1321_v62  ;;  %v809_v61 = vmul.f32 1.442695, %v779_v51 }
 0x19a   :  { %v1093_v15 = vpop.eup %1092  ;;  %v647_v16 = vsel %vm644_vm4, %v646_v8, %v642_v13  ;;  %1094 = vrcp.f32 %v1532_v10  ;;  %v673_v43 = vand.u32 2147483647, %v1532_v10  ;;  %v675_v44 = vand.u32 2147483648, %v1532_v10  ;;  %v723_v13 = vld [vmem:[%s1609_s5 + $0x70] sm:$0xff] }
 0x19b   :  { %v736_v17 = vadd.f32 %v720_v9, %v647_v16  ;;  %v650_v18 = vmul.f32 %v1093_v15, %v1517_v56  ;;  %1096 = vpow2.f32 %v976_v11  ;;  %vm655_vm5 = vweird.f32 %v1093_v15 }
 0x19c   :  { %v385_v22 = vpop.f32.mrf.mxu2  ;;  %1098 = vpow2.f32 %v805_v14  ;;  %vm656_vm7 = vmor %vm654_vm6, %vm655_vm5  ;;  %vm669_vm10 = vweird.f32 %v1532_v10  ;;  %v676_v52 = vor.u32 1.1754944e-38, %v675_v44  ;;  %vm674_vm12 = vcmp.eq.f32.partialorder %v673_v43, 8.507059e+37 }
 0x19d   :  { %v756_v23 = vmul.f32 %v1328_v2, %v736_v17  ;;  %v651_v24 = vsub.f32 1.0, %v650_v18  ;;  %v386_v25 = vadd.f32 %v1289_v30, %v385_v22 }
 0x19f   :  { %v844_v28 = vadd.f32 %v828_v19, %v756_v23  ;;  %v652_v29 = vmul.f32 %v1093_v15, %v651_v24  ;;  %404 = vst.msk [vmem:[%s1613_s9 + $0x78] sm:$0xff] %vm388_vm1, %v386_v25  ;;  %v977_v31 = vmul.f32 -1.442695, %v386_v25  ;;  %v780_v0 = vmul.f32 %v1300_v36, %v386_v25 }
 0x1a0   :  { %v1095_v32 = vpop.eup %1094 }
 0x1a1   :  { %860 = vst.msk [vmem:[%s1614_s10 + $0x58] sm:$0xff] %vm388_vm1, %v844_v28  ;;  %v653_v30 = vadd.f32 %v1093_v15, %v652_v29  ;;  %v665_v33 = vmul.f32 %v1095_v32, %v1532_v10  ;;  %1100 = vpow2.f32 %v977_v31  ;;  %v1097_v34 = vpop.eup %1096  ;;  %vm670_vm9 = vweird.f32 %v1095_v32 }
 0x1a2   :  { %v1099_v38 = vpop.eup %1098  ;;  %v467_v41 = vadd.f32 1.0, %v1097_v34  ;;  %1102 = vpow2.f32 %v807_v21  ;;  %vm671_vm11 = vmor %vm669_vm10, %vm670_vm9  ;;  %v811_v10 = vmul.f32 1.442695, %v780_v0 }
 0x1a3   :  { %v657_v39 = vsel %vm656_vm7, %v1093_v15, %v653_v30  ;;  %v666_v40 = vsub.f32 1.0, %v665_v33  ;;  %v829_v47 = vmul.f32 %v1099_v38, %v1321_v62 }
 0x1a4   :  { %v662_v42 = vsel %vm659_vm8, %v661_v35, %v657_v39  ;;  %1104 = vrcp.f32 %v467_v41  ;;  %v690_v6 = vand.u32 2147483648, %v467_v41  ;;  %v688_v9 = vand.u32 2147483647, %v467_v41 }
 0x1a5   :  { %v737_v45 = vadd.f32 %v721_v37, %v662_v42  ;;  %v667_v46 = vmul.f32 %v1095_v32, %v666_v40  ;;  %vm684_vm14 = vweird.f32 %v467_v41 }
 0x1a6   :  { %v691_v12 = vor.u32 1.1754944e-38, %v690_v6  ;;  %vm689_vm0 = vcmp.eq.f32.partialorder %v688_v9, 8.507059e+37 }
 0x1a7   :  { %v1101_v48 = vpop.eup %1100  ;;  %v757_v49 = vmul.f32 %v1328_v2, %v737_v45  ;;  %v668_v50 = vadd.f32 %v1095_v32, %v667_v46 }
 0x1a8   :  { %v468_v54 = vadd.f32 1.0, %v1101_v48  ;;  %v1103_v57 = vpop.eup %1102 }
 0x1a9   :  { %v845_v55 = vadd.f32 %v829_v47, %v757_v49  ;;  %v672_v56 = vsel %vm671_vm11, %v1095_v32, %v668_v50  ;;  %v830_v3 = vmul.f32 %v1103_v57, %v1321_v62 }
 0x1aa   :  { %v677_v58 = vsel %vm674_vm12, %v676_v52, %v672_v56  ;;  %1106 = vrcp.f32 %v468_v54  ;;  %v1105_v59 = vpop.eup %1104  ;;  %v705_v16 = vand.u32 2147483648, %v468_v54  ;;  %v703_v20 = vand.u32 2147483647, %v468_v54 }
 0x1ab   :  { %861 = vst.msk [vmem:[%s1614_s10 + $0x60] sm:$0xff] %vm388_vm1, %v845_v55  ;;  %v738_v60 = vadd.f32 %v722_v53, %v677_v58  ;;  %v680_v63 = vmul.f32 %v1105_v59, %v467_v41  ;;  %1108 = vpow2.f32 %v809_v61  ;;  %vm685_vm13 = vweird.f32 %v1105_v59 }
 0x1ac   :  { %vm686_vm15 = vmor %vm684_vm14, %vm685_vm13  ;;  %1110 = vpow2.f32 %v811_v10  ;;  %vm699_vm3 = vweird.f32 %v468_v54  ;;  %v706_v26 = vor.u32 1.1754944e-38, %v705_v16  ;;  %vm704_vm5 = vcmp.eq.f32.partialorder %v703_v20, 8.507059e+37 }
 0x1ad   :  { %v758_v1 = vmul.f32 %v1328_v2, %v738_v60  ;;  %v681_v4 = vsub.f32 1.0, %v680_v63 }
 0x1af   :  { %v846_v5 = vadd.f32 %v830_v3, %v758_v1  ;;  %v682_v8 = vmul.f32 %v1105_v59, %v681_v4 }
 0x1b0   :  { %v1107_v7 = vpop.eup %1106 }
 0x1b1   :  { %862 = vst.msk [vmem:[%s1614_s10 + $0x68] sm:$0xff] %vm388_vm1, %v846_v5  ;;  %v695_v11 = vmul.f32 %v1107_v7, %v468_v54  ;;  %v683_v36 = vadd.f32 %v1105_v59, %v682_v8  ;;  %v1109_v17 = vpop.eup %1108  ;;  %vm700_vm2 = vweird.f32 %v1107_v7 }
 0x1b2   :  { %v831_v25 = vmul.f32 %v1109_v17, %v1321_v62  ;;  %vm701_vm4 = vmor %vm699_vm3, %vm700_vm2  ;;  %v1111_v29 = vpop.eup %1110 }
 0x1b3   :  { %v696_v14 = vsub.f32 1.0, %v695_v11  ;;  %v687_v15 = vsel %vm686_vm15, %v1105_v59, %v683_v36  ;;  %v832_v33 = vmul.f32 %v1111_v29, %v1321_v62 }
 0x1b4   :  { %v692_v18 = vsel %vm689_vm0, %v691_v12, %v687_v15 }
 0x1b5   :  { %v697_v19 = vmul.f32 %v1107_v7, %v696_v14  ;;  %v739_v22 = vadd.f32 %v723_v13, %v692_v18 }
 0x1b7   :  { %v698_v23 = vadd.f32 %v1107_v7, %v697_v19  ;;  %v759_v24 = vmul.f32 %v1328_v2, %v739_v22 }
 0x1b9   :  { %v702_v28 = vsel %vm701_vm4, %v1107_v7, %v698_v23  ;;  %v847_v31 = vadd.f32 %v831_v25, %v759_v24 }
 0x1ba   :  { %v707_v32 = vsel %vm704_vm5, %v706_v26, %v702_v28 }
 0x1bb   :  { %v740_v21 = vadd.f32 %v724_v27, %v707_v32  ;;  %863 = vst.msk [vmem:[%s1614_s10 + $0x70] sm:$0xff] %vm388_vm1, %v847_v31 }
 0x1bd   :  { %v760_v30 = vmul.f32 %v1328_v2, %v740_v21 }
 0x1bf   :  { %v848_v34 = vadd.f32 %v832_v33, %v760_v30 }
 0x1c1   :  { %864 = vst.msk [vmem:[%s1614_s10 + $0x78] sm:$0xff] %vm388_vm1, %v848_v34 }
 0x1c2   :  { %873 = vsyncpa [#allocation3], 1 }

</bundles_post_ra>
